<compile_context>
chip_gen: v7x
topology: tpu7x:2x2x1
jax: 0.10.0
libtpu: 0.0.40
codegen_flags: <defaults>
</compile_context>

<pallas_src>
from functools import partial

import numpy as np

import jax
import jax.numpy as jnp
from jax import lax
from jax.experimental import pallas as pl
from jax.experimental.pallas import tpu as pltpu

# ---------------- configuration (small synthetic shapes) ----------------
B = 2
H_IMG = 8
W_IMG = 8
HW = H_IMG * W_IMG
N = 1 + HW                      # CoaT convention: cls token + image tokens
NUM_HEADS = 8
C = 64
CH = C // NUM_HEADS
SCALE = CH ** (-0.5)

# ConvRelPosEnc window config (CoaT default): kernel_size -> #heads
CRPE_WINDOW = {3: 2, 5: 3, 7: 3}
PMAX = max(CRPE_WINDOW) // 2    # 3 -> merged 7x7 tap window
KMAX = 2 * PMAX + 1             # 7

# kernel-internal token layout: image tokens rows 0..HW-1 (row-major y*W+x),
# cls at row HW, zero padding up to NPAD so token-axis slices are 8-aligned.
NPAD = ((N + 7) // 8) * 8       # 72

# conv scratch buffer: image stored at the aligned sublane-tile [8, 16);
# window reads touch columns 5..18 only, so only the two flanking tiles
# ([0,8) and [16,24)) need to hold zeros.
IMG_COL = 8
BUF_W = 24


# ------------------------------ kernel ----------------------------------
def make_kernel(bb):
    """Build the kernel for `bb` batches per grid step (static)."""

    def factor_attn_kernel(x_ref, wqkv_ref, wp_ref, bp_ref, cw_ref, cb_ref,
                           hm_ref, o_ref, pad_ref):
        # ---- fused qkv projection: all `bb` batches in one MXU pass ----
        x2 = x_ref[...].reshape(bb * NPAD, C).astype(jnp.float32)
        qkv = jnp.dot(x2, wqkv_ref[...], preferred_element_type=jnp.float32)

        # token-validity mask for the k-softmax (rows >= N are zero padding);
        # computed once per grid step and shared by all merged batches.
        valid = lax.broadcasted_iota(jnp.int32, (NPAD, C), 0) < N

        # ---- conv-buffer halo zeroing (review: no full re-zero) ----
        # The buffer has no row halo (row shifts below are free leading-dim
        # value slices), so only the two sublane tiles flanking the aligned
        # image tile need zeros.  The image tile itself is fully overwritten
        # for every batch.  16 half-vreg stores per grid step.
        pad_ref[:, 0:IMG_COL, :] = jnp.zeros((H_IMG, IMG_COL, C), jnp.float32)
        pad_ref[:, IMG_COL + W_IMG:BUF_W, :] = jnp.zeros(
            (H_IMG, BUF_W - IMG_COL - W_IMG, C), jnp.float32)

        zrow = jnp.zeros((PMAX, W_IMG, C), jnp.float32)    # hoisted constant

        outs = []
        for b in range(bb):
            r0 = b * NPAD
            q = qkv[r0:r0 + NPAD, 0:C]                      # (NPAD, C)
            k = qkv[r0:r0 + NPAD, C:2 * C]
            v = qkv[r0:r0 + NPAD, 2 * C:3 * C]

            # ---- k softmax over tokens; padded rows underflow to exact 0 ----
            k = jnp.where(valid, k, jnp.float32(-1e30))
            k = k - jnp.max(k, axis=0, keepdims=True)
            k_exp = jnp.exp(k)
            k_soft = k_exp / jnp.sum(k_exp, axis=0, keepdims=True)

            # ---- factorized attention ----
            # hm_ref = block-diagonal head mask pre-multiplied by SCALE (host).
            # NOTE(review): if the bundle dump shows a vxpose feeding this
            # lhs-dim-0 contraction, switch to pl.dot(k_soft, v, trans_a=True).
            kv = lax.dot_general(k_soft, v, (((0,), (0,)), ((), ())),
                                 preferred_element_type=jnp.float32)   # (C, C)
            kv = kv * hm_ref[...]
            fa = jnp.dot(q, kv, preferred_element_type=jnp.float32)    # (NPAD, C)

            # ---- CRPE: merged full-C 7x7 depthwise conv over the 8x8 image ----
            v_img = v[0:HW, :].reshape(H_IMG, W_IMG, C)     # free regroup
            pad_ref[:, IMG_COL:IMG_COL + W_IMG, :] = v_img  # aligned tile store

            # Static Python loops: after the dj-hoist only acc (8 vregs),
            # col (8), win (8) and one tap weight are live at a time, well
            # under the 64-vreg budget (fori_loop(unroll=True) is equivalent).
            acc = jnp.zeros((H_IMG, W_IMG, C), jnp.float32)
            for dj in range(KMAX):
                # one unaligned sublane extract per dj (7 total), hoisted out
                # of the di loop per review feedback.
                c0 = IMG_COL - PMAX + dj
                col = pad_ref[:, c0:c0 + W_IMG, :]          # (8, 8, C)
                for di in range(KMAX):
                    s = di - PMAX
                    if s == 0:
                        win = col
                    elif s < 0:
                        # shift down, zero-fill the top (free vreg re-select)
                        win = jnp.concatenate(
                            [zrow[:-s], col[:H_IMG + s]], axis=0)
                    else:
                        # shift up, zero-fill the bottom
                        win = jnp.concatenate(
                            [col[s:], zrow[:s]], axis=0)
                    # tap weights pre-broadcast to (49, 8, C) on the host:
                    # one aligned vreg load, leading-dim broadcast is free.
                    w_tap = cw_ref[di * KMAX + dj]          # (8, C)
                    acc = acc + win * w_tap[None]
            conv_v = (acc + cb_ref[...][None]).reshape(HW, C)

            # EV_hat = q_img * conv(v_img); cls + padding rows contribute 0
            ev = q[0:HW, :] * conv_v                        # (HW, C)
            outs.append(jnp.concatenate([fa[0:HW] + ev, fa[HW:]], axis=0))

        # ---- combine + fused output projection across merged batches ----
        total = outs[0] if bb == 1 else jnp.concatenate(outs, axis=0)
        out = jnp.dot(total, wp_ref[...],
                      preferred_element_type=jnp.float32) + bp_ref[...]
        # NOTE(review): C=64 -> half-lane stores; lane-dense repacking of the
        # output left out (only worth it if the vst slot is saturated).
        o_ref[...] = out.reshape(bb, NPAD, C).astype(o_ref.dtype)

    return factor_attn_kernel


# ------------------------------ wrapper ----------------------------------
def batches_per_step(batch):
    """Batches merged into one grid step.

    Single-TensorCore chips (v2..v6 per JAX device) merge the whole (tiny)
    batch into one grid step; v7x keeps one batch per step so its two
    TensorCores can each take a "parallel" batch step.
    """
    try:
        kind = jax.devices()[0].device_kind.lower()
    except Exception:
        kind = ""
    if "v7" in kind or "7x" in kind:
        return 1
    return batch


@partial(jax.jit, static_argnames=("bb",))
def factor_attn(x, wqkv_t, wp, bp, cw, cb, hmask, *, bb):
    bsz = x.shape[0]
    assert bsz % bb == 0
    # Token reorder/pad (image tokens first, cls last, zero pad to NPAD).
    # Kept wrapper-side: the explicit zero rows keep every physical row of the
    # block well defined for the softmax / MXU contractions; in a real model
    # this fuses with the producing/consuming ops.
    x_re = jnp.concatenate(
        [x[:, 1:, :], x[:, 0:1, :],
         jnp.zeros((bsz, NPAD - N, C), x.dtype)], axis=1)           # (B,NPAD,C)

    def full_spec(a):
        nd = a.ndim
        return pl.BlockSpec(a.shape, lambda b: (0,) * nd)
        # NOTE(review): pipeline_mode=pl.Buffered(1) would drop the unused
        # double buffers for these constant-index weights; negligible here.

    weights = (wqkv_t, wp, bp, cw, cb, hmask)
    grid_spec = pltpu.PrefetchScalarGridSpec(
        num_scalar_prefetch=0,
        grid=(bsz // bb,),
        in_specs=[pl.BlockSpec((bb, NPAD, C), lambda b: (b, 0, 0))]
                 + [full_spec(a) for a in weights],
        out_specs=pl.BlockSpec((bb, NPAD, C), lambda b: (b, 0, 0)),
        scratch_shapes=[
            pltpu.VMEM((H_IMG, BUF_W, C), jnp.float32),    # conv image buffer
        ],
    )
    out_re = pl.pallas_call(
        make_kernel(bb),
        out_shape=jax.ShapeDtypeStruct((bsz, NPAD, C), x.dtype),
        grid_spec=grid_spec,
        # TODO(synk): on v7x, verify in the trace that both TensorCores take a
        # batch step each; if not, switch to (pltpu.CORE_PARALLEL,).
        compiler_params=pltpu.CompilerParams(
            dimension_semantics=("parallel",)),
    )(x_re, *weights)

    # undo the token permutation, drop padding rows
    return jnp.concatenate(
        [out_re[:, HW:HW + 1, :], out_re[:, :HW, :]], axis=1)       # (B, N, C)


# ------------------------- pure-JAX reference -----------------------------
def reference_forward(x, wqkv, wproj, bproj, conv_ws, conv_bs):
    Bb, Nn, Cc = x.shape
    h, ch = NUM_HEADS, CH
    qkv = x @ wqkv.T
    qkv = qkv.reshape(Bb, Nn, 3, h, ch).transpose(2, 0, 3, 1, 4)
    q, k, v = qkv[0], qkv[1], qkv[2]                        # (B, h, N, Ch)
    k_soft = jax.nn.softmax(k, axis=2)
    fa = jnp.einsum('bhnc,bhnd->bhcd', k_soft, v)
    fa = jnp.einsum('bhnc,bhcd->bhnd', q, fa)
    # ConvRelPosEnc
    q_img = q[:, :, 1:, :]
    v_img = v[:, :, 1:, :]
    v_img = v_img.transpose(0, 1, 3, 2).reshape(Bb, h * ch, H_IMG, W_IMG)
    outs = []
    c0 = 0
    for ks, nh in CRPE_WINDOW.items():
        gc = nh * ch
        vi = v_img[:, c0:c0 + gc]
        p = ks // 2
        co = lax.conv_general_dilated(
            vi, conv_ws[ks], (1, 1), ((p, p), (p, p)),
            dimension_numbers=('NCHW', 'OIHW', 'NCHW'),
            feature_group_count=gc)
        co = co + conv_bs[ks].reshape(1, gc, 1, 1)
        outs.append(co)
        c0 += gc
    conv_v = jnp.concatenate(outs, axis=1)
    conv_v = conv_v.reshape(Bb, h, ch, H_IMG * W_IMG).transpose(0, 1, 3, 2)
    ev = q_img * conv_v
    crpe = jnp.pad(ev, ((0, 0), (0, 0), (1, 0), (0, 0)))
    xo = SCALE * fa + crpe
    xo = xo.transpose(0, 2, 1, 3).reshape(Bb, Nn, Cc)
    return xo @ wproj.T + bproj


# --------------------------------- main -----------------------------------
if __name__ == "__main__":
    key = jax.random.PRNGKey(0)
    keys = jax.random.split(key, 16)
    x = jax.random.normal(keys[0], (B, N, C), jnp.float32)

    # parameters (PyTorch shapes), deterministic init; qkv_bias=False (default)
    wqkv = 0.05 * jax.random.normal(keys[1], (3 * C, C), jnp.float32)
    wproj = 0.05 * jax.random.normal(keys[2], (C, C), jnp.float32)
    bproj = 0.05 * jax.random.normal(keys[3], (C,), jnp.float32)
    conv_ws, conv_bs = {}, {}
    i = 4
    for ks, nh in CRPE_WINDOW.items():
        gc = nh * CH
        conv_ws[ks] = 0.1 * jax.random.normal(keys[i], (gc, 1, ks, ks),
                                              jnp.float32); i += 1
        conv_bs[ks] = 0.05 * jax.random.normal(keys[i], (gc,),
                                               jnp.float32); i += 1

    # ---- glue reshapes for the kernel ----
    # fused qkv weight: y = x @ W.T with columns ordered [q | k | v]
    wqkv_t = jnp.asarray(wqkv).T                     # (C, 3C)
    wp = jnp.asarray(wproj).T                        # (C, C)
    bp = jnp.asarray(bproj).reshape(1, C)            # (1, C)

    # merged CRPE weight table: (49, C); taps outside a group's window are 0.
    cw_np = np.zeros((KMAX * KMAX, C), np.float32)
    cb_np = np.zeros((C,), np.float32)
    c0 = 0
    for ks, nh in CRPE_WINDOW.items():
        gc = nh * CH
        p = ks // 2
        w = np.asarray(conv_ws[ks]).reshape(gc, ks, ks)
        for di in range(ks):
            for dj in range(ks):
                t = (di - p + PMAX) * KMAX + (dj - p + PMAX)
                cw_np[t, c0:c0 + gc] = w[:, di, dj]
        cb_np[c0:c0 + gc] = np.asarray(conv_bs[ks])
        c0 += gc
    assert c0 == C
    # pre-broadcast along the sublane axis (review item): each tap weight is a
    # single aligned vreg load inside the kernel.
    cw = jnp.asarray(np.ascontiguousarray(
        np.broadcast_to(cw_np[:, None, :], (KMAX * KMAX, W_IMG, C))))  # (49,8,C)
    cb = jnp.asarray(np.ascontiguousarray(
        np.broadcast_to(cb_np[None, :], (W_IMG, C))))                  # (8, C)

    # block-diagonal head mask pre-multiplied by the attention scale (review)
    heads = np.arange(C) // CH
    hmask = jnp.asarray(
        (heads[:, None] == heads[None, :]).astype(np.float32) * SCALE)  # (C,C)

    bb = batches_per_step(B)
    out = factor_attn(x, wqkv_t, wp, bp, cw, cb, hmask, bb=bb)
    out = jax.block_until_ready(out)
    assert out.shape == (B, N, C)

    ref = reference_forward(x, wqkv, wproj, bproj, conv_ws, conv_bs)
    if not jnp.allclose(out, ref, atol=1e-2, rtol=1e-2):
        raise AssertionError(
            f"mismatch vs reference, max abs diff "
            f"{float(jnp.max(jnp.abs(out - ref)))}")

    print("KERNEL_OK")
</pallas_src>

<mosaic_0001>
module attributes {stable_mosaic.version = 11 : i64} {
  func.func @factor_attn_kernel(%arg0: i32, %arg1: memref<2x72x64xf32, #tpu.memory_space<vmem>>, %arg2: memref<64x192xf32, #tpu.memory_space<vmem>>, %arg3: memref<64x64xf32, #tpu.memory_space<vmem>>, %arg4: memref<1x64xf32, #tpu.memory_space<vmem>>, %arg5: memref<49x8x64xf32, #tpu.memory_space<vmem>>, %arg6: memref<8x64xf32, #tpu.memory_space<vmem>>, %arg7: memref<64x64xf32, #tpu.memory_space<vmem>>, %arg8: memref<2x72x64xf32, #tpu.memory_space<vmem>>, %arg9: memref<8x24x64xf32, #tpu.memory_space<vmem>>) attributes {dimension_semantics = [#tpu.dimension_semantics<parallel>], iteration_bounds = array<i64: 1>, scalar_prefetch = 0 : i64, scratch_operands = 1 : i64, tpu.core_type = #tpu.core_type<tc>, window_params = [{transform_indices = @transform_0, window_bounds = array<i64: 2, 72, 64>}, {pipeline_mode = #tpu.pipeline_mode<synchronous>, transform_indices = @transform_1, window_bounds = array<i64: 64, 192>}, {pipeline_mode = #tpu.pipeline_mode<synchronous>, transform_indices = @transform_2, window_bounds = array<i64: 64, 64>}, {pipeline_mode = #tpu.pipeline_mode<synchronous>, transform_indices = @transform_3, window_bounds = array<i64: 1, 64>}, {pipeline_mode = #tpu.pipeline_mode<synchronous>, transform_indices = @transform_4, window_bounds = array<i64: 49, 8, 64>}, {pipeline_mode = #tpu.pipeline_mode<synchronous>, transform_indices = @transform_5, window_bounds = array<i64: 8, 64>}, {pipeline_mode = #tpu.pipeline_mode<synchronous>, transform_indices = @transform_6, window_bounds = array<i64: 64, 64>}, {transform_indices = @transform_7, window_bounds = array<i64: 2, 72, 64>}]} {
    %c0 = arith.constant 0 : index
    %c0_0 = arith.constant 0 : index
    %c0_1 = arith.constant 0 : index
    %0 = vector.load %arg1[%c0, %c0_0, %c0_1] : memref<2x72x64xf32, #tpu.memory_space<vmem>>, vector<2x72x64xf32>
    %1 = vector.shape_cast %0 : vector<2x72x64xf32> to vector<144x64xf32>
    %c0_2 = arith.constant 0 : index
    %c0_3 = arith.constant 0 : index
    %2 = vector.load %arg2[%c0_2, %c0_3] : memref<64x192xf32, #tpu.memory_space<vmem>>, vector<64x192xf32>
    %cst = arith.constant dense<0.000000e+00> : vector<144x192xf32>
    %3 = tpu.matmul %1, %2, %cst {dimension_numbers = #tpu.dot_dimension_numbers<[1], [0], [0], [1], [0, 0, 1, 1], [], []>} : vector<144x64xf32>, vector<64x192xf32>, vector<144x192xf32> -> vector<144x192xf32>
    %4 = tpu.iota {dimensions = array<i32: 0>} : vector<72x64xi32>
    %c65_i32 = arith.constant 65 : i32
    %5 = vector.broadcast %c65_i32 : i32 to vector<72x64xi32>
    %6 = arith.cmpi slt, %4, %5 : vector<72x64xi32>
    %cst_4 = arith.constant 0.000000e+00 : f32
    %7 = vector.broadcast %cst_4 : f32 to vector<8x8x64xf32>
    %c0_5 = arith.constant 0 : index
    %c0_6 = arith.constant 0 : index
    %c0_7 = arith.constant 0 : index
    %8 = vector.load %arg9[%c0_5, %c0_6, %c0_7] : memref<8x24x64xf32, #tpu.memory_space<vmem>>, vector<8x8x64xf32>
    tpu.vector_store %arg9[%c0_5, %c0_6, %c0_7], %7 {strides = array<i32>} : memref<8x24x64xf32, #tpu.memory_space<vmem>>, vector<8x8x64xf32>,
    %cst_8 = arith.constant 0.000000e+00 : f32
    %9 = vector.broadcast %cst_8 : f32 to vector<8x8x64xf32>
    %c0_9 = arith.constant 0 : index
    %c16 = arith.constant 16 : index
    %c0_10 = arith.constant 0 : index
    %10 = vector.load %arg9[%c0_9, %c16, %c0_10] : memref<8x24x64xf32, #tpu.memory_space<vmem>>, vector<8x8x64xf32>
    tpu.vector_store %arg9[%c0_9, %c16, %c0_10], %9 {strides = array<i32>} : memref<8x24x64xf32, #tpu.memory_space<vmem>>, vector<8x8x64xf32>,
    %cst_11 = arith.constant 0.000000e+00 : f32
    %11 = vector.broadcast %cst_11 : f32 to vector<3x8x64xf32>
    %12 = vector.extract_strided_slice %3 {offsets = [0, 0], sizes = [72, 64], strides = [1, 1]} : vector<144x192xf32> to vector<72x64xf32>
    %13 = vector.extract_strided_slice %3 {offsets = [0, 64], sizes = [72, 64], strides = [1, 1]} : vector<144x192xf32> to vector<72x64xf32>
    %14 = vector.extract_strided_slice %3 {offsets = [0, 128], sizes = [72, 64], strides = [1, 1]} : vector<144x192xf32> to vector<72x64xf32>
    %cst_12 = arith.constant -1.000000e+30 : f32
    %15 = vector.broadcast %cst_12 : f32 to vector<72x64xf32>
    %16 = arith.select %6, %13, %15 : vector<72x64xi1>, vector<72x64xf32>
    %cst_13 = arith.constant dense<0xFF800000> : vector<64xf32>
    %17 = vector.multi_reduction <maximumf>, %16, %cst_13 [0] : vector<72x64xf32> to vector<64xf32>
    %18 = vector.shape_cast %17 : vector<64xf32> to vector<1x64xf32>
    %19 = vector.broadcast %18 : vector<1x64xf32> to vector<72x64xf32>
    %20 = arith.subf %16, %19 : vector<72x64xf32>
    %21 = math.exp %20 : vector<72x64xf32>
    %cst_14 = arith.constant dense<0.000000e+00> : vector<64xf32>
    %22 = vector.multi_reduction <add>, %21, %cst_14 [0] : vector<72x64xf32> to vector<64xf32>
    %23 = vector.shape_cast %22 : vector<64xf32> to vector<1x64xf32>
    %24 = vector.broadcast %23 : vector<1x64xf32> to vector<72x64xf32>
    %25 = arith.divf %21, %24 : vector<72x64xf32>
    %cst_15 = arith.constant dense<0.000000e+00> : vector<64x64xf32>
    %26 = tpu.matmul %25, %14, %cst_15 {dimension_numbers = #tpu.dot_dimension_numbers<[0], [0], [1], [1], [0, 1, 1, 1], [], []>} : vector<72x64xf32>, vector<72x64xf32>, vector<64x64xf32> -> vector<64x64xf32>
    %c0_16 = arith.constant 0 : index
    %c0_17 = arith.constant 0 : index
    %27 = vector.load %arg7[%c0_16, %c0_17] : memref<64x64xf32, #tpu.memory_space<vmem>>, vector<64x64xf32>
    %28 = arith.mulf %26, %27 : vector<64x64xf32>
    %cst_18 = arith.constant dense<0.000000e+00> : vector<72x64xf32>
    %29 = tpu.matmul %12, %28, %cst_18 {dimension_numbers = #tpu.dot_dimension_numbers<[1], [0], [0], [1], [0, 0, 1, 1], [], []>} : vector<72x64xf32>, vector<64x64xf32>, vector<72x64xf32> -> vector<72x64xf32>
    %30 = vector.extract_strided_slice %14 {offsets = [0, 0], sizes = [64, 64], strides = [1, 1]} : vector<72x64xf32> to vector<64x64xf32>
    %31 = vector.shape_cast %30 : vector<64x64xf32> to vector<8x8x64xf32>
    %c0_19 = arith.constant 0 : index
    %c8 = arith.constant 8 : index
    %c0_20 = arith.constant 0 : index
    %32 = vector.load %arg9[%c0_19, %c8, %c0_20] : memref<8x24x64xf32, #tpu.memory_space<vmem>>, vector<8x8x64xf32>
    tpu.vector_store %arg9[%c0_19, %c8, %c0_20], %31 {strides = array<i32>} : memref<8x24x64xf32, #tpu.memory_space<vmem>>, vector<8x8x64xf32>,
    %cst_21 = arith.constant 0.000000e+00 : f32
    %33 = vector.broadcast %cst_21 : f32 to vector<8x8x64xf32>
    %c0_22 = arith.constant 0 : index
    %c5 = arith.constant 5 : index
    %c0_23 = arith.constant 0 : index
    %34 = vector.load %arg9[%c0_22, %c5, %c0_23] : memref<8x24x64xf32, #tpu.memory_space<vmem>>, vector<8x8x64xf32>
    %35 = vector.extract_strided_slice %34 {offsets = [0, 0, 0], sizes = [5, 8, 64], strides = [1, 1, 1]} : vector<8x8x64xf32> to vector<5x8x64xf32>
    %36 = tpu.concatenate %11, %35 in 0 : vector<3x8x64xf32>, vector<5x8x64xf32> -> vector<8x8x64xf32>
    %c0_24 = arith.constant 0 : index
    %c0_25 = arith.constant 0 : index
    %c0_26 = arith.constant 0 : index
    %37 = vector.load %arg5[%c0_24, %c0_25, %c0_26] : memref<49x8x64xf32, #tpu.memory_space<vmem>>, vector<1x8x64xf32>
    %38 = vector.shape_cast %37 : vector<1x8x64xf32> to vector<8x64xf32>
    %39 = vector.shape_cast %38 : vector<8x64xf32> to vector<1x8x64xf32>
    %40 = vector.broadcast %39 : vector<1x8x64xf32> to vector<8x8x64xf32>
    %41 = arith.mulf %36, %40 : vector<8x8x64xf32>
    %42 = arith.addf %33, %41 : vector<8x8x64xf32>
    %43 = vector.extract_strided_slice %11 {offsets = [0, 0, 0], sizes = [2, 8, 64], strides = [1, 1, 1]} : vector<3x8x64xf32> to vector<2x8x64xf32>
    %44 = vector.extract_strided_slice %34 {offsets = [0, 0, 0], sizes = [6, 8, 64], strides = [1, 1, 1]} : vector<8x8x64xf32> to vector<6x8x64xf32>
    %45 = tpu.concatenate %43, %44 in 0 : vector<2x8x64xf32>, vector<6x8x64xf32> -> vector<8x8x64xf32>
    %c7 = arith.constant 7 : index
    %c0_27 = arith.constant 0 : index
    %c0_28 = arith.constant 0 : index
    %46 = vector.load %arg5[%c7, %c0_27, %c0_28] : memref<49x8x64xf32, #tpu.memory_space<vmem>>, vector<1x8x64xf32>
    %47 = vector.shape_cast %46 : vector<1x8x64xf32> to vector<8x64xf32>
    %48 = vector.shape_cast %47 : vector<8x64xf32> to vector<1x8x64xf32>
    %49 = vector.broadcast %48 : vector<1x8x64xf32> to vector<8x8x64xf32>
    %50 = arith.mulf %45, %49 : vector<8x8x64xf32>
    %51 = arith.addf %42, %50 : vector<8x8x64xf32>
    %52 = vector.extract_strided_slice %11 {offsets = [0, 0, 0], sizes = [1, 8, 64], strides = [1, 1, 1]} : vector<3x8x64xf32> to vector<1x8x64xf32>
    %53 = vector.extract_strided_slice %34 {offsets = [0, 0, 0], sizes = [7, 8, 64], strides = [1, 1, 1]} : vector<8x8x64xf32> to vector<7x8x64xf32>
    %54 = tpu.concatenate %52, %53 in 0 : vector<1x8x64xf32>, vector<7x8x64xf32> -> vector<8x8x64xf32>
    %c14 = arith.constant 14 : index
    %c0_29 = arith.constant 0 : index
    %c0_30 = arith.constant 0 : index
    %55 = vector.load %arg5[%c14, %c0_29, %c0_30] : memref<49x8x64xf32, #tpu.memory_space<vmem>>, vector<1x8x64xf32>
    %56 = vector.shape_cast %55 : vector<1x8x64xf32> to vector<8x64xf32>
    %57 = vector.shape_cast %56 : vector<8x64xf32> to vector<1x8x64xf32>
    %58 = vector.broadcast %57 : vector<1x8x64xf32> to vector<8x8x64xf32>
    %59 = arith.mulf %54, %58 : vector<8x8x64xf32>
    %60 = arith.addf %51, %59 : vector<8x8x64xf32>
    %c21 = arith.constant 21 : index
    %c0_31 = arith.constant 0 : index
    %c0_32 = arith.constant 0 : index
    %61 = vector.load %arg5[%c21, %c0_31, %c0_32] : memref<49x8x64xf32, #tpu.memory_space<vmem>>, vector<1x8x64xf32>
    %62 = vector.shape_cast %61 : vector<1x8x64xf32> to vector<8x64xf32>
    %63 = vector.shape_cast %62 : vector<8x64xf32> to vector<1x8x64xf32>
    %64 = vector.broadcast %63 : vector<1x8x64xf32> to vector<8x8x64xf32>
    %65 = arith.mulf %34, %64 : vector<8x8x64xf32>
    %66 = arith.addf %60, %65 : vector<8x8x64xf32>
    %67 = vector.extract_strided_slice %34 {offsets = [1, 0, 0], sizes = [7, 8, 64], strides = [1, 1, 1]} : vector<8x8x64xf32> to vector<7x8x64xf32>
    %68 = vector.extract_strided_slice %11 {offsets = [0, 0, 0], sizes = [1, 8, 64], strides = [1, 1, 1]} : vector<3x8x64xf32> to vector<1x8x64xf32>
    %69 = tpu.concatenate %67, %68 in 0 : vector<7x8x64xf32>, vector<1x8x64xf32> -> vector<8x8x64xf32>
    %c28 = arith.constant 28 : index
    %c0_33 = arith.constant 0 : index
    %c0_34 = arith.constant 0 : index
    %70 = vector.load %arg5[%c28, %c0_33, %c0_34] : memref<49x8x64xf32, #tpu.memory_space<vmem>>, vector<1x8x64xf32>
    %71 = vector.shape_cast %70 : vector<1x8x64xf32> to vector<8x64xf32>
    %72 = vector.shape_cast %71 : vector<8x64xf32> to vector<1x8x64xf32>
    %73 = vector.broadcast %72 : vector<1x8x64xf32> to vector<8x8x64xf32>
    %74 = arith.mulf %69, %73 : vector<8x8x64xf32>
    %75 = arith.addf %66, %74 : vector<8x8x64xf32>
    %76 = vector.extract_strided_slice %34 {offsets = [2, 0, 0], sizes = [6, 8, 64], strides = [1, 1, 1]} : vector<8x8x64xf32> to vector<6x8x64xf32>
    %77 = vector.extract_strided_slice %11 {offsets = [0, 0, 0], sizes = [2, 8, 64], strides = [1, 1, 1]} : vector<3x8x64xf32> to vector<2x8x64xf32>
    %78 = tpu.concatenate %76, %77 in 0 : vector<6x8x64xf32>, vector<2x8x64xf32> -> vector<8x8x64xf32>
    %c35 = arith.constant 35 : index
    %c0_35 = arith.constant 0 : index
    %c0_36 = arith.constant 0 : index
    %79 = vector.load %arg5[%c35, %c0_35, %c0_36] : memref<49x8x64xf32, #tpu.memory_space<vmem>>, vector<1x8x64xf32>
    %80 = vector.shape_cast %79 : vector<1x8x64xf32> to vector<8x64xf32>
    %81 = vector.shape_cast %80 : vector<8x64xf32> to vector<1x8x64xf32>
    %82 = vector.broadcast %81 : vector<1x8x64xf32> to vector<8x8x64xf32>
    %83 = arith.mulf %78, %82 : vector<8x8x64xf32>
    %84 = arith.addf %75, %83 : vector<8x8x64xf32>
    %85 = vector.extract_strided_slice %34 {offsets = [3, 0, 0], sizes = [5, 8, 64], strides = [1, 1, 1]} : vector<8x8x64xf32> to vector<5x8x64xf32>
    %86 = tpu.concatenate %85, %11 in 0 : vector<5x8x64xf32>, vector<3x8x64xf32> -> vector<8x8x64xf32>
    %c42 = arith.constant 42 : index
    %c0_37 = arith.constant 0 : index
    %c0_38 = arith.constant 0 : index
    %87 = vector.load %arg5[%c42, %c0_37, %c0_38] : memref<49x8x64xf32, #tpu.memory_space<vmem>>, vector<1x8x64xf32>
    %88 = vector.shape_cast %87 : vector<1x8x64xf32> to vector<8x64xf32>
    %89 = vector.shape_cast %88 : vector<8x64xf32> to vector<1x8x64xf32>
    %90 = vector.broadcast %89 : vector<1x8x64xf32> to vector<8x8x64xf32>
    %91 = arith.mulf %86, %90 : vector<8x8x64xf32>
    %92 = arith.addf %84, %91 : vector<8x8x64xf32>
    %c0_39 = arith.constant 0 : index
    %c6 = arith.constant 6 : index
    %c0_40 = arith.constant 0 : index
    %93 = vector.load %arg9[%c0_39, %c6, %c0_40] : memref<8x24x64xf32, #tpu.memory_space<vmem>>, vector<8x8x64xf32>
    %94 = vector.extract_strided_slice %93 {offsets = [0, 0, 0], sizes = [5, 8, 64], strides = [1, 1, 1]} : vector<8x8x64xf32> to vector<5x8x64xf32>
    %95 = tpu.concatenate %11, %94 in 0 : vector<3x8x64xf32>, vector<5x8x64xf32> -> vector<8x8x64xf32>
    %c1 = arith.constant 1 : index
    %c0_41 = arith.constant 0 : index
    %c0_42 = arith.constant 0 : index
    %96 = vector.load %arg5[%c1, %c0_41, %c0_42] : memref<49x8x64xf32, #tpu.memory_space<vmem>>, vector<1x8x64xf32>
    %97 = vector.shape_cast %96 : vector<1x8x64xf32> to vector<8x64xf32>
    %98 = vector.shape_cast %97 : vector<8x64xf32> to vector<1x8x64xf32>
    %99 = vector.broadcast %98 : vector<1x8x64xf32> to vector<8x8x64xf32>
    %100 = arith.mulf %95, %99 : vector<8x8x64xf32>
    %101 = arith.addf %92, %100 : vector<8x8x64xf32>
    %102 = vector.extract_strided_slice %11 {offsets = [0, 0, 0], sizes = [2, 8, 64], strides = [1, 1, 1]} : vector<3x8x64xf32> to vector<2x8x64xf32>
    %103 = vector.extract_strided_slice %93 {offsets = [0, 0, 0], sizes = [6, 8, 64], strides = [1, 1, 1]} : vector<8x8x64xf32> to vector<6x8x64xf32>
    %104 = tpu.concatenate %102, %103 in 0 : vector<2x8x64xf32>, vector<6x8x64xf32> -> vector<8x8x64xf32>
    %c8_43 = arith.constant 8 : index
    %c0_44 = arith.constant 0 : index
    %c0_45 = arith.constant 0 : index
    %105 = vector.load %arg5[%c8_43, %c0_44, %c0_45] : memref<49x8x64xf32, #tpu.memory_space<vmem>>, vector<1x8x64xf32>
    %106 = vector.shape_cast %105 : vector<1x8x64xf32> to vector<8x64xf32>
    %107 = vector.shape_cast %106 : vector<8x64xf32> to vector<1x8x64xf32>
    %108 = vector.broadcast %107 : vector<1x8x64xf32> to vector<8x8x64xf32>
    %109 = arith.mulf %104, %108 : vector<8x8x64xf32>
    %110 = arith.addf %101, %109 : vector<8x8x64xf32>
    %111 = vector.extract_strided_slice %11 {offsets = [0, 0, 0], sizes = [1, 8, 64], strides = [1, 1, 1]} : vector<3x8x64xf32> to vector<1x8x64xf32>
    %112 = vector.extract_strided_slice %93 {offsets = [0, 0, 0], sizes = [7, 8, 64], strides = [1, 1, 1]} : vector<8x8x64xf32> to vector<7x8x64xf32>
    %113 = tpu.concatenate %111, %112 in 0 : vector<1x8x64xf32>, vector<7x8x64xf32> -> vector<8x8x64xf32>
    %c15 = arith.constant 15 : index
    %c0_46 = arith.constant 0 : index
    %c0_47 = arith.constant 0 : index
    %114 = vector.load %arg5[%c15, %c0_46, %c0_47] : memref<49x8x64xf32, #tpu.memory_space<vmem>>, vector<1x8x64xf32>
    %115 = vector.shape_cast %114 : vector<1x8x64xf32> to vector<8x64xf32>
    %116 = vector.shape_cast %115 : vector<8x64xf32> to vector<1x8x64xf32>
    %117 = vector.broadcast %116 : vector<1x8x64xf32> to vector<8x8x64xf32>
    %118 = arith.mulf %113, %117 : vector<8x8x64xf32>
    %119 = arith.addf %110, %118 : vector<8x8x64xf32>
    %c22 = arith.constant 22 : index
    %c0_48 = arith.constant 0 : index
    %c0_49 = arith.constant 0 : index
    %120 = vector.load %arg5[%c22, %c0_48, %c0_49] : memref<49x8x64xf32, #tpu.memory_space<vmem>>, vector<1x8x64xf32>
    %121 = vector.shape_cast %120 : vector<1x8x64xf32> to vector<8x64xf32>
    %122 = vector.shape_cast %121 : vector<8x64xf32> to vector<1x8x64xf32>
    %123 = vector.broadcast %122 : vector<1x8x64xf32> to vector<8x8x64xf32>
    %124 = arith.mulf %93, %123 : vector<8x8x64xf32>
    %125 = arith.addf %119, %124 : vector<8x8x64xf32>
    %126 = vector.extract_strided_slice %93 {offsets = [1, 0, 0], sizes = [7, 8, 64], strides = [1, 1, 1]} : vector<8x8x64xf32> to vector<7x8x64xf32>
    %127 = vector.extract_strided_slice %11 {offsets = [0, 0, 0], sizes = [1, 8, 64], strides = [1, 1, 1]} : vector<3x8x64xf32> to vector<1x8x64xf32>
    %128 = tpu.concatenate %126, %127 in 0 : vector<7x8x64xf32>, vector<1x8x64xf32> -> vector<8x8x64xf32>
    %c29 = arith.constant 29 : index
    %c0_50 = arith.constant 0 : index
    %c0_51 = arith.constant 0 : index
    %129 = vector.load %arg5[%c29, %c0_50, %c0_51] : memref<49x8x64xf32, #tpu.memory_space<vmem>>, vector<1x8x64xf32>
    %130 = vector.shape_cast %129 : vector<1x8x64xf32> to vector<8x64xf32>
    %131 = vector.shape_cast %130 : vector<8x64xf32> to vector<1x8x64xf32>
    %132 = vector.broadcast %131 : vector<1x8x64xf32> to vector<8x8x64xf32>
    %133 = arith.mulf %128, %132 : vector<8x8x64xf32>
    %134 = arith.addf %125, %133 : vector<8x8x64xf32>
    %135 = vector.extract_strided_slice %93 {offsets = [2, 0, 0], sizes = [6, 8, 64], strides = [1, 1, 1]} : vector<8x8x64xf32> to vector<6x8x64xf32>
    %136 = vector.extract_strided_slice %11 {offsets = [0, 0, 0], sizes = [2, 8, 64], strides = [1, 1, 1]} : vector<3x8x64xf32> to vector<2x8x64xf32>
    %137 = tpu.concatenate %135, %136 in 0 : vector<6x8x64xf32>, vector<2x8x64xf32> -> vector<8x8x64xf32>
    %c36 = arith.constant 36 : index
    %c0_52 = arith.constant 0 : index
    %c0_53 = arith.constant 0 : index
    %138 = vector.load %arg5[%c36, %c0_52, %c0_53] : memref<49x8x64xf32, #tpu.memory_space<vmem>>, vector<1x8x64xf32>
    %139 = vector.shape_cast %138 : vector<1x8x64xf32> to vector<8x64xf32>
    %140 = vector.shape_cast %139 : vector<8x64xf32> to vector<1x8x64xf32>
    %141 = vector.broadcast %140 : vector<1x8x64xf32> to vector<8x8x64xf32>
    %142 = arith.mulf %137, %141 : vector<8x8x64xf32>
    %143 = arith.addf %134, %142 : vector<8x8x64xf32>
    %144 = vector.extract_strided_slice %93 {offsets = [3, 0, 0], sizes = [5, 8, 64], strides = [1, 1, 1]} : vector<8x8x64xf32> to vector<5x8x64xf32>
    %145 = tpu.concatenate %144, %11 in 0 : vector<5x8x64xf32>, vector<3x8x64xf32> -> vector<8x8x64xf32>
    %c43 = arith.constant 43 : index
    %c0_54 = arith.constant 0 : index
    %c0_55 = arith.constant 0 : index
    %146 = vector.load %arg5[%c43, %c0_54, %c0_55] : memref<49x8x64xf32, #tpu.memory_space<vmem>>, vector<1x8x64xf32>
    %147 = vector.shape_cast %146 : vector<1x8x64xf32> to vector<8x64xf32>
    %148 = vector.shape_cast %147 : vector<8x64xf32> to vector<1x8x64xf32>
    %149 = vector.broadcast %148 : vector<1x8x64xf32> to vector<8x8x64xf32>
    %150 = arith.mulf %145, %149 : vector<8x8x64xf32>
    %151 = arith.addf %143, %150 : vector<8x8x64xf32>
    %c0_56 = arith.constant 0 : index
    %c7_57 = arith.constant 7 : index
    %c0_58 = arith.constant 0 : index
    %152 = vector.load %arg9[%c0_56, %c7_57, %c0_58] : memref<8x24x64xf32, #tpu.memory_space<vmem>>, vector<8x8x64xf32>
    %153 = vector.extract_strided_slice %152 {offsets = [0, 0, 0], sizes = [5, 8, 64], strides = [1, 1, 1]} : vector<8x8x64xf32> to vector<5x8x64xf32>
    %154 = tpu.concatenate %11, %153 in 0 : vector<3x8x64xf32>, vector<5x8x64xf32> -> vector<8x8x64xf32>
    %c2 = arith.constant 2 : index
    %c0_59 = arith.constant 0 : index
    %c0_60 = arith.constant 0 : index
    %155 = vector.load %arg5[%c2, %c0_59, %c0_60] : memref<49x8x64xf32, #tpu.memory_space<vmem>>, vector<1x8x64xf32>
    %156 = vector.shape_cast %155 : vector<1x8x64xf32> to vector<8x64xf32>
    %157 = vector.shape_cast %156 : vector<8x64xf32> to vector<1x8x64xf32>
    %158 = vector.broadcast %157 : vector<1x8x64xf32> to vector<8x8x64xf32>
    %159 = arith.mulf %154, %158 : vector<8x8x64xf32>
    %160 = arith.addf %151, %159 : vector<8x8x64xf32>
    %161 = vector.extract_strided_slice %11 {offsets = [0, 0, 0], sizes = [2, 8, 64], strides = [1, 1, 1]} : vector<3x8x64xf32> to vector<2x8x64xf32>
    %162 = vector.extract_strided_slice %152 {offsets = [0, 0, 0], sizes = [6, 8, 64], strides = [1, 1, 1]} : vector<8x8x64xf32> to vector<6x8x64xf32>
    %163 = tpu.concatenate %161, %162 in 0 : vector<2x8x64xf32>, vector<6x8x64xf32> -> vector<8x8x64xf32>
    %c9 = arith.constant 9 : index
    %c0_61 = arith.constant 0 : index
    %c0_62 = arith.constant 0 : index
    %164 = vector.load %arg5[%c9, %c0_61, %c0_62] : memref<49x8x64xf32, #tpu.memory_space<vmem>>, vector<1x8x64xf32>
    %165 = vector.shape_cast %164 : vector<1x8x64xf32> to vector<8x64xf32>
    %166 = vector.shape_cast %165 : vector<8x64xf32> to vector<1x8x64xf32>
    %167 = vector.broadcast %166 : vector<1x8x64xf32> to vector<8x8x64xf32>
    %168 = arith.mulf %163, %167 : vector<8x8x64xf32>
    %169 = arith.addf %160, %168 : vector<8x8x64xf32>
    %170 = vector.extract_strided_slice %11 {offsets = [0, 0, 0], sizes = [1, 8, 64], strides = [1, 1, 1]} : vector<3x8x64xf32> to vector<1x8x64xf32>
    %171 = vector.extract_strided_slice %152 {offsets = [0, 0, 0], sizes = [7, 8, 64], strides = [1, 1, 1]} : vector<8x8x64xf32> to vector<7x8x64xf32>
    %172 = tpu.concatenate %170, %171 in 0 : vector<1x8x64xf32>, vector<7x8x64xf32> -> vector<8x8x64xf32>
    %c16_63 = arith.constant 16 : index
    %c0_64 = arith.constant 0 : index
    %c0_65 = arith.constant 0 : index
    %173 = vector.load %arg5[%c16_63, %c0_64, %c0_65] : memref<49x8x64xf32, #tpu.memory_space<vmem>>, vector<1x8x64xf32>
    %174 = vector.shape_cast %173 : vector<1x8x64xf32> to vector<8x64xf32>
    %175 = vector.shape_cast %174 : vector<8x64xf32> to vector<1x8x64xf32>
    %176 = vector.broadcast %175 : vector<1x8x64xf32> to vector<8x8x64xf32>
    %177 = arith.mulf %172, %176 : vector<8x8x64xf32>
    %178 = arith.addf %169, %177 : vector<8x8x64xf32>
    %c23 = arith.constant 23 : index
    %c0_66 = arith.constant 0 : index
    %c0_67 = arith.constant 0 : index
    %179 = vector.load %arg5[%c23, %c0_66, %c0_67] : memref<49x8x64xf32, #tpu.memory_space<vmem>>, vector<1x8x64xf32>
    %180 = vector.shape_cast %179 : vector<1x8x64xf32> to vector<8x64xf32>
    %181 = vector.shape_cast %180 : vector<8x64xf32> to vector<1x8x64xf32>
    %182 = vector.broadcast %181 : vector<1x8x64xf32> to vector<8x8x64xf32>
    %183 = arith.mulf %152, %182 : vector<8x8x64xf32>
    %184 = arith.addf %178, %183 : vector<8x8x64xf32>
    %185 = vector.extract_strided_slice %152 {offsets = [1, 0, 0], sizes = [7, 8, 64], strides = [1, 1, 1]} : vector<8x8x64xf32> to vector<7x8x64xf32>
    %186 = vector.extract_strided_slice %11 {offsets = [0, 0, 0], sizes = [1, 8, 64], strides = [1, 1, 1]} : vector<3x8x64xf32> to vector<1x8x64xf32>
    %187 = tpu.concatenate %185, %186 in 0 : vector<7x8x64xf32>, vector<1x8x64xf32> -> vector<8x8x64xf32>
    %c30 = arith.constant 30 : index
    %c0_68 = arith.constant 0 : index
    %c0_69 = arith.constant 0 : index
    %188 = vector.load %arg5[%c30, %c0_68, %c0_69] : memref<49x8x64xf32, #tpu.memory_space<vmem>>, vector<1x8x64xf32>
    %189 = vector.shape_cast %188 : vector<1x8x64xf32> to vector<8x64xf32>
    %190 = vector.shape_cast %189 : vector<8x64xf32> to vector<1x8x64xf32>
    %191 = vector.broadcast %190 : vector<1x8x64xf32> to vector<8x8x64xf32>
    %192 = arith.mulf %187, %191 : vector<8x8x64xf32>
    %193 = arith.addf %184, %192 : vector<8x8x64xf32>
    %194 = vector.extract_strided_slice %152 {offsets = [2, 0, 0], sizes = [6, 8, 64], strides = [1, 1, 1]} : vector<8x8x64xf32> to vector<6x8x64xf32>
    %195 = vector.extract_strided_slice %11 {offsets = [0, 0, 0], sizes = [2, 8, 64], strides = [1, 1, 1]} : vector<3x8x64xf32> to vector<2x8x64xf32>
    %196 = tpu.concatenate %194, %195 in 0 : vector<6x8x64xf32>, vector<2x8x64xf32> -> vector<8x8x64xf32>
    %c37 = arith.constant 37 : index
    %c0_70 = arith.constant 0 : index
    %c0_71 = arith.constant 0 : index
    %197 = vector.load %arg5[%c37, %c0_70, %c0_71] : memref<49x8x64xf32, #tpu.memory_space<vmem>>, vector<1x8x64xf32>
    %198 = vector.shape_cast %197 : vector<1x8x64xf32> to vector<8x64xf32>
    %199 = vector.shape_cast %198 : vector<8x64xf32> to vector<1x8x64xf32>
    %200 = vector.broadcast %199 : vector<1x8x64xf32> to vector<8x8x64xf32>
    %201 = arith.mulf %196, %200 : vector<8x8x64xf32>
    %202 = arith.addf %193, %201 : vector<8x8x64xf32>
    %203 = vector.extract_strided_slice %152 {offsets = [3, 0, 0], sizes = [5, 8, 64], strides = [1, 1, 1]} : vector<8x8x64xf32> to vector<5x8x64xf32>
    %204 = tpu.concatenate %203, %11 in 0 : vector<5x8x64xf32>, vector<3x8x64xf32> -> vector<8x8x64xf32>
    %c44 = arith.constant 44 : index
    %c0_72 = arith.constant 0 : index
    %c0_73 = arith.constant 0 : index
    %205 = vector.load %arg5[%c44, %c0_72, %c0_73] : memref<49x8x64xf32, #tpu.memory_space<vmem>>, vector<1x8x64xf32>
    %206 = vector.shape_cast %205 : vector<1x8x64xf32> to vector<8x64xf32>
    %207 = vector.shape_cast %206 : vector<8x64xf32> to vector<1x8x64xf32>
    %208 = vector.broadcast %207 : vector<1x8x64xf32> to vector<8x8x64xf32>
    %209 = arith.mulf %204, %208 : vector<8x8x64xf32>
    %210 = arith.addf %202, %209 : vector<8x8x64xf32>
    %c0_74 = arith.constant 0 : index
    %c8_75 = arith.constant 8 : index
    %c0_76 = arith.constant 0 : index
    %211 = vector.load %arg9[%c0_74, %c8_75, %c0_76] : memref<8x24x64xf32, #tpu.memory_space<vmem>>, vector<8x8x64xf32>
    %212 = vector.extract_strided_slice %211 {offsets = [0, 0, 0], sizes = [5, 8, 64], strides = [1, 1, 1]} : vector<8x8x64xf32> to vector<5x8x64xf32>
    %213 = tpu.concatenate %11, %212 in 0 : vector<3x8x64xf32>, vector<5x8x64xf32> -> vector<8x8x64xf32>
    %c3 = arith.constant 3 : index
    %c0_77 = arith.constant 0 : index
    %c0_78 = arith.constant 0 : index
    %214 = vector.load %arg5[%c3, %c0_77, %c0_78] : memref<49x8x64xf32, #tpu.memory_space<vmem>>, vector<1x8x64xf32>
    %215 = vector.shape_cast %214 : vector<1x8x64xf32> to vector<8x64xf32>
    %216 = vector.shape_cast %215 : vector<8x64xf32> to vector<1x8x64xf32>
    %217 = vector.broadcast %216 : vector<1x8x64xf32> to vector<8x8x64xf32>
    %218 = arith.mulf %213, %217 : vector<8x8x64xf32>
    %219 = arith.addf %210, %218 : vector<8x8x64xf32>
    %220 = vector.extract_strided_slice %11 {offsets = [0, 0, 0], sizes = [2, 8, 64], strides = [1, 1, 1]} : vector<3x8x64xf32> to vector<2x8x64xf32>
    %221 = vector.extract_strided_slice %211 {offsets = [0, 0, 0], sizes = [6, 8, 64], strides = [1, 1, 1]} : vector<8x8x64xf32> to vector<6x8x64xf32>
    %222 = tpu.concatenate %220, %221 in 0 : vector<2x8x64xf32>, vector<6x8x64xf32> -> vector<8x8x64xf32>
    %c10 = arith.constant 10 : index
    %c0_79 = arith.constant 0 : index
    %c0_80 = arith.constant 0 : index
    %223 = vector.load %arg5[%c10, %c0_79, %c0_80] : memref<49x8x64xf32, #tpu.memory_space<vmem>>, vector<1x8x64xf32>
    %224 = vector.shape_cast %223 : vector<1x8x64xf32> to vector<8x64xf32>
    %225 = vector.shape_cast %224 : vector<8x64xf32> to vector<1x8x64xf32>
    %226 = vector.broadcast %225 : vector<1x8x64xf32> to vector<8x8x64xf32>
    %227 = arith.mulf %222, %226 : vector<8x8x64xf32>
    %228 = arith.addf %219, %227 : vector<8x8x64xf32>
    %229 = vector.extract_strided_slice %11 {offsets = [0, 0, 0], sizes = [1, 8, 64], strides = [1, 1, 1]} : vector<3x8x64xf32> to vector<1x8x64xf32>
    %230 = vector.extract_strided_slice %211 {offsets = [0, 0, 0], sizes = [7, 8, 64], strides = [1, 1, 1]} : vector<8x8x64xf32> to vector<7x8x64xf32>
    %231 = tpu.concatenate %229, %230 in 0 : vector<1x8x64xf32>, vector<7x8x64xf32> -> vector<8x8x64xf32>
    %c17 = arith.constant 17 : index
    %c0_81 = arith.constant 0 : index
    %c0_82 = arith.constant 0 : index
    %232 = vector.load %arg5[%c17, %c0_81, %c0_82] : memref<49x8x64xf32, #tpu.memory_space<vmem>>, vector<1x8x64xf32>
    %233 = vector.shape_cast %232 : vector<1x8x64xf32> to vector<8x64xf32>
    %234 = vector.shape_cast %233 : vector<8x64xf32> to vector<1x8x64xf32>
    %235 = vector.broadcast %234 : vector<1x8x64xf32> to vector<8x8x64xf32>
    %236 = arith.mulf %231, %235 : vector<8x8x64xf32>
    %237 = arith.addf %228, %236 : vector<8x8x64xf32>
    %c24 = arith.constant 24 : index
    %c0_83 = arith.constant 0 : index
    %c0_84 = arith.constant 0 : index
    %238 = vector.load %arg5[%c24, %c0_83, %c0_84] : memref<49x8x64xf32, #tpu.memory_space<vmem>>, vector<1x8x64xf32>
    %239 = vector.shape_cast %238 : vector<1x8x64xf32> to vector<8x64xf32>
    %240 = vector.shape_cast %239 : vector<8x64xf32> to vector<1x8x64xf32>
    %241 = vector.broadcast %240 : vector<1x8x64xf32> to vector<8x8x64xf32>
    %242 = arith.mulf %211, %241 : vector<8x8x64xf32>
    %243 = arith.addf %237, %242 : vector<8x8x64xf32>
    %244 = vector.extract_strided_slice %211 {offsets = [1, 0, 0], sizes = [7, 8, 64], strides = [1, 1, 1]} : vector<8x8x64xf32> to vector<7x8x64xf32>
    %245 = vector.extract_strided_slice %11 {offsets = [0, 0, 0], sizes = [1, 8, 64], strides = [1, 1, 1]} : vector<3x8x64xf32> to vector<1x8x64xf32>
    %246 = tpu.concatenate %244, %245 in 0 : vector<7x8x64xf32>, vector<1x8x64xf32> -> vector<8x8x64xf32>
    %c31 = arith.constant 31 : index
    %c0_85 = arith.constant 0 : index
    %c0_86 = arith.constant 0 : index
    %247 = vector.load %arg5[%c31, %c0_85, %c0_86] : memref<49x8x64xf32, #tpu.memory_space<vmem>>, vector<1x8x64xf32>
    %248 = vector.shape_cast %247 : vector<1x8x64xf32> to vector<8x64xf32>
    %249 = vector.shape_cast %248 : vector<8x64xf32> to vector<1x8x64xf32>
    %250 = vector.broadcast %249 : vector<1x8x64xf32> to vector<8x8x64xf32>
    %251 = arith.mulf %246, %250 : vector<8x8x64xf32>
    %252 = arith.addf %243, %251 : vector<8x8x64xf32>
    %253 = vector.extract_strided_slice %211 {offsets = [2, 0, 0], sizes = [6, 8, 64], strides = [1, 1, 1]} : vector<8x8x64xf32> to vector<6x8x64xf32>
    %254 = vector.extract_strided_slice %11 {offsets = [0, 0, 0], sizes = [2, 8, 64], strides = [1, 1, 1]} : vector<3x8x64xf32> to vector<2x8x64xf32>
    %255 = tpu.concatenate %253, %254 in 0 : vector<6x8x64xf32>, vector<2x8x64xf32> -> vector<8x8x64xf32>
    %c38 = arith.constant 38 : index
    %c0_87 = arith.constant 0 : index
    %c0_88 = arith.constant 0 : index
    %256 = vector.load %arg5[%c38, %c0_87, %c0_88] : memref<49x8x64xf32, #tpu.memory_space<vmem>>, vector<1x8x64xf32>
    %257 = vector.shape_cast %256 : vector<1x8x64xf32> to vector<8x64xf32>
    %258 = vector.shape_cast %257 : vector<8x64xf32> to vector<1x8x64xf32>
    %259 = vector.broadcast %258 : vector<1x8x64xf32> to vector<8x8x64xf32>
    %260 = arith.mulf %255, %259 : vector<8x8x64xf32>
    %261 = arith.addf %252, %260 : vector<8x8x64xf32>
    %262 = vector.extract_strided_slice %211 {offsets = [3, 0, 0], sizes = [5, 8, 64], strides = [1, 1, 1]} : vector<8x8x64xf32> to vector<5x8x64xf32>
    %263 = tpu.concatenate %262, %11 in 0 : vector<5x8x64xf32>, vector<3x8x64xf32> -> vector<8x8x64xf32>
    %c45 = arith.constant 45 : index
    %c0_89 = arith.constant 0 : index
    %c0_90 = arith.constant 0 : index
    %264 = vector.load %arg5[%c45, %c0_89, %c0_90] : memref<49x8x64xf32, #tpu.memory_space<vmem>>, vector<1x8x64xf32>
    %265 = vector.shape_cast %264 : vector<1x8x64xf32> to vector<8x64xf32>
    %266 = vector.shape_cast %265 : vector<8x64xf32> to vector<1x8x64xf32>
    %267 = vector.broadcast %266 : vector<1x8x64xf32> to vector<8x8x64xf32>
    %268 = arith.mulf %263, %267 : vector<8x8x64xf32>
    %269 = arith.addf %261, %268 : vector<8x8x64xf32>
    %c0_91 = arith.constant 0 : index
    %c9_92 = arith.constant 9 : index
    %c0_93 = arith.constant 0 : index
    %270 = vector.load %arg9[%c0_91, %c9_92, %c0_93] : memref<8x24x64xf32, #tpu.memory_space<vmem>>, vector<8x8x64xf32>
    %271 = vector.extract_strided_slice %270 {offsets = [0, 0, 0], sizes = [5, 8, 64], strides = [1, 1, 1]} : vector<8x8x64xf32> to vector<5x8x64xf32>
    %272 = tpu.concatenate %11, %271 in 0 : vector<3x8x64xf32>, vector<5x8x64xf32> -> vector<8x8x64xf32>
    %c4 = arith.constant 4 : index
    %c0_94 = arith.constant 0 : index
    %c0_95 = arith.constant 0 : index
    %273 = vector.load %arg5[%c4, %c0_94, %c0_95] : memref<49x8x64xf32, #tpu.memory_space<vmem>>, vector<1x8x64xf32>
    %274 = vector.shape_cast %273 : vector<1x8x64xf32> to vector<8x64xf32>
    %275 = vector.shape_cast %274 : vector<8x64xf32> to vector<1x8x64xf32>
    %276 = vector.broadcast %275 : vector<1x8x64xf32> to vector<8x8x64xf32>
    %277 = arith.mulf %272, %276 : vector<8x8x64xf32>
    %278 = arith.addf %269, %277 : vector<8x8x64xf32>
    %279 = vector.extract_strided_slice %11 {offsets = [0, 0, 0], sizes = [2, 8, 64], strides = [1, 1, 1]} : vector<3x8x64xf32> to vector<2x8x64xf32>
    %280 = vector.extract_strided_slice %270 {offsets = [0, 0, 0], sizes = [6, 8, 64], strides = [1, 1, 1]} : vector<8x8x64xf32> to vector<6x8x64xf32>
    %281 = tpu.concatenate %279, %280 in 0 : vector<2x8x64xf32>, vector<6x8x64xf32> -> vector<8x8x64xf32>
    %c11 = arith.constant 11 : index
    %c0_96 = arith.constant 0 : index
    %c0_97 = arith.constant 0 : index
    %282 = vector.load %arg5[%c11, %c0_96, %c0_97] : memref<49x8x64xf32, #tpu.memory_space<vmem>>, vector<1x8x64xf32>
    %283 = vector.shape_cast %282 : vector<1x8x64xf32> to vector<8x64xf32>
    %284 = vector.shape_cast %283 : vector<8x64xf32> to vector<1x8x64xf32>
    %285 = vector.broadcast %284 : vector<1x8x64xf32> to vector<8x8x64xf32>
    %286 = arith.mulf %281, %285 : vector<8x8x64xf32>
    %287 = arith.addf %278, %286 : vector<8x8x64xf32>
    %288 = vector.extract_strided_slice %11 {offsets = [0, 0, 0], sizes = [1, 8, 64], strides = [1, 1, 1]} : vector<3x8x64xf32> to vector<1x8x64xf32>
    %289 = vector.extract_strided_slice %270 {offsets = [0, 0, 0], sizes = [7, 8, 64], strides = [1, 1, 1]} : vector<8x8x64xf32> to vector<7x8x64xf32>
    %290 = tpu.concatenate %288, %289 in 0 : vector<1x8x64xf32>, vector<7x8x64xf32> -> vector<8x8x64xf32>
    %c18 = arith.constant 18 : index
    %c0_98 = arith.constant 0 : index
    %c0_99 = arith.constant 0 : index
    %291 = vector.load %arg5[%c18, %c0_98, %c0_99] : memref<49x8x64xf32, #tpu.memory_space<vmem>>, vector<1x8x64xf32>
    %292 = vector.shape_cast %291 : vector<1x8x64xf32> to vector<8x64xf32>
    %293 = vector.shape_cast %292 : vector<8x64xf32> to vector<1x8x64xf32>
    %294 = vector.broadcast %293 : vector<1x8x64xf32> to vector<8x8x64xf32>
    %295 = arith.mulf %290, %294 : vector<8x8x64xf32>
    %296 = arith.addf %287, %295 : vector<8x8x64xf32>
    %c25 = arith.constant 25 : index
    %c0_100 = arith.constant 0 : index
    %c0_101 = arith.constant 0 : index
    %297 = vector.load %arg5[%c25, %c0_100, %c0_101] : memref<49x8x64xf32, #tpu.memory_space<vmem>>, vector<1x8x64xf32>
    %298 = vector.shape_cast %297 : vector<1x8x64xf32> to vector<8x64xf32>
    %299 = vector.shape_cast %298 : vector<8x64xf32> to vector<1x8x64xf32>
    %300 = vector.broadcast %299 : vector<1x8x64xf32> to vector<8x8x64xf32>
    %301 = arith.mulf %270, %300 : vector<8x8x64xf32>
    %302 = arith.addf %296, %301 : vector<8x8x64xf32>
    %303 = vector.extract_strided_slice %270 {offsets = [1, 0, 0], sizes = [7, 8, 64], strides = [1, 1, 1]} : vector<8x8x64xf32> to vector<7x8x64xf32>
    %304 = vector.extract_strided_slice %11 {offsets = [0, 0, 0], sizes = [1, 8, 64], strides = [1, 1, 1]} : vector<3x8x64xf32> to vector<1x8x64xf32>
    %305 = tpu.concatenate %303, %304 in 0 : vector<7x8x64xf32>, vector<1x8x64xf32> -> vector<8x8x64xf32>
    %c32 = arith.constant 32 : index
    %c0_102 = arith.constant 0 : index
    %c0_103 = arith.constant 0 : index
    %306 = vector.load %arg5[%c32, %c0_102, %c0_103] : memref<49x8x64xf32, #tpu.memory_space<vmem>>, vector<1x8x64xf32>
    %307 = vector.shape_cast %306 : vector<1x8x64xf32> to vector<8x64xf32>
    %308 = vector.shape_cast %307 : vector<8x64xf32> to vector<1x8x64xf32>
    %309 = vector.broadcast %308 : vector<1x8x64xf32> to vector<8x8x64xf32>
    %310 = arith.mulf %305, %309 : vector<8x8x64xf32>
    %311 = arith.addf %302, %310 : vector<8x8x64xf32>
    %312 = vector.extract_strided_slice %270 {offsets = [2, 0, 0], sizes = [6, 8, 64], strides = [1, 1, 1]} : vector<8x8x64xf32> to vector<6x8x64xf32>
    %313 = vector.extract_strided_slice %11 {offsets = [0, 0, 0], sizes = [2, 8, 64], strides = [1, 1, 1]} : vector<3x8x64xf32> to vector<2x8x64xf32>
    %314 = tpu.concatenate %312, %313 in 0 : vector<6x8x64xf32>, vector<2x8x64xf32> -> vector<8x8x64xf32>
    %c39 = arith.constant 39 : index
    %c0_104 = arith.constant 0 : index
    %c0_105 = arith.constant 0 : index
    %315 = vector.load %arg5[%c39, %c0_104, %c0_105] : memref<49x8x64xf32, #tpu.memory_space<vmem>>, vector<1x8x64xf32>
    %316 = vector.shape_cast %315 : vector<1x8x64xf32> to vector<8x64xf32>
    %317 = vector.shape_cast %316 : vector<8x64xf32> to vector<1x8x64xf32>
    %318 = vector.broadcast %317 : vector<1x8x64xf32> to vector<8x8x64xf32>
    %319 = arith.mulf %314, %318 : vector<8x8x64xf32>
    %320 = arith.addf %311, %319 : vector<8x8x64xf32>
    %321 = vector.extract_strided_slice %270 {offsets = [3, 0, 0], sizes = [5, 8, 64], strides = [1, 1, 1]} : vector<8x8x64xf32> to vector<5x8x64xf32>
    %322 = tpu.concatenate %321, %11 in 0 : vector<5x8x64xf32>, vector<3x8x64xf32> -> vector<8x8x64xf32>
    %c46 = arith.constant 46 : index
    %c0_106 = arith.constant 0 : index
    %c0_107 = arith.constant 0 : index
    %323 = vector.load %arg5[%c46, %c0_106, %c0_107] : memref<49x8x64xf32, #tpu.memory_space<vmem>>, vector<1x8x64xf32>
    %324 = vector.shape_cast %323 : vector<1x8x64xf32> to vector<8x64xf32>
    %325 = vector.shape_cast %324 : vector<8x64xf32> to vector<1x8x64xf32>
    %326 = vector.broadcast %325 : vector<1x8x64xf32> to vector<8x8x64xf32>
    %327 = arith.mulf %322, %326 : vector<8x8x64xf32>
    %328 = arith.addf %320, %327 : vector<8x8x64xf32>
    %c0_108 = arith.constant 0 : index
    %c10_109 = arith.constant 10 : index
    %c0_110 = arith.constant 0 : index
    %329 = vector.load %arg9[%c0_108, %c10_109, %c0_110] : memref<8x24x64xf32, #tpu.memory_space<vmem>>, vector<8x8x64xf32>
    %330 = vector.extract_strided_slice %329 {offsets = [0, 0, 0], sizes = [5, 8, 64], strides = [1, 1, 1]} : vector<8x8x64xf32> to vector<5x8x64xf32>
    %331 = tpu.concatenate %11, %330 in 0 : vector<3x8x64xf32>, vector<5x8x64xf32> -> vector<8x8x64xf32>
    %c5_111 = arith.constant 5 : index
    %c0_112 = arith.constant 0 : index
    %c0_113 = arith.constant 0 : index
    %332 = vector.load %arg5[%c5_111, %c0_112, %c0_113] : memref<49x8x64xf32, #tpu.memory_space<vmem>>, vector<1x8x64xf32>
    %333 = vector.shape_cast %332 : vector<1x8x64xf32> to vector<8x64xf32>
    %334 = vector.shape_cast %333 : vector<8x64xf32> to vector<1x8x64xf32>
    %335 = vector.broadcast %334 : vector<1x8x64xf32> to vector<8x8x64xf32>
    %336 = arith.mulf %331, %335 : vector<8x8x64xf32>
    %337 = arith.addf %328, %336 : vector<8x8x64xf32>
    %338 = vector.extract_strided_slice %11 {offsets = [0, 0, 0], sizes = [2, 8, 64], strides = [1, 1, 1]} : vector<3x8x64xf32> to vector<2x8x64xf32>
    %339 = vector.extract_strided_slice %329 {offsets = [0, 0, 0], sizes = [6, 8, 64], strides = [1, 1, 1]} : vector<8x8x64xf32> to vector<6x8x64xf32>
    %340 = tpu.concatenate %338, %339 in 0 : vector<2x8x64xf32>, vector<6x8x64xf32> -> vector<8x8x64xf32>
    %c12 = arith.constant 12 : index
    %c0_114 = arith.constant 0 : index
    %c0_115 = arith.constant 0 : index
    %341 = vector.load %arg5[%c12, %c0_114, %c0_115] : memref<49x8x64xf32, #tpu.memory_space<vmem>>, vector<1x8x64xf32>
    %342 = vector.shape_cast %341 : vector<1x8x64xf32> to vector<8x64xf32>
    %343 = vector.shape_cast %342 : vector<8x64xf32> to vector<1x8x64xf32>
    %344 = vector.broadcast %343 : vector<1x8x64xf32> to vector<8x8x64xf32>
    %345 = arith.mulf %340, %344 : vector<8x8x64xf32>
    %346 = arith.addf %337, %345 : vector<8x8x64xf32>
    %347 = vector.extract_strided_slice %11 {offsets = [0, 0, 0], sizes = [1, 8, 64], strides = [1, 1, 1]} : vector<3x8x64xf32> to vector<1x8x64xf32>
    %348 = vector.extract_strided_slice %329 {offsets = [0, 0, 0], sizes = [7, 8, 64], strides = [1, 1, 1]} : vector<8x8x64xf32> to vector<7x8x64xf32>
    %349 = tpu.concatenate %347, %348 in 0 : vector<1x8x64xf32>, vector<7x8x64xf32> -> vector<8x8x64xf32>
    %c19 = arith.constant 19 : index
    %c0_116 = arith.constant 0 : index
    %c0_117 = arith.constant 0 : index
    %350 = vector.load %arg5[%c19, %c0_116, %c0_117] : memref<49x8x64xf32, #tpu.memory_space<vmem>>, vector<1x8x64xf32>
    %351 = vector.shape_cast %350 : vector<1x8x64xf32> to vector<8x64xf32>
    %352 = vector.shape_cast %351 : vector<8x64xf32> to vector<1x8x64xf32>
    %353 = vector.broadcast %352 : vector<1x8x64xf32> to vector<8x8x64xf32>
    %354 = arith.mulf %349, %353 : vector<8x8x64xf32>
    %355 = arith.addf %346, %354 : vector<8x8x64xf32>
    %c26 = arith.constant 26 : index
    %c0_118 = arith.constant 0 : index
    %c0_119 = arith.constant 0 : index
    %356 = vector.load %arg5[%c26, %c0_118, %c0_119] : memref<49x8x64xf32, #tpu.memory_space<vmem>>, vector<1x8x64xf32>
    %357 = vector.shape_cast %356 : vector<1x8x64xf32> to vector<8x64xf32>
    %358 = vector.shape_cast %357 : vector<8x64xf32> to vector<1x8x64xf32>
    %359 = vector.broadcast %358 : vector<1x8x64xf32> to vector<8x8x64xf32>
    %360 = arith.mulf %329, %359 : vector<8x8x64xf32>
    %361 = arith.addf %355, %360 : vector<8x8x64xf32>
    %362 = vector.extract_strided_slice %329 {offsets = [1, 0, 0], sizes = [7, 8, 64], strides = [1, 1, 1]} : vector<8x8x64xf32> to vector<7x8x64xf32>
    %363 = vector.extract_strided_slice %11 {offsets = [0, 0, 0], sizes = [1, 8, 64], strides = [1, 1, 1]} : vector<3x8x64xf32> to vector<1x8x64xf32>
    %364 = tpu.concatenate %362, %363 in 0 : vector<7x8x64xf32>, vector<1x8x64xf32> -> vector<8x8x64xf32>
    %c33 = arith.constant 33 : index
    %c0_120 = arith.constant 0 : index
    %c0_121 = arith.constant 0 : index
    %365 = vector.load %arg5[%c33, %c0_120, %c0_121] : memref<49x8x64xf32, #tpu.memory_space<vmem>>, vector<1x8x64xf32>
    %366 = vector.shape_cast %365 : vector<1x8x64xf32> to vector<8x64xf32>
    %367 = vector.shape_cast %366 : vector<8x64xf32> to vector<1x8x64xf32>
    %368 = vector.broadcast %367 : vector<1x8x64xf32> to vector<8x8x64xf32>
    %369 = arith.mulf %364, %368 : vector<8x8x64xf32>
    %370 = arith.addf %361, %369 : vector<8x8x64xf32>
    %371 = vector.extract_strided_slice %329 {offsets = [2, 0, 0], sizes = [6, 8, 64], strides = [1, 1, 1]} : vector<8x8x64xf32> to vector<6x8x64xf32>
    %372 = vector.extract_strided_slice %11 {offsets = [0, 0, 0], sizes = [2, 8, 64], strides = [1, 1, 1]} : vector<3x8x64xf32> to vector<2x8x64xf32>
    %373 = tpu.concatenate %371, %372 in 0 : vector<6x8x64xf32>, vector<2x8x64xf32> -> vector<8x8x64xf32>
    %c40 = arith.constant 40 : index
    %c0_122 = arith.constant 0 : index
    %c0_123 = arith.constant 0 : index
    %374 = vector.load %arg5[%c40, %c0_122, %c0_123] : memref<49x8x64xf32, #tpu.memory_space<vmem>>, vector<1x8x64xf32>
    %375 = vector.shape_cast %374 : vector<1x8x64xf32> to vector<8x64xf32>
    %376 = vector.shape_cast %375 : vector<8x64xf32> to vector<1x8x64xf32>
    %377 = vector.broadcast %376 : vector<1x8x64xf32> to vector<8x8x64xf32>
    %378 = arith.mulf %373, %377 : vector<8x8x64xf32>
    %379 = arith.addf %370, %378 : vector<8x8x64xf32>
    %380 = vector.extract_strided_slice %329 {offsets = [3, 0, 0], sizes = [5, 8, 64], strides = [1, 1, 1]} : vector<8x8x64xf32> to vector<5x8x64xf32>
    %381 = tpu.concatenate %380, %11 in 0 : vector<5x8x64xf32>, vector<3x8x64xf32> -> vector<8x8x64xf32>
    %c47 = arith.constant 47 : index
    %c0_124 = arith.constant 0 : index
    %c0_125 = arith.constant 0 : index
    %382 = vector.load %arg5[%c47, %c0_124, %c0_125] : memref<49x8x64xf32, #tpu.memory_space<vmem>>, vector<1x8x64xf32>
    %383 = vector.shape_cast %382 : vector<1x8x64xf32> to vector<8x64xf32>
    %384 = vector.shape_cast %383 : vector<8x64xf32> to vector<1x8x64xf32>
    %385 = vector.broadcast %384 : vector<1x8x64xf32> to vector<8x8x64xf32>
    %386 = arith.mulf %381, %385 : vector<8x8x64xf32>
    %387 = arith.addf %379, %386 : vector<8x8x64xf32>
    %c0_126 = arith.constant 0 : index
    %c11_127 = arith.constant 11 : index
    %c0_128 = arith.constant 0 : index
    %388 = vector.load %arg9[%c0_126, %c11_127, %c0_128] : memref<8x24x64xf32, #tpu.memory_space<vmem>>, vector<8x8x64xf32>
    %389 = vector.extract_strided_slice %388 {offsets = [0, 0, 0], sizes = [5, 8, 64], strides = [1, 1, 1]} : vector<8x8x64xf32> to vector<5x8x64xf32>
    %390 = tpu.concatenate %11, %389 in 0 : vector<3x8x64xf32>, vector<5x8x64xf32> -> vector<8x8x64xf32>
    %c6_129 = arith.constant 6 : index
    %c0_130 = arith.constant 0 : index
    %c0_131 = arith.constant 0 : index
    %391 = vector.load %arg5[%c6_129, %c0_130, %c0_131] : memref<49x8x64xf32, #tpu.memory_space<vmem>>, vector<1x8x64xf32>
    %392 = vector.shape_cast %391 : vector<1x8x64xf32> to vector<8x64xf32>
    %393 = vector.shape_cast %392 : vector<8x64xf32> to vector<1x8x64xf32>
    %394 = vector.broadcast %393 : vector<1x8x64xf32> to vector<8x8x64xf32>
    %395 = arith.mulf %390, %394 : vector<8x8x64xf32>
    %396 = arith.addf %387, %395 : vector<8x8x64xf32>
    %397 = vector.extract_strided_slice %11 {offsets = [0, 0, 0], sizes = [2, 8, 64], strides = [1, 1, 1]} : vector<3x8x64xf32> to vector<2x8x64xf32>
    %398 = vector.extract_strided_slice %388 {offsets = [0, 0, 0], sizes = [6, 8, 64], strides = [1, 1, 1]} : vector<8x8x64xf32> to vector<6x8x64xf32>
    %399 = tpu.concatenate %397, %398 in 0 : vector<2x8x64xf32>, vector<6x8x64xf32> -> vector<8x8x64xf32>
    %c13 = arith.constant 13 : index
    %c0_132 = arith.constant 0 : index
    %c0_133 = arith.constant 0 : index
    %400 = vector.load %arg5[%c13, %c0_132, %c0_133] : memref<49x8x64xf32, #tpu.memory_space<vmem>>, vector<1x8x64xf32>
    %401 = vector.shape_cast %400 : vector<1x8x64xf32> to vector<8x64xf32>
    %402 = vector.shape_cast %401 : vector<8x64xf32> to vector<1x8x64xf32>
    %403 = vector.broadcast %402 : vector<1x8x64xf32> to vector<8x8x64xf32>
    %404 = arith.mulf %399, %403 : vector<8x8x64xf32>
    %405 = arith.addf %396, %404 : vector<8x8x64xf32>
    %406 = vector.extract_strided_slice %11 {offsets = [0, 0, 0], sizes = [1, 8, 64], strides = [1, 1, 1]} : vector<3x8x64xf32> to vector<1x8x64xf32>
    %407 = vector.extract_strided_slice %388 {offsets = [0, 0, 0], sizes = [7, 8, 64], strides = [1, 1, 1]} : vector<8x8x64xf32> to vector<7x8x64xf32>
    %408 = tpu.concatenate %406, %407 in 0 : vector<1x8x64xf32>, vector<7x8x64xf32> -> vector<8x8x64xf32>
    %c20 = arith.constant 20 : index
    %c0_134 = arith.constant 0 : index
    %c0_135 = arith.constant 0 : index
    %409 = vector.load %arg5[%c20, %c0_134, %c0_135] : memref<49x8x64xf32, #tpu.memory_space<vmem>>, vector<1x8x64xf32>
    %410 = vector.shape_cast %409 : vector<1x8x64xf32> to vector<8x64xf32>
    %411 = vector.shape_cast %410 : vector<8x64xf32> to vector<1x8x64xf32>
    %412 = vector.broadcast %411 : vector<1x8x64xf32> to vector<8x8x64xf32>
    %413 = arith.mulf %408, %412 : vector<8x8x64xf32>
    %414 = arith.addf %405, %413 : vector<8x8x64xf32>
    %c27 = arith.constant 27 : index
    %c0_136 = arith.constant 0 : index
    %c0_137 = arith.constant 0 : index
    %415 = vector.load %arg5[%c27, %c0_136, %c0_137] : memref<49x8x64xf32, #tpu.memory_space<vmem>>, vector<1x8x64xf32>
    %416 = vector.shape_cast %415 : vector<1x8x64xf32> to vector<8x64xf32>
    %417 = vector.shape_cast %416 : vector<8x64xf32> to vector<1x8x64xf32>
    %418 = vector.broadcast %417 : vector<1x8x64xf32> to vector<8x8x64xf32>
    %419 = arith.mulf %388, %418 : vector<8x8x64xf32>
    %420 = arith.addf %414, %419 : vector<8x8x64xf32>
    %421 = vector.extract_strided_slice %388 {offsets = [1, 0, 0], sizes = [7, 8, 64], strides = [1, 1, 1]} : vector<8x8x64xf32> to vector<7x8x64xf32>
    %422 = vector.extract_strided_slice %11 {offsets = [0, 0, 0], sizes = [1, 8, 64], strides = [1, 1, 1]} : vector<3x8x64xf32> to vector<1x8x64xf32>
    %423 = tpu.concatenate %421, %422 in 0 : vector<7x8x64xf32>, vector<1x8x64xf32> -> vector<8x8x64xf32>
    %c34 = arith.constant 34 : index
    %c0_138 = arith.constant 0 : index
    %c0_139 = arith.constant 0 : index
    %424 = vector.load %arg5[%c34, %c0_138, %c0_139] : memref<49x8x64xf32, #tpu.memory_space<vmem>>, vector<1x8x64xf32>
    %425 = vector.shape_cast %424 : vector<1x8x64xf32> to vector<8x64xf32>
    %426 = vector.shape_cast %425 : vector<8x64xf32> to vector<1x8x64xf32>
    %427 = vector.broadcast %426 : vector<1x8x64xf32> to vector<8x8x64xf32>
    %428 = arith.mulf %423, %427 : vector<8x8x64xf32>
    %429 = arith.addf %420, %428 : vector<8x8x64xf32>
    %430 = vector.extract_strided_slice %388 {offsets = [2, 0, 0], sizes = [6, 8, 64], strides = [1, 1, 1]} : vector<8x8x64xf32> to vector<6x8x64xf32>
    %431 = vector.extract_strided_slice %11 {offsets = [0, 0, 0], sizes = [2, 8, 64], strides = [1, 1, 1]} : vector<3x8x64xf32> to vector<2x8x64xf32>
    %432 = tpu.concatenate %430, %431 in 0 : vector<6x8x64xf32>, vector<2x8x64xf32> -> vector<8x8x64xf32>
    %c41 = arith.constant 41 : index
    %c0_140 = arith.constant 0 : index
    %c0_141 = arith.constant 0 : index
    %433 = vector.load %arg5[%c41, %c0_140, %c0_141] : memref<49x8x64xf32, #tpu.memory_space<vmem>>, vector<1x8x64xf32>
    %434 = vector.shape_cast %433 : vector<1x8x64xf32> to vector<8x64xf32>
    %435 = vector.shape_cast %434 : vector<8x64xf32> to vector<1x8x64xf32>
    %436 = vector.broadcast %435 : vector<1x8x64xf32> to vector<8x8x64xf32>
    %437 = arith.mulf %432, %436 : vector<8x8x64xf32>
    %438 = arith.addf %429, %437 : vector<8x8x64xf32>
    %439 = vector.extract_strided_slice %388 {offsets = [3, 0, 0], sizes = [5, 8, 64], strides = [1, 1, 1]} : vector<8x8x64xf32> to vector<5x8x64xf32>
    %440 = tpu.concatenate %439, %11 in 0 : vector<5x8x64xf32>, vector<3x8x64xf32> -> vector<8x8x64xf32>
    %c48 = arith.constant 48 : index
    %c0_142 = arith.constant 0 : index
    %c0_143 = arith.constant 0 : index
    %441 = vector.load %arg5[%c48, %c0_142, %c0_143] : memref<49x8x64xf32, #tpu.memory_space<vmem>>, vector<1x8x64xf32>
    %442 = vector.shape_cast %441 : vector<1x8x64xf32> to vector<8x64xf32>
    %443 = vector.shape_cast %442 : vector<8x64xf32> to vector<1x8x64xf32>
    %444 = vector.broadcast %443 : vector<1x8x64xf32> to vector<8x8x64xf32>
    %445 = arith.mulf %440, %444 : vector<8x8x64xf32>
    %446 = arith.addf %438, %445 : vector<8x8x64xf32>
    %c0_144 = arith.constant 0 : index
    %c0_145 = arith.constant 0 : index
    %447 = vector.load %arg6[%c0_144, %c0_145] : memref<8x64xf32, #tpu.memory_space<vmem>>, vector<8x64xf32>
    %448 = vector.shape_cast %447 : vector<8x64xf32> to vector<1x8x64xf32>
    %449 = vector.broadcast %448 : vector<1x8x64xf32> to vector<8x8x64xf32>
    %450 = arith.addf %446, %449 : vector<8x8x64xf32>
    %451 = vector.shape_cast %450 : vector<8x8x64xf32> to vector<64x64xf32>
    %452 = vector.extract_strided_slice %12 {offsets = [0, 0], sizes = [64, 64], strides = [1, 1]} : vector<72x64xf32> to vector<64x64xf32>
    %453 = arith.mulf %452, %451 : vector<64x64xf32>
    %454 = vector.extract_strided_slice %29 {offsets = [0, 0], sizes = [64, 64], strides = [1, 1]} : vector<72x64xf32> to vector<64x64xf32>
    %455 = arith.addf %454, %453 : vector<64x64xf32>
    %456 = vector.extract_strided_slice %29 {offsets = [64, 0], sizes = [8, 64], strides = [1, 1]} : vector<72x64xf32> to vector<8x64xf32>
    %457 = tpu.concatenate %455, %456 in 0 : vector<64x64xf32>, vector<8x64xf32> -> vector<72x64xf32>
    %458 = vector.extract_strided_slice %3 {offsets = [72, 0], sizes = [72, 64], strides = [1, 1]} : vector<144x192xf32> to vector<72x64xf32>
    %459 = vector.extract_strided_slice %3 {offsets = [72, 64], sizes = [72, 64], strides = [1, 1]} : vector<144x192xf32> to vector<72x64xf32>
    %460 = vector.extract_strided_slice %3 {offsets = [72, 128], sizes = [72, 64], strides = [1, 1]} : vector<144x192xf32> to vector<72x64xf32>
    %cst_146 = arith.constant -1.000000e+30 : f32
    %461 = vector.broadcast %cst_146 : f32 to vector<72x64xf32>
    %462 = arith.select %6, %459, %461 : vector<72x64xi1>, vector<72x64xf32>
    %cst_147 = arith.constant dense<0xFF800000> : vector<64xf32>
    %463 = vector.multi_reduction <maximumf>, %462, %cst_147 [0] : vector<72x64xf32> to vector<64xf32>
    %464 = vector.shape_cast %463 : vector<64xf32> to vector<1x64xf32>
    %465 = vector.broadcast %464 : vector<1x64xf32> to vector<72x64xf32>
    %466 = arith.subf %462, %465 : vector<72x64xf32>
    %467 = math.exp %466 : vector<72x64xf32>
    %cst_148 = arith.constant dense<0.000000e+00> : vector<64xf32>
    %468 = vector.multi_reduction <add>, %467, %cst_148 [0] : vector<72x64xf32> to vector<64xf32>
    %469 = vector.shape_cast %468 : vector<64xf32> to vector<1x64xf32>
    %470 = vector.broadcast %469 : vector<1x64xf32> to vector<72x64xf32>
    %471 = arith.divf %467, %470 : vector<72x64xf32>
    %cst_149 = arith.constant dense<0.000000e+00> : vector<64x64xf32>
    %472 = tpu.matmul %471, %460, %cst_149 {dimension_numbers = #tpu.dot_dimension_numbers<[0], [0], [1], [1], [0, 1, 1, 1], [], []>} : vector<72x64xf32>, vector<72x64xf32>, vector<64x64xf32> -> vector<64x64xf32>
    %c0_150 = arith.constant 0 : index
    %c0_151 = arith.constant 0 : index
    %473 = vector.load %arg7[%c0_150, %c0_151] : memref<64x64xf32, #tpu.memory_space<vmem>>, vector<64x64xf32>
    %474 = arith.mulf %472, %473 : vector<64x64xf32>
    %cst_152 = arith.constant dense<0.000000e+00> : vector<72x64xf32>
    %475 = tpu.matmul %458, %474, %cst_152 {dimension_numbers = #tpu.dot_dimension_numbers<[1], [0], [0], [1], [0, 0, 1, 1], [], []>} : vector<72x64xf32>, vector<64x64xf32>, vector<72x64xf32> -> vector<72x64xf32>
    %476 = vector.extract_strided_slice %460 {offsets = [0, 0], sizes = [64, 64], strides = [1, 1]} : vector<72x64xf32> to vector<64x64xf32>
    %477 = vector.shape_cast %476 : vector<64x64xf32> to vector<8x8x64xf32>
    %c0_153 = arith.constant 0 : index
    %c8_154 = arith.constant 8 : index
    %c0_155 = arith.constant 0 : index
    %478 = vector.load %arg9[%c0_153, %c8_154, %c0_155] : memref<8x24x64xf32, #tpu.memory_space<vmem>>, vector<8x8x64xf32>
    tpu.vector_store %arg9[%c0_153, %c8_154, %c0_155], %477 {strides = array<i32>} : memref<8x24x64xf32, #tpu.memory_space<vmem>>, vector<8x8x64xf32>,
    %cst_156 = arith.constant 0.000000e+00 : f32
    %479 = vector.broadcast %cst_156 : f32 to vector<8x8x64xf32>
    %c0_157 = arith.constant 0 : index
    %c5_158 = arith.constant 5 : index
    %c0_159 = arith.constant 0 : index
    %480 = vector.load %arg9[%c0_157, %c5_158, %c0_159] : memref<8x24x64xf32, #tpu.memory_space<vmem>>, vector<8x8x64xf32>
    %481 = vector.extract_strided_slice %480 {offsets = [0, 0, 0], sizes = [5, 8, 64], strides = [1, 1, 1]} : vector<8x8x64xf32> to vector<5x8x64xf32>
    %482 = tpu.concatenate %11, %481 in 0 : vector<3x8x64xf32>, vector<5x8x64xf32> -> vector<8x8x64xf32>
    %c0_160 = arith.constant 0 : index
    %c0_161 = arith.constant 0 : index
    %c0_162 = arith.constant 0 : index
    %483 = vector.load %arg5[%c0_160, %c0_161, %c0_162] : memref<49x8x64xf32, #tpu.memory_space<vmem>>, vector<1x8x64xf32>
    %484 = vector.shape_cast %483 : vector<1x8x64xf32> to vector<8x64xf32>
    %485 = vector.shape_cast %484 : vector<8x64xf32> to vector<1x8x64xf32>
    %486 = vector.broadcast %485 : vector<1x8x64xf32> to vector<8x8x64xf32>
    %487 = arith.mulf %482, %486 : vector<8x8x64xf32>
    %488 = arith.addf %479, %487 : vector<8x8x64xf32>
    %489 = vector.extract_strided_slice %11 {offsets = [0, 0, 0], sizes = [2, 8, 64], strides = [1, 1, 1]} : vector<3x8x64xf32> to vector<2x8x64xf32>
    %490 = vector.extract_strided_slice %480 {offsets = [0, 0, 0], sizes = [6, 8, 64], strides = [1, 1, 1]} : vector<8x8x64xf32> to vector<6x8x64xf32>
    %491 = tpu.concatenate %489, %490 in 0 : vector<2x8x64xf32>, vector<6x8x64xf32> -> vector<8x8x64xf32>
    %c7_163 = arith.constant 7 : index
    %c0_164 = arith.constant 0 : index
    %c0_165 = arith.constant 0 : index
    %492 = vector.load %arg5[%c7_163, %c0_164, %c0_165] : memref<49x8x64xf32, #tpu.memory_space<vmem>>, vector<1x8x64xf32>
    %493 = vector.shape_cast %492 : vector<1x8x64xf32> to vector<8x64xf32>
    %494 = vector.shape_cast %493 : vector<8x64xf32> to vector<1x8x64xf32>
    %495 = vector.broadcast %494 : vector<1x8x64xf32> to vector<8x8x64xf32>
    %496 = arith.mulf %491, %495 : vector<8x8x64xf32>
    %497 = arith.addf %488, %496 : vector<8x8x64xf32>
    %498 = vector.extract_strided_slice %11 {offsets = [0, 0, 0], sizes = [1, 8, 64], strides = [1, 1, 1]} : vector<3x8x64xf32> to vector<1x8x64xf32>
    %499 = vector.extract_strided_slice %480 {offsets = [0, 0, 0], sizes = [7, 8, 64], strides = [1, 1, 1]} : vector<8x8x64xf32> to vector<7x8x64xf32>
    %500 = tpu.concatenate %498, %499 in 0 : vector<1x8x64xf32>, vector<7x8x64xf32> -> vector<8x8x64xf32>
    %c14_166 = arith.constant 14 : index
    %c0_167 = arith.constant 0 : index
    %c0_168 = arith.constant 0 : index
    %501 = vector.load %arg5[%c14_166, %c0_167, %c0_168] : memref<49x8x64xf32, #tpu.memory_space<vmem>>, vector<1x8x64xf32>
    %502 = vector.shape_cast %501 : vector<1x8x64xf32> to vector<8x64xf32>
    %503 = vector.shape_cast %502 : vector<8x64xf32> to vector<1x8x64xf32>
    %504 = vector.broadcast %503 : vector<1x8x64xf32> to vector<8x8x64xf32>
    %505 = arith.mulf %500, %504 : vector<8x8x64xf32>
    %506 = arith.addf %497, %505 : vector<8x8x64xf32>
    %c21_169 = arith.constant 21 : index
    %c0_170 = arith.constant 0 : index
    %c0_171 = arith.constant 0 : index
    %507 = vector.load %arg5[%c21_169, %c0_170, %c0_171] : memref<49x8x64xf32, #tpu.memory_space<vmem>>, vector<1x8x64xf32>
    %508 = vector.shape_cast %507 : vector<1x8x64xf32> to vector<8x64xf32>
    %509 = vector.shape_cast %508 : vector<8x64xf32> to vector<1x8x64xf32>
    %510 = vector.broadcast %509 : vector<1x8x64xf32> to vector<8x8x64xf32>
    %511 = arith.mulf %480, %510 : vector<8x8x64xf32>
    %512 = arith.addf %506, %511 : vector<8x8x64xf32>
    %513 = vector.extract_strided_slice %480 {offsets = [1, 0, 0], sizes = [7, 8, 64], strides = [1, 1, 1]} : vector<8x8x64xf32> to vector<7x8x64xf32>
    %514 = vector.extract_strided_slice %11 {offsets = [0, 0, 0], sizes = [1, 8, 64], strides = [1, 1, 1]} : vector<3x8x64xf32> to vector<1x8x64xf32>
    %515 = tpu.concatenate %513, %514 in 0 : vector<7x8x64xf32>, vector<1x8x64xf32> -> vector<8x8x64xf32>
    %c28_172 = arith.constant 28 : index
    %c0_173 = arith.constant 0 : index
    %c0_174 = arith.constant 0 : index
    %516 = vector.load %arg5[%c28_172, %c0_173, %c0_174] : memref<49x8x64xf32, #tpu.memory_space<vmem>>, vector<1x8x64xf32>
    %517 = vector.shape_cast %516 : vector<1x8x64xf32> to vector<8x64xf32>
    %518 = vector.shape_cast %517 : vector<8x64xf32> to vector<1x8x64xf32>
    %519 = vector.broadcast %518 : vector<1x8x64xf32> to vector<8x8x64xf32>
    %520 = arith.mulf %515, %519 : vector<8x8x64xf32>
    %521 = arith.addf %512, %520 : vector<8x8x64xf32>
    %522 = vector.extract_strided_slice %480 {offsets = [2, 0, 0], sizes = [6, 8, 64], strides = [1, 1, 1]} : vector<8x8x64xf32> to vector<6x8x64xf32>
    %523 = vector.extract_strided_slice %11 {offsets = [0, 0, 0], sizes = [2, 8, 64], strides = [1, 1, 1]} : vector<3x8x64xf32> to vector<2x8x64xf32>
    %524 = tpu.concatenate %522, %523 in 0 : vector<6x8x64xf32>, vector<2x8x64xf32> -> vector<8x8x64xf32>
    %c35_175 = arith.constant 35 : index
    %c0_176 = arith.constant 0 : index
    %c0_177 = arith.constant 0 : index
    %525 = vector.load %arg5[%c35_175, %c0_176, %c0_177] : memref<49x8x64xf32, #tpu.memory_space<vmem>>, vector<1x8x64xf32>
    %526 = vector.shape_cast %525 : vector<1x8x64xf32> to vector<8x64xf32>
    %527 = vector.shape_cast %526 : vector<8x64xf32> to vector<1x8x64xf32>
    %528 = vector.broadcast %527 : vector<1x8x64xf32> to vector<8x8x64xf32>
    %529 = arith.mulf %524, %528 : vector<8x8x64xf32>
    %530 = arith.addf %521, %529 : vector<8x8x64xf32>
    %531 = vector.extract_strided_slice %480 {offsets = [3, 0, 0], sizes = [5, 8, 64], strides = [1, 1, 1]} : vector<8x8x64xf32> to vector<5x8x64xf32>
    %532 = tpu.concatenate %531, %11 in 0 : vector<5x8x64xf32>, vector<3x8x64xf32> -> vector<8x8x64xf32>
    %c42_178 = arith.constant 42 : index
    %c0_179 = arith.constant 0 : index
    %c0_180 = arith.constant 0 : index
    %533 = vector.load %arg5[%c42_178, %c0_179, %c0_180] : memref<49x8x64xf32, #tpu.memory_space<vmem>>, vector<1x8x64xf32>
    %534 = vector.shape_cast %533 : vector<1x8x64xf32> to vector<8x64xf32>
    %535 = vector.shape_cast %534 : vector<8x64xf32> to vector<1x8x64xf32>
    %536 = vector.broadcast %535 : vector<1x8x64xf32> to vector<8x8x64xf32>
    %537 = arith.mulf %532, %536 : vector<8x8x64xf32>
    %538 = arith.addf %530, %537 : vector<8x8x64xf32>
    %c0_181 = arith.constant 0 : index
    %c6_182 = arith.constant 6 : index
    %c0_183 = arith.constant 0 : index
    %539 = vector.load %arg9[%c0_181, %c6_182, %c0_183] : memref<8x24x64xf32, #tpu.memory_space<vmem>>, vector<8x8x64xf32>
    %540 = vector.extract_strided_slice %539 {offsets = [0, 0, 0], sizes = [5, 8, 64], strides = [1, 1, 1]} : vector<8x8x64xf32> to vector<5x8x64xf32>
    %541 = tpu.concatenate %11, %540 in 0 : vector<3x8x64xf32>, vector<5x8x64xf32> -> vector<8x8x64xf32>
    %c1_184 = arith.constant 1 : index
    %c0_185 = arith.constant 0 : index
    %c0_186 = arith.constant 0 : index
    %542 = vector.load %arg5[%c1_184, %c0_185, %c0_186] : memref<49x8x64xf32, #tpu.memory_space<vmem>>, vector<1x8x64xf32>
    %543 = vector.shape_cast %542 : vector<1x8x64xf32> to vector<8x64xf32>
    %544 = vector.shape_cast %543 : vector<8x64xf32> to vector<1x8x64xf32>
    %545 = vector.broadcast %544 : vector<1x8x64xf32> to vector<8x8x64xf32>
    %546 = arith.mulf %541, %545 : vector<8x8x64xf32>
    %547 = arith.addf %538, %546 : vector<8x8x64xf32>
    %548 = vector.extract_strided_slice %11 {offsets = [0, 0, 0], sizes = [2, 8, 64], strides = [1, 1, 1]} : vector<3x8x64xf32> to vector<2x8x64xf32>
    %549 = vector.extract_strided_slice %539 {offsets = [0, 0, 0], sizes = [6, 8, 64], strides = [1, 1, 1]} : vector<8x8x64xf32> to vector<6x8x64xf32>
    %550 = tpu.concatenate %548, %549 in 0 : vector<2x8x64xf32>, vector<6x8x64xf32> -> vector<8x8x64xf32>
    %c8_187 = arith.constant 8 : index
    %c0_188 = arith.constant 0 : index
    %c0_189 = arith.constant 0 : index
    %551 = vector.load %arg5[%c8_187, %c0_188, %c0_189] : memref<49x8x64xf32, #tpu.memory_space<vmem>>, vector<1x8x64xf32>
    %552 = vector.shape_cast %551 : vector<1x8x64xf32> to vector<8x64xf32>
    %553 = vector.shape_cast %552 : vector<8x64xf32> to vector<1x8x64xf32>
    %554 = vector.broadcast %553 : vector<1x8x64xf32> to vector<8x8x64xf32>
    %555 = arith.mulf %550, %554 : vector<8x8x64xf32>
    %556 = arith.addf %547, %555 : vector<8x8x64xf32>
    %557 = vector.extract_strided_slice %11 {offsets = [0, 0, 0], sizes = [1, 8, 64], strides = [1, 1, 1]} : vector<3x8x64xf32> to vector<1x8x64xf32>
    %558 = vector.extract_strided_slice %539 {offsets = [0, 0, 0], sizes = [7, 8, 64], strides = [1, 1, 1]} : vector<8x8x64xf32> to vector<7x8x64xf32>
    %559 = tpu.concatenate %557, %558 in 0 : vector<1x8x64xf32>, vector<7x8x64xf32> -> vector<8x8x64xf32>
    %c15_190 = arith.constant 15 : index
    %c0_191 = arith.constant 0 : index
    %c0_192 = arith.constant 0 : index
    %560 = vector.load %arg5[%c15_190, %c0_191, %c0_192] : memref<49x8x64xf32, #tpu.memory_space<vmem>>, vector<1x8x64xf32>
    %561 = vector.shape_cast %560 : vector<1x8x64xf32> to vector<8x64xf32>
    %562 = vector.shape_cast %561 : vector<8x64xf32> to vector<1x8x64xf32>
    %563 = vector.broadcast %562 : vector<1x8x64xf32> to vector<8x8x64xf32>
    %564 = arith.mulf %559, %563 : vector<8x8x64xf32>
    %565 = arith.addf %556, %564 : vector<8x8x64xf32>
    %c22_193 = arith.constant 22 : index
    %c0_194 = arith.constant 0 : index
    %c0_195 = arith.constant 0 : index
    %566 = vector.load %arg5[%c22_193, %c0_194, %c0_195] : memref<49x8x64xf32, #tpu.memory_space<vmem>>, vector<1x8x64xf32>
    %567 = vector.shape_cast %566 : vector<1x8x64xf32> to vector<8x64xf32>
    %568 = vector.shape_cast %567 : vector<8x64xf32> to vector<1x8x64xf32>
    %569 = vector.broadcast %568 : vector<1x8x64xf32> to vector<8x8x64xf32>
    %570 = arith.mulf %539, %569 : vector<8x8x64xf32>
    %571 = arith.addf %565, %570 : vector<8x8x64xf32>
    %572 = vector.extract_strided_slice %539 {offsets = [1, 0, 0], sizes = [7, 8, 64], strides = [1, 1, 1]} : vector<8x8x64xf32> to vector<7x8x64xf32>
    %573 = vector.extract_strided_slice %11 {offsets = [0, 0, 0], sizes = [1, 8, 64], strides = [1, 1, 1]} : vector<3x8x64xf32> to vector<1x8x64xf32>
    %574 = tpu.concatenate %572, %573 in 0 : vector<7x8x64xf32>, vector<1x8x64xf32> -> vector<8x8x64xf32>
    %c29_196 = arith.constant 29 : index
    %c0_197 = arith.constant 0 : index
    %c0_198 = arith.constant 0 : index
    %575 = vector.load %arg5[%c29_196, %c0_197, %c0_198] : memref<49x8x64xf32, #tpu.memory_space<vmem>>, vector<1x8x64xf32>
    %576 = vector.shape_cast %575 : vector<1x8x64xf32> to vector<8x64xf32>
    %577 = vector.shape_cast %576 : vector<8x64xf32> to vector<1x8x64xf32>
    %578 = vector.broadcast %577 : vector<1x8x64xf32> to vector<8x8x64xf32>
    %579 = arith.mulf %574, %578 : vector<8x8x64xf32>
    %580 = arith.addf %571, %579 : vector<8x8x64xf32>
    %581 = vector.extract_strided_slice %539 {offsets = [2, 0, 0], sizes = [6, 8, 64], strides = [1, 1, 1]} : vector<8x8x64xf32> to vector<6x8x64xf32>
    %582 = vector.extract_strided_slice %11 {offsets = [0, 0, 0], sizes = [2, 8, 64], strides = [1, 1, 1]} : vector<3x8x64xf32> to vector<2x8x64xf32>
    %583 = tpu.concatenate %581, %582 in 0 : vector<6x8x64xf32>, vector<2x8x64xf32> -> vector<8x8x64xf32>
    %c36_199 = arith.constant 36 : index
    %c0_200 = arith.constant 0 : index
    %c0_201 = arith.constant 0 : index
    %584 = vector.load %arg5[%c36_199, %c0_200, %c0_201] : memref<49x8x64xf32, #tpu.memory_space<vmem>>, vector<1x8x64xf32>
    %585 = vector.shape_cast %584 : vector<1x8x64xf32> to vector<8x64xf32>
    %586 = vector.shape_cast %585 : vector<8x64xf32> to vector<1x8x64xf32>
    %587 = vector.broadcast %586 : vector<1x8x64xf32> to vector<8x8x64xf32>
    %588 = arith.mulf %583, %587 : vector<8x8x64xf32>
    %589 = arith.addf %580, %588 : vector<8x8x64xf32>
    %590 = vector.extract_strided_slice %539 {offsets = [3, 0, 0], sizes = [5, 8, 64], strides = [1, 1, 1]} : vector<8x8x64xf32> to vector<5x8x64xf32>
    %591 = tpu.concatenate %590, %11 in 0 : vector<5x8x64xf32>, vector<3x8x64xf32> -> vector<8x8x64xf32>
    %c43_202 = arith.constant 43 : index
    %c0_203 = arith.constant 0 : index
    %c0_204 = arith.constant 0 : index
    %592 = vector.load %arg5[%c43_202, %c0_203, %c0_204] : memref<49x8x64xf32, #tpu.memory_space<vmem>>, vector<1x8x64xf32>
    %593 = vector.shape_cast %592 : vector<1x8x64xf32> to vector<8x64xf32>
    %594 = vector.shape_cast %593 : vector<8x64xf32> to vector<1x8x64xf32>
    %595 = vector.broadcast %594 : vector<1x8x64xf32> to vector<8x8x64xf32>
    %596 = arith.mulf %591, %595 : vector<8x8x64xf32>
    %597 = arith.addf %589, %596 : vector<8x8x64xf32>
    %c0_205 = arith.constant 0 : index
    %c7_206 = arith.constant 7 : index
    %c0_207 = arith.constant 0 : index
    %598 = vector.load %arg9[%c0_205, %c7_206, %c0_207] : memref<8x24x64xf32, #tpu.memory_space<vmem>>, vector<8x8x64xf32>
    %599 = vector.extract_strided_slice %598 {offsets = [0, 0, 0], sizes = [5, 8, 64], strides = [1, 1, 1]} : vector<8x8x64xf32> to vector<5x8x64xf32>
    %600 = tpu.concatenate %11, %599 in 0 : vector<3x8x64xf32>, vector<5x8x64xf32> -> vector<8x8x64xf32>
    %c2_208 = arith.constant 2 : index
    %c0_209 = arith.constant 0 : index
    %c0_210 = arith.constant 0 : index
    %601 = vector.load %arg5[%c2_208, %c0_209, %c0_210] : memref<49x8x64xf32, #tpu.memory_space<vmem>>, vector<1x8x64xf32>
    %602 = vector.shape_cast %601 : vector<1x8x64xf32> to vector<8x64xf32>
    %603 = vector.shape_cast %602 : vector<8x64xf32> to vector<1x8x64xf32>
    %604 = vector.broadcast %603 : vector<1x8x64xf32> to vector<8x8x64xf32>
    %605 = arith.mulf %600, %604 : vector<8x8x64xf32>
    %606 = arith.addf %597, %605 : vector<8x8x64xf32>
    %607 = vector.extract_strided_slice %11 {offsets = [0, 0, 0], sizes = [2, 8, 64], strides = [1, 1, 1]} : vector<3x8x64xf32> to vector<2x8x64xf32>
    %608 = vector.extract_strided_slice %598 {offsets = [0, 0, 0], sizes = [6, 8, 64], strides = [1, 1, 1]} : vector<8x8x64xf32> to vector<6x8x64xf32>
    %609 = tpu.concatenate %607, %608 in 0 : vector<2x8x64xf32>, vector<6x8x64xf32> -> vector<8x8x64xf32>
    %c9_211 = arith.constant 9 : index
    %c0_212 = arith.constant 0 : index
    %c0_213 = arith.constant 0 : index
    %610 = vector.load %arg5[%c9_211, %c0_212, %c0_213] : memref<49x8x64xf32, #tpu.memory_space<vmem>>, vector<1x8x64xf32>
    %611 = vector.shape_cast %610 : vector<1x8x64xf32> to vector<8x64xf32>
    %612 = vector.shape_cast %611 : vector<8x64xf32> to vector<1x8x64xf32>
    %613 = vector.broadcast %612 : vector<1x8x64xf32> to vector<8x8x64xf32>
    %614 = arith.mulf %609, %613 : vector<8x8x64xf32>
    %615 = arith.addf %606, %614 : vector<8x8x64xf32>
    %616 = vector.extract_strided_slice %11 {offsets = [0, 0, 0], sizes = [1, 8, 64], strides = [1, 1, 1]} : vector<3x8x64xf32> to vector<1x8x64xf32>
    %617 = vector.extract_strided_slice %598 {offsets = [0, 0, 0], sizes = [7, 8, 64], strides = [1, 1, 1]} : vector<8x8x64xf32> to vector<7x8x64xf32>
    %618 = tpu.concatenate %616, %617 in 0 : vector<1x8x64xf32>, vector<7x8x64xf32> -> vector<8x8x64xf32>
    %c16_214 = arith.constant 16 : index
    %c0_215 = arith.constant 0 : index
    %c0_216 = arith.constant 0 : index
    %619 = vector.load %arg5[%c16_214, %c0_215, %c0_216] : memref<49x8x64xf32, #tpu.memory_space<vmem>>, vector<1x8x64xf32>
    %620 = vector.shape_cast %619 : vector<1x8x64xf32> to vector<8x64xf32>
    %621 = vector.shape_cast %620 : vector<8x64xf32> to vector<1x8x64xf32>
    %622 = vector.broadcast %621 : vector<1x8x64xf32> to vector<8x8x64xf32>
    %623 = arith.mulf %618, %622 : vector<8x8x64xf32>
    %624 = arith.addf %615, %623 : vector<8x8x64xf32>
    %c23_217 = arith.constant 23 : index
    %c0_218 = arith.constant 0 : index
    %c0_219 = arith.constant 0 : index
    %625 = vector.load %arg5[%c23_217, %c0_218, %c0_219] : memref<49x8x64xf32, #tpu.memory_space<vmem>>, vector<1x8x64xf32>
    %626 = vector.shape_cast %625 : vector<1x8x64xf32> to vector<8x64xf32>
    %627 = vector.shape_cast %626 : vector<8x64xf32> to vector<1x8x64xf32>
    %628 = vector.broadcast %627 : vector<1x8x64xf32> to vector<8x8x64xf32>
    %629 = arith.mulf %598, %628 : vector<8x8x64xf32>
    %630 = arith.addf %624, %629 : vector<8x8x64xf32>
    %631 = vector.extract_strided_slice %598 {offsets = [1, 0, 0], sizes = [7, 8, 64], strides = [1, 1, 1]} : vector<8x8x64xf32> to vector<7x8x64xf32>
    %632 = vector.extract_strided_slice %11 {offsets = [0, 0, 0], sizes = [1, 8, 64], strides = [1, 1, 1]} : vector<3x8x64xf32> to vector<1x8x64xf32>
    %633 = tpu.concatenate %631, %632 in 0 : vector<7x8x64xf32>, vector<1x8x64xf32> -> vector<8x8x64xf32>
    %c30_220 = arith.constant 30 : index
    %c0_221 = arith.constant 0 : index
    %c0_222 = arith.constant 0 : index
    %634 = vector.load %arg5[%c30_220, %c0_221, %c0_222] : memref<49x8x64xf32, #tpu.memory_space<vmem>>, vector<1x8x64xf32>
    %635 = vector.shape_cast %634 : vector<1x8x64xf32> to vector<8x64xf32>
    %636 = vector.shape_cast %635 : vector<8x64xf32> to vector<1x8x64xf32>
    %637 = vector.broadcast %636 : vector<1x8x64xf32> to vector<8x8x64xf32>
    %638 = arith.mulf %633, %637 : vector<8x8x64xf32>
    %639 = arith.addf %630, %638 : vector<8x8x64xf32>
    %640 = vector.extract_strided_slice %598 {offsets = [2, 0, 0], sizes = [6, 8, 64], strides = [1, 1, 1]} : vector<8x8x64xf32> to vector<6x8x64xf32>
    %641 = vector.extract_strided_slice %11 {offsets = [0, 0, 0], sizes = [2, 8, 64], strides = [1, 1, 1]} : vector<3x8x64xf32> to vector<2x8x64xf32>
    %642 = tpu.concatenate %640, %641 in 0 : vector<6x8x64xf32>, vector<2x8x64xf32> -> vector<8x8x64xf32>
    %c37_223 = arith.constant 37 : index
    %c0_224 = arith.constant 0 : index
    %c0_225 = arith.constant 0 : index
    %643 = vector.load %arg5[%c37_223, %c0_224, %c0_225] : memref<49x8x64xf32, #tpu.memory_space<vmem>>, vector<1x8x64xf32>
    %644 = vector.shape_cast %643 : vector<1x8x64xf32> to vector<8x64xf32>
    %645 = vector.shape_cast %644 : vector<8x64xf32> to vector<1x8x64xf32>
    %646 = vector.broadcast %645 : vector<1x8x64xf32> to vector<8x8x64xf32>
    %647 = arith.mulf %642, %646 : vector<8x8x64xf32>
    %648 = arith.addf %639, %647 : vector<8x8x64xf32>
    %649 = vector.extract_strided_slice %598 {offsets = [3, 0, 0], sizes = [5, 8, 64], strides = [1, 1, 1]} : vector<8x8x64xf32> to vector<5x8x64xf32>
    %650 = tpu.concatenate %649, %11 in 0 : vector<5x8x64xf32>, vector<3x8x64xf32> -> vector<8x8x64xf32>
    %c44_226 = arith.constant 44 : index
    %c0_227 = arith.constant 0 : index
    %c0_228 = arith.constant 0 : index
    %651 = vector.load %arg5[%c44_226, %c0_227, %c0_228] : memref<49x8x64xf32, #tpu.memory_space<vmem>>, vector<1x8x64xf32>
    %652 = vector.shape_cast %651 : vector<1x8x64xf32> to vector<8x64xf32>
    %653 = vector.shape_cast %652 : vector<8x64xf32> to vector<1x8x64xf32>
    %654 = vector.broadcast %653 : vector<1x8x64xf32> to vector<8x8x64xf32>
    %655 = arith.mulf %650, %654 : vector<8x8x64xf32>
    %656 = arith.addf %648, %655 : vector<8x8x64xf32>
    %c0_229 = arith.constant 0 : index
    %c8_230 = arith.constant 8 : index
    %c0_231 = arith.constant 0 : index
    %657 = vector.load %arg9[%c0_229, %c8_230, %c0_231] : memref<8x24x64xf32, #tpu.memory_space<vmem>>, vector<8x8x64xf32>
    %658 = vector.extract_strided_slice %657 {offsets = [0, 0, 0], sizes = [5, 8, 64], strides = [1, 1, 1]} : vector<8x8x64xf32> to vector<5x8x64xf32>
    %659 = tpu.concatenate %11, %658 in 0 : vector<3x8x64xf32>, vector<5x8x64xf32> -> vector<8x8x64xf32>
    %c3_232 = arith.constant 3 : index
    %c0_233 = arith.constant 0 : index
    %c0_234 = arith.constant 0 : index
    %660 = vector.load %arg5[%c3_232, %c0_233, %c0_234] : memref<49x8x64xf32, #tpu.memory_space<vmem>>, vector<1x8x64xf32>
    %661 = vector.shape_cast %660 : vector<1x8x64xf32> to vector<8x64xf32>
    %662 = vector.shape_cast %661 : vector<8x64xf32> to vector<1x8x64xf32>
    %663 = vector.broadcast %662 : vector<1x8x64xf32> to vector<8x8x64xf32>
    %664 = arith.mulf %659, %663 : vector<8x8x64xf32>
    %665 = arith.addf %656, %664 : vector<8x8x64xf32>
    %666 = vector.extract_strided_slice %11 {offsets = [0, 0, 0], sizes = [2, 8, 64], strides = [1, 1, 1]} : vector<3x8x64xf32> to vector<2x8x64xf32>
    %667 = vector.extract_strided_slice %657 {offsets = [0, 0, 0], sizes = [6, 8, 64], strides = [1, 1, 1]} : vector<8x8x64xf32> to vector<6x8x64xf32>
    %668 = tpu.concatenate %666, %667 in 0 : vector<2x8x64xf32>, vector<6x8x64xf32> -> vector<8x8x64xf32>
    %c10_235 = arith.constant 10 : index
    %c0_236 = arith.constant 0 : index
    %c0_237 = arith.constant 0 : index
    %669 = vector.load %arg5[%c10_235, %c0_236, %c0_237] : memref<49x8x64xf32, #tpu.memory_space<vmem>>, vector<1x8x64xf32>
    %670 = vector.shape_cast %669 : vector<1x8x64xf32> to vector<8x64xf32>
    %671 = vector.shape_cast %670 : vector<8x64xf32> to vector<1x8x64xf32>
    %672 = vector.broadcast %671 : vector<1x8x64xf32> to vector<8x8x64xf32>
    %673 = arith.mulf %668, %672 : vector<8x8x64xf32>
    %674 = arith.addf %665, %673 : vector<8x8x64xf32>
    %675 = vector.extract_strided_slice %11 {offsets = [0, 0, 0], sizes = [1, 8, 64], strides = [1, 1, 1]} : vector<3x8x64xf32> to vector<1x8x64xf32>
    %676 = vector.extract_strided_slice %657 {offsets = [0, 0, 0], sizes = [7, 8, 64], strides = [1, 1, 1]} : vector<8x8x64xf32> to vector<7x8x64xf32>
    %677 = tpu.concatenate %675, %676 in 0 : vector<1x8x64xf32>, vector<7x8x64xf32> -> vector<8x8x64xf32>
    %c17_238 = arith.constant 17 : index
    %c0_239 = arith.constant 0 : index
    %c0_240 = arith.constant 0 : index
    %678 = vector.load %arg5[%c17_238, %c0_239, %c0_240] : memref<49x8x64xf32, #tpu.memory_space<vmem>>, vector<1x8x64xf32>
    %679 = vector.shape_cast %678 : vector<1x8x64xf32> to vector<8x64xf32>
    %680 = vector.shape_cast %679 : vector<8x64xf32> to vector<1x8x64xf32>
    %681 = vector.broadcast %680 : vector<1x8x64xf32> to vector<8x8x64xf32>
    %682 = arith.mulf %677, %681 : vector<8x8x64xf32>
    %683 = arith.addf %674, %682 : vector<8x8x64xf32>
    %c24_241 = arith.constant 24 : index
    %c0_242 = arith.constant 0 : index
    %c0_243 = arith.constant 0 : index
    %684 = vector.load %arg5[%c24_241, %c0_242, %c0_243] : memref<49x8x64xf32, #tpu.memory_space<vmem>>, vector<1x8x64xf32>
    %685 = vector.shape_cast %684 : vector<1x8x64xf32> to vector<8x64xf32>
    %686 = vector.shape_cast %685 : vector<8x64xf32> to vector<1x8x64xf32>
    %687 = vector.broadcast %686 : vector<1x8x64xf32> to vector<8x8x64xf32>
    %688 = arith.mulf %657, %687 : vector<8x8x64xf32>
    %689 = arith.addf %683, %688 : vector<8x8x64xf32>
    %690 = vector.extract_strided_slice %657 {offsets = [1, 0, 0], sizes = [7, 8, 64], strides = [1, 1, 1]} : vector<8x8x64xf32> to vector<7x8x64xf32>
    %691 = vector.extract_strided_slice %11 {offsets = [0, 0, 0], sizes = [1, 8, 64], strides = [1, 1, 1]} : vector<3x8x64xf32> to vector<1x8x64xf32>
    %692 = tpu.concatenate %690, %691 in 0 : vector<7x8x64xf32>, vector<1x8x64xf32> -> vector<8x8x64xf32>
    %c31_244 = arith.constant 31 : index
    %c0_245 = arith.constant 0 : index
    %c0_246 = arith.constant 0 : index
    %693 = vector.load %arg5[%c31_244, %c0_245, %c0_246] : memref<49x8x64xf32, #tpu.memory_space<vmem>>, vector<1x8x64xf32>
    %694 = vector.shape_cast %693 : vector<1x8x64xf32> to vector<8x64xf32>
    %695 = vector.shape_cast %694 : vector<8x64xf32> to vector<1x8x64xf32>
    %696 = vector.broadcast %695 : vector<1x8x64xf32> to vector<8x8x64xf32>
    %697 = arith.mulf %692, %696 : vector<8x8x64xf32>
    %698 = arith.addf %689, %697 : vector<8x8x64xf32>
    %699 = vector.extract_strided_slice %657 {offsets = [2, 0, 0], sizes = [6, 8, 64], strides = [1, 1, 1]} : vector<8x8x64xf32> to vector<6x8x64xf32>
    %700 = vector.extract_strided_slice %11 {offsets = [0, 0, 0], sizes = [2, 8, 64], strides = [1, 1, 1]} : vector<3x8x64xf32> to vector<2x8x64xf32>
    %701 = tpu.concatenate %699, %700 in 0 : vector<6x8x64xf32>, vector<2x8x64xf32> -> vector<8x8x64xf32>
    %c38_247 = arith.constant 38 : index
    %c0_248 = arith.constant 0 : index
    %c0_249 = arith.constant 0 : index
    %702 = vector.load %arg5[%c38_247, %c0_248, %c0_249] : memref<49x8x64xf32, #tpu.memory_space<vmem>>, vector<1x8x64xf32>
    %703 = vector.shape_cast %702 : vector<1x8x64xf32> to vector<8x64xf32>
    %704 = vector.shape_cast %703 : vector<8x64xf32> to vector<1x8x64xf32>
    %705 = vector.broadcast %704 : vector<1x8x64xf32> to vector<8x8x64xf32>
    %706 = arith.mulf %701, %705 : vector<8x8x64xf32>
    %707 = arith.addf %698, %706 : vector<8x8x64xf32>
    %708 = vector.extract_strided_slice %657 {offsets = [3, 0, 0], sizes = [5, 8, 64], strides = [1, 1, 1]} : vector<8x8x64xf32> to vector<5x8x64xf32>
    %709 = tpu.concatenate %708, %11 in 0 : vector<5x8x64xf32>, vector<3x8x64xf32> -> vector<8x8x64xf32>
    %c45_250 = arith.constant 45 : index
    %c0_251 = arith.constant 0 : index
    %c0_252 = arith.constant 0 : index
    %710 = vector.load %arg5[%c45_250, %c0_251, %c0_252] : memref<49x8x64xf32, #tpu.memory_space<vmem>>, vector<1x8x64xf32>
    %711 = vector.shape_cast %710 : vector<1x8x64xf32> to vector<8x64xf32>
    %712 = vector.shape_cast %711 : vector<8x64xf32> to vector<1x8x64xf32>
    %713 = vector.broadcast %712 : vector<1x8x64xf32> to vector<8x8x64xf32>
    %714 = arith.mulf %709, %713 : vector<8x8x64xf32>
    %715 = arith.addf %707, %714 : vector<8x8x64xf32>
    %c0_253 = arith.constant 0 : index
    %c9_254 = arith.constant 9 : index
    %c0_255 = arith.constant 0 : index
    %716 = vector.load %arg9[%c0_253, %c9_254, %c0_255] : memref<8x24x64xf32, #tpu.memory_space<vmem>>, vector<8x8x64xf32>
    %717 = vector.extract_strided_slice %716 {offsets = [0, 0, 0], sizes = [5, 8, 64], strides = [1, 1, 1]} : vector<8x8x64xf32> to vector<5x8x64xf32>
    %718 = tpu.concatenate %11, %717 in 0 : vector<3x8x64xf32>, vector<5x8x64xf32> -> vector<8x8x64xf32>
    %c4_256 = arith.constant 4 : index
    %c0_257 = arith.constant 0 : index
    %c0_258 = arith.constant 0 : index
    %719 = vector.load %arg5[%c4_256, %c0_257, %c0_258] : memref<49x8x64xf32, #tpu.memory_space<vmem>>, vector<1x8x64xf32>
    %720 = vector.shape_cast %719 : vector<1x8x64xf32> to vector<8x64xf32>
    %721 = vector.shape_cast %720 : vector<8x64xf32> to vector<1x8x64xf32>
    %722 = vector.broadcast %721 : vector<1x8x64xf32> to vector<8x8x64xf32>
    %723 = arith.mulf %718, %722 : vector<8x8x64xf32>
    %724 = arith.addf %715, %723 : vector<8x8x64xf32>
    %725 = vector.extract_strided_slice %11 {offsets = [0, 0, 0], sizes = [2, 8, 64], strides = [1, 1, 1]} : vector<3x8x64xf32> to vector<2x8x64xf32>
    %726 = vector.extract_strided_slice %716 {offsets = [0, 0, 0], sizes = [6, 8, 64], strides = [1, 1, 1]} : vector<8x8x64xf32> to vector<6x8x64xf32>
    %727 = tpu.concatenate %725, %726 in 0 : vector<2x8x64xf32>, vector<6x8x64xf32> -> vector<8x8x64xf32>
    %c11_259 = arith.constant 11 : index
    %c0_260 = arith.constant 0 : index
    %c0_261 = arith.constant 0 : index
    %728 = vector.load %arg5[%c11_259, %c0_260, %c0_261] : memref<49x8x64xf32, #tpu.memory_space<vmem>>, vector<1x8x64xf32>
    %729 = vector.shape_cast %728 : vector<1x8x64xf32> to vector<8x64xf32>
    %730 = vector.shape_cast %729 : vector<8x64xf32> to vector<1x8x64xf32>
    %731 = vector.broadcast %730 : vector<1x8x64xf32> to vector<8x8x64xf32>
    %732 = arith.mulf %727, %731 : vector<8x8x64xf32>
    %733 = arith.addf %724, %732 : vector<8x8x64xf32>
    %734 = vector.extract_strided_slice %11 {offsets = [0, 0, 0], sizes = [1, 8, 64], strides = [1, 1, 1]} : vector<3x8x64xf32> to vector<1x8x64xf32>
    %735 = vector.extract_strided_slice %716 {offsets = [0, 0, 0], sizes = [7, 8, 64], strides = [1, 1, 1]} : vector<8x8x64xf32> to vector<7x8x64xf32>
    %736 = tpu.concatenate %734, %735 in 0 : vector<1x8x64xf32>, vector<7x8x64xf32> -> vector<8x8x64xf32>
    %c18_262 = arith.constant 18 : index
    %c0_263 = arith.constant 0 : index
    %c0_264 = arith.constant 0 : index
    %737 = vector.load %arg5[%c18_262, %c0_263, %c0_264] : memref<49x8x64xf32, #tpu.memory_space<vmem>>, vector<1x8x64xf32>
    %738 = vector.shape_cast %737 : vector<1x8x64xf32> to vector<8x64xf32>
    %739 = vector.shape_cast %738 : vector<8x64xf32> to vector<1x8x64xf32>
    %740 = vector.broadcast %739 : vector<1x8x64xf32> to vector<8x8x64xf32>
    %741 = arith.mulf %736, %740 : vector<8x8x64xf32>
    %742 = arith.addf %733, %741 : vector<8x8x64xf32>
    %c25_265 = arith.constant 25 : index
    %c0_266 = arith.constant 0 : index
    %c0_267 = arith.constant 0 : index
    %743 = vector.load %arg5[%c25_265, %c0_266, %c0_267] : memref<49x8x64xf32, #tpu.memory_space<vmem>>, vector<1x8x64xf32>
    %744 = vector.shape_cast %743 : vector<1x8x64xf32> to vector<8x64xf32>
    %745 = vector.shape_cast %744 : vector<8x64xf32> to vector<1x8x64xf32>
    %746 = vector.broadcast %745 : vector<1x8x64xf32> to vector<8x8x64xf32>
    %747 = arith.mulf %716, %746 : vector<8x8x64xf32>
    %748 = arith.addf %742, %747 : vector<8x8x64xf32>
    %749 = vector.extract_strided_slice %716 {offsets = [1, 0, 0], sizes = [7, 8, 64], strides = [1, 1, 1]} : vector<8x8x64xf32> to vector<7x8x64xf32>
    %750 = vector.extract_strided_slice %11 {offsets = [0, 0, 0], sizes = [1, 8, 64], strides = [1, 1, 1]} : vector<3x8x64xf32> to vector<1x8x64xf32>
    %751 = tpu.concatenate %749, %750 in 0 : vector<7x8x64xf32>, vector<1x8x64xf32> -> vector<8x8x64xf32>
    %c32_268 = arith.constant 32 : index
    %c0_269 = arith.constant 0 : index
    %c0_270 = arith.constant 0 : index
    %752 = vector.load %arg5[%c32_268, %c0_269, %c0_270] : memref<49x8x64xf32, #tpu.memory_space<vmem>>, vector<1x8x64xf32>
    %753 = vector.shape_cast %752 : vector<1x8x64xf32> to vector<8x64xf32>
    %754 = vector.shape_cast %753 : vector<8x64xf32> to vector<1x8x64xf32>
    %755 = vector.broadcast %754 : vector<1x8x64xf32> to vector<8x8x64xf32>
    %756 = arith.mulf %751, %755 : vector<8x8x64xf32>
    %757 = arith.addf %748, %756 : vector<8x8x64xf32>
    %758 = vector.extract_strided_slice %716 {offsets = [2, 0, 0], sizes = [6, 8, 64], strides = [1, 1, 1]} : vector<8x8x64xf32> to vector<6x8x64xf32>
    %759 = vector.extract_strided_slice %11 {offsets = [0, 0, 0], sizes = [2, 8, 64], strides = [1, 1, 1]} : vector<3x8x64xf32> to vector<2x8x64xf32>
    %760 = tpu.concatenate %758, %759 in 0 : vector<6x8x64xf32>, vector<2x8x64xf32> -> vector<8x8x64xf32>
    %c39_271 = arith.constant 39 : index
    %c0_272 = arith.constant 0 : index
    %c0_273 = arith.constant 0 : index
    %761 = vector.load %arg5[%c39_271, %c0_272, %c0_273] : memref<49x8x64xf32, #tpu.memory_space<vmem>>, vector<1x8x64xf32>
    %762 = vector.shape_cast %761 : vector<1x8x64xf32> to vector<8x64xf32>
    %763 = vector.shape_cast %762 : vector<8x64xf32> to vector<1x8x64xf32>
    %764 = vector.broadcast %763 : vector<1x8x64xf32> to vector<8x8x64xf32>
    %765 = arith.mulf %760, %764 : vector<8x8x64xf32>
    %766 = arith.addf %757, %765 : vector<8x8x64xf32>
    %767 = vector.extract_strided_slice %716 {offsets = [3, 0, 0], sizes = [5, 8, 64], strides = [1, 1, 1]} : vector<8x8x64xf32> to vector<5x8x64xf32>
    %768 = tpu.concatenate %767, %11 in 0 : vector<5x8x64xf32>, vector<3x8x64xf32> -> vector<8x8x64xf32>
    %c46_274 = arith.constant 46 : index
    %c0_275 = arith.constant 0 : index
    %c0_276 = arith.constant 0 : index
    %769 = vector.load %arg5[%c46_274, %c0_275, %c0_276] : memref<49x8x64xf32, #tpu.memory_space<vmem>>, vector<1x8x64xf32>
    %770 = vector.shape_cast %769 : vector<1x8x64xf32> to vector<8x64xf32>
    %771 = vector.shape_cast %770 : vector<8x64xf32> to vector<1x8x64xf32>
    %772 = vector.broadcast %771 : vector<1x8x64xf32> to vector<8x8x64xf32>
    %773 = arith.mulf %768, %772 : vector<8x8x64xf32>
    %774 = arith.addf %766, %773 : vector<8x8x64xf32>
    %c0_277 = arith.constant 0 : index
    %c10_278 = arith.constant 10 : index
    %c0_279 = arith.constant 0 : index
    %775 = vector.load %arg9[%c0_277, %c10_278, %c0_279] : memref<8x24x64xf32, #tpu.memory_space<vmem>>, vector<8x8x64xf32>
    %776 = vector.extract_strided_slice %775 {offsets = [0, 0, 0], sizes = [5, 8, 64], strides = [1, 1, 1]} : vector<8x8x64xf32> to vector<5x8x64xf32>
    %777 = tpu.concatenate %11, %776 in 0 : vector<3x8x64xf32>, vector<5x8x64xf32> -> vector<8x8x64xf32>
    %c5_280 = arith.constant 5 : index
    %c0_281 = arith.constant 0 : index
    %c0_282 = arith.constant 0 : index
    %778 = vector.load %arg5[%c5_280, %c0_281, %c0_282] : memref<49x8x64xf32, #tpu.memory_space<vmem>>, vector<1x8x64xf32>
    %779 = vector.shape_cast %778 : vector<1x8x64xf32> to vector<8x64xf32>
    %780 = vector.shape_cast %779 : vector<8x64xf32> to vector<1x8x64xf32>
    %781 = vector.broadcast %780 : vector<1x8x64xf32> to vector<8x8x64xf32>
    %782 = arith.mulf %777, %781 : vector<8x8x64xf32>
    %783 = arith.addf %774, %782 : vector<8x8x64xf32>
    %784 = vector.extract_strided_slice %11 {offsets = [0, 0, 0], sizes = [2, 8, 64], strides = [1, 1, 1]} : vector<3x8x64xf32> to vector<2x8x64xf32>
    %785 = vector.extract_strided_slice %775 {offsets = [0, 0, 0], sizes = [6, 8, 64], strides = [1, 1, 1]} : vector<8x8x64xf32> to vector<6x8x64xf32>
    %786 = tpu.concatenate %784, %785 in 0 : vector<2x8x64xf32>, vector<6x8x64xf32> -> vector<8x8x64xf32>
    %c12_283 = arith.constant 12 : index
    %c0_284 = arith.constant 0 : index
    %c0_285 = arith.constant 0 : index
    %787 = vector.load %arg5[%c12_283, %c0_284, %c0_285] : memref<49x8x64xf32, #tpu.memory_space<vmem>>, vector<1x8x64xf32>
    %788 = vector.shape_cast %787 : vector<1x8x64xf32> to vector<8x64xf32>
    %789 = vector.shape_cast %788 : vector<8x64xf32> to vector<1x8x64xf32>
    %790 = vector.broadcast %789 : vector<1x8x64xf32> to vector<8x8x64xf32>
    %791 = arith.mulf %786, %790 : vector<8x8x64xf32>
    %792 = arith.addf %783, %791 : vector<8x8x64xf32>
    %793 = vector.extract_strided_slice %11 {offsets = [0, 0, 0], sizes = [1, 8, 64], strides = [1, 1, 1]} : vector<3x8x64xf32> to vector<1x8x64xf32>
    %794 = vector.extract_strided_slice %775 {offsets = [0, 0, 0], sizes = [7, 8, 64], strides = [1, 1, 1]} : vector<8x8x64xf32> to vector<7x8x64xf32>
    %795 = tpu.concatenate %793, %794 in 0 : vector<1x8x64xf32>, vector<7x8x64xf32> -> vector<8x8x64xf32>
    %c19_286 = arith.constant 19 : index
    %c0_287 = arith.constant 0 : index
    %c0_288 = arith.constant 0 : index
    %796 = vector.load %arg5[%c19_286, %c0_287, %c0_288] : memref<49x8x64xf32, #tpu.memory_space<vmem>>, vector<1x8x64xf32>
    %797 = vector.shape_cast %796 : vector<1x8x64xf32> to vector<8x64xf32>
    %798 = vector.shape_cast %797 : vector<8x64xf32> to vector<1x8x64xf32>
    %799 = vector.broadcast %798 : vector<1x8x64xf32> to vector<8x8x64xf32>
    %800 = arith.mulf %795, %799 : vector<8x8x64xf32>
    %801 = arith.addf %792, %800 : vector<8x8x64xf32>
    %c26_289 = arith.constant 26 : index
    %c0_290 = arith.constant 0 : index
    %c0_291 = arith.constant 0 : index
    %802 = vector.load %arg5[%c26_289, %c0_290, %c0_291] : memref<49x8x64xf32, #tpu.memory_space<vmem>>, vector<1x8x64xf32>
    %803 = vector.shape_cast %802 : vector<1x8x64xf32> to vector<8x64xf32>
    %804 = vector.shape_cast %803 : vector<8x64xf32> to vector<1x8x64xf32>
    %805 = vector.broadcast %804 : vector<1x8x64xf32> to vector<8x8x64xf32>
    %806 = arith.mulf %775, %805 : vector<8x8x64xf32>
    %807 = arith.addf %801, %806 : vector<8x8x64xf32>
    %808 = vector.extract_strided_slice %775 {offsets = [1, 0, 0], sizes = [7, 8, 64], strides = [1, 1, 1]} : vector<8x8x64xf32> to vector<7x8x64xf32>
    %809 = vector.extract_strided_slice %11 {offsets = [0, 0, 0], sizes = [1, 8, 64], strides = [1, 1, 1]} : vector<3x8x64xf32> to vector<1x8x64xf32>
    %810 = tpu.concatenate %808, %809 in 0 : vector<7x8x64xf32>, vector<1x8x64xf32> -> vector<8x8x64xf32>
    %c33_292 = arith.constant 33 : index
    %c0_293 = arith.constant 0 : index
    %c0_294 = arith.constant 0 : index
    %811 = vector.load %arg5[%c33_292, %c0_293, %c0_294] : memref<49x8x64xf32, #tpu.memory_space<vmem>>, vector<1x8x64xf32>
    %812 = vector.shape_cast %811 : vector<1x8x64xf32> to vector<8x64xf32>
    %813 = vector.shape_cast %812 : vector<8x64xf32> to vector<1x8x64xf32>
    %814 = vector.broadcast %813 : vector<1x8x64xf32> to vector<8x8x64xf32>
    %815 = arith.mulf %810, %814 : vector<8x8x64xf32>
    %816 = arith.addf %807, %815 : vector<8x8x64xf32>
    %817 = vector.extract_strided_slice %775 {offsets = [2, 0, 0], sizes = [6, 8, 64], strides = [1, 1, 1]} : vector<8x8x64xf32> to vector<6x8x64xf32>
    %818 = vector.extract_strided_slice %11 {offsets = [0, 0, 0], sizes = [2, 8, 64], strides = [1, 1, 1]} : vector<3x8x64xf32> to vector<2x8x64xf32>
    %819 = tpu.concatenate %817, %818 in 0 : vector<6x8x64xf32>, vector<2x8x64xf32> -> vector<8x8x64xf32>
    %c40_295 = arith.constant 40 : index
    %c0_296 = arith.constant 0 : index
    %c0_297 = arith.constant 0 : index
    %820 = vector.load %arg5[%c40_295, %c0_296, %c0_297] : memref<49x8x64xf32, #tpu.memory_space<vmem>>, vector<1x8x64xf32>
    %821 = vector.shape_cast %820 : vector<1x8x64xf32> to vector<8x64xf32>
    %822 = vector.shape_cast %821 : vector<8x64xf32> to vector<1x8x64xf32>
    %823 = vector.broadcast %822 : vector<1x8x64xf32> to vector<8x8x64xf32>
    %824 = arith.mulf %819, %823 : vector<8x8x64xf32>
    %825 = arith.addf %816, %824 : vector<8x8x64xf32>
    %826 = vector.extract_strided_slice %775 {offsets = [3, 0, 0], sizes = [5, 8, 64], strides = [1, 1, 1]} : vector<8x8x64xf32> to vector<5x8x64xf32>
    %827 = tpu.concatenate %826, %11 in 0 : vector<5x8x64xf32>, vector<3x8x64xf32> -> vector<8x8x64xf32>
    %c47_298 = arith.constant 47 : index
    %c0_299 = arith.constant 0 : index
    %c0_300 = arith.constant 0 : index
    %828 = vector.load %arg5[%c47_298, %c0_299, %c0_300] : memref<49x8x64xf32, #tpu.memory_space<vmem>>, vector<1x8x64xf32>
    %829 = vector.shape_cast %828 : vector<1x8x64xf32> to vector<8x64xf32>
    %830 = vector.shape_cast %829 : vector<8x64xf32> to vector<1x8x64xf32>
    %831 = vector.broadcast %830 : vector<1x8x64xf32> to vector<8x8x64xf32>
    %832 = arith.mulf %827, %831 : vector<8x8x64xf32>
    %833 = arith.addf %825, %832 : vector<8x8x64xf32>
    %c0_301 = arith.constant 0 : index
    %c11_302 = arith.constant 11 : index
    %c0_303 = arith.constant 0 : index
    %834 = vector.load %arg9[%c0_301, %c11_302, %c0_303] : memref<8x24x64xf32, #tpu.memory_space<vmem>>, vector<8x8x64xf32>
    %835 = vector.extract_strided_slice %834 {offsets = [0, 0, 0], sizes = [5, 8, 64], strides = [1, 1, 1]} : vector<8x8x64xf32> to vector<5x8x64xf32>
    %836 = tpu.concatenate %11, %835 in 0 : vector<3x8x64xf32>, vector<5x8x64xf32> -> vector<8x8x64xf32>
    %c6_304 = arith.constant 6 : index
    %c0_305 = arith.constant 0 : index
    %c0_306 = arith.constant 0 : index
    %837 = vector.load %arg5[%c6_304, %c0_305, %c0_306] : memref<49x8x64xf32, #tpu.memory_space<vmem>>, vector<1x8x64xf32>
    %838 = vector.shape_cast %837 : vector<1x8x64xf32> to vector<8x64xf32>
    %839 = vector.shape_cast %838 : vector<8x64xf32> to vector<1x8x64xf32>
    %840 = vector.broadcast %839 : vector<1x8x64xf32> to vector<8x8x64xf32>
    %841 = arith.mulf %836, %840 : vector<8x8x64xf32>
    %842 = arith.addf %833, %841 : vector<8x8x64xf32>
    %843 = vector.extract_strided_slice %11 {offsets = [0, 0, 0], sizes = [2, 8, 64], strides = [1, 1, 1]} : vector<3x8x64xf32> to vector<2x8x64xf32>
    %844 = vector.extract_strided_slice %834 {offsets = [0, 0, 0], sizes = [6, 8, 64], strides = [1, 1, 1]} : vector<8x8x64xf32> to vector<6x8x64xf32>
    %845 = tpu.concatenate %843, %844 in 0 : vector<2x8x64xf32>, vector<6x8x64xf32> -> vector<8x8x64xf32>
    %c13_307 = arith.constant 13 : index
    %c0_308 = arith.constant 0 : index
    %c0_309 = arith.constant 0 : index
    %846 = vector.load %arg5[%c13_307, %c0_308, %c0_309] : memref<49x8x64xf32, #tpu.memory_space<vmem>>, vector<1x8x64xf32>
    %847 = vector.shape_cast %846 : vector<1x8x64xf32> to vector<8x64xf32>
    %848 = vector.shape_cast %847 : vector<8x64xf32> to vector<1x8x64xf32>
    %849 = vector.broadcast %848 : vector<1x8x64xf32> to vector<8x8x64xf32>
    %850 = arith.mulf %845, %849 : vector<8x8x64xf32>
    %851 = arith.addf %842, %850 : vector<8x8x64xf32>
    %852 = vector.extract_strided_slice %11 {offsets = [0, 0, 0], sizes = [1, 8, 64], strides = [1, 1, 1]} : vector<3x8x64xf32> to vector<1x8x64xf32>
    %853 = vector.extract_strided_slice %834 {offsets = [0, 0, 0], sizes = [7, 8, 64], strides = [1, 1, 1]} : vector<8x8x64xf32> to vector<7x8x64xf32>
    %854 = tpu.concatenate %852, %853 in 0 : vector<1x8x64xf32>, vector<7x8x64xf32> -> vector<8x8x64xf32>
    %c20_310 = arith.constant 20 : index
    %c0_311 = arith.constant 0 : index
    %c0_312 = arith.constant 0 : index
    %855 = vector.load %arg5[%c20_310, %c0_311, %c0_312] : memref<49x8x64xf32, #tpu.memory_space<vmem>>, vector<1x8x64xf32>
    %856 = vector.shape_cast %855 : vector<1x8x64xf32> to vector<8x64xf32>
    %857 = vector.shape_cast %856 : vector<8x64xf32> to vector<1x8x64xf32>
    %858 = vector.broadcast %857 : vector<1x8x64xf32> to vector<8x8x64xf32>
    %859 = arith.mulf %854, %858 : vector<8x8x64xf32>
    %860 = arith.addf %851, %859 : vector<8x8x64xf32>
    %c27_313 = arith.constant 27 : index
    %c0_314 = arith.constant 0 : index
    %c0_315 = arith.constant 0 : index
    %861 = vector.load %arg5[%c27_313, %c0_314, %c0_315] : memref<49x8x64xf32, #tpu.memory_space<vmem>>, vector<1x8x64xf32>
    %862 = vector.shape_cast %861 : vector<1x8x64xf32> to vector<8x64xf32>
    %863 = vector.shape_cast %862 : vector<8x64xf32> to vector<1x8x64xf32>
    %864 = vector.broadcast %863 : vector<1x8x64xf32> to vector<8x8x64xf32>
    %865 = arith.mulf %834, %864 : vector<8x8x64xf32>
    %866 = arith.addf %860, %865 : vector<8x8x64xf32>
    %867 = vector.extract_strided_slice %834 {offsets = [1, 0, 0], sizes = [7, 8, 64], strides = [1, 1, 1]} : vector<8x8x64xf32> to vector<7x8x64xf32>
    %868 = vector.extract_strided_slice %11 {offsets = [0, 0, 0], sizes = [1, 8, 64], strides = [1, 1, 1]} : vector<3x8x64xf32> to vector<1x8x64xf32>
    %869 = tpu.concatenate %867, %868 in 0 : vector<7x8x64xf32>, vector<1x8x64xf32> -> vector<8x8x64xf32>
    %c34_316 = arith.constant 34 : index
    %c0_317 = arith.constant 0 : index
    %c0_318 = arith.constant 0 : index
    %870 = vector.load %arg5[%c34_316, %c0_317, %c0_318] : memref<49x8x64xf32, #tpu.memory_space<vmem>>, vector<1x8x64xf32>
    %871 = vector.shape_cast %870 : vector<1x8x64xf32> to vector<8x64xf32>
    %872 = vector.shape_cast %871 : vector<8x64xf32> to vector<1x8x64xf32>
    %873 = vector.broadcast %872 : vector<1x8x64xf32> to vector<8x8x64xf32>
    %874 = arith.mulf %869, %873 : vector<8x8x64xf32>
    %875 = arith.addf %866, %874 : vector<8x8x64xf32>
    %876 = vector.extract_strided_slice %834 {offsets = [2, 0, 0], sizes = [6, 8, 64], strides = [1, 1, 1]} : vector<8x8x64xf32> to vector<6x8x64xf32>
    %877 = vector.extract_strided_slice %11 {offsets = [0, 0, 0], sizes = [2, 8, 64], strides = [1, 1, 1]} : vector<3x8x64xf32> to vector<2x8x64xf32>
    %878 = tpu.concatenate %876, %877 in 0 : vector<6x8x64xf32>, vector<2x8x64xf32> -> vector<8x8x64xf32>
    %c41_319 = arith.constant 41 : index
    %c0_320 = arith.constant 0 : index
    %c0_321 = arith.constant 0 : index
    %879 = vector.load %arg5[%c41_319, %c0_320, %c0_321] : memref<49x8x64xf32, #tpu.memory_space<vmem>>, vector<1x8x64xf32>
    %880 = vector.shape_cast %879 : vector<1x8x64xf32> to vector<8x64xf32>
    %881 = vector.shape_cast %880 : vector<8x64xf32> to vector<1x8x64xf32>
    %882 = vector.broadcast %881 : vector<1x8x64xf32> to vector<8x8x64xf32>
    %883 = arith.mulf %878, %882 : vector<8x8x64xf32>
    %884 = arith.addf %875, %883 : vector<8x8x64xf32>
    %885 = vector.extract_strided_slice %834 {offsets = [3, 0, 0], sizes = [5, 8, 64], strides = [1, 1, 1]} : vector<8x8x64xf32> to vector<5x8x64xf32>
    %886 = tpu.concatenate %885, %11 in 0 : vector<5x8x64xf32>, vector<3x8x64xf32> -> vector<8x8x64xf32>
    %c48_322 = arith.constant 48 : index
    %c0_323 = arith.constant 0 : index
    %c0_324 = arith.constant 0 : index
    %887 = vector.load %arg5[%c48_322, %c0_323, %c0_324] : memref<49x8x64xf32, #tpu.memory_space<vmem>>, vector<1x8x64xf32>
    %888 = vector.shape_cast %887 : vector<1x8x64xf32> to vector<8x64xf32>
    %889 = vector.shape_cast %888 : vector<8x64xf32> to vector<1x8x64xf32>
    %890 = vector.broadcast %889 : vector<1x8x64xf32> to vector<8x8x64xf32>
    %891 = arith.mulf %886, %890 : vector<8x8x64xf32>
    %892 = arith.addf %884, %891 : vector<8x8x64xf32>
    %c0_325 = arith.constant 0 : index
    %c0_326 = arith.constant 0 : index
    %893 = vector.load %arg6[%c0_325, %c0_326] : memref<8x64xf32, #tpu.memory_space<vmem>>, vector<8x64xf32>
    %894 = vector.shape_cast %893 : vector<8x64xf32> to vector<1x8x64xf32>
    %895 = vector.broadcast %894 : vector<1x8x64xf32> to vector<8x8x64xf32>
    %896 = arith.addf %892, %895 : vector<8x8x64xf32>
    %897 = vector.shape_cast %896 : vector<8x8x64xf32> to vector<64x64xf32>
    %898 = vector.extract_strided_slice %458 {offsets = [0, 0], sizes = [64, 64], strides = [1, 1]} : vector<72x64xf32> to vector<64x64xf32>
    %899 = arith.mulf %898, %897 : vector<64x64xf32>
    %900 = vector.extract_strided_slice %475 {offsets = [0, 0], sizes = [64, 64], strides = [1, 1]} : vector<72x64xf32> to vector<64x64xf32>
    %901 = arith.addf %900, %899 : vector<64x64xf32>
    %902 = vector.extract_strided_slice %475 {offsets = [64, 0], sizes = [8, 64], strides = [1, 1]} : vector<72x64xf32> to vector<8x64xf32>
    %903 = tpu.concatenate %901, %902 in 0 : vector<64x64xf32>, vector<8x64xf32> -> vector<72x64xf32>
    %904 = tpu.concatenate %457, %903 in 0 : vector<72x64xf32>, vector<72x64xf32> -> vector<144x64xf32>
    %c0_327 = arith.constant 0 : index
    %c0_328 = arith.constant 0 : index
    %905 = vector.load %arg3[%c0_327, %c0_328] : memref<64x64xf32, #tpu.memory_space<vmem>>, vector<64x64xf32>
    %cst_329 = arith.constant dense<0.000000e+00> : vector<144x64xf32>
    %906 = tpu.matmul %904, %905, %cst_329 {dimension_numbers = #tpu.dot_dimension_numbers<[1], [0], [0], [1], [0, 0, 1, 1], [], []>} : vector<144x64xf32>, vector<64x64xf32>, vector<144x64xf32> -> vector<144x64xf32>
    %c0_330 = arith.constant 0 : index
    %c0_331 = arith.constant 0 : index
    %907 = vector.load %arg4[%c0_330, %c0_331] : memref<1x64xf32, #tpu.memory_space<vmem>>, vector<1x64xf32>
    %908 = vector.broadcast %907 : vector<1x64xf32> to vector<144x64xf32>
    %909 = arith.addf %906, %908 : vector<144x64xf32>
    %910 = vector.shape_cast %909 : vector<144x64xf32> to vector<2x72x64xf32>
    %c0_332 = arith.constant 0 : index
    %c0_333 = arith.constant 0 : index
    %c0_334 = arith.constant 0 : index
    %911 = vector.load %arg8[%c0_332, %c0_333, %c0_334] : memref<2x72x64xf32, #tpu.memory_space<vmem>>, vector<2x72x64xf32>
    tpu.vector_store %arg8[%c0_332, %c0_333, %c0_334], %910 {strides = array<i32>} : memref<2x72x64xf32, #tpu.memory_space<vmem>>, vector<2x72x64xf32>,
    return
  }
  func.func @transform_0(%arg0: i32) -> (i32, i32, i32) {
    %c0_i32 = arith.constant 0 : i32
    %c0_i32_0 = arith.constant 0 : i32
    %c0_i32_1 = arith.constant 0 : i32
    return %arg0, %c0_i32, %c0_i32_0 : i32, i32, i32
  }
  func.func @transform_1(%arg0: i32) -> (i32, i32) {
    %c0_i32 = arith.constant 0 : i32
    %c0_i32_0 = arith.constant 0 : i32
    %c0_i32_1 = arith.constant 0 : i32
    return %c0_i32, %c0_i32_0 : i32, i32
  }
  func.func @transform_2(%arg0: i32) -> (i32, i32) {
    %c0_i32 = arith.constant 0 : i32
    %c0_i32_0 = arith.constant 0 : i32
    %c0_i32_1 = arith.constant 0 : i32
    return %c0_i32, %c0_i32_0 : i32, i32
  }
  func.func @transform_3(%arg0: i32) -> (i32, i32) {
    %c0_i32 = arith.constant 0 : i32
    %c0_i32_0 = arith.constant 0 : i32
    %c0_i32_1 = arith.constant 0 : i32
    return %c0_i32, %c0_i32_0 : i32, i32
  }
  func.func @transform_4(%arg0: i32) -> (i32, i32, i32) {
    %c0_i32 = arith.constant 0 : i32
    %c0_i32_0 = arith.constant 0 : i32
    %c0_i32_1 = arith.constant 0 : i32
    %c0_i32_2 = arith.constant 0 : i32
    return %c0_i32, %c0_i32_0, %c0_i32_1 : i32, i32, i32
  }
  func.func @transform_5(%arg0: i32) -> (i32, i32) {
    %c0_i32 = arith.constant 0 : i32
    %c0_i32_0 = arith.constant 0 : i32
    %c0_i32_1 = arith.constant 0 : i32
    return %c0_i32, %c0_i32_0 : i32, i32
  }
  func.func @transform_6(%arg0: i32) -> (i32, i32) {
    %c0_i32 = arith.constant 0 : i32
    %c0_i32_0 = arith.constant 0 : i32
    %c0_i32_1 = arith.constant 0 : i32
    return %c0_i32, %c0_i32_0 : i32, i32
  }
  func.func @transform_7(%arg0: i32) -> (i32, i32, i32) {
    %c0_i32 = arith.constant 0 : i32
    %c0_i32_0 = arith.constant 0 : i32
    %c0_i32_1 = arith.constant 0 : i32
    return %arg0, %c0_i32, %c0_i32_0 : i32, i32, i32
  }
}

</mosaic_0001>

<bundles_post_ra>
// kernel: factor_attn.1
= control target key start
LH: loop header
LB: loop body
LE: loop exit
PB: predicated region body
PF: predicated region fallthrough
CT: control target
= control target key end

     0   :  { %vm60_vm0 = vcmask 523264   ;;  %v6780_v3 = vmov 0.0   ;;  %vm332_vm1 = vcmask 1048064   ;;  %s3849_s29 = smov 64   ;;  %vm484_vm3 = vcmask 588800   ;;  %s6772_s1 = inlined_call_operand.vmem [shape: f32[64,192], index: 1, kind: input, shape index: {}]   ;;  %s6773_s0 = inlined_call_operand.vmem [shape: f32[2,72,64], index: 0, kind: input, shape index: {}]   ;;  %s6774_s4 = inlined_call_operand.vmem [shape: f32[49,8,64], index: 4, kind: input, shape index: {}]   ;;  %s6775_s5 = inlined_call_operand.vmem [shape: f32[8,64], index: 5, kind: input, shape index: {}]   ;;  %s6776_s2 = inlined_call_operand.vmem [shape: f32[64,64], index: 2, kind: input, shape index: {}]   ;;  %s6777_s6 = inlined_call_operand.vmem [shape: f32[64,64], index: 6, kind: input, shape index: {}]   ;;  %s6778_s3 = inlined_call_operand.vmem [shape: f32[1,64], index: 3, kind: input, shape index: {}]   ;;  %s6779_s7 = inlined_call_operand.vmem [shape: f32[2,72,64], index: 7, kind: output, shape index: {}]  }
   0x1   :  { %v45_v0 = vld [vmem:[%s6772_s1 + $0x8] sm:$0xff]  ;;  %v47_v1 = vld [vmem:[%s6772_s1 + $0x18] sm:$0xff]  ;;  %v44_v2 = vld [vmem:[%s6772_s1] sm:$0xff]  ;;  %179 = vmatprep.mubr.f32.mxu0 %v6780_v3  ;;  %307 = vst.msk [vmem:[#allocation2] sm:$0xff] %vm60_vm0, %v6780_v3  ;;  %vm3851_vm4 = vmmov 0  }
   0x2   :  { %308 = vst.msk [vmem:[#allocation2 + $0x18] sm:$0xff] %vm60_vm0, %v6780_v3  ;;  %309 = vst.msk [vmem:[#allocation2 + $0x30] sm:$0xff] %vm60_vm0, %v6780_v3  ;;  %v3707_v4 = vpack.c.bf16 %v47_v1, %v45_v0  ;;  %v46_v5 = vld [vmem:[%s6772_s1 + $0x10] sm:$0xff]  ;;  %v49_v6 = vld [vmem:[%s6772_s1 + $0x28] sm:$0xff] }
   0x3   :  { %310 = vst.msk [vmem:[#allocation2 + $0x48] sm:$0xff] %vm60_vm0, %v6780_v3  ;;  %311 = vst.msk [vmem:[#allocation2 + $0x60] sm:$0xff] %vm60_vm0, %v6780_v3  ;;  %v51_v7 = vld [vmem:[%s6772_s1 + $0x38] sm:$0xff]  ;;  %v3709_v8 = vpack.c.bf16 %v46_v5, %v44_v2  ;;  %v48_v10 = vld [vmem:[%s6772_s1 + $0x20] sm:$0xff] }
   0x4   :  { %312 = vst.msk [vmem:[#allocation2 + $0x78] sm:$0xff] %vm60_vm0, %v6780_v3  ;;  %313 = vst.msk [vmem:[#allocation2 + $0x90] sm:$0xff] %vm60_vm0, %v6780_v3  ;;  %v3711_v9 = vpack.c.bf16 %v51_v7, %v49_v6  ;;  %v50_v11 = vld [vmem:[%s6772_s1 + $0x30] sm:$0xff]  ;;  %v53_v12 = vld [vmem:[%s6772_s1 + $0x48] sm:$0xff]  ;;  %3708 = vmatprep.subr.bf16.mxu0 %v3707_v4 }
   0x5   :  { %314 = vst.msk [vmem:[#allocation2 + $0xa8] sm:$0xff] %vm60_vm0, %v6780_v3  ;;  %315 = vst.msk [vmem:[#allocation2 + $0x10] sm:$0xff] %vm60_vm0, %v6780_v3  ;;  %v55_v13 = vld [vmem:[%s6772_s1 + $0x58] sm:$0xff]  ;;  %3710 = vmatpush1.bf16.msra.mxu0 %v3709_v8  ;;  %v3713_v14 = vpack.c.bf16 %v50_v11, %v48_v10  ;;  %v52_v16 = vld [vmem:[%s6772_s1 + $0x40] sm:$0xff] }
   0x6   :  { %316 = vst.msk [vmem:[#allocation2 + $0x28] sm:$0xff] %vm60_vm0, %v6780_v3  ;;  %317 = vst.msk [vmem:[#allocation2 + $0x40] sm:$0xff] %vm60_vm0, %v6780_v3  ;;  %3712 = vmatprep.subr.bf16.mxu0 %v3711_v9  ;;  %v3715_v15 = vpack.c.bf16 %v55_v13, %v53_v12  ;;  %v54_v17 = vld [vmem:[%s6772_s1 + $0x50] sm:$0xff]  ;;  %v57_v18 = vld [vmem:[%s6772_s1 + $0x68] sm:$0xff] }
   0x7   :  { %318 = vst.msk [vmem:[#allocation2 + $0x58] sm:$0xff] %vm60_vm0, %v6780_v3  ;;  %319 = vst.msk [vmem:[#allocation2 + $0x70] sm:$0xff] %vm60_vm0, %v6780_v3  ;;  %v59_v19 = vld [vmem:[%s6772_s1 + $0x78] sm:$0xff]  ;;  %v3717_v20 = vpack.c.bf16 %v54_v17, %v52_v16  ;;  %v56_v22 = vld [vmem:[%s6772_s1 + $0x60] sm:$0xff] }
   0x8   :  { %320 = vst.msk [vmem:[#allocation2 + $0x88] sm:$0xff] %vm60_vm0, %v6780_v3  ;;  %321 = vst.msk [vmem:[#allocation2 + $0xa0] sm:$0xff] %vm60_vm0, %v6780_v3  ;;  %v3719_v21 = vpack.c.bf16 %v59_v19, %v57_v18  ;;  %v58_v23 = vld [vmem:[%s6772_s1 + $0x70] sm:$0xff]  ;;  %v26_v25 = vld [vmem:[%s6773_s0] sm:$0xff] }
   0x9   :  { %322 = vst.msk [vmem:[#allocation2 + $0xb8] sm:$0xff] %vm60_vm0, %v6780_v3  ;;  %3714 = vmatpush1.bf16.msra.mxu0 %v3713_v14  ;;  %v3721_v24 = vpack.c.bf16 %v58_v23, %v56_v22  ;;  %v27_v26 = vld [vmem:[%s6773_s0 + $0x8] sm:$0xff]  ;;  %v28_v27 = vld [vmem:[%s6773_s0 + $0x10] sm:$0xff]  ;;  %v29_v28 = vld [vmem:[%s6773_s0 + $0x18] sm:$0xff]  ;;  %v288_v14 = vlaneseq }
   0xa   :  { %3716 = vmatprep.subr.bf16.mxu0 %v3715_v15  ;;  %v30_v29 = vld [vmem:[%s6773_s0 + $0x20] sm:$0xff]  ;;  %v31_v30 = vld [vmem:[%s6773_s0 + $0x28] sm:$0xff]  ;;  %v32_v31 = vld [vmem:[%s6773_s0 + $0x30] sm:$0xff] }
   0xb   :  { %v33_v32 = vld [vmem:[%s6773_s0 + $0x38] sm:$0xff]  ;;  %v34_v33 = vld [vmem:[%s6773_s0 + $0x40] sm:$0xff]  ;;  %v35_v34 = vld [vmem:[%s6773_s0 + $0x48] sm:$0xff] }
   0xc   :  { %v36_v35 = vld [vmem:[%s6773_s0 + $0x50] sm:$0xff]  ;;  %v37_v36 = vld [vmem:[%s6773_s0 + $0x58] sm:$0xff]  ;;  %v38_v37 = vld [vmem:[%s6773_s0 + $0x60] sm:$0xff] }
   0xd   :  { %3718 = vmatpush1.bf16.msra.mxu0 %v3717_v20  ;;  %v39_v38 = vld [vmem:[%s6773_s0 + $0x68] sm:$0xff]  ;;  %v40_v39 = vld [vmem:[%s6773_s0 + $0x70] sm:$0xff]  ;;  %v41_v40 = vld [vmem:[%s6773_s0 + $0x78] sm:$0xff] }
   0xe   :  { %3720 = vmatprep.subr.bf16.mxu0 %v3719_v21  ;;  %v42_v41 = vld [vmem:[%s6773_s0 + $0x80] sm:$0xff]  ;;  %v43_v42 = vld [vmem:[%s6773_s0 + $0x88] sm:$0xff]  ;;  %v4072_v45 = vld [vmem:[%s6774_s4 + $0x38] sm:$0xff] }
   0xf   :  { %v4067_v44 = vld [vmem:[%s6774_s4] sm:$0xff]  ;;  %v798_v48 = vmul.f32 0.0, %v4072_v45  ;;  %v4080_v49 = vld [vmem:[%s6774_s4 + $0x70] sm:$0xff]  ;;  %v4089_v55 = vld [vmem:[%s6774_s4 + $0xa8] sm:$0xff] }
  0x10   :  { %6905 = vst [vmem:[#allocation4_spill] sm:$0xff] %v4067_v44  ;;  %v784_v47 = vmul.f32 0.0, %v4067_v44  ;;  %v814_v54 = vmul.f32 0.0, %v4080_v49  ;;  %v4105_v1 = vld [vmem:[%s6774_s4 + $0xe0] sm:$0xff]  ;;  %v4127_v20 = vld [vmem:[%s6774_s4 + $0x8] sm:$0xff]  ;;  %v4132_v21 = vld [vmem:[%s6774_s4 + $0x118] sm:$0xff] }
  0x11   :  { %3722 = vmatpush1.bf16.msra.mxu0 %v3721_v24  ;;  %v4139_v23 = vld [vmem:[%s6774_s4 + $0x40] sm:$0xff] }
  0x12   :  { %v805_v53 = vadd.f32 %v798_v48, %v784_v47 }
  0x14   :  { %3257 = vmatmul.mubr.msk.f32.vlgmr.msra.gmra.mrb[0].mxu0 %vm60_vm0, %v26_v25  ;;  %v822_v61 = vadd.f32 %v814_v54, %v805_v53  ;;  %v4144_v25 = vmul.f32 0.0, %v4127_v20  ;;  %v4212_v54 = vld [vmem:[%s6774_s4 + $0x120] sm:$0xff] }
  0x15   :  { %185 = vmatprep.mubr.f32.mxu0 %v6780_v3 }
  0x18   :  { %3258 = vmatmul.mubr.msk.f32.gmra.mrb[2].mxu0 %vm60_vm0, %v27_v26 }
  0x19   :  { %191 = vmatprep.mubr.f32.mxu0 %v6780_v3 }
  0x1c   :  { %3259 = vmatmul.mubr.msk.f32.gmra.mrb[4].mxu0 %vm60_vm0, %v28_v27 }
  0x1d   :  { %197 = vmatprep.mubr.f32.mxu0 %v6780_v3 }
  0x20   :  { %3260 = vmatmul.mubr.msk.f32.gmra.mrb[6].mxu0 %vm60_vm0, %v29_v28  ;;  %v4152_v28 = vmul.f32 0.0, %v4139_v23 }
  0x21   :  { %203 = vmatprep.mubr.f32.mxu0 %v6780_v3 }
  0x24   :  { %3261 = vmatmul.mubr.msk.f32.gmra.mrb[8].mxu0 %vm60_vm0, %v30_v29  ;;  %v289_v29 = vshrl.u32 %v288_v14, 7 }
  0x25   :  { %209 = vmatprep.mubr.f32.mxu0 %v6780_v3 }
  0x28   :  { %3262 = vmatmul.mubr.msk.f32.gmra.mrb[10].mxu0 %vm60_vm0, %v31_v30  ;;  %v4157_v30 = vld [vmem:[%s6774_s4 + $0x78] sm:$0xff] }
  0x29   :  { %215 = vmatprep.mubr.f32.mxu0 %v6780_v3 }
  0x2c   :  { %3263 = vmatmul.mubr.msk.f32.gmra.mrb[12].mxu0 %vm60_vm0, %v32_v31  ;;  %v4162_v31 = vld [vmem:[%s6774_s4 + $0x10] sm:$0xff] }
  0x2d   :  { %221 = vmatprep.mubr.f32.mxu0 %v6780_v3 }
  0x30   :  { %3264 = vmatmul.mubr.msk.f32.gmra.mrb[14].mxu0 %vm60_vm0, %v33_v32  ;;  %v4167_v32 = vld [vmem:[%s6774_s4 + $0x18] sm:$0xff] }
  0x31   :  { %227 = vmatprep.mubr.f32.mxu0 %v6780_v3 }
  0x34   :  { %3265 = vmatmul.mubr.msk.f32.gmra.mrb[16].mxu0 %vm60_vm0, %v34_v33 }
  0x35   :  { %233 = vmatprep.mubr.f32.mxu0 %v6780_v3 }
  0x38   :  { %3266 = vmatmul.mubr.msk.f32.gmra.mrb[18].mxu0 %vm60_vm0, %v35_v34 }
  0x39   :  { %239 = vmatprep.mubr.f32.mxu0 %v6780_v3 }
  0x3c   :  { %3267 = vmatmul.mubr.msk.f32.gmra.mrb[20].mxu0 %vm60_vm0, %v36_v35 }
  0x3d   :  { %245 = vmatprep.mubr.f32.mxu0 %v6780_v3 }
  0x40   :  { %3268 = vmatmul.mubr.msk.f32.gmra.mrb[22].mxu0 %vm60_vm0, %v37_v36 }
  0x41   :  { %251 = vmatprep.mubr.f32.mxu0 %v6780_v3 }
  0x44   :  { %3269 = vmatmul.mubr.msk.f32.gmra.mrb[24].mxu0 %vm60_vm0, %v38_v37  ;;  %v4180_v37 = vld [vmem:[%s6774_s4 + $0xe8] sm:$0xff] }
  0x45   :  { %257 = vmatprep.mubr.f32.mxu0 %v6780_v3 }
  0x48   :  { %3270 = vmatmul.mubr.msk.f32.gmra.mrb[26].mxu0 %vm60_vm0, %v39_v38 }
  0x49   :  { %263 = vmatprep.mubr.f32.mxu0 %v6780_v3 }
  0x4c   :  { %3271 = vmatmul.mubr.msk.f32.gmra.mrb[28].mxu0 %vm60_vm0, %v40_v39  ;;  %v4185_v39 = vmul.f32 0.0, %v4157_v30 }
  0x4d   :  { %269 = vmatprep.mubr.f32.mxu0 %v6780_v3 }
  0x50   :  { %3272 = vmatmul.mubr.msk.f32.gmra.mrb[30].mxu0 %vm60_vm0, %v41_v40  ;;  %v4188_v40 = vmul.f32 0.0, %v4162_v31 }
  0x51   :  { %275 = vmatprep.mubr.f32.mxu0 %v6780_v3 }
  0x52   :  { %6912 = vst [vmem:[#allocation11_spill] sm:$0xff] %v4188_v40 }
  0x54   :  { %3273 = vmatmul.mubr.msk.f32.gmra.mrb[32].mxu0 %vm60_vm0, %v42_v41  ;;  %v4191_v41 = vmul.f32 0.0, %v4167_v32 }
  0x55   :  { %281 = vmatprep.mubr.f32.mxu0 %v6780_v3 }
  0x56   :  { %6913 = vst [vmem:[#allocation12_spill] sm:$0xff] %v4191_v41  ;;  %v4350_v41 = vld [vmem:[%s6774_s4 + $0x80] sm:$0xff] }
  0x58   :  { %3274 = vmatmul.mubr.msk.f32.gmra.mrb[34].mxu0 %vm60_vm0, %v43_v42 }
  0xe7   :  { %v4062_v43 = vpop.f32.mrb[0].mxu0 }
  0xe8   :  { %6904 = vst [vmem:[#allocation3_spill] sm:$0xff] %v4062_v43  ;;  %v183_v46 = vpop.f32.mrb[1].mxu0 }
  0xe9   :  { %767 = vst.msk [vmem:[#allocation2 + $0x8] sm:$0xff] %vm60_vm0, %v183_v46 }
  0xeb   :  { %v4082_v50 = vpop.f32.mrb[2].mxu0 }
  0xec   :  { %6906 = vst [vmem:[#allocation5_spill] sm:$0xff] %v4082_v50  ;;  %v189_v51 = vpop.f32.mrb[3].mxu0 }
  0xed   :  { %768 = vst.msk [vmem:[#allocation2 + $0x20] sm:$0xff] %vm60_vm0, %v189_v51  ;;  %v3723_v52 = vpack.c.bf16 %v189_v51, %v183_v46  ;;  %v4198_v46 = vld [vmem:[%s6774_s4 + $0xb0] sm:$0xff] }
  0xef   :  { %v4091_v56 = vpop.f32.mrb[4].mxu0  ;;  %3724 = vmatprep.subr.bf16.mxu1 %v3723_v52 }
  0xf0   :  { %6907 = vst [vmem:[#allocation6_spill] sm:$0xff] %v4091_v56  ;;  %v775_v57 = vld [vmem:[#allocation2 + $0x5] sm:$0xff]  ;;  %v4093_v58 = vpop.f32.mrb[5].mxu0  ;;  %3726 = vmatpush3.bf16.msra.mxu1 %v3723_v52  ;;  %v4298_v3 = vsel %vm332_vm1, %v4091_v56, -inf }
  0xf1   :  { %769 = vst.msk [vmem:[#allocation2 + $0x38] sm:$0xff] %vm60_vm0, %v4093_v58  ;;  %v799_v59 = vmul.f32 %v4072_v45, %v775_v57  ;;  %v815_v60 = vmul.f32 %v4080_v49, %v775_v57  ;;  %v832_v62 = vmul.f32 %v4089_v55, %v775_v57  ;;  %v785_v4 = vmul.f32 %v4067_v44, %v775_v57  ;;  %v4217_v57 = vld [vmem:[%s6774_s4 + $0x150] sm:$0xff] }
  0xf3   :  { %v4100_v63 = vpop.f32.mrb[6].mxu0  ;;  %v806_v5 = vadd.f32 %v799_v59, %v784_v47  ;;  %v823_v6 = vadd.f32 %v815_v60, %v805_v53  ;;  %v840_v7 = vadd.f32 %v832_v62, %v822_v61  ;;  %v4203_v47 = vld [vmem:[%s6774_s4 + $0xf0] sm:$0xff]  ;;  %v899_v60 = vld [vmem:[#allocation2 + $0x6] sm:$0xff]  ;;  %v4229_v62 = vld [vmem:[%s6774_s4 + $0x158] sm:$0xff] }
  0xf4   :  { %6908 = vst [vmem:[#allocation7_spill] sm:$0xff] %v4100_v63  ;;  %v776_v0 = vld [vmem:[#allocation2 + $0x1d] sm:$0xff]  ;;  %v4107_v2 = vpop.f32.mrb[7].mxu0  ;;  %v4224_v61 = vld [vmem:[%s6774_s4 + $0x48] sm:$0xff]  ;;  %v4264_v14 = vmul.f32 0.0, %v4203_v47 }
  0xf5   :  { %770 = vst.msk [vmem:[#allocation2 + $0x50] sm:$0xff] %vm60_vm0, %v4107_v2  ;;  %v800_v8 = vmul.f32 %v4072_v45, %v776_v0  ;;  %v816_v9 = vmul.f32 %v4080_v49, %v776_v0  ;;  %v833_v10 = vmul.f32 %v4089_v55, %v776_v0  ;;  %v850_v11 = vmul.f32 %v4105_v1, %v776_v0 }
  0xf6   :  { %v786_v26 = vmul.f32 %v4067_v44, %v776_v0  ;;  %6916 = vst [vmem:[#allocation15_spill] sm:$0xff] %v4224_v61  ;;  %v4234_v0 = vmul.f32 0.0, %v4105_v1  ;;  %6924 = vst [vmem:[#allocation23_spill] sm:$0xff] %v4264_v14  ;;  %v4309_v14 = vmul.f32 %v4198_v46, %v899_v60 }
  0xf7   :  { %v4116_v12 = vpop.f32.mrb[8].mxu0  ;;  %v807_v15 = vadd.f32 %v800_v8, %v785_v4  ;;  %v824_v16 = vadd.f32 %v816_v9, %v806_v5  ;;  %v841_v17 = vadd.f32 %v833_v10, %v823_v6  ;;  %v858_v18 = vadd.f32 %v850_v11, %v840_v7  ;;  %v4247_v7 = vld [vmem:[%s6774_s4 + $0x128] sm:$0xff]  ;;  %v4252_v8 = vld [vmem:[%s6774_s4 + $0x160] sm:$0xff] }
  0xf8   :  { %6909 = vst [vmem:[#allocation8_spill] sm:$0xff] %v4116_v12  ;;  %v4118_v13 = vpop.f32.mrb[9].mxu0  ;;  %v4122_v19 = vld [vmem:[#allocation2 + $0x35] sm:$0xff]  ;;  %6917 = vst [vmem:[#allocation16_spill] sm:$0xff] %v4234_v0  ;;  %v4237_v4 = vmul.f32 0.0, %v4132_v21  ;;  %v4240_v5 = vmul.f32 0.0, %v4217_v57 }
  0xf9   :  { %771 = vst.msk [vmem:[#allocation2 + $0x68] sm:$0xff] %vm60_vm0, %v4118_v13  ;;  %v801_v27 = vmul.f32 %v4072_v45, %v4122_v19  ;;  %v817_v33 = vmul.f32 %v4080_v49, %v4122_v19  ;;  %v834_v34 = vmul.f32 %v4089_v55, %v4122_v19  ;;  %v851_v35 = vmul.f32 %v4105_v1, %v4122_v19 }
  0xfa   :  { %v868_v36 = vmul.f32 %v4132_v21, %v4122_v19  ;;  %6918 = vst [vmem:[#allocation17_spill] sm:$0xff] %v4237_v4  ;;  %6919 = vst [vmem:[#allocation18_spill] sm:$0xff] %v4240_v5  ;;  %v4242_v6 = vadd.s32 64, %v289_v29  ;;  %v4255_v9 = vmul.f32 0.0, %v4180_v37  ;;  %v4258_v10 = vmul.f32 0.0, %v4212_v54  ;;  %v901_v5 = vld [vmem:[#allocation2 + $0x36] sm:$0xff] }
  0xfb   :  { %v4134_v22 = vpop.f32.mrb[10].mxu0  ;;  %v4182_v38 = vadd.f32 %v801_v27, %v786_v26  ;;  %v4205_v48 = vadd.f32 %v817_v33, %v807_v15  ;;  %v842_v51 = vadd.f32 %v834_v34, %v824_v16  ;;  %v859_v52 = vadd.f32 %v851_v35, %v841_v17  ;;  %v4266_v15 = vld [vmem:[#allocation2 + $0x7] sm:$0xff]  ;;  %v4290_v34 = vld [vmem:[%s6774_s4 + $0x50] sm:$0xff] }
  0xfc   :  { %6910 = vst [vmem:[#allocation9_spill] sm:$0xff] %v4134_v22  ;;  %v4141_v24 = vpop.f32.mrb[11].mxu0  ;;  %v4207_v53 = vadd.f32 %v868_v36, %v858_v18  ;;  %6920 = vst [vmem:[#allocation19_spill] sm:$0xff] %v4242_v6  ;;  %v4261_v11 = vmul.f32 0.0, %v4229_v62  ;;  %v4268_v16 = vld [vmem:[#allocation2 + $0x8] sm:$0xff]  ;;  %v4275_v26 = vmul.f32 0.0, %v4247_v7  ;;  %v4285_v33 = vmul.f32 %v4127_v20, %v899_v60 }
  0xfd   :  { %772 = vst.msk [vmem:[#allocation2 + $0x80] sm:$0xff] %vm60_vm0, %v4141_v24  ;;  %6911 = vst [vmem:[#allocation10_spill] sm:$0xff] %v4182_v38  ;;  %v4270_v17 = vld [vmem:[#allocation2 + $0x4d] sm:$0xff]  ;;  %v4278_v27 = vmul.f32 0.0, %v4252_v8  ;;  %v4282_v29 = vsel %vm332_vm1, %v4062_v43, -inf  ;;  %v4294_v35 = vsel %vm332_vm1, %v4082_v50, -inf  ;;  %v4303_v43 = vmul.f32 %v4139_v23, %v899_v60 }
  0xfe   :  { %6921 = vst [vmem:[#allocation20_spill] sm:$0xff] %v4255_v9  ;;  %6922 = vst [vmem:[#allocation21_spill] sm:$0xff] %v4258_v10  ;;  %v900_v36 = vld [vmem:[#allocation2 + $0x1e] sm:$0xff]  ;;  %v3727_v50 = vpack.c.bf16 %v4107_v2, %v4093_v58  ;;  %v4317_v56 = vmul.f32 %v4162_v31, %v4266_v15  ;;  %v4325_v10 = vmul.f32 %v4167_v32, %v4268_v16 }
  0xff   :  { %v4193_v42 = vpop.f32.mrb[12].mxu0  ;;  %6923 = vst [vmem:[#allocation22_spill] sm:$0xff] %v4261_v11  ;;  %6925 = vst [vmem:[#allocation24_spill] sm:$0xff] %v4266_v15  ;;  %v4321_v11 = vmul.f32 %v4224_v61, %v4266_v15  ;;  %v852_v58 = vmul.f32 %v4105_v1, %v4270_v17  ;;  %v4333_v2 = vmul.f32 %v4290_v34, %v4268_v16  ;;  %v4341_v15 = vld [vmem:[#allocation2 + $0x20] sm:$0xff] }
 0x100   :  { %6914 = vst [vmem:[#allocation13_spill] sm:$0xff] %v4193_v42  ;;  %v4219_v59 = vpop.f32.mrb[13].mxu0  ;;  %6926 = vst [vmem:[#allocation25_spill] sm:$0xff] %v4268_v16  ;;  %v4339_v9 = vmul.f32 %v4139_v23, %v900_v36  ;;  %3728 = vmatprep.subr.bf16.mxu1 %v3727_v50  ;;  %v4353_v16 = vmul.f32 %v4157_v30, %v900_v36 }
 0x101   :  { %6915 = vst [vmem:[#allocation14_spill] sm:$0xff] %v4219_v59  ;;  %773 = vst.msk [vmem:[#allocation2 + $0x98] sm:$0xff] %vm60_vm0, %v4219_v59  ;;  %v860_v6 = vadd.f32 %v852_v58, %v842_v51  ;;  %3730 = vmatpush3.bf16.msra.mxu1 %v3727_v50  ;;  %v4380_v50 = vld [vmem:[#allocation2 + $0x37] sm:$0xff]  ;;  %v4386_v58 = vmul.f32 %v4167_v32, %v4341_v15 }
 0x102   :  { %6928 = vst [vmem:[#allocation27_spill] sm:$0xff] %v4275_v26  ;;  %6929 = vst [vmem:[#allocation28_spill] sm:$0xff] %v4278_v27  ;;  %v4306_v26 = vmul.f32 %v4157_v30, %v899_v60  ;;  %v4327_v60 = vld [vmem:[#allocation2 + $0x1f] sm:$0xff] }
 0x103   :  { %v4272_v18 = vpop.f32.mrb[14].mxu0  ;;  %6930 = vst [vmem:[#allocation29_spill] sm:$0xff] %v4282_v29  ;;  %6931 = vst [vmem:[#allocation30_spill] sm:$0xff] %v4294_v35  ;;  %v4336_v29 = vmul.f32 %v4127_v20, %v900_v36  ;;  %v4370_v0 = vmul.f32 %v4162_v31, %v4327_v60  ;;  %v4374_v38 = vmul.f32 %v4224_v61, %v4327_v60 }
 0x104   :  { %6927 = vst [vmem:[#allocation26_spill] sm:$0xff] %v4272_v18  ;;  %v4300_v27 = vpop.f32.mrb[15].mxu0  ;;  %6933 = vst [vmem:[#allocation32_spill] sm:$0xff] %v4317_v56 }
 0x105   :  { %6932 = vst [vmem:[#allocation31_spill] sm:$0xff] %v4300_v27  ;;  %774 = vst.msk [vmem:[#allocation2 + $0xb0] sm:$0xff] %vm60_vm0, %v4300_v27  ;;  %v4456_v27 = vld [vmem:[#allocation2 + $0x65] sm:$0xff] }
 0x106   :  { %6934 = vst [vmem:[#allocation33_spill] sm:$0xff] %v4321_v11  ;;  %6935 = vst [vmem:[#allocation34_spill] sm:$0xff] %v4325_v10  ;;  %v869_v10 = vmul.f32 %v4132_v21, %v4270_v17  ;;  %v3731_v11 = vpack.c.bf16 %v4141_v24, %v4118_v13  ;;  %v4557_v13 = vld [vmem:[%s6774_s4 + $0xf8] sm:$0xff]  ;;  %v853_v35 = vmul.f32 %v4105_v1, %v4456_v27 }
 0x107   :  { %6936 = vst [vmem:[#allocation35_spill] sm:$0xff] %v4327_v60  ;;  %6937 = vst [vmem:[#allocation36_spill] sm:$0xff] %v4333_v2  ;;  %v4345_v56 = vpop.f32.mrb[16].mxu0  ;;  %v4356_v2 = vmul.f32 %v4198_v46, %v900_v36 }
 0x108   :  { %6938 = vst [vmem:[#allocation37_spill] sm:$0xff] %v4336_v29  ;;  %6939 = vst [vmem:[#allocation38_spill] sm:$0xff] %v4339_v9  ;;  %v4359_v29 = vmul.f32 %v4180_v37, %v900_v36  ;;  %v4361_v4 = vpop.f32.mrb[17].mxu0  ;;  %v4378_v36 = vmul.f32 %v4350_v41, %v4327_v60  ;;  %v4382_v51 = vadd.f32 %v869_v10, %v859_v52  ;;  %v4534_v9 = vsel %vm332_vm1, %v4134_v22, -inf }
 0x109   :  { %6940 = vst [vmem:[#allocation39_spill] sm:$0xff] %v4341_v15  ;;  %6941 = vst [vmem:[#allocation40_spill] sm:$0xff] %v4345_v56  ;;  %v4366_v56 = vld [vmem:[%s6774_s4 + $0x88] sm:$0xff]  ;;  %v4398_v60 = vmul.f32 %v4067_v44, %v4122_v19  ;;  %v4403_v52 = vmul.f32 %v4127_v20, %v901_v5  ;;  %v4406_v10 = vmul.f32 %v4139_v23, %v901_v5  ;;  %3732 = vmatprep.subr.bf16.mxu1 %v3731_v11 }
 0x10a   :  { %6942 = vst [vmem:[#allocation41_spill] sm:$0xff] %v4361_v4  ;;  %6943 = vst [vmem:[#allocation42_spill] sm:$0xff] %v4370_v0  ;;  %v4390_v4 = vmul.f32 %v4290_v34, %v4341_v15  ;;  %v4394_v0 = vmul.f32 %v4366_v56, %v4341_v15  ;;  %v4417_v15 = vld [vmem:[%s6774_s4 + $0xb8] sm:$0xff]  ;;  %v4420_v19 = vmul.f32 %v4180_v37, %v901_v5  ;;  %3734 = vmatpush3.bf16.msra.mxu1 %v3731_v11 }
 0x10b   :  { %6944 = vst [vmem:[#allocation43_spill] sm:$0xff] %v4374_v38  ;;  %6945 = vst [vmem:[#allocation44_spill] sm:$0xff] %v4378_v36  ;;  %v4400_v38 = vld [vmem:[#allocation2 + $0x38] sm:$0xff]  ;;  %v4438_v36 = vld [vmem:[%s6774_s4 + $0xc0] sm:$0xff] }
 0x10c   :  { %6946 = vst [vmem:[#allocation45_spill] sm:$0xff] %v4380_v50  ;;  %6947 = vst [vmem:[#allocation46_spill] sm:$0xff] %v4386_v58  ;;  %v4409_v58 = vmul.f32 %v4157_v30, %v901_v5  ;;  %v4460_v59 = vmul.f32 %v4366_v56, %v4400_v38 }
 0x10d   :  { %6948 = vst [vmem:[#allocation47_spill] sm:$0xff] %v4390_v4  ;;  %6949 = vst [vmem:[#allocation48_spill] sm:$0xff] %v4394_v0  ;;  %v4412_v4 = vmul.f32 %v4198_v46, %v901_v5  ;;  %v4423_v0 = vmul.f32 %v4212_v54, %v901_v5  ;;  %v4446_v5 = vmul.f32 %v4417_v15, %v4380_v50 }
 0x10e   :  { %6950 = vst [vmem:[#allocation49_spill] sm:$0xff] %v4398_v60  ;;  %6951 = vst [vmem:[#allocation50_spill] sm:$0xff] %v4400_v38  ;;  %v4442_v60 = vmul.f32 %v4350_v41, %v4380_v50 }
 0x10f   :  { %6952 = vst [vmem:[#allocation51_spill] sm:$0xff] %v4403_v52  ;;  %6953 = vst [vmem:[#allocation52_spill] sm:$0xff] %v4406_v10  ;;  %v4427_v10 = vmul.f32 %v4162_v31, %v4380_v50  ;;  %v4431_v52 = vmul.f32 %v4224_v61, %v4380_v50  ;;  %v4468_v50 = vsel %vm332_vm1, %v4100_v63, -inf }
 0x110   :  { %6954 = vst [vmem:[#allocation53_spill] sm:$0xff] %v4409_v58  ;;  %v4433_v58 = vld [vmem:[#allocation2 + $0x4e] sm:$0xff]  ;;  %6957 = vst [vmem:[#allocation56_spill] sm:$0xff] %v4438_v36 }
 0x111   :  { %6955 = vst [vmem:[#allocation54_spill] sm:$0xff] %v4427_v10  ;;  %6956 = vst [vmem:[#allocation55_spill] sm:$0xff] %v4431_v52  ;;  %v4450_v10 = vmul.f32 %v4167_v32, %v4400_v38  ;;  %v4454_v52 = vmul.f32 %v4290_v34, %v4400_v38  ;;  %v4490_v63 = vmul.f32 %v4127_v20, %v4433_v58 }
 0x112   :  { %6958 = vst [vmem:[#allocation57_spill] sm:$0xff] %v4442_v60  ;;  %6959 = vst [vmem:[#allocation58_spill] sm:$0xff] %v4446_v5  ;;  %v4464_v60 = vmul.f32 %v4438_v36, %v4400_v38  ;;  %v4474_v5 = vld [vmem:[#allocation2 + $0x4f] sm:$0xff]  ;;  %v4486_v38 = vmul.f32 %v4089_v55, %v4270_v17 }
 0x113   :  { %6960 = vst [vmem:[#allocation59_spill] sm:$0xff] %v4450_v10  ;;  %6961 = vst [vmem:[#allocation60_spill] sm:$0xff] %v4454_v52  ;;  %v4472_v10 = vmul.f32 %v4067_v44, %v4270_v17  ;;  %v4478_v52 = vmul.f32 %v4072_v45, %v4270_v17  ;;  %v870_v44 = vmul.f32 %v4132_v21, %v4456_v27 }
 0x114   :  { %6962 = vst [vmem:[#allocation61_spill] sm:$0xff] %v4460_v59  ;;  %6963 = vst [vmem:[#allocation62_spill] sm:$0xff] %v4464_v60  ;;  %v4482_v59 = vmul.f32 %v4080_v49, %v4270_v17  ;;  %v4494_v60 = vmul.f32 %v4139_v23, %v4433_v58  ;;  %v4530_v18 = vmul.f32 %v4417_v15, %v4474_v5 }
 0x115   :  { %6964 = vst [vmem:[#allocation63_spill] sm:$0xff] %v4468_v50  ;;  %6965 = vst [vmem:[#allocation64_spill] sm:$0xff] %v4472_v10  ;;  %v4498_v10 = vmul.f32 %v4157_v30, %v4433_v58  ;;  %v4526_v50 = vmul.f32 %v4350_v41, %v4474_v5 }
 0x116   :  { %6966 = vst [vmem:[#allocation65_spill] sm:$0xff] %v4474_v5  ;;  %6967 = vst [vmem:[#allocation66_spill] sm:$0xff] %v4478_v52  ;;  %v4502_v52 = vmul.f32 %v4198_v46, %v4433_v58 }
 0x117   :  { %6968 = vst [vmem:[#allocation67_spill] sm:$0xff] %v4482_v59  ;;  %6969 = vst [vmem:[#allocation68_spill] sm:$0xff] %v4490_v63  ;;  %v4504_v59 = vld [vmem:[#allocation2 + $0x50] sm:$0xff]  ;;  %v4510_v63 = vmul.f32 %v4180_v37, %v4433_v58 }
 0x118   :  { %6970 = vst [vmem:[#allocation69_spill] sm:$0xff] %v4494_v60  ;;  %6971 = vst [vmem:[#allocation70_spill] sm:$0xff] %v4498_v10  ;;  %v4514_v60 = vmul.f32 %v4212_v54, %v4433_v58  ;;  %v4518_v10 = vmul.f32 %v4162_v31, %v4474_v5  ;;  %v4561_v24 = vmul.f32 %v4366_v56, %v4504_v59 }
 0x119   :  { %6972 = vst [vmem:[#allocation71_spill] sm:$0xff] %v4502_v52  ;;  %6973 = vst [vmem:[#allocation72_spill] sm:$0xff] %v4504_v59  ;;  %v4522_v52 = vmul.f32 %v4224_v61, %v4474_v5  ;;  %v4571_v22 = vmul.f32 %v4438_v36, %v4504_v59 }
 0x11a   :  { %6974 = vst [vmem:[#allocation73_spill] sm:$0xff] %v4518_v10  ;;  %6976 = vst [vmem:[#allocation75_spill] sm:$0xff] %v4526_v50  ;;  %v4538_v10 = vld [vmem:[#allocation2 + $0x7d] sm:$0xff]  ;;  %v4546_v50 = vmul.f32 %v4167_v32, %v4504_v59 }
 0x11b   :  { %6975 = vst [vmem:[#allocation74_spill] sm:$0xff] %v4522_v52  ;;  %6977 = vst [vmem:[#allocation76_spill] sm:$0xff] %v4530_v18  ;;  %v4542_v52 = vmul.f32 %v4203_v47, %v4474_v5  ;;  %v4550_v18 = vmul.f32 %v4290_v34, %v4504_v59  ;;  %v4563_v5 = vld [vmem:[#allocation2 + $0x66] sm:$0xff] }
 0x11c   :  { %6978 = vst [vmem:[#allocation77_spill] sm:$0xff] %v4534_v9  ;;  %6980 = vst [vmem:[#allocation79_spill] sm:$0xff] %v4546_v50  ;;  %v885_v50 = vmul.f32 %v4217_v57, %v4270_v17  ;;  %v4575_v9 = vmul.f32 %v4557_v13, %v4504_v59  ;;  %v4589_v17 = vmul.f32 %v4080_v49, %v4456_v27 }
 0x11d   :  { %6979 = vst [vmem:[#allocation78_spill] sm:$0xff] %v4542_v52  ;;  %6981 = vst [vmem:[#allocation80_spill] sm:$0xff] %v4550_v18  ;;  %v877_v52 = vadd.f32 %v870_v44, %v860_v6  ;;  %v886_v18 = vmul.f32 %v4217_v57, %v4456_v27  ;;  %v887_v44 = vmul.f32 %v4217_v57, %v4538_v10 }
 0x11e   :  { %6982 = vst [vmem:[#allocation81_spill] sm:$0xff] %v4557_v13  ;;  %6983 = vst [vmem:[#allocation82_spill] sm:$0xff] %v4561_v24  ;;  %v4579_v24 = vsel %vm332_vm1, %v4116_v12, -inf  ;;  %v4585_v6 = vmul.f32 %v4072_v45, %v4456_v27  ;;  %v4595_v12 = vmul.f32 %v4089_v55, %v4456_v27  ;;  %v4601_v11 = vmul.f32 %v4127_v20, %v4563_v5 }
 0x11f   :  { %6984 = vst [vmem:[#allocation83_spill] sm:$0xff] %v4571_v22  ;;  %6985 = vst [vmem:[#allocation84_spill] sm:$0xff] %v4575_v9  ;;  %v891_v22 = vadd.f32 %v885_v50, %v4207_v53  ;;  %v892_v59 = vadd.f32 %v886_v18, %v4382_v51  ;;  %v893_v9 = vadd.f32 %v887_v44, %v877_v52  ;;  %v4625_v44 = vld [vmem:[#allocation2 + $0x68] sm:$0xff] }
 0x120   :  { %6986 = vst [vmem:[#allocation85_spill] sm:$0xff] %v4579_v24  ;;  %6987 = vst [vmem:[#allocation86_spill] sm:$0xff] %v4589_v17  ;;  %v4603_v24 = vld [vmem:[#allocation2 + $0x67] sm:$0xff]  ;;  %v4607_v17 = vmul.f32 %v4139_v23, %v4563_v5  ;;  %v4611_v53 = vmul.f32 %v4157_v30, %v4563_v5  ;;  %v4617_v51 = vmul.f32 %v4198_v46, %v4563_v5 }
 0x121   :  { %6988 = vst [vmem:[#allocation87_spill] sm:$0xff] %v4601_v11  ;;  %6989 = vst [vmem:[#allocation88_spill] sm:$0xff] %v4603_v24  ;;  %v915_v18 = vadd.f32 %v4144_v25, %v891_v22  ;;  %v916_v50 = vadd.f32 %v4144_v25, %v892_v59  ;;  %v4621_v20 = vmul.f32 %v4180_v37, %v4563_v5 }
 0x122   :  { %6990 = vst [vmem:[#allocation89_spill] sm:$0xff] %v4607_v17  ;;  %6991 = vst [vmem:[#allocation90_spill] sm:$0xff] %v4611_v53  ;;  %v998_v52 = vmul.f32 %v4212_v54, %v4563_v5  ;;  %v917_v17 = vadd.f32 %v4144_v25, %v893_v9  ;;  %v4630_v22 = vmul.f32 %v4162_v31, %v4603_v24 }
 0x123   :  { %6992 = vst [vmem:[#allocation91_spill] sm:$0xff] %v4617_v51  ;;  %6993 = vst [vmem:[#allocation92_spill] sm:$0xff] %v4621_v20  ;;  %v4634_v59 = vmul.f32 %v4224_v61, %v4603_v24  ;;  %v932_v51 = vadd.f32 %v4152_v28, %v915_v18  ;;  %v933_v53 = vadd.f32 %v4152_v28, %v916_v50 }
 0x124   :  { %6994 = vst [vmem:[#allocation93_spill] sm:$0xff] %v4625_v44  ;;  %6995 = vst [vmem:[#allocation94_spill] sm:$0xff] %v4630_v22  ;;  %v4640_v11 = vmul.f32 %v4350_v41, %v4603_v24  ;;  %v4644_v20 = vmul.f32 %v4417_v15, %v4603_v24  ;;  %v4648_v25 = vmul.f32 %v4203_v47, %v4603_v24  ;;  %v7046_v22 = vld [vmem:[#allocation67_spill] sm:$0xff] }
 0x125   :  { %6996 = vst [vmem:[#allocation95_spill] sm:$0xff] %v4634_v59  ;;  %v934_v31 = vadd.f32 %v4303_v43, %v917_v17  ;;  %v4653_v9 = vmul.f32 %v4247_v7, %v4603_v24  ;;  %v4657_v28 = vmul.f32 %v4167_v32, %v4625_v44  ;;  %v950_v18 = vadd.f32 %v4185_v39, %v932_v51  ;;  %v4684_v51 = vld [vmem:[#allocation2 + $0x95] sm:$0xff] }
 0x126   :  { %6997 = vst [vmem:[#allocation96_spill] sm:$0xff] %v4640_v11  ;;  %6998 = vst [vmem:[#allocation97_spill] sm:$0xff] %v4644_v20  ;;  %v951_v50 = vadd.f32 %v4306_v26, %v933_v53  ;;  %v4663_v20 = vmul.f32 %v4290_v34, %v4625_v44  ;;  %v4667_v11 = vmul.f32 %v4366_v56, %v4625_v44  ;;  %v4682_v53 = vsel %vm332_vm1, %v4193_v42, -inf  ;;  %v4689_v24 = vld [vmem:[%s6774_s4 + $0x130] sm:$0xff]  ;;  %v904_v42 = vld [vmem:[#allocation2 + $0x7e] sm:$0xff] }
 0x127   :  { %6999 = vst [vmem:[#allocation98_spill] sm:$0xff] %v4657_v28  ;;  %v4671_v43 = vmul.f32 %v4438_v36, %v4625_v44  ;;  %v952_v17 = vadd.f32 %v4353_v16, %v934_v31  ;;  %v4676_v32 = vmul.f32 %v4557_v13, %v4625_v44  ;;  %v968_v39 = vadd.f32 %v4309_v14, %v950_v18  ;;  %v4715_v14 = vpop.f32.mrb[18].mxu0  ;;  %v782_v28 = vld [vmem:[#allocation2 + $0xad] sm:$0xff] }
 0x128   :  { %7000 = vst [vmem:[#allocation99_spill] sm:$0xff] %v4663_v20  ;;  %7001 = vst [vmem:[#allocation100_spill] sm:$0xff] %v4667_v11  ;;  %v969_v26 = vadd.f32 %v4356_v2, %v951_v50  ;;  %v871_v16 = vmul.f32 %v4132_v21, %v4538_v10  ;;  %v843_v2 = vadd.f32 %v4486_v38, %v4205_v48  ;;  %v4835_v13 = vld [vmem:[#allocation2 + $0x69] sm:$0xff] }
 0x129   :  { %7002 = vst [vmem:[#allocation101_spill] sm:$0xff] %v4671_v43  ;;  %7003 = vst [vmem:[#allocation102_spill] sm:$0xff] %v4676_v32  ;;  %v970_v31 = vadd.f32 %v4412_v4, %v952_v17  ;;  %v4700_v18 = vmul.f32 %v4689_v24, %v4625_v44  ;;  %v4704_v50 = vmul.f32 %v4072_v45, %v4538_v10  ;;  %v4717_v44 = vld [vmem:[#allocation2 + $0x9] sm:$0xff]  ;;  %v7037_v32 = vld [vmem:[#allocation31_spill] sm:$0xff] }
 0x12a   :  { %v986_v43 = vadd.f32 %v4359_v29, %v968_v39  ;;  %v987_v11 = vadd.f32 %v4420_v19, %v969_v26  ;;  %v4710_v4 = vmul.f32 %v4080_v49, %v4538_v10  ;;  %v861_v38 = vadd.f32 %v853_v35, %v843_v2  ;;  %7004 = vst [vmem:[#allocation103_spill] sm:$0xff] %v4715_v14  ;;  %v4719_v45 = vld [vmem:[#allocation2 + $0xa] sm:$0xff]  ;;  %v4727_v35 = vpop.f32.mrb[19].mxu0 }
 0x12b   :  { %v988_v17 = vadd.f32 %v4510_v63, %v970_v31  ;;  %v888_v48 = vmul.f32 %v4217_v57, %v4684_v51  ;;  %7005 = vst [vmem:[#allocation104_spill] sm:$0xff] %v4717_v44  ;;  %7006 = vst [vmem:[#allocation105_spill] sm:$0xff] %v4719_v45  ;;  %v1013_v39 = vmul.f32 %v4229_v62, %v4433_v58  ;;  %v4729_v26 = vld [vmem:[#allocation2 + $0xb] sm:$0xff]  ;;  %v4742_v58 = vld [vmem:[#allocation2 + $0x21] sm:$0xff] }
 0x12c   :  { %v1003_v29 = vadd.f32 %v4423_v0, %v986_v43  ;;  %v1004_v19 = vadd.f32 %v4514_v60, %v987_v11  ;;  %v1014_v63 = vmul.f32 %v4229_v62, %v4563_v5  ;;  %7007 = vst [vmem:[#allocation106_spill] sm:$0xff] %v4729_v26  ;;  %v4733_v31 = vmul.f32 %v4089_v55, %v4538_v10  ;;  %v4736_v0 = vld [vmem:[#allocation2 + $0x7f] sm:$0xff]  ;;  %v4738_v11 = vpop.f32.mrb[20].mxu0  ;;  %v4837_v36 = vld [vmem:[#allocation2 + $0x6a] sm:$0xff] }
 0x12d   :  { %v1005_v2 = vadd.f32 %v998_v52, %v988_v17  ;;  %v1015_v45 = vmul.f32 %v4229_v62, %v904_v42  ;;  %v878_v60 = vadd.f32 %v871_v16, %v861_v38  ;;  %7008 = vst [vmem:[#allocation107_spill] sm:$0xff] %v4738_v11  ;;  %2134 = vst.msk [vmem:[#allocation2 + $0x8] sm:$0xff] %vm60_vm0, %v4727_v35  ;;  %v4744_v5 = vld [vmem:[#allocation2 + $0x22] sm:$0xff]  ;;  %v4757_v16 = vpop.f32.mrb[21].mxu0 }
 0x12e   :  { %7009 = vst [vmem:[#allocation108_spill] sm:$0xff] %v4742_v58  ;;  %7010 = vst [vmem:[#allocation109_spill] sm:$0xff] %v4744_v5  ;;  %v4748_v43 = vmul.f32 %v4105_v1, %v4538_v10  ;;  %v4751_v52 = vmul.f32 %v4139_v23, %v904_v42  ;;  %v4753_v17 = vadd.f32 %v1013_v39, %v1003_v29  ;;  %v4759_v38 = vld [vmem:[#allocation2 + $0x23] sm:$0xff]  ;;  %v4767_v14 = vpop.f32.mrb[22].mxu0  ;;  %v4771_v23 = vld [vmem:[#allocation2 + $0x39] sm:$0xff] }
 0x12f   :  { %v4755_v26 = vadd.f32 %v1014_v63, %v1004_v19  ;;  %7013 = vst [vmem:[#allocation112_spill] sm:$0xff] %v4759_v38  ;;  %v4762_v44 = vmul.f32 %v4157_v30, %v904_v42  ;;  %v4765_v5 = vmul.f32 %v4198_v46, %v904_v42  ;;  %v1021_v58 = vadd.f32 %v1015_v45, %v1005_v2  ;;  %v4773_v29 = vld [vmem:[#allocation2 + $0x3a] sm:$0xff]  ;;  %v4789_v45 = vpop.f32.mrb[23].mxu0 }
 0x130   :  { %7011 = vst [vmem:[#allocation110_spill] sm:$0xff] %v4753_v17  ;;  %v894_v10 = vadd.f32 %v888_v48, %v878_v60  ;;  %7014 = vst [vmem:[#allocation113_spill] sm:$0xff] %v4767_v14  ;;  %v4776_v19 = vmul.f32 %v4180_v37, %v904_v42  ;;  %v4779_v39 = vmul.f32 %v4212_v54, %v904_v42  ;;  %v4791_v2 = vld [vmem:[#allocation2 + $0x3b] sm:$0xff] }
 0x131   :  { %7012 = vst [vmem:[#allocation111_spill] sm:$0xff] %v4755_v26  ;;  %2135 = vst.msk [vmem:[#allocation2 + $0x20] sm:$0xff] %vm60_vm0, %v4757_v16  ;;  %v4783_v63 = vmul.f32 %v4224_v61, %v4736_v0  ;;  %v4787_v48 = vmul.f32 %v4350_v41, %v4736_v0  ;;  %v1045_v60 = vadd.f32 %v4188_v40, %v1021_v58  ;;  %v4807_v26 = vld [vmem:[#allocation2 + $0x51] sm:$0xff] }
 0x132   :  { %7015 = vst [vmem:[#allocation114_spill] sm:$0xff] %v4771_v23  ;;  %7016 = vst [vmem:[#allocation115_spill] sm:$0xff] %v4773_v29  ;;  %v4796_v38 = vmul.f32 %v4417_v15, %v4736_v0  ;;  %v4800_v42 = vmul.f32 %v4203_v47, %v4736_v0  ;;  %v918_v29 = vadd.f32 %v4285_v33, %v894_v10  ;;  %v4803_v23 = vpop.f32.mrb[24].mxu0  ;;  %v4811_v58 = vld [vmem:[#allocation2 + $0x53] sm:$0xff] }
 0x133   :  { %7017 = vst [vmem:[#allocation116_spill] sm:$0xff] %v4783_v63  ;;  %7018 = vst [vmem:[#allocation117_spill] sm:$0xff] %v4787_v48  ;;  %v4815_v14 = vmul.f32 %v4252_v8, %v4736_v0  ;;  %v821_v11 = vmul.f32 %v4080_v49, %v4684_v51  ;;  %v838_v33 = vmul.f32 %v4089_v55, %v4684_v51  ;;  %v7030_v61 = vld [vmem:[#allocation26_spill] sm:$0xff] }
 0x134   :  { %7019 = vst [vmem:[#allocation118_spill] sm:$0xff] %v4789_v45  ;;  %7020 = vst [vmem:[#allocation119_spill] sm:$0xff] %v4791_v2  ;;  %v4809_v2 = vld [vmem:[#allocation2 + $0x52] sm:$0xff]  ;;  %v855_v10 = vmul.f32 %v4105_v1, %v4684_v51  ;;  %v343_v20 = vsel %vm332_vm1, %v7030_v61, -inf }
 0x135   :  { %7021 = vst [vmem:[#allocation120_spill] sm:$0xff] %v4796_v38  ;;  %7022 = vst [vmem:[#allocation121_spill] sm:$0xff] %v4800_v42  ;;  %v4839_v42 = vld [vmem:[#allocation2 + $0x6b] sm:$0xff]  ;;  %v7040_v48 = vld [vmem:[#allocation66_spill] sm:$0xff] }
 0x136   :  { %7023 = vst [vmem:[#allocation122_spill] sm:$0xff] %v4803_v23  ;;  %2136 = vst.msk [vmem:[#allocation2 + $0x38] sm:$0xff] %vm60_vm0, %v4789_v45  ;;  %v4823_v23 = vpop.f32.mrb[25].mxu0  ;;  %v7039_v38 = vld [vmem:[#allocation49_spill] sm:$0xff] }
 0x137   :  { %7024 = vst [vmem:[#allocation123_spill] sm:$0xff] %v4807_v26  ;;  %7025 = vst [vmem:[#allocation124_spill] sm:$0xff] %v4809_v2  ;;  %v7028_v26 = vld [vmem:[#allocation33_spill] sm:$0xff]  ;;  %v7029_v2 = vld [vmem:[#allocation38_spill] sm:$0xff]  ;;  %v4833_v49 = vpop.f32.mrb[26].mxu0  ;;  %v809_v63 = vadd.f32 %v7040_v48, %v7039_v38 }
 0x138   :  { %7026 = vst [vmem:[#allocation125_spill] sm:$0xff] %v4811_v58  ;;  %7027 = vst [vmem:[#allocation126_spill] sm:$0xff] %v4823_v23  ;;  %v1062_v40 = vadd.f32 %v7028_v26, %v1045_v60  ;;  %v872_v58 = vmul.f32 %v4132_v21, %v4684_v51  ;;  %v935_v17 = vadd.f32 %v7029_v2, %v918_v29  ;;  %v7035_v26 = vld [vmem:[#allocation63_spill] sm:$0xff]  ;;  %v7036_v51 = vld [vmem:[#allocation14_spill] sm:$0xff] }
 0x139   :  { %2137 = vst.msk [vmem:[#allocation2 + $0x50] sm:$0xff] %vm60_vm0, %v4823_v23  ;;  %7031 = vst [vmem:[#allocation33_spill] sm:$0xff] %v4833_v49  ;;  %v344_v60 = vmax.f32 %v7035_v26, %v343_v20  ;;  %v3735_v29 = vpack.c.bf16 %v7037_v32, %v7036_v51  ;;  %v7038_v2 = vld [vmem:[#allocation4_spill] sm:$0xff]  ;;  %v4848_v23 = vpop.f32.mrb[27].mxu0  ;;  %v7045_v26 = vld [vmem:[#allocation10_spill] sm:$0xff] }
 0x13a   :  { %7032 = vst [vmem:[#allocation38_spill] sm:$0xff] %v4835_v13  ;;  %7033 = vst [vmem:[#allocation127_spill] sm:$0xff] %v4837_v36  ;;  %v789_v61 = vmul.f32 %v7038_v2, %v4456_v27  ;;  %v7042_v49 = vld [vmem:[#allocation44_spill] sm:$0xff]  ;;  %v4851_v13 = vld [vmem:[#allocation2 + $0x80] sm:$0xff]  ;;  %v826_v32 = vadd.f32 %v7046_v22, %v7045_v26  ;;  %v4860_v27 = vpop.f32.mrb[28].mxu0  ;;  %v839_v22 = vmul.f32 %v4089_v55, %v782_v28 }
 0x13b   :  { %7034 = vst [vmem:[#allocation128_spill] sm:$0xff] %v4839_v42  ;;  %7041 = vst [vmem:[#allocation63_spill] sm:$0xff] %v4848_v23  ;;  %v1080_v45 = vadd.f32 %v7042_v49, %v1062_v40  ;;  %v7043_v36 = vld [vmem:[#allocation53_spill] sm:$0xff]  ;;  %v7044_v42 = vld [vmem:[#allocation64_spill] sm:$0xff]  ;;  %v7050_v40 = vmax.f32 %v4298_v3, %v4682_v53  ;;  %3736 = vmatprep.subr.bf16.mxu1 %v3735_v29 }
 0x13c   :  { %v953_v59 = vadd.f32 %v7043_v36, %v935_v17  ;;  %v810_v20 = vadd.f32 %v4585_v6, %v7044_v42  ;;  %2138 = vst.msk [vmem:[#allocation2 + $0x68] sm:$0xff] %vm60_vm0, %v4848_v23  ;;  %7047 = vst [vmem:[#allocation14_spill] sm:$0xff] %v4860_v27  ;;  %v4862_v38 = vld [vmem:[#allocation2 + $0x81] sm:$0xff]  ;;  %v811_v36 = vadd.f32 %v4704_v50, %v789_v61  ;;  %v7051_v6 = vld [vmem:[#allocation86_spill] sm:$0xff]  ;;  %v4874_v42 = vpop.f32.mrb[29].mxu0  ;;  %3738 = vmatpush3.bf16.msra.mxu1 %v3735_v29 }
 0x13d   :  { %7048 = vst [vmem:[#allocation31_spill] sm:$0xff] %v4862_v38  ;;  %v4864_v48 = vld [vmem:[#allocation2 + $0x82] sm:$0xff]  ;;  %v4869_v49 = vmax.f32 %v7050_v40, %v344_v60  ;;  %v827_v17 = vadd.f32 %v7051_v6, %v809_v63  ;;  %v7053_v2 = vld [vmem:[#allocation58_spill] sm:$0xff]  ;;  %v844_v53 = vadd.f32 %v4595_v12, %v826_v32  ;;  %v4882_v61 = vpop.f32.mrb[30].mxu0  ;;  %v856_v63 = vmul.f32 %v4105_v1, %v782_v28  ;;  %v7056_v60 = vld [vmem:[#allocation41_spill] sm:$0xff] }
 0x13e   :  { %7049 = vst [vmem:[#allocation4_spill] sm:$0xff] %v4864_v48  ;;  %v4876_v51 = vld [vmem:[#allocation2 + $0x83] sm:$0xff]  ;;  %v1098_v26 = vadd.f32 %v7053_v2, %v1080_v45  ;;  %v905_v38 = vld [vmem:[#allocation2 + $0x96] sm:$0xff]  ;;  %v828_v3 = vadd.f32 %v4710_v4, %v810_v20  ;;  %7055 = vst [vmem:[#allocation66_spill] sm:$0xff] %v4882_v61  ;;  %v829_v55 = vadd.f32 %v821_v11, %v811_v36  ;;  %3534 = vmatprep.subr.mxu1 %v7056_v60 }
 0x13f   :  { %7052 = vst [vmem:[#allocation49_spill] sm:$0xff] %v4876_v51  ;;  %v7054_v48 = vld [vmem:[#allocation71_spill] sm:$0xff]  ;;  %2139 = vst.msk [vmem:[#allocation2 + $0x80] sm:$0xff] %vm60_vm0, %v4874_v42  ;;  %v845_v50 = vadd.f32 %v4733_v31, %v827_v17  ;;  %v873_v45 = vmul.f32 %v4132_v21, %v782_v28  ;;  %v7057_v4 = vld [vmem:[#allocation78_spill] sm:$0xff]  ;;  %v1016_v11 = vmul.f32 %v4229_v62, %v905_v38 }
 0x140   :  { %v971_v23 = vadd.f32 %v7054_v48, %v953_v59  ;;  %v4890_v59 = vpop.f32.mrb[31].mxu0  ;;  %v1116_v20 = vadd.f32 %v7057_v4, %v1098_v26  ;;  %v7058_v12 = vld [vmem:[#allocation92_spill] sm:$0xff]  ;;  %v846_v32 = vadd.f32 %v838_v33, %v828_v3  ;;  %v862_v48 = vadd.f32 %v4748_v43, %v844_v53  ;;  %3535 = vmatpush3.msra.mxu1 %v7056_v60 }
 0x141   :  { %v4895_v40 = vpop.f32.mrb[32].mxu0  ;;  %v847_v31 = vadd.f32 %v839_v22, %v829_v55  ;;  %v863_v36 = vadd.f32 %v855_v10, %v845_v50  ;;  %v889_v1 = vmul.f32 %v4217_v57, %v782_v28  ;;  %v1127_v43 = vmul.f32 %v4247_v7, %v4736_v0  ;;  %v7061_v57 = vld [vmem:[#allocation16_spill] sm:$0xff]  ;;  %v7062_v22 = vld [vmem:[#allocation17_spill] sm:$0xff]  ;;  %v7063_v55 = vld [vmem:[#allocation19_spill] sm:$0xff] }
 0x142   :  { %v989_v29 = vadd.f32 %v7058_v12, %v971_v23  ;;  %7059 = vst [vmem:[#allocation44_spill] sm:$0xff] %v4895_v40  ;;  %v4899_v21 = vpop.f32.mrb[33].mxu0  ;;  %v1133_v6 = vadd.f32 %v4653_v9, %v1116_v20  ;;  %v864_v2 = vadd.f32 %v856_v63, %v846_v32  ;;  %v879_v26 = vadd.f32 %v872_v58, %v862_v48  ;;  %v7064_v50 = vld [vmem:[#allocation18_spill] sm:$0xff]  ;;  %v7066_v4 = vld [vmem:[#allocation32_spill] sm:$0xff] }
 0x143   :  { %v4904_v23 = vpop.f32.mrb[34].mxu0  ;;  %v4910_v33 = vmul.f32 %v4290_v34, %v4851_v13  ;;  %v865_v28 = vadd.f32 %v7061_v57, %v847_v31  ;;  %v880_v10 = vadd.f32 %v873_v45, %v863_v36  ;;  %vm306_vm2 = vcmp.lt.s32.totalorder %v7063_v55, 65  ;;  %v7065_v45 = vld [vmem:[#allocation12_spill] sm:$0xff]  ;;  %v7068_v36 = vld [vmem:[#allocation51_spill] sm:$0xff] }
 0x144   :  { %v1006_v17 = vadd.f32 %v4779_v39, %v989_v29  ;;  %7060 = vst [vmem:[#allocation53_spill] sm:$0xff] %v4904_v23  ;;  %v1149_v9 = vadd.f32 %v4815_v14, %v1133_v6  ;;  %v4917_v39 = vld [vmem:[%s6774_s4 + $0x168] sm:$0xff]  ;;  %v881_v3 = vadd.f32 %v7062_v22, %v864_v2  ;;  %v895_v53 = vadd.f32 %v889_v1, %v879_v26  ;;  %v7067_v29 = vld [vmem:[#allocation37_spill] sm:$0xff]  ;;  %v7070_v26 = vld [vmem:[#allocation43_spill] sm:$0xff] }
 0x145   :  { %v4923_v34 = vmul.f32 %v4366_v56, %v4851_v13  ;;  %v1271_v0 = vmul.f32 %v4917_v39, %v4851_v13  ;;  %v882_v14 = vadd.f32 %v7062_v22, %v865_v28  ;;  %v896_v63 = vadd.f32 %v7064_v50, %v880_v10  ;;  %v7069_v6 = vld [vmem:[#allocation36_spill] sm:$0xff]  ;;  %v4938_v2 = vld [vmem:[#allocation2 + $0x97] sm:$0xff] }
 0x146   :  { %v1022_v58 = vadd.f32 %v1016_v11, %v1006_v17  ;;  %v1173_v60 = vadd.f32 %v7065_v45, %v1149_v9  ;;  %v897_v12 = vadd.f32 %v7064_v50, %v881_v3  ;;  %v919_v32 = vadd.f32 %v7067_v29, %v895_v53  ;;  %v906_v28 = vld [vmem:[#allocation2 + $0xae] sm:$0xff]  ;;  %v7073_v53 = vld [vmem:[#allocation87_spill] sm:$0xff] }
 0x147   :  { %v949_v48 = vmul.f32 %v4157_v30, %v905_v38  ;;  %v966_v11 = vmul.f32 %v4198_v46, %v905_v38  ;;  %v898_v31 = vadd.f32 %v7064_v50, %v882_v14  ;;  %v920_v1 = vadd.f32 %v7068_v36, %v896_v63  ;;  %v7071_v10 = vld [vmem:[#allocation68_spill] sm:$0xff]  ;;  %v7074_v14 = vld [vmem:[#allocation69_spill] sm:$0xff] }
 0x148   :  { %v1046_v20 = vadd.f32 %v7066_v4, %v1022_v58  ;;  %v1190_v17 = vadd.f32 %v7069_v6, %v1173_v60  ;;  %v921_v9 = vadd.f32 %v7071_v10, %v897_v12  ;;  %v7072_v58 = vld [vmem:[#allocation52_spill] sm:$0xff]  ;;  %v983_v3 = vmul.f32 %v4180_v37, %v905_v38  ;;  %v7076_v60 = vld [vmem:[#allocation57_spill] sm:$0xff]  ;;  %v7079_v10 = vld [vmem:[#allocation90_spill] sm:$0xff] }
 0x149   :  { %v936_v22 = vadd.f32 %v7072_v58, %v919_v32  ;;  %v1000_v30 = vmul.f32 %v4212_v54, %v905_v38  ;;  %v922_v4 = vadd.f32 %v7073_v53, %v898_v31  ;;  %v937_v50 = vadd.f32 %v7074_v14, %v920_v1  ;;  %v7075_v63 = vld [vmem:[#allocation48_spill] sm:$0xff]  ;;  %v7077_v6 = vld [vmem:[#allocation89_spill] sm:$0xff]  ;;  %v7080_v31 = vld [vmem:[#allocation62_spill] sm:$0xff] }
 0x14a   :  { %v1063_v57 = vadd.f32 %v7070_v26, %v1046_v20  ;;  %v1208_v29 = vadd.f32 %v7075_v63, %v1190_v17  ;;  %v938_v51 = vadd.f32 %v7077_v6, %v921_v9  ;;  %v7078_v20 = vld [vmem:[#allocation70_spill] sm:$0xff]  ;;  %v1144_v12 = vmul.f32 %v4252_v8, %v4938_v2  ;;  %v7081_v1 = vld [vmem:[#allocation76_spill] sm:$0xff] }
 0x14b   :  { %v954_v26 = vadd.f32 %v7078_v20, %v936_v22  ;;  %v939_v32 = vadd.f32 %v4751_v52, %v922_v4  ;;  %v955_v58 = vadd.f32 %v7079_v10, %v937_v50  ;;  %v967_v38 = vmul.f32 %v4198_v46, %v906_v28  ;;  %v7083_v52 = vld [vmem:[#allocation84_spill] sm:$0xff] }
 0x14c   :  { %v1081_v36 = vadd.f32 %v7076_v60, %v1063_v57  ;;  %v1226_v53 = vadd.f32 %v7080_v31, %v1208_v29  ;;  %v956_v17 = vadd.f32 %v4762_v44, %v938_v51  ;;  %v7082_v57 = vld [vmem:[#allocation91_spill] sm:$0xff]  ;;  %v984_v60 = vmul.f32 %v4180_v37, %v906_v28  ;;  %v7084_v51 = vld [vmem:[#allocation40_spill] sm:$0xff] }
 0x14d   :  { %v972_v63 = vadd.f32 %v7082_v57, %v954_v26  ;;  %v957_v9 = vadd.f32 %v949_v48, %v939_v32  ;;  %v973_v22 = vadd.f32 %v4765_v5, %v955_v58  ;;  %v1001_v6 = vmul.f32 %v4212_v54, %v906_v28  ;;  %v7085_v32 = vld [vmem:[#allocation20_spill] sm:$0xff]  ;;  %v7087_v58 = vld [vmem:[#allocation29_spill] sm:$0xff] }
 0x14e   :  { %v1099_v14 = vadd.f32 %v7081_v1, %v1081_v36  ;;  %v1244_v4 = vadd.f32 %v7083_v52, %v1226_v53  ;;  %v974_v46 = vadd.f32 %v966_v11, %v956_v17  ;;  %v1017_v44 = vmul.f32 %v4229_v62, %v906_v28  ;;  %v7086_v11 = vld [vmem:[#allocation85_spill] sm:$0xff]  ;;  %v7089_v1 = vld [vmem:[#allocation22_spill] sm:$0xff] }
 0x14f   :  { %v990_v29 = vadd.f32 %v4776_v19, %v972_v63  ;;  %v975_v20 = vadd.f32 %v967_v38, %v957_v9  ;;  %v991_v36 = vadd.f32 %v983_v3, %v973_v22  ;;  %v4970_v48 = vsel %vm306_vm2, %v7084_v51, -1e+30  ;;  %v7088_v38 = vld [vmem:[#allocation21_spill] sm:$0xff]  ;;  %v7090_v63 = vld [vmem:[#allocation34_spill] sm:$0xff] }
 0x150   :  { %v1117_v50 = vadd.f32 %v4648_v25, %v1099_v14  ;;  %v1261_v37 = vadd.f32 %v4700_v18, %v1244_v4  ;;  %v992_v54 = vadd.f32 %v984_v60, %v974_v46  ;;  %v338_v19 = vmax.f32 %v7087_v58, %v7086_v11  ;;  %v4990_v9 = vld [vmem:[#allocation2 + $0x99] sm:$0xff] }
 0x151   :  { %v1007_v26 = vadd.f32 %v1000_v30, %v990_v29  ;;  %v993_v10 = vadd.f32 %v7085_v32, %v975_v20  ;;  %v1008_v25 = vadd.f32 %v1001_v6, %v991_v36  ;;  %v345_v3 = vsel %vm332_vm1, %v4970_v48, -inf  ;;  %v7091_v22 = vld [vmem:[#allocation42_spill] sm:$0xff]  ;;  %v7096_v20 = vld [vmem:[#allocation77_spill] sm:$0xff] }
 0x152   :  { %v1134_v5 = vadd.f32 %v1127_v43, %v1117_v50  ;;  %v4978_v62 = vadd.f32 %v1271_v0, %v1261_v37  ;;  %v1009_v31 = vadd.f32 %v7088_v38, %v992_v54  ;;  %v1255_v18 = vmul.f32 %v4689_v24, %v4851_v13  ;;  %v4983_v43 = vld [vmem:[#allocation2 + $0x98] sm:$0xff]  ;;  %v7099_v54 = vld [vmem:[#allocation47_spill] sm:$0xff]  ;;  %v7100_v32 = vld [vmem:[#allocation73_spill] sm:$0xff] }
 0x153   :  { %v1023_v53 = vadd.f32 %v1017_v44, %v1007_v26  ;;  %v1010_v30 = vadd.f32 %v7088_v38, %v993_v10  ;;  %v1024_v14 = vadd.f32 %v7089_v1, %v1008_v25  ;;  %v346_v17 = vmax.f32 %v338_v19, %v345_v3  ;;  %v4994_v6 = vld [vmem:[#allocation2 + $0x9a] sm:$0xff]  ;;  %v7104_v38 = vld [vmem:[#allocation61_spill] sm:$0xff] }
 0x154   :  { %v1150_v28 = vadd.f32 %v1144_v12, %v1134_v5  ;;  %v1077_v57 = vmul.f32 %v4350_v41, %v4938_v2  ;;  %v1025_v12 = vadd.f32 %v7089_v1, %v1009_v31  ;;  %7092 = vst [vmem:[#allocation64_spill] sm:$0xff] %v4994_v6  ;;  %v4996_v52 = vld [vmem:[#allocation2 + $0x9b] sm:$0xff]  ;;  %v5005_v37 = vpack.c.bf16 %v4757_v16, %v4727_v35 }
 0x155   :  { %v1047_v60 = vadd.f32 %v7091_v22, %v1023_v53  ;;  %7093 = vst [vmem:[#allocation10_spill] sm:$0xff] %v4996_v52  ;;  %v1026_v4 = vadd.f32 %v7089_v1, %v1010_v30  ;;  %v7094_v50 = vld [vmem:[#allocation54_spill] sm:$0xff]  ;;  %2140 = vst.msk [vmem:[#allocation2 + $0x98] sm:$0xff] %vm60_vm0, %v4890_v59  ;;  %v1094_v5 = vmul.f32 %v4417_v15, %v4938_v2  ;;  %v7101_v25 = vld [vmem:[#allocation55_spill] sm:$0xff] }
 0x156   :  { %v1174_v0 = vadd.f32 %v7090_v63, %v1150_v28  ;;  %v1048_v46 = vadd.f32 %v7094_v50, %v1024_v14  ;;  %v7095_v29 = vld [vmem:[#allocation30_spill] sm:$0xff]  ;;  %7098 = vst [vmem:[#allocation67_spill] sm:$0xff] %v5005_v37  ;;  %v1049_v10 = vadd.f32 %v7100_v32, %v1025_v12  ;;  %v1111_v58 = vmul.f32 %v4203_v47, %v4938_v2  ;;  %v1034_v53 = vld [vmem:[#allocation2 + $0xaf] sm:$0xff]  ;;  %v7105_v30 = vld [vmem:[#allocation95_spill] sm:$0xff] }
 0x157   :  { %v7097_v36 = vmax.f32 %v7095_v29, %v7096_v20  ;;  %v1064_v11 = vadd.f32 %v7101_v25, %v1047_v60  ;;  %v7102_v19 = vld [vmem:[#allocation94_spill] sm:$0xff]  ;;  %v7106_v14 = vld [vmem:[#allocation75_spill] sm:$0xff]  ;;  %v1128_v22 = vmul.f32 %v4247_v7, %v4938_v2  ;;  %v7110_v60 = vld [vmem:[#allocation116_spill] sm:$0xff]  ;;  %v1095_v25 = vmul.f32 %v4417_v15, %v1034_v53 }
 0x158   :  { %v1191_v26 = vadd.f32 %v7099_v54, %v1174_v0  ;;  %v1050_v3 = vadd.f32 %v7102_v19, %v1026_v4  ;;  %v7103_v28 = vld [vmem:[#allocation74_spill] sm:$0xff]  ;;  %v1066_v1 = vadd.f32 %v7105_v30, %v1049_v10  ;;  %v7111_v50 = vld [vmem:[#allocation96_spill] sm:$0xff]  ;;  %v7117_v30 = vld [vmem:[#allocation121_spill] sm:$0xff] }
 0x159   :  { %v347_v44 = vmax.f32 %v346_v17, %v7097_v36  ;;  %v1065_v35 = vadd.f32 %v7103_v28, %v1048_v46  ;;  %v1082_v17 = vadd.f32 %v7106_v14, %v1064_v11  ;;  %v7107_v63 = vld [vmem:[#allocation118_spill] sm:$0xff]  ;;  %v1272_v36 = vmul.f32 %v4917_v39, %v4983_v43  ;;  %v7115_v11 = vld [vmem:[#allocation120_spill] sm:$0xff]  ;;  %v7142_v37 = vld [vmem:[#allocation13_spill] sm:$0xff] }
 0x15a   :  { %v1209_v31 = vadd.f32 %v7104_v38, %v1191_v26  ;;  %v7108_v0 = vld [vmem:[#allocation126_spill] sm:$0xff]  ;;  %v1067_v4 = vadd.f32 %v7110_v60, %v1050_v3  ;;  %v7114_v26 = vld [vmem:[#allocation97_spill] sm:$0xff] }
 0x15b   :  { %v349_v16 = vmax.f32 %v347_v44, %v4869_v49  ;;  %v5024_v12 = vpack.c.bf16 %v7108_v0, %v7107_v63  ;;  %v1083_v46 = vadd.f32 %v7111_v50, %v1065_v35  ;;  %v7112_v49 = vld [vmem:[#allocation83_spill] sm:$0xff]  ;;  %v7113_v44 = vld [vmem:[#allocation117_spill] sm:$0xff]  ;;  %v1100_v32 = vadd.f32 %v7114_v26, %v1082_v17  ;;  %v7116_v28 = vld [vmem:[#allocation102_spill] sm:$0xff] }
 0x15c   :  { %v1227_v20 = vadd.f32 %v7112_v49, %v1209_v31  ;;  %v1084_v54 = vadd.f32 %v7113_v44, %v1066_v1  ;;  %v1085_v10 = vadd.f32 %v1077_v57, %v1067_v4  ;;  %v1112_v35 = vmul.f32 %v4203_v47, %v1034_v53  ;;  %v7118_v50 = vld [vmem:[#allocation56_spill] sm:$0xff]  ;;  %v1162_v49 = vld [vmem:[#allocation2 + $0xb0] sm:$0xff] }
 0x15d   :  { %7109 = vst [vmem:[#allocation86_spill] sm:$0xff] %v5024_v12  ;;  %v350_v29 = vrot.slane %v349_v16, 4  ;;  %v1101_v19 = vadd.f32 %v7115_v11, %v1083_v46  ;;  %v1118_v31 = vadd.f32 %v7117_v30, %v1100_v32  ;;  %v1129_v0 = vmul.f32 %v4247_v7, %v1034_v53  ;;  %v7119_v46 = vld [vmem:[#allocation23_spill] sm:$0xff]  ;;  %v5050_v26 = vld [vmem:[#allocation2 + $0xb1] sm:$0xff] }
 0x15e   :  { %v1245_v3 = vadd.f32 %v7116_v28, %v1227_v20  ;;  %v1102_v38 = vadd.f32 %v1094_v5, %v1084_v54  ;;  %v1103_v14 = vadd.f32 %v1095_v25, %v1085_v10  ;;  %v1145_v4 = vmul.f32 %v4252_v8, %v1034_v53  ;;  %v7120_v20 = vld [vmem:[#allocation81_spill] sm:$0xff]  ;;  %v7121_v7 = vld [vmem:[#allocation27_spill] sm:$0xff]  ;;  %7122 = vst [vmem:[#allocation58_spill] sm:$0xff] %v5050_v26  ;;  %v7125_v10 = vld [vmem:[#allocation28_spill] sm:$0xff] }
 0x15f   :  { %v351_v2 = vmax.f32 %v349_v16, %v350_v29  ;;  %v1119_v63 = vadd.f32 %v1111_v58, %v1101_v19  ;;  %v1135_v57 = vadd.f32 %v1128_v22, %v1118_v31  ;;  %v1221_v16 = vmul.f32 %v7118_v50, %v4851_v13  ;;  %v5052_v22 = vld [vmem:[#allocation2 + $0xb2] sm:$0xff] }
 0x160   :  { %v1262_v60 = vadd.f32 %v1255_v18, %v1245_v3  ;;  %v1120_v17 = vadd.f32 %v1112_v35, %v1102_v38  ;;  %v1121_v29 = vadd.f32 %v7119_v46, %v1103_v14  ;;  %v1238_v44 = vmul.f32 %v7120_v20, %v4851_v13  ;;  %7123 = vst [vmem:[#allocation71_spill] sm:$0xff] %v5052_v22  ;;  %v5054_v8 = vld [vmem:[#allocation2 + $0xb3] sm:$0xff]  ;;  %v7127_v35 = vld [vmem:[#allocation59_spill] sm:$0xff]  ;;  %v7131_v46 = vld [vmem:[#allocation80_spill] sm:$0xff] }
 0x161   :  { %v352_v1 = vrot.slane %v351_v2, 2  ;;  %v1136_v5 = vadd.f32 %v1129_v0, %v1119_v63  ;;  %v1151_v18 = vadd.f32 %v1145_v4, %v1135_v57  ;;  %7124 = vst [vmem:[#allocation41_spill] sm:$0xff] %v5054_v8  ;;  %v1205_v53 = vmul.f32 %v4366_v56, %v4983_v43  ;;  %2141 = vst.msk [vmem:[#allocation2 + $0xb0] sm:$0xff] %vm60_vm0, %v4899_v21  ;;  %v7128_v14 = vld [vmem:[#allocation79_spill] sm:$0xff]  ;;  %v7129_v0 = vld [vmem:[#allocation60_spill] sm:$0xff] }
 0x162   :  { %v5047_v58 = vadd.f32 %v1272_v36, %v1262_v60  ;;  %v1137_v54 = vadd.f32 %v7121_v7, %v1120_v17  ;;  %v1138_v32 = vadd.f32 %v7121_v7, %v1121_v29  ;;  %v1222_v13 = vmul.f32 %v7118_v50, %v4983_v43  ;;  %v7130_v57 = vld [vmem:[#allocation98_spill] sm:$0xff] }
 0x163   :  { %v353_v47 = vmax.f32 %v351_v2, %v352_v1  ;;  %v1152_v25 = vadd.f32 %v7125_v10, %v1136_v5  ;;  %v1239_v36 = vmul.f32 %v7120_v20, %v4983_v43  ;;  %v7126_v2 = vld [vmem:[#allocation46_spill] sm:$0xff]  ;;  %v1256_v3 = vmul.f32 %v4689_v24, %v4983_v43  ;;  %v7132_v43 = vld [vmem:[#allocation3_spill] sm:$0xff] }
 0x164   :  { %v1153_v19 = vadd.f32 %v7125_v10, %v1137_v54  ;;  %v1175_v28 = vadd.f32 %v7126_v2, %v1151_v18  ;;  %v1154_v38 = vadd.f32 %v7125_v10, %v1138_v32  ;;  %v1223_v60 = vmul.f32 %v7118_v50, %v1162_v49  ;;  %v7133_v54 = vld [vmem:[#allocation99_spill] sm:$0xff]  ;;  %v7134_v32 = vld [vmem:[#allocation82_spill] sm:$0xff]  ;;  %v7135_v10 = vld [vmem:[#allocation5_spill] sm:$0xff] }
 0x165   :  { %v354_v11 = vrot.slane %v353_v47, 1  ;;  %v1176_v30 = vadd.f32 %v7127_v35, %v1152_v25  ;;  %v1240_v17 = vmul.f32 %v7120_v20, %v1162_v49  ;;  %v1273_v12 = vmul.f32 %v4917_v39, %v1162_v49 }
 0x166   :  { %v1177_v63 = vadd.f32 %v7128_v14, %v1153_v19  ;;  %v1192_v1 = vadd.f32 %v7129_v0, %v1175_v28  ;;  %v1178_v4 = vadd.f32 %v7130_v57, %v1154_v38  ;;  %v7137_v28 = vld [vmem:[#allocation100_spill] sm:$0xff]  ;;  %v1257_v38 = vmul.f32 %v4689_v24, %v1162_v49  ;;  %v7138_v14 = vld [vmem:[#allocation7_spill] sm:$0xff]  ;;  %v7139_v0 = vld [vmem:[#allocation101_spill] sm:$0xff] }
 0x167   :  { %v355_v31 = vmax.f32 %v353_v47, %v354_v11  ;;  %v1193_v29 = vadd.f32 %v7131_v46, %v1176_v30  ;;  %v7136_v11 = vld [vmem:[#allocation6_spill] sm:$0xff]  ;;  %v7140_v46 = vld [vmem:[#allocation8_spill] sm:$0xff] }
 0x168   :  { %v1194_v18 = vadd.f32 %v7133_v54, %v1177_v63  ;;  %v1210_v47 = vadd.f32 %v7134_v32, %v1192_v1  ;;  %v1195_v2 = vadd.f32 %v4910_v33, %v1178_v4  ;;  %v7141_v54 = vld [vmem:[#allocation9_spill] sm:$0xff] }
 0x169   :  { %v364_v5 = vsub.f32 %v4970_v48, %v355_v31  ;;  %v356_v7 = vsub.f32 %v7132_v43, %v355_v31  ;;  %v357_v25 = vsub.f32 %v7135_v10, %v355_v31  ;;  %v358_v19 = vsub.f32 %v7136_v11, %v355_v31  ;;  %v7169_v10 = vld [vmem:[#allocation50_spill] sm:$0xff] }
 0x16a   :  { %v1211_v35 = vadd.f32 %v7137_v28, %v1193_v29  ;;  %v359_v30 = vsub.f32 %v7138_v14, %v355_v31  ;;  %v1212_v48 = vadd.f32 %v4923_v34, %v1194_v18  ;;  %v1228_v57 = vadd.f32 %v7139_v0, %v1210_v47  ;;  %v7143_v28 = vld [vmem:[#allocation26_spill] sm:$0xff] }
 0x16b   :  { %v360_v63 = vsub.f32 %v7140_v46, %v355_v31  ;;  %v361_v1 = vsub.f32 %v7141_v54, %v355_v31  ;;  %v1213_v32 = vadd.f32 %v1205_v53, %v1195_v2  ;;  %v362_v33 = vsub.f32 %v7142_v37, %v355_v31 }
 0x16c   :  { %v1229_v51 = vadd.f32 %v1221_v16, %v1211_v35  ;;  %v1230_v4 = vadd.f32 %v1222_v13, %v1212_v48  ;;  %v1246_v29 = vadd.f32 %v1238_v44, %v1228_v57  ;;  %v363_v8 = vsub.f32 %v7143_v28, %v355_v31  ;;  %v7147_v31 = vld [vmem:[#allocation15_spill] sm:$0xff] }
 0x16d   :  { %v365_v22 = vmul.f32 1.442695, %v356_v7  ;;  %v5095_v14 = vadd.f32 %v1223_v60, %v1213_v32  ;;  %v367_v18 = vmul.f32 1.442695, %v357_v25  ;;  %v369_v47 = vmul.f32 1.442695, %v358_v19 }
 0x16e   :  { %v1247_v34 = vadd.f32 %v1239_v36, %v1229_v51  ;;  %v5097_v0 = vadd.f32 %v1240_v17, %v1230_v4  ;;  %v1263_v46 = vadd.f32 %v1256_v3, %v1246_v29  ;;  %v371_v53 = vmul.f32 1.442695, %v359_v30  ;;  %v7148_v36 = vld [vmem:[#allocation110_spill] sm:$0xff]  ;;  %v7149_v60 = vld [vmem:[#allocation11_spill] sm:$0xff]  ;;  %v7154_v29 = vld [vmem:[#allocation33_spill] sm:$0xff] }
 0x16f   :  { %7144 = vst [vmem:[#allocation78_spill] sm:$0xff] %v5095_v14  ;;  %3799 = vpow2.f32 %v365_v22  ;;  %v373_v49 = vmul.f32 1.442695, %v360_v63  ;;  %v375_v44 = vmul.f32 1.442695, %v361_v1  ;;  %v1053_v51 = vmul.f32 0.0, %v7147_v31 }
 0x170   :  { %7145 = vst [vmem:[#allocation92_spill] sm:$0xff] %v5097_v0  ;;  %v5099_v16 = vadd.f32 %v1257_v38, %v1247_v34  ;;  %3801 = vpow2.f32 %v367_v18  ;;  %v5101_v2 = vadd.f32 %v1273_v12, %v1263_v46  ;;  %v377_v13 = vmul.f32 1.442695, %v362_v33  ;;  %v7150_v38 = vld [vmem:[#allocation107_spill] sm:$0xff]  ;;  %v7152_v46 = vld [vmem:[#allocation113_spill] sm:$0xff]  ;;  %v7153_v1 = vld [vmem:[#allocation122_spill] sm:$0xff] }
 0x171   :  { %3803 = vpow2.f32 %v369_v47  ;;  %v1043_v17 = vadd.f32 %v7149_v60, %v7148_v36  ;;  %v379_v3 = vmul.f32 1.442695, %v363_v8  ;;  %v381_v22 = vmul.f32 1.442695, %v364_v5  ;;  %v7151_v5 = vld [vmem:[#allocation103_spill] sm:$0xff]  ;;  %v7170_v14 = vld [vmem:[#allocation88_spill] sm:$0xff] }
 0x172   :  { %7146 = vst [vmem:[#allocation16_spill] sm:$0xff] %v5099_v16  ;;  %3805 = vpow2.f32 %v371_v53  ;;  %v1070_v25 = vmul.f32 0.0, %v4350_v41  ;;  %v1702_v30 = vsel %vm332_vm1, %v7150_v38, -inf  ;;  %v1701_v57 = vsel %vm332_vm1, %v7151_v5, -inf }
 0x173   :  { %3807 = vpow2.f32 %v373_v49  ;;  %v1060_v19 = vadd.f32 %v1053_v51, %v1043_v17  ;;  %v1703_v63 = vsel %vm332_vm1, %v7152_v46, -inf  ;;  %v1704_v32 = vsel %vm332_vm1, %v7153_v1, -inf  ;;  %v7155_v49 = vld [vmem:[#allocation63_spill] sm:$0xff] }
 0x174   :  { %3809 = vpow2.f32 %v375_v44  ;;  %v1705_v34 = vsel %vm332_vm1, %v7154_v29, -inf  ;;  %v1707_v18 = vsel %vm332_vm1, %v4860_v27, -inf  ;;  %v5135_v44 = vpack.c.bf16 %v4874_v42, %v7155_v49 }
 0x175   :  { %3811 = vpow2.f32 %v377_v13  ;;  %v1708_v53 = vmax.f32 %v1702_v30, %v1707_v18  ;;  %v1709_v13 = vsel %vm332_vm1, %v4882_v61, -inf  ;;  %v5147_v30 = vpack.c.bf16 %v4899_v21, %v4890_v59 }
 0x176   :  { %3813 = vpow2.f32 %v379_v3  ;;  %7156 = vst [vmem:[#allocation17_spill] sm:$0xff] %v5135_v44  ;;  %v1710_v17 = vmax.f32 %v1703_v63, %v1709_v13  ;;  %v1711_v3 = vsel %vm332_vm1, %v4895_v40, -inf  ;;  %v5152_v42 = vsel %vm306_vm2, %v4904_v23, -1e+30 }
 0x177   :  { %3815 = vpow2.f32 %v381_v22  ;;  %7157 = vst [vmem:[#allocation19_spill] sm:$0xff] %v5147_v30  ;;  %v1706_v63 = vmax.f32 %v1701_v57, %v1705_v34  ;;  %v1713_v18 = vsel %vm332_vm1, %v5152_v42, -inf  ;;  %v1078_v21 = vadd.f32 %v1070_v25, %v1060_v19  ;;  %v7159_v57 = vld [vmem:[#allocation35_spill] sm:$0xff] }
 0x178   :  { %v1235_v0 = vmul.f32 %v7120_v20, %v7169_v10 }
 0x179   :  { %v5106_v7 = vpop.eup %3799 }
 0x17a   :  { %v5109_v12 = vpop.eup %3801  ;;  %v383_v35 = vsel %vm332_vm1, %v5106_v7, 0.0 }
 0x17b   :  { %v5115_v48 = vpop.eup %3803  ;;  %v384_v8 = vsel %vm332_vm1, %v5109_v12, 0.0 }
 0x17c   :  { %v5125_v33 = vpop.eup %3805  ;;  %v385_v4 = vadd.f32 %v384_v8, %v383_v35  ;;  %v386_v47 = vsel %vm332_vm1, %v5115_v48, 0.0  ;;  %v1712_v35 = vmax.f32 %v1704_v32, %v1711_v3  ;;  %v1714_v3 = vmax.f32 %v1706_v63, %v1713_v18 }
 0x17d   :  { %v5139_v31 = vpop.eup %3807  ;;  %v388_v22 = vsel %vm332_vm1, %v5125_v33, 0.0 }
 0x17e   :  { %v387_v36 = vadd.f32 %v386_v47, %v385_v4  ;;  %v5154_v8 = vpop.eup %3809  ;;  %v7158_v47 = vld [vmem:[#allocation24_spill] sm:$0xff]  ;;  %v390_v32 = vsel %vm332_vm1, %v5139_v31, 0.0  ;;  %v1716_v59 = vmax.f32 %v1710_v17, %v1712_v35  ;;  %v1715_v19 = vmax.f32 %v1714_v3, %v1708_v53  ;;  %v7161_v35 = vld [vmem:[#allocation45_spill] sm:$0xff] }
 0x17f   :  { %v1088_v49 = vmul.f32 %v4417_v15, %v7158_v47  ;;  %v5162_v13 = vpop.eup %3811  ;;  %v392_v30 = vsel %vm332_vm1, %v5154_v8, 0.0  ;;  %v3840_v17 = vld [vmem:[%s6774_s4 + $0x128] sm:$0xff]  ;;  %v7162_v53 = vld [vmem:[#allocation65_spill] sm:$0xff] }
 0x180   :  { %v389_v4 = vadd.f32 %v388_v22, %v387_v36  ;;  %v3839_v36 = vld [vmem:[%s6774_s4 + $0xf0] sm:$0xff]  ;;  %v7160_v22 = vld [vmem:[#allocation111_spill] sm:$0xff]  ;;  %v5172_v28 = vpop.eup %3813  ;;  %v394_v63 = vsel %vm332_vm1, %v5162_v13, 0.0 }
 0x181   :  { %v1106_v34 = vmul.f32 %v3839_v36, %v7159_v57  ;;  %v1044_v23 = vadd.f32 %v7149_v60, %v7160_v22  ;;  %v1096_v44 = vadd.f32 %v1088_v49, %v1078_v21  ;;  %v1717_v22 = vmax.f32 %v1715_v19, %v1716_v59 }
 0x182   :  { %v391_v55 = vadd.f32 %v390_v32, %v389_v4  ;;  %v1124_v4 = vmul.f32 %v3840_v17, %v7161_v35  ;;  %v5180_v32 = vpop.eup %3815  ;;  %v396_v21 = vsel %vm332_vm1, %v5172_v28, 0.0 }
 0x183   :  { %v1114_v18 = vadd.f32 %v1106_v34, %v1096_v44  ;;  %v1061_v37 = vadd.f32 %v1053_v51, %v1044_v23  ;;  %v1718_v54 = vrot.slane %v1717_v22, 4  ;;  %v1071_v44 = vmul.f32 %v4350_v41, %v7158_v47  ;;  %v3842_v23 = vld [vmem:[%s6774_s4 + $0x50] sm:$0xff]  ;;  %v5203_v41 = vld [vmem:[%s6774_s4 + $0xc8] sm:$0xff] }
 0x184   :  { %v393_v25 = vadd.f32 %v392_v30, %v391_v55  ;;  %v3841_v30 = vld [vmem:[%s6774_s4 + $0x160] sm:$0xff]  ;;  %v398_v34 = vsel %vm332_vm1, %v5180_v32, 0.0  ;;  %v1181_v51 = vmul.f32 0.0, %v3842_v23  ;;  %7163 = vst [vmem:[#allocation18_spill] sm:$0xff] %v5203_v41  ;;  %v1089_v47 = vmul.f32 %v4417_v15, %v7159_v57 }
 0x185   :  { %v1141_v49 = vmul.f32 %v3841_v30, %v7162_v53  ;;  %v1131_v55 = vadd.f32 %v1124_v4, %v1114_v18  ;;  %v1719_v4 = vmax.f32 %v1717_v22, %v1718_v54  ;;  %v1198_v18 = vmul.f32 0.0, %v4366_v56 }
 0x186   :  { %v395_v60 = vadd.f32 %v394_v63, %v393_v25  ;;  %v5198_v25 = vld [vmem:[%s6774_s4 + $0x58] sm:$0xff]  ;;  %v1107_v23 = vmul.f32 %v3839_v36, %v7161_v35  ;;  %v5230_v36 = vld [vmem:[%s6774_s4 + $0x90] sm:$0xff]  ;;  %v1142_v26 = vmul.f32 %v3841_v30, %v7170_v14 }
 0x187   :  { %v1147_v59 = vadd.f32 %v1141_v49, %v1131_v55  ;;  %v7164_v49 = vld [vmem:[#allocation25_spill] sm:$0xff]  ;;  %v1720_v22 = vrot.slane %v1719_v4, 2  ;;  %7167 = vst [vmem:[#allocation12_spill] sm:$0xff] %v5230_v36 }
 0x188   :  { %v397_v3 = vadd.f32 %v396_v21, %v395_v60  ;;  %v1079_v60 = vadd.f32 %v1071_v44, %v1061_v37  ;;  %v1199_v21 = vmul.f32 %v4366_v56, %v7164_v49  ;;  %v1216_v55 = vmul.f32 %v7118_v50, %v7164_v49  ;;  %v7166_v37 = vld [vmem:[#allocation39_spill] sm:$0xff] }
 0x189   :  { %v1171_v63 = vadd.f32 %v7065_v45, %v1147_v59  ;;  %v1217_v44 = vmul.f32 %v7118_v50, %v7166_v37  ;;  %v1721_v59 = vmax.f32 %v1719_v4, %v1720_v22  ;;  %v5225_v49 = vld [vmem:[%s6774_s4 + $0x20] sm:$0xff]  ;;  %v1234_v35 = vmul.f32 %v7120_v20, %v7166_v37  ;;  %v7168_v50 = vld [vmem:[#allocation108_spill] sm:$0xff] }
 0x18a   :  { %v399_v19 = vadd.f32 %v398_v34, %v397_v3  ;;  %v7165_v3 = vld [vmem:[#allocation104_spill] sm:$0xff]  ;;  %v1097_v15 = vadd.f32 %v1089_v47, %v1079_v60  ;;  %v1125_v47 = vmul.f32 %v3840_v17, %v7162_v53  ;;  %v5238_v22 = vmul.f32 0.0, %v5225_v49 }
 0x18b   :  { %v1310_v34 = vmul.f32 %v5198_v25, %v7165_v3  ;;  %v1188_v52 = vadd.f32 %v1181_v51, %v1171_v63  ;;  %v5218_v57 = vmul.f32 %v5203_v41, %v7165_v3  ;;  %v1252_v17 = vmul.f32 %v4689_v24, %v7169_v10  ;;  %v5261_v10 = vld [vmem:[%s6774_s4 + $0x138] sm:$0xff] }
 0x18c   :  { %v400_v54 = vrot.slane %v399_v19, 4  ;;  %v1115_v60 = vadd.f32 %v1107_v23, %v1097_v15  ;;  %v1301_v23 = vadd.f32 %v5238_v22, %v4978_v62  ;;  %v7171_v15 = vld [vmem:[#allocation72_spill] sm:$0xff] }
 0x18d   :  { %v1206_v63 = vadd.f32 %v1198_v18, %v1188_v52  ;;  %v5248_v52 = vld [vmem:[%s6774_s4 + $0x100] sm:$0xff]  ;;  %v1253_v20 = vmul.f32 %v4689_v24, %v7171_v15  ;;  %v1269_v30 = vmul.f32 %v4917_v39, %v7171_v15  ;;  %v1326_v24 = vmul.f32 0.0, %v5230_v36 }
 0x18e   :  { %v401_v56 = vadd.f32 %v400_v54, %v399_v19  ;;  %v1328_v19 = vmul.f32 %v5230_v36, %v7168_v50  ;;  %v1722_v54 = vrot.slane %v1721_v59, 1  ;;  %v1132_v16 = vadd.f32 %v1125_v47, %v1115_v60 }
 0x18f   :  { %v1224_v6 = vadd.f32 %v1216_v55, %v1206_v63  ;;  %v1318_v62 = vadd.f32 %v1310_v34, %v1301_v23 }
 0x190   :  { %v402_v4 = vrot.slane %v401_v56, 2  ;;  %v5250_v18 = vmax.f32 %v1721_v59, %v1722_v54  ;;  %v1148_v55 = vadd.f32 %v1142_v26, %v1132_v16  ;;  %v5266_v59 = vmul.f32 0.0, %v5198_v25 }
 0x191   :  { %v1242_v14 = vadd.f32 %v1234_v35, %v1224_v6  ;;  %v1362_v6 = vmul.f32 %v5248_v52, %v7168_v50  ;;  %v1336_v54 = vadd.f32 %v1328_v19, %v1318_v62 }
 0x192   :  { %v403_v53 = vadd.f32 %v402_v4, %v401_v56  ;;  %v1732_v56 = vsub.f32 %v5152_v42, %v5250_v18  ;;  %v1172_v35 = vadd.f32 %v7065_v45, %v1148_v55  ;;  %v1724_v26 = vsub.f32 %v7151_v5, %v5250_v18  ;;  %v7172_v42 = vld [vmem:[#allocation114_spill] sm:$0xff]  ;;  %v7196_v5 = vld [vmem:[#allocation112_spill] sm:$0xff] }
 0x193   :  { %v1259_v47 = vadd.f32 %v1252_v17, %v1242_v14  ;;  %v1725_v16 = vsub.f32 %v7150_v38, %v5250_v18  ;;  %v5278_v60 = vmul.f32 %v5261_v10, %v7172_v42  ;;  %v1346_v17 = vmul.f32 %v5203_v41, %v7172_v42 }
 0x194   :  { %v404_v37 = vrot.slane %v403_v53, 1  ;;  %v1189_v4 = vadd.f32 %v1181_v51, %v1172_v35  ;;  %v1726_v45 = vsub.f32 %v7152_v46, %v5250_v18  ;;  %v1727_v51 = vsub.f32 %v7153_v1, %v5250_v18  ;;  %v5295_v35 = vld [vmem:[%s6774_s4 + $0x170] sm:$0xff]  ;;  %v7195_v1 = vld [vmem:[#allocation106_spill] sm:$0xff] }
 0x195   :  { %v1275_v34 = vadd.f32 %v1269_v30, %v1259_v47  ;;  %v1735_v23 = vmul.f32 1.442695, %v1725_v16  ;;  %v1354_v55 = vadd.f32 %v1346_v17, %v1336_v54  ;;  %v7174_v30 = vld [vmem:[#allocation38_spill] sm:$0xff]  ;;  %v1749_v54 = vmul.f32 1.442695, %v1732_v56 }
 0x196   :  { %v405_v63 = vadd.f32 %v404_v37, %v403_v53  ;;  %v1733_v53 = vmul.f32 1.442695, %v1724_v26  ;;  %v1207_v14 = vadd.f32 %v1199_v21, %v1189_v4  ;;  %v7173_v37 = vld [vmem:[#allocation123_spill] sm:$0xff]  ;;  %v1737_v19 = vmul.f32 1.442695, %v1726_v45 }
 0x197   :  { %v1299_v15 = vadd.f32 %v5238_v22, %v1275_v34  ;;  %v1364_v38 = vmul.f32 %v5248_v52, %v7173_v37  ;;  %v1382_v62 = vmul.f32 %v5261_v10, %v7174_v30  ;;  %v1728_v26 = vsub.f32 %v7154_v29, %v5250_v18  ;;  %v7175_v34 = vld [vmem:[#allocation31_spill] sm:$0xff] }
 0x198   :  { %3817 = vrcp.f32 %v405_v63  ;;  %v1225_v21 = vadd.f32 %v1217_v44, %v1207_v14  ;;  %v1739_v16 = vmul.f32 1.442695, %v1727_v51  ;;  %v1399_v4 = vmul.f32 %v5295_v35, %v7175_v34  ;;  %v5308_v44 = vld [vmem:[%s6774_s4 + $0x60] sm:$0xff] }
 0x199   :  { %3819 = vpow2.f32 %v1733_v53  ;;  %v1316_v47 = vadd.f32 %v5266_v59, %v1299_v15  ;;  %v1372_v63 = vadd.f32 %v1364_v38, %v1354_v55  ;;  %v1741_v15 = vmul.f32 1.442695, %v1728_v26 }
 0x19a   :  { %3821 = vpow2.f32 %v1735_v23  ;;  %v1243_v45 = vadd.f32 %v1235_v0, %v1225_v21  ;;  %v1729_v23 = vsub.f32 %v4860_v27, %v5250_v18  ;;  %v1397_v38 = vmul.f32 %v5295_v35, %v7173_v37  ;;  %v5314_v0 = vld [vmem:[%s6774_s4 + $0x28] sm:$0xff] }
 0x19b   :  { %3823 = vpow2.f32 %v1737_v19  ;;  %v1334_v17 = vadd.f32 %v1326_v24, %v1316_v47  ;;  %v1389_v53 = vadd.f32 %v1382_v62, %v1372_v63  ;;  %v7176_v24 = vld [vmem:[#allocation93_spill] sm:$0xff]  ;;  %v1730_v19 = vsub.f32 %v4882_v61, %v5250_v18  ;;  %v5477_v61 = vld [vmem:[%s6774_s4 + $0xa0] sm:$0xff]  ;;  %v5482_v27 = vld [vmem:[%s6774_s4 + $0x148] sm:$0xff] }
 0x19c   :  { %3825 = vpow2.f32 %v1739_v16  ;;  %v1260_v56 = vadd.f32 %v1253_v20, %v1243_v45  ;;  %v1270_v55 = vmul.f32 %v4917_v39, %v7176_v24  ;;  %v1743_v62 = vmul.f32 1.442695, %v1729_v23  ;;  %v7177_v63 = vld [vmem:[#allocation105_spill] sm:$0xff] }
 0x19d   :  { %v1352_v14 = vadd.f32 %v5218_v57, %v1334_v17  ;;  %v1405_v51 = vadd.f32 %v1399_v4, %v1389_v53  ;;  %3827 = vpow2.f32 %v1741_v15  ;;  %v5321_v47 = vmul.f32 0.0, %v5314_v0 }
 0x19e   :  { %3829 = vpow2.f32 %v1749_v54  ;;  %v1276_v21 = vadd.f32 %v1270_v55, %v1260_v56  ;;  %v1438_v26 = vmul.f32 %v5308_v44, %v7177_v63  ;;  %v1731_v20 = vsub.f32 %v4895_v40, %v5250_v18 }
 0x19f   :  { %v1370_v57 = vadd.f32 %v1362_v6, %v1352_v14  ;;  %3831 = vpow2.f32 %v1743_v62  ;;  %v1745_v39 = vmul.f32 1.442695, %v1730_v19  ;;  %v1429_v4 = vadd.f32 %v5321_v47, %v1405_v51 }
 0x1a0   :  { %v1300_v55 = vadd.f32 %v5238_v22, %v1276_v21  ;;  %v1582_v29 = vmul.f32 0.0, %v5477_v61 }
 0x1a1   :  { %3833 = vpow2.f32 %v1745_v39  ;;  %v1387_v24 = vadd.f32 %v5278_v60, %v1370_v57  ;;  %v1446_v19 = vadd.f32 %v1438_v26, %v1429_v4  ;;  %v5367_v39 = vmul.f32 0.0, %v5308_v44  ;;  %v5381_v4 = vld [vmem:[%s6774_s4 + $0xd0] sm:$0xff] }
 0x1a2   :  { %v3818_v16 = vpop.eup %3817 }
 0x1a3   :  { %v409_v17 = vmul.f32 %v3818_v16, %v5115_v48  ;;  %v407_v45 = vmul.f32 %v3818_v16, %v5106_v7  ;;  %v410_v53 = vmul.f32 %v3818_v16, %v5125_v33  ;;  %v408_v6 = vmul.f32 %v3818_v16, %v5109_v12  ;;  %v5332_v54 = vpop.eup %3819  ;;  %v5341_v48 = vld [vmem:[%s6774_s4 + $0x98] sm:$0xff] }
 0x1a4   :  { %7178 = vst [vmem:[#allocation32_spill] sm:$0xff] %v5332_v54  ;;  %v412_v23 = vmul.f32 %v3818_v16, %v5154_v8  ;;  %v411_v15 = vmul.f32 %v3818_v16, %v5139_v31  ;;  %v414_v18 = vmul.f32 %v3818_v16, %v5172_v28  ;;  %v413_v14 = vmul.f32 %v3818_v16, %v5162_v13  ;;  %v5343_v7 = vpop.eup %3821  ;;  %v7180_v28 = vld [vmem:[#allocation109_spill] sm:$0xff] }
 0x1a5   :  { %7179 = vst [vmem:[#allocation37_spill] sm:$0xff] %v5343_v7  ;;  %429 = vrot.lane.b32.xlu1 %v409_v17, %s3849_s29  ;;  %425 = vrot.lane.b32.xlu0 %v407_v45, %s3849_s29  ;;  %v5348_v12 = vmul.f32 %v3818_v16, %v5180_v32  ;;  %v1747_v33 = vmul.f32 1.442695, %v1731_v20  ;;  %v1456_v31 = vmul.f32 %v5341_v48, %v7180_v28  ;;  %v5352_v8 = vpop.eup %3823  ;;  %v1751_v13 = vsel %vm332_vm1, %v5332_v54, 0.0 }
 0x1a6   :  { %7181 = vst [vmem:[#allocation51_spill] sm:$0xff] %v5352_v8  ;;  %v1752_v56 = vsel %vm332_vm1, %v5343_v7, 0.0  ;;  %v1754_v51 = vsel %vm332_vm1, %v5352_v8, 0.0  ;;  %v5362_v62 = vpop.eup %3825  ;;  %v1327_v16 = vmul.f32 %v5230_v36, %v7165_v3  ;;  %v1403_v20 = vadd.f32 %v1397_v38, %v1387_v24 }
 0x1a7   :  { %3835 = vpow2.f32 %v1747_v33  ;;  %v1753_v32 = vadd.f32 %v1752_v56, %v1751_v13  ;;  %7182 = vst [vmem:[#allocation36_spill] sm:$0xff] %v5362_v62  ;;  %v1317_v17 = vadd.f32 %v5266_v59, %v1300_v55  ;;  %v1756_v60 = vsel %vm332_vm1, %v5362_v62, 0.0  ;;  %v5374_v21 = vpop.eup %3827  ;;  %v7197_v62 = vld [vmem:[#allocation119_spill] sm:$0xff] }
 0x1a8   :  { %v1464_v57 = vadd.f32 %v1456_v31, %v1446_v19  ;;  %7183 = vst [vmem:[#allocation43_spill] sm:$0xff] %v5374_v21  ;;  %v1427_v26 = vadd.f32 %v5321_v47, %v1403_v20  ;;  %v1454_v38 = vmul.f32 0.0, %v5341_v48  ;;  %v5383_v45 = vpop.eup %3829  ;;  %v1758_v33 = vsel %vm332_vm1, %v5374_v21, 0.0  ;;  %v7185_v31 = vld [vmem:[#allocation115_spill] sm:$0xff] }
 0x1a9   :  { %431 = vrot.lane.b32.xlu1 %v410_v53, %s3849_s29  ;;  %427 = vrot.lane.b32.xlu0 %v408_v6, %s3849_s29  ;;  %v1755_v22 = vadd.f32 %v1754_v51, %v1753_v32  ;;  %v1335_v59 = vadd.f32 %v1327_v16, %v1317_v17  ;;  %7184 = vst [vmem:[#allocation68_spill] sm:$0xff] %v5383_v45  ;;  %v5391_v56 = vpop.eup %3831  ;;  %v5403_v51 = vld [vmem:[%s6774_s4 + $0x108] sm:$0xff] }
 0x1aa   :  { %v1294_v53 = vmul.f32 %v5225_v49, %v7165_v3  ;;  %v1474_v13 = vmul.f32 %v5381_v4, %v7185_v31  ;;  %7186 = vst [vmem:[#allocation52_spill] sm:$0xff] %v5391_v56  ;;  %v1444_v24 = vadd.f32 %v5367_v39, %v1427_v26  ;;  %v1345_v55 = vmul.f32 %v5203_v41, %v7168_v50  ;;  %v7188_v26 = vld [vmem:[#allocation124_spill] sm:$0xff] }
 0x1ab   :  { %v1757_v6 = vadd.f32 %v1756_v60, %v1755_v22  ;;  %v1760_v3 = vsel %vm332_vm1, %v5391_v56, 0.0  ;;  %v1472_v17 = vmul.f32 %v5381_v4, %v7177_v63  ;;  %v5413_v22 = vpop.eup %3833 }
 0x1ac   :  { %v1482_v19 = vadd.f32 %v1474_v13, %v1464_v57  ;;  %v1302_v16 = vadd.f32 %v1294_v53, %v5047_v58  ;;  %v1462_v20 = vadd.f32 %v1454_v38, %v1444_v24  ;;  %7187 = vst [vmem:[#allocation87_spill] sm:$0xff] %v5413_v22  ;;  %v1762_v57 = vsel %vm332_vm1, %v5413_v22, 0.0  ;;  %v5432_v24 = vld [vmem:[%s6774_s4 + $0x178] sm:$0xff] }
 0x1ad   :  { %435 = vrot.lane.b32.xlu1 %v412_v23, %s3849_s29  ;;  %433 = vrot.lane.b32.xlu0 %v411_v15, %s3849_s29  ;;  %v1759_v32 = vadd.f32 %v1758_v33, %v1757_v6  ;;  %v5411_v23 = vld [vmem:[%s6774_s4 + $0x140] sm:$0xff]  ;;  %v1353_v15 = vadd.f32 %v1345_v55, %v1335_v59  ;;  %v1492_v6 = vmul.f32 %v5403_v51, %v7188_v26 }
 0x1ae   :  { %v1480_v58 = vadd.f32 %v1472_v17, %v1462_v20  ;;  %v1490_v38 = vmul.f32 %v5403_v51, %v7180_v28  ;;  %v1363_v53 = vmul.f32 %v5248_v52, %v7172_v42  ;;  %v1508_v13 = vmul.f32 %v5411_v23, %v7185_v31 }
 0x1af   :  { %v1761_v60 = vadd.f32 %v1760_v3, %v1759_v32  ;;  %v1500_v55 = vadd.f32 %v1492_v6, %v1482_v19  ;;  %v1766_v32 = vsel %vm332_vm1, %v5383_v45, 0.0  ;;  %v1525_v19 = vmul.f32 %v5432_v24, %v7188_v26 }
 0x1b0   :  { %v1498_v20 = vadd.f32 %v1490_v38, %v1480_v58  ;;  %v1381_v58 = vmul.f32 %v5261_v10, %v7173_v37  ;;  %v5457_v38 = vld [vmem:[%s6774_s4 + $0x68] sm:$0xff] }
 0x1b1   :  { %v5423_v33 = vpop.eup %3835  ;;  %439 = vrot.lane.b32.xlu1 %v414_v18, %s3849_s29  ;;  %437 = vrot.lane.b32.xlu0 %v413_v14, %s3849_s29  ;;  %v1763_v59 = vadd.f32 %v1762_v57, %v1761_v60  ;;  %v1371_v18 = vadd.f32 %v1363_v53, %v1353_v15  ;;  %v5441_v14 = vld [vmem:[%s6774_s4 + $0x30] sm:$0xff]  ;;  %v7191_v60 = vld [vmem:[#allocation127_spill] sm:$0xff]  ;;  %7192 = vst [vmem:[#allocation57_spill] sm:$0xff] %v5457_v38  ;;  %v5462_v53 = vld [vmem:[%s6774_s4 + $0xd8] sm:$0xff] }
 0x1b2   :  { %7189 = vst [vmem:[#allocation69_spill] sm:$0xff] %v5423_v33  ;;  %v1764_v3 = vsel %vm332_vm1, %v5423_v33, 0.0  ;;  %7190 = vst [vmem:[#allocation48_spill] sm:$0xff] %v5441_v14  ;;  %v1510_v57 = vmul.f32 %v5411_v23, %v7191_v60  ;;  %v1515_v40 = vadd.f32 %v1508_v13, %v1498_v20  ;;  %v5448_v6 = vmul.f32 0.0, %v5441_v14 }
 0x1b3   :  { %v1765_v17 = vadd.f32 %v1764_v3, %v1763_v59  ;;  %v5467_v59 = vld [vmem:[%s6774_s4 + $0x110] sm:$0xff]  ;;  %v1311_v20 = vmul.f32 %v5198_v25, %v7168_v50  ;;  %v1600_v46 = vmul.f32 %v5462_v53, %v7195_v1  ;;  %v1566_v8 = vmul.f32 %v5457_v38, %v7195_v1 }
 0x1b4   :  { %v1517_v13 = vadd.f32 %v1510_v57, %v1500_v55  ;;  %v1531_v3 = vadd.f32 %v1525_v19, %v1515_v40  ;;  %v5487_v40 = vld [vmem:[%s6774_s4 + $0x180] sm:$0xff]  ;;  %v1398_v55 = vmul.f32 %v5295_v35, %v7174_v30  ;;  %v5493_v19 = vpop.f32.mrb[35].mxu0  ;;  %v1618_v14 = vmul.f32 %v5467_v59, %v7196_v5 }
 0x1b5   :  { %441 = vrot.lane.b32.xlu0 %v5348_v12, %s3849_s29  ;;  %v1767_v15 = vadd.f32 %v1766_v32, %v1765_v17  ;;  %v5470_v12 = vmul.f32 0.0, %v5457_v38  ;;  %v1388_v32 = vadd.f32 %v1381_v58, %v1371_v18  ;;  %v7193_v18 = vld [vmem:[#allocation4_spill] sm:$0xff]  ;;  %7194 = vst [vmem:[#allocation89_spill] sm:$0xff] %v5493_v19  ;;  %v1319_v56 = vadd.f32 %v1311_v20, %v1302_v16  ;;  %v7198_v19 = vld [vmem:[#allocation125_spill] sm:$0xff] }
 0x1b6   :  { %v1527_v57 = vmul.f32 %v5432_v24, %v7193_v18  ;;  %v1555_v58 = vadd.f32 %v5448_v6, %v1531_v3  ;;  %v1636_v18 = vmul.f32 %v5482_v27, %v7197_v62  ;;  %v1653_v3 = vmul.f32 %v5487_v40, %v7198_v19 }
 0x1b7   :  { %v1768_v17 = vrot.slane %v1767_v15, 4  ;;  %v1404_v33 = vadd.f32 %v1398_v55, %v1388_v32  ;;  %v1584_v32 = vmul.f32 %v5477_v61, %v7196_v5  ;;  %v1347_v20 = vmul.f32 %v5203_v41, %v7173_v37 }
 0x1b8   :  { %v1533_v22 = vadd.f32 %v1527_v57, %v1517_v13  ;;  %v1572_v21 = vadd.f32 %v5470_v12, %v1555_v58  ;;  %v1455_v13 = vmul.f32 %v5341_v48, %v7177_v63 }
 0x1b9   :  { %v1769_v45 = vadd.f32 %v1768_v17, %v1767_v15  ;;  %v1428_v54 = vadd.f32 %v5321_v47, %v1404_v33  ;;  %v1329_v15 = vmul.f32 %v5230_v36, %v7172_v42 }
 0x1ba   :  { %v1557_v11 = vadd.f32 %v5448_v6, %v1533_v22  ;;  %v1590_v16 = vadd.f32 %v1582_v29, %v1572_v21  ;;  %v1473_v22 = vmul.f32 %v5381_v4, %v7180_v28  ;;  %v1602_v29 = vmul.f32 %v5462_v53, %v7197_v62 }
 0x1bb   :  { %v1770_v7 = vrot.slane %v1769_v45, 2  ;;  %v1445_v55 = vadd.f32 %v5367_v39, %v1428_v54  ;;  %v1337_v47 = vadd.f32 %v1329_v15, %v1319_v56  ;;  %v1365_v21 = vmul.f32 %v5248_v52, %v7174_v30 }
 0x1bc   :  { %v1574_v57 = vadd.f32 %v1566_v8, %v1557_v11  ;;  %v1608_v33 = vadd.f32 %v1600_v46, %v1590_v16  ;;  %v1491_v54 = vmul.f32 %v5403_v51, %v7185_v31  ;;  %v1620_v11 = vmul.f32 %v5467_v59, %v7198_v19  ;;  %v7199_v16 = vld [vmem:[#allocation128_spill] sm:$0xff] }
 0x1bd   :  { %v1771_v17 = vadd.f32 %v1770_v7, %v1769_v45  ;;  %v1463_v38 = vadd.f32 %v1455_v13, %v1445_v55  ;;  %v1355_v36 = vadd.f32 %v1347_v20, %v1337_v47  ;;  %v1383_v46 = vmul.f32 %v5261_v10, %v7175_v34 }
 0x1be   :  { %v1592_v5 = vadd.f32 %v1584_v32, %v1574_v57  ;;  %v1626_v41 = vadd.f32 %v1618_v14, %v1608_v33  ;;  %v1509_v15 = vmul.f32 %v5411_v23, %v7188_v26  ;;  %v1638_v14 = vmul.f32 %v5482_v27, %v7199_v16  ;;  %v5540_v32 = vld [vmem:[%s6775_s5] sm:$0xff] }
 0x1bf   :  { %v1772_v58 = vrot.slane %v1771_v17, 1  ;;  %v1481_v8 = vadd.f32 %v1473_v22, %v1463_v38  ;;  %v1373_v45 = vadd.f32 %v1365_v21, %v1355_v36  ;;  %v1400_v13 = vmul.f32 %v5295_v35, %v4990_v9 }
 0x1c0   :  { %v1610_v39 = vadd.f32 %v1602_v29, %v1592_v5  ;;  %v1643_v56 = vadd.f32 %v1636_v18, %v1626_v41  ;;  %v1295_v41 = vmul.f32 %v5225_v49, %v7168_v50  ;;  %v1526_v18 = vmul.f32 %v5432_v24, %v7191_v60 }
 0x1c1   :  { %v1773_v7 = vadd.f32 %v1772_v58, %v1771_v17  ;;  %v1499_v20 = vadd.f32 %v1491_v54, %v1481_v8  ;;  %v1390_v5 = vadd.f32 %v1383_v46, %v1373_v45  ;;  %v7200_v17 = vld [vmem:[#allocation49_spill] sm:$0xff]  ;;  %v1422_v22 = vmul.f32 %v5314_v0, %v7177_v63 }
 0x1c2   :  { %v1628_v38 = vadd.f32 %v1620_v11, %v1610_v39  ;;  %v1659_v36 = vadd.f32 %v1653_v3, %v1643_v56  ;;  %v1655_v55 = vmul.f32 %v5487_v40, %v7200_v17  ;;  %v1303_v29 = vadd.f32 %v1295_v41, %v5101_v2 }
 0x1c3   :  { %3837 = vrcp.f32 %v1773_v7  ;;  %v1516_v57 = vadd.f32 %v1509_v15, %v1499_v20  ;;  %v1406_v33 = vadd.f32 %v1400_v13, %v1390_v5  ;;  %v1439_v3 = vmul.f32 %v5308_v44, %v7180_v28  ;;  %v3843_v5 = vld [vmem:[%s6774_s4 + $0x168] sm:$0xff] }
 0x1c4   :  { %v1645_v47 = vadd.f32 %v1638_v14, %v1628_v38  ;;  %v1668_v21 = vadd.f32 %v5540_v32, %v1659_v36  ;;  %v1312_v11 = vmul.f32 %v5198_v25, %v7172_v42  ;;  %v1457_v2 = vmul.f32 %v5341_v48, %v7185_v31  ;;  %v7202_v14 = vld [vmem:[#allocation6_spill] sm:$0xff]  ;;  %v7205_v36 = vld [vmem:[#allocation112_spill] sm:$0xff] }
 0x1c5   :  { %v1532_v58 = vadd.f32 %v1526_v18, %v1516_v57  ;;  %v1430_v50 = vadd.f32 %v1422_v22, %v1406_v33  ;;  %v1583_v39 = vmul.f32 %v5477_v61, %v7195_v1  ;;  %v1475_v45 = vmul.f32 %v5381_v4, %v7188_v26  ;;  %v7206_v22 = vld [vmem:[#allocation18_spill] sm:$0xff] }
 0x1c6   :  { %v1661_v54 = vadd.f32 %v1655_v55, %v1645_v47  ;;  %v5557_v46 = vmul.f32 %v1668_v21, %v7132_v43  ;;  %v1320_v56 = vadd.f32 %v1312_v11, %v1303_v29  ;;  %v5576_v41 = vmul.f32 0.0, %v3843_v5  ;;  %v7207_v21 = vld [vmem:[#allocation32_spill] sm:$0xff] }
 0x1c7   :  { %v1556_v7 = vadd.f32 %v5448_v6, %v1532_v58  ;;  %v1447_v8 = vadd.f32 %v1439_v3, %v1430_v50  ;;  %v7204_v6 = vld [vmem:[#allocation12_spill] sm:$0xff]  ;;  %v1601_v18 = vmul.f32 %v5462_v53, %v7205_v36  ;;  %v1493_v55 = vmul.f32 %v5403_v51, %v7191_v60  ;;  %v7209_v3 = vld [vmem:[#allocation51_spill] sm:$0xff] }
 0x1c8   :  { %7201 = vst [vmem:[#allocation70_spill] sm:$0xff] %v5557_v46  ;;  %v1670_v63 = vadd.f32 %v5540_v32, %v1661_v54  ;;  %v1330_v38 = vmul.f32 %v7204_v6, %v7173_v37  ;;  %v1348_v29 = vmul.f32 %v7206_v22, %v7174_v30  ;;  %v7208_v54 = vld [vmem:[#allocation37_spill] sm:$0xff]  ;;  %v7212_v5 = vld [vmem:[#allocation52_spill] sm:$0xff] }
 0x1c9   :  { %v1573_v15 = vadd.f32 %v5470_v12, %v1556_v7  ;;  %v1465_v20 = vadd.f32 %v1457_v2, %v1447_v8  ;;  %v7210_v7 = vld [vmem:[#allocation36_spill] sm:$0xff]  ;;  %v7211_v8 = vld [vmem:[#allocation43_spill] sm:$0xff] }
 0x1ca   :  { %v5569_v13 = vmul.f32 %v1670_v63, %v7202_v14  ;;  %v1338_v33 = vadd.f32 %v1330_v38, %v1320_v56  ;;  %v7216_v56 = vld [vmem:[#allocation69_spill] sm:$0xff] }
 0x1cb   :  { %v1591_v57 = vadd.f32 %v1583_v39, %v1573_v15  ;;  %v1483_v47 = vadd.f32 %v1475_v45, %v1465_v20  ;;  %v7214_v39 = vld [vmem:[#allocation87_spill] sm:$0xff]  ;;  %v7218_v20 = vld [vmem:[#allocation16_spill] sm:$0xff] }
 0x1cc   :  { %7203 = vst [vmem:[#allocation90_spill] sm:$0xff] %v5569_v13  ;;  %v1280_v38 = vadd.f32 %v5576_v41, %v7218_v20  ;;  %v1356_v46 = vadd.f32 %v1348_v29, %v1338_v33  ;;  %v1296_v20 = vmul.f32 %v5225_v49, %v7172_v42  ;;  %v1384_v29 = vmul.f32 %v5261_v10, %v4990_v9  ;;  %v3845_v42 = vld [vmem:[%s6774_s4 + $0x130] sm:$0xff] }
 0x1cd   :  { %v3838_v12 = vpop.eup %3837  ;;  %v1258_v14 = vmul.f32 0.0, %v3845_v42  ;;  %v1585_v42 = vmul.f32 %v5477_v61, %v7197_v62 }
 0x1ce   :  { %v1775_v58 = vmul.f32 %v3838_v12, %v7207_v21  ;;  %v1776_v50 = vmul.f32 %v3838_v12, %v7208_v54  ;;  %v1777_v11 = vmul.f32 %v3838_v12, %v7209_v3  ;;  %v1778_v63 = vmul.f32 %v3838_v12, %v7210_v7  ;;  %v7219_v21 = vld [vmem:[#allocation68_spill] sm:$0xff] }
 0x1cf   :  { %v5589_v2 = vmul.f32 %v3838_v12, %v7211_v8  ;;  %v5592_v13 = vmul.f32 %v3838_v12, %v7212_v5  ;;  %v5595_v45 = vmul.f32 %v3838_v12, %v7214_v39  ;;  %v5598_v15 = vmul.f32 %v3838_v12, %v7216_v56  ;;  %v7221_v5 = vld [vmem:[#allocation4_spill] sm:$0xff] }
 0x1d0   :  { %1793 = vrot.lane.b32.xlu0 %v1775_v58, %s3849_s29  ;;  %v5604_v54 = vmul.f32 %v3838_v12, %v7219_v21  ;;  %v1609_v3 = vadd.f32 %v1601_v18, %v1591_v57  ;;  %v1619_v7 = vmul.f32 %v5467_v59, %v7197_v62  ;;  %v1501_v8 = vadd.f32 %v1493_v55, %v1483_v47  ;;  %v3844_v12 = vld [vmem:[%s6774_s4 + $0xf8] sm:$0xff]  ;;  %v7222_v47 = vld [vmem:[#allocation64_spill] sm:$0xff] }
 0x1d1   :  { %7213 = vst [vmem:[#allocation62_spill] sm:$0xff] %v5592_v13  ;;  %7215 = vst [vmem:[#allocation76_spill] sm:$0xff] %v5595_v45  ;;  %v1511_v39 = vmul.f32 %v5411_v23, %v7221_v5  ;;  %v1366_v56 = vmul.f32 %v5248_v52, %v7175_v34  ;;  %v1241_v58 = vmul.f32 0.0, %v3844_v12  ;;  %v1637_v57 = vmul.f32 %v5482_v27, %v7198_v19 }
 0x1d2   :  { %7217 = vst [vmem:[#allocation91_spill] sm:$0xff] %v5598_v15  ;;  %7220 = vst [vmem:[#allocation84_spill] sm:$0xff] %v5604_v54  ;;  %v1627_v18 = vadd.f32 %v1619_v7, %v1609_v3  ;;  %v1528_v21 = vmul.f32 %v5432_v24, %v7222_v47  ;;  %v1304_v43 = vadd.f32 %v1296_v20, %v1280_v38  ;;  %v7225_v15 = vld [vmem:[#allocation78_spill] sm:$0xff] }
 0x1d3   :  { %v1518_v55 = vadd.f32 %v1511_v39, %v1501_v8  ;;  %v1374_v33 = vadd.f32 %v1366_v56, %v1356_v46  ;;  %v1654_v7 = vmul.f32 %v5487_v40, %v7199_v16  ;;  %v7223_v39 = vld [vmem:[#allocation48_spill] sm:$0xff]  ;;  %v7224_v56 = vld [vmem:[#allocation58_spill] sm:$0xff]  ;;  %v1249_v45 = vadd.f32 %v1241_v58, %v7225_v15 }
 0x1d4   :  { %1795 = vrot.lane.b32.xlu0 %v1776_v50, %s3849_s29  ;;  %v1644_v3 = vadd.f32 %v1637_v57, %v1627_v18  ;;  %v1550_v12 = vmul.f32 %v7223_v39, %v7195_v1  ;;  %v1401_v54 = vmul.f32 %v5295_v35, %v7224_v56  ;;  %v1313_v38 = vmul.f32 %v5198_v25, %v7173_v37  ;;  %v7226_v50 = vld [vmem:[#allocation57_spill] sm:$0xff] }
 0x1d5   :  { %v1534_v8 = vadd.f32 %v1528_v21, %v1518_v55  ;;  %v1391_v46 = vadd.f32 %v1384_v29, %v1374_v33  ;;  %v1567_v18 = vmul.f32 %v7226_v50, %v7205_v36  ;;  %v1423_v55 = vmul.f32 %v5314_v0, %v7180_v28  ;;  %v7227_v21 = vld [vmem:[#allocation92_spill] sm:$0xff] }
 0x1d6   :  { %v1660_v13 = vadd.f32 %v1654_v7, %v1644_v3  ;;  %v1265_v1 = vadd.f32 %v1258_v14, %v7227_v21  ;;  %v1321_v29 = vadd.f32 %v1313_v38, %v1304_v43  ;;  %v1331_v15 = vmul.f32 %v7204_v6, %v7174_v30  ;;  %v7228_v7 = vld [vmem:[#allocation5_spill] sm:$0xff] }
 0x1d7   :  { %v1558_v20 = vadd.f32 %v1550_v12, %v1534_v8  ;;  %v1407_v57 = vadd.f32 %v1401_v54, %v1391_v46  ;;  %v1440_v54 = vmul.f32 %v5308_v44, %v7185_v31  ;;  %v5651_v28 = vmul.f32 %v5198_v25, %v7175_v34 }
 0x1d8   :  { %1797 = vrot.lane.b32.xlu0 %v1777_v11, %s3849_s29  ;;  %v1669_v33 = vadd.f32 %v5540_v32, %v1660_v13  ;;  %v1339_v13 = vadd.f32 %v1331_v15, %v1321_v29  ;;  %v1349_v43 = vmul.f32 %v7206_v22, %v7175_v34  ;;  %v1603_v12 = vmul.f32 %v5462_v53, %v7198_v19 }
 0x1d9   :  { %v1575_v58 = vadd.f32 %v1567_v18, %v1558_v20  ;;  %v1431_v3 = vadd.f32 %v1423_v55, %v1407_v57  ;;  %v1458_v38 = vmul.f32 %v5341_v48, %v7188_v26  ;;  %v1266_v20 = vadd.f32 %v1258_v14, %v1249_v45 }
 0x1da   :  { %v5654_v11 = vmul.f32 %v1669_v33, %v7228_v7  ;;  %v1281_v18 = vadd.f32 %v5576_v41, %v1265_v1  ;;  %v1357_v57 = vadd.f32 %v1349_v43, %v1339_v13  ;;  %v1367_v55 = vmul.f32 %v5248_v52, %v4990_v9 }
 0x1db   :  { %v1593_v8 = vadd.f32 %v1585_v42, %v1575_v58  ;;  %v1448_v46 = vadd.f32 %v1440_v54, %v1431_v3  ;;  %v1621_v33 = vmul.f32 %v5467_v59, %v7199_v16  ;;  %v1476_v15 = vmul.f32 %v5381_v4, %v7191_v60 }
 0x1dc   :  { %1799 = vrot.lane.b32.xlu0 %v1778_v63, %s3849_s29  ;;  %v1375_v58 = vadd.f32 %v1367_v55, %v1357_v57  ;;  %v1385_v14 = vmul.f32 %v5261_v10, %v7224_v56  ;;  %v5673_v45 = vmul.f32 0.0, %v5295_v35  ;;  %v1297_v63 = vmul.f32 %v5225_v49, %v7173_v37 }
 0x1dd   :  { %v1611_v21 = vadd.f32 %v1603_v12, %v1593_v8  ;;  %v1466_v29 = vadd.f32 %v1458_v38, %v1448_v46  ;;  %v1639_v42 = vmul.f32 %v5482_v27, %v7200_v17  ;;  %v1494_v54 = vmul.f32 %v5403_v51, %v7221_v5  ;;  %v7229_v12 = vld [vmem:[#allocation10_spill] sm:$0xff] }
 0x1de   :  { %v1368_v13 = vmul.f32 %v5248_v52, %v7224_v56  ;;  %v1392_v43 = vadd.f32 %v1385_v14, %v1375_v58  ;;  %v1305_v35 = vadd.f32 %v1297_v63, %v1281_v18  ;;  %v1314_v8 = vmul.f32 %v5198_v25, %v7174_v30  ;;  %v7231_v14 = vld [vmem:[#allocation62_spill] sm:$0xff] }
 0x1df   :  { %v1629_v1 = vadd.f32 %v1621_v33, %v1611_v21  ;;  %v1484_v3 = vadd.f32 %v1476_v15, %v1466_v29  ;;  %v1656_v46 = vmul.f32 %v5487_v40, %v7229_v12  ;;  %v1512_v57 = vmul.f32 %v5411_v23, %v7222_v47  ;;  %v7230_v15 = vld [vmem:[#allocation71_spill] sm:$0xff] }
 0x1e0   :  { %1801 = vrot.lane.b32.xlu0 %v5589_v2, %s3849_s29  ;;  %v1408_v55 = vadd.f32 %v5673_v45, %v1392_v43  ;;  %v1424_v21 = vmul.f32 %v5314_v0, %v7185_v31  ;;  %v1322_v33 = vadd.f32 %v1314_v8, %v1305_v35  ;;  %v1332_v2 = vmul.f32 %v7204_v6, %v7175_v34 }
 0x1e1   :  { %v1646_v37 = vadd.f32 %v1639_v42, %v1629_v1  ;;  %v1502_v38 = vadd.f32 %v1494_v54, %v1484_v3  ;;  %v1282_v18 = vadd.f32 %v5576_v41, %v1266_v20  ;;  %v1529_v58 = vmul.f32 %v5432_v24, %v7230_v15 }
 0x1e2   :  { %v1432_v63 = vadd.f32 %v1424_v21, %v1408_v55  ;;  %v1441_v1 = vmul.f32 %v5308_v44, %v7188_v26  ;;  %v1340_v42 = vadd.f32 %v1332_v2, %v1322_v33  ;;  %v1350_v31 = vmul.f32 %v7206_v22, %v4990_v9  ;;  %v7233_v55 = vld [vmem:[#allocation76_spill] sm:$0xff] }
 0x1e3   :  { %v1662_v25 = vadd.f32 %v1656_v46, %v1646_v37  ;;  %v1519_v29 = vadd.f32 %v1512_v57, %v1502_v38  ;;  %v1551_v41 = vmul.f32 %v7223_v39, %v7205_v36  ;;  %v1459_v20 = vmul.f32 %v5341_v48, %v7191_v60  ;;  %v7232_v46 = vld [vmem:[#allocation7_spill] sm:$0xff] }
 0x1e4   :  { %1803 = vrot.lane.b32.xlu0 %v7231_v14, %s3849_s29  ;;  %v1449_v54 = vadd.f32 %v1441_v1, %v1432_v63  ;;  %v1358_v43 = vadd.f32 %v1350_v31, %v1340_v42  ;;  %v1386_v35 = vmul.f32 0.0, %v5261_v10  ;;  %v1298_v8 = vmul.f32 %v5225_v49, %v7174_v30 }
 0x1e5   :  { %v1671_v34 = vadd.f32 %v5540_v32, %v1662_v25  ;;  %v1535_v3 = vadd.f32 %v1529_v58, %v1519_v29  ;;  %v1333_v37 = vmul.f32 %v7204_v6, %v4990_v9  ;;  %v1568_v36 = vmul.f32 %v7226_v50, %v7197_v62 }
 0x1e6   :  { %v1467_v21 = vadd.f32 %v1459_v20, %v1449_v54  ;;  %v1477_v10 = vmul.f32 %v5381_v4, %v7221_v5  ;;  %v1376_v33 = vadd.f32 %v1368_v13, %v1358_v43  ;;  %v1306_v2 = vadd.f32 %v1298_v8, %v1282_v18  ;;  %v7234_v18 = vld [vmem:[#allocation91_spill] sm:$0xff] }
 0x1e7   :  { %v5716_v38 = vmul.f32 %v1671_v34, %v7232_v46  ;;  %v1559_v57 = vadd.f32 %v1551_v41, %v1535_v3  ;;  %v1351_v49 = vmul.f32 %v7206_v22, %v7224_v56  ;;  %v1586_v30 = vmul.f32 %v5477_v61, %v7198_v19 }
 0x1e8   :  { %1805 = vrot.lane.b32.xlu0 %v7233_v55, %s3849_s29  ;;  %v1604_v6 = vmul.f32 %v5462_v53, %v7199_v16  ;;  %v1485_v25 = vadd.f32 %v1477_v10, %v1467_v21  ;;  %v1495_v29 = vmul.f32 %v5403_v51, %v7222_v47  ;;  %v1393_v58 = vadd.f32 %v1386_v35, %v1376_v33  ;;  %v7236_v10 = vld [vmem:[#allocation41_spill] sm:$0xff] }
 0x1e9   :  { %v1576_v9 = vadd.f32 %v1568_v36, %v1559_v57  ;;  %v1323_v14 = vadd.f32 %v5651_v28, %v1306_v2  ;;  %v1513_v13 = vmul.f32 %v5411_v23, %v7230_v15  ;;  %v5736_v22 = vmul.f32 0.0, %v5432_v24 }
 0x1ea   :  { %v1425_v56 = vmul.f32 %v5314_v0, %v7188_v26  ;;  %v1503_v1 = vadd.f32 %v1495_v29, %v1485_v25  ;;  %v1409_v42 = vadd.f32 %v5673_v45, %v1393_v58  ;;  %v1369_v34 = vmul.f32 0.0, %v5248_v52 }
 0x1eb   :  { %v1594_v63 = vadd.f32 %v1586_v30, %v1576_v9  ;;  %v1341_v31 = vadd.f32 %v1333_v37, %v1323_v14  ;;  %v1622_v3 = vmul.f32 %v5467_v59, %v7200_v17  ;;  %v1442_v24 = vmul.f32 %v5308_v44, %v7191_v60  ;;  %v7235_v37 = vld [vmem:[#allocation84_spill] sm:$0xff] }
 0x1ec   :  { %1807 = vrot.lane.b32.xlu0 %v7234_v18, %s3849_s29  ;;  %v1520_v41 = vadd.f32 %v1513_v13, %v1503_v1  ;;  %v1433_v20 = vadd.f32 %v1425_v56, %v1409_v42  ;;  %v1640_v43 = vmul.f32 %v5482_v27, %v7229_v12  ;;  %v1552_v8 = vmul.f32 %v7223_v39, %v7197_v62 }
 0x1ed   :  { %v1612_v28 = vadd.f32 %v1604_v6, %v1594_v63  ;;  %v1359_v54 = vadd.f32 %v1351_v49, %v1341_v31  ;;  %v1460_v36 = vmul.f32 %v5341_v48, %v7221_v5  ;;  %v1657_v33 = vmul.f32 %v5487_v40, %v7236_v10 }
 0x1ee   :  { %v1536_v52 = vadd.f32 %v5736_v22, %v1520_v41  ;;  %v1450_v57 = vadd.f32 %v1442_v24, %v1433_v20  ;;  %v1569_v2 = vmul.f32 %v7226_v50, %v7198_v19  ;;  %v1478_v62 = vmul.f32 %v5381_v4, %v7222_v47 }
 0x1ef   :  { %v1630_v26 = vadd.f32 %v1622_v3, %v1612_v28  ;;  %v1377_v55 = vadd.f32 %v1369_v34, %v1359_v54  ;;  %v1587_v25 = vmul.f32 %v5477_v61, %v7199_v16  ;;  %v1496_v29 = vmul.f32 %v5403_v51, %v7230_v15  ;;  %v7237_v28 = vld [vmem:[#allocation8_spill] sm:$0xff] }
 0x1f0   :  { %1809 = vrot.lane.b32.xlu0 %v7235_v37, %s3849_s29  ;;  %v1560_v49 = vadd.f32 %v1552_v8, %v1536_v52  ;;  %v1468_v9 = vadd.f32 %v1460_v36, %v1450_v57  ;;  %v1514_v58 = vmul.f32 0.0, %v5411_v23  ;;  %v1426_v56 = vmul.f32 %v5314_v0, %v7191_v60 }
 0x1f1   :  { %v1647_v21 = vadd.f32 %v1640_v43, %v1630_v26  ;;  %v1394_v30 = vadd.f32 %v1386_v35, %v1377_v55  ;;  %v1605_v35 = vmul.f32 %v5462_v53, %v7200_v17  ;;  %v1443_v34 = vmul.f32 %v5308_v44, %v7221_v5 }
 0x1f2   :  { %v1577_v14 = vadd.f32 %v1569_v2, %v1560_v49  ;;  %v1486_v63 = vadd.f32 %v1478_v62, %v1468_v9  ;;  %v1461_v60 = vmul.f32 %v5341_v48, %v7222_v47  ;;  %v1641_v20 = vmul.f32 %v5482_v27, %v7236_v10 }
 0x1f3   :  { %v1663_v6 = vadd.f32 %v1657_v33, %v1647_v21  ;;  %v1410_v13 = vadd.f32 %v5673_v45, %v1394_v30  ;;  %v1623_v45 = vmul.f32 %v5467_v59, %v7229_v12  ;;  %v1658_v24 = vmul.f32 0.0, %v5487_v40 }
 0x1f4   :  { %v1595_v1 = vadd.f32 %v1587_v25, %v1577_v14  ;;  %v1504_v42 = vadd.f32 %v1496_v29, %v1486_v63  ;;  %v1553_v44 = vmul.f32 %v7223_v39, %v7198_v19  ;;  %v1479_v5 = vmul.f32 %v5381_v4, %v7230_v15 }
 0x1f5   :  { %v1672_v18 = vadd.f32 %v5540_v32, %v1663_v6  ;;  %v1434_v31 = vadd.f32 %v1426_v56, %v1410_v13  ;;  %v1497_v8 = vmul.f32 0.0, %v5403_v51  ;;  %v1570_v48 = vmul.f32 %v7226_v50, %v7199_v16  ;;  %v7238_v51 = vld [vmem:[#allocation9_spill] sm:$0xff] }
 0x1f6   :  { %v1613_v3 = vadd.f32 %v1605_v35, %v1595_v1  ;;  %v1521_v41 = vadd.f32 %v1514_v58, %v1504_v42  ;;  %v1588_v19 = vmul.f32 %v5477_v61, %v7200_v17  ;;  %v1606_v55 = vmul.f32 %v5462_v53, %v7229_v12 }
 0x1f7   :  { %v5777_v23 = vmul.f32 %v1672_v18, %v7237_v28  ;;  %v1451_v0 = vadd.f32 %v1443_v34, %v1434_v31  ;;  %v1624_v49 = vmul.f32 %v5467_v59, %v7236_v10  ;;  %v1642_v9 = vmul.f32 0.0, %v5482_v27 }
 0x1f8   :  { %v1631_v54 = vadd.f32 %v1623_v45, %v1613_v3  ;;  %v1537_v26 = vadd.f32 %v5736_v22, %v1521_v41  ;;  %v1554_v30 = vmul.f32 %v7223_v39, %v7199_v16  ;;  %v1571_v29 = vmul.f32 %v7226_v50, %v7200_v17  ;;  %v7239_v39 = vld [vmem:[#allocation13_spill] sm:$0xff] }
 0x1f9   :  { %v1469_v43 = vadd.f32 %v1461_v60, %v1451_v0  ;;  %v1589_v63 = vmul.f32 %v5477_v61, %v7229_v12  ;;  %v1607_v27 = vmul.f32 %v5462_v53, %v7236_v10  ;;  %v1625_v16 = vmul.f32 0.0, %v5467_v59  ;;  %v7240_v61 = vld [vmem:[#allocation26_spill] sm:$0xff] }
 0x1fa   :  { %v1648_v37 = vadd.f32 %v1641_v20, %v1631_v54  ;;  %v1561_v52 = vadd.f32 %v1553_v44, %v1537_v26 }
 0x1fb   :  { %v1487_v47 = vadd.f32 %v1479_v5, %v1469_v43 }
 0x1fc   :  { %v1664_v57 = vadd.f32 %v1658_v24, %v1648_v37  ;;  %v1578_v40 = vadd.f32 %v1570_v48, %v1561_v52 }
 0x1fd   :  { %v1505_v36 = vadd.f32 %v1497_v8, %v1487_v47 }
 0x1fe   :  { %v1673_v4 = vadd.f32 %v5540_v32, %v1664_v57  ;;  %v1596_v15 = vadd.f32 %v1588_v19, %v1578_v40 }
 0x1ff   :  { %v1522_v21 = vadd.f32 %v1514_v58, %v1505_v36  ;;  %v3850_v36 = vmov 0.0|0.0  }
 0x200   :  { %v5800_v33 = vmul.f32 %v1673_v4, %v7238_v51  ;;  %v1614_v2 = vadd.f32 %v1606_v55, %v1596_v15  ;;  %3739 = vmatprep.subr.bf16.mxu1 %v3850_v36  ;;  %v7241_v4 = vmov 0.0   ;;  %v3011_v15 = vld [vmem:[%s6776_s2] sm:$0xff]  ;;  %v3012_v55 = vld [vmem:[%s6776_s2 + $0x8] sm:$0xff] }
 0x201   :  { %v1538_v62 = vadd.f32 %v5736_v22, %v1522_v21  ;;  %v3013_v21 = vld [vmem:[%s6776_s2 + $0x10] sm:$0xff] }
 0x202   :  { %v1632_v6 = vadd.f32 %v1624_v49, %v1614_v2  ;;  %v3779_v2 = vpack.c.bf16 %v3012_v55, %v3011_v15  ;;  %v3014_v49 = vld [vmem:[%s6776_s2 + $0x18] sm:$0xff] }
 0x203   :  { %v1562_v25 = vadd.f32 %v1554_v30, %v1538_v62  ;;  %v3015_v62 = vld [vmem:[%s6776_s2 + $0x20] sm:$0xff]  ;;  %v3016_v30 = vld [vmem:[%s6776_s2 + $0x28] sm:$0xff]  ;;  %v7250_v55 = vld [vmem:[#allocation70_spill] sm:$0xff] }
 0x204   :  { %v1649_v58 = vadd.f32 %v1642_v9, %v1632_v6  ;;  %3780 = vmatprep.subr.bf16.mxu0 %v3779_v2  ;;  %v3787_v6 = vpack.c.bf16 %v3016_v30, %v3015_v62 }
 0x205   :  { %v1579_v14 = vadd.f32 %v1571_v29, %v1562_v25  ;;  %3782 = vmatpush3.bf16.msra.mxu0 %v3779_v2  ;;  %v615_v25 = vld [vmem:[%s6777_s6 + $0x8] sm:$0xff]  ;;  %v614_v29 = vld [vmem:[%s6777_s6] sm:$0xff] }
 0x206   :  { %v1665_v13 = vadd.f32 %v1658_v24, %v1649_v58 }
 0x207   :  { %v1597_v56 = vadd.f32 %v1589_v63, %v1579_v14 }
 0x208   :  { %v1674_v22 = vadd.f32 %v5540_v32, %v1665_v13 }
 0x209   :  { %v1615_v18 = vadd.f32 %v1607_v27, %v1597_v56  ;;  %v617_v27 = vld [vmem:[%s6777_s6 + $0x18] sm:$0xff] }
 0x20a   :  { %v5817_v35 = vmul.f32 %v1674_v22, %v7239_v39  ;;  %v616_v22 = vld [vmem:[%s6777_s6 + $0x10] sm:$0xff] }
 0x20b   :  { %v1633_v1 = vadd.f32 %v1625_v16, %v1615_v18 }
 0x20d   :  { %v1650_v17 = vadd.f32 %v1642_v9, %v1633_v1  ;;  %v3783_v9 = vpack.c.bf16 %v3014_v49, %v3013_v21 }
 0x20f   :  { %v1666_v50 = vadd.f32 %v1658_v24, %v1650_v17  ;;  %3784 = vmatprep.subr.bf16.mxu0 %v3783_v9 }
 0x210   :  { %3786 = vmatpush3.bf16.msra.mxu0 %v3783_v9 }
 0x211   :  { %v1675_v42 = vadd.f32 %v5540_v32, %v1666_v50  ;;  %3788 = vmatprep.subr.bf16.mxu0 %v3787_v6 }
 0x213   :  { %v5821_v12 = vmul.f32 %v1675_v42, %v7240_v61  ;;  %v619_v42 = vld [vmem:[%s6777_s6 + $0x28] sm:$0xff] }
 0x214   :  { %3790 = vmatpush3.bf16.msra.mxu0 %v3787_v6  ;;  %v7251_v6 = vld [vmem:[#allocation90_spill] sm:$0xff] }
 0x217   :  { %v426_v31 = vpop.permute.xlu0 %425  ;;  %v430_v53 = vpop.permute.xlu1 %429 }
 0x218   :  { %452 = vxpose.xlu1.b32.start [1/9] (short) (narrow) %v426_v31, 64  ;;  %v618_v31 = vld [vmem:[%s6777_s6 + $0x20] sm:$0xff] }
 0x21b   :  { %v428_v34 = vpop.permute.xlu0 %427  ;;  %v432_v10 = vpop.permute.xlu1 %431 }
 0x21c   :  { %453 = vxpose.xlu1.b32.cont [2/9] (short) (narrow) %v428_v34, 64 }
 0x21f   :  { %v434_v59 = vpop.permute.xlu0 %433  ;;  %v436_v45 = vpop.permute.xlu1 %435 }
 0x220   :  { %454 = vxpose.xlu1.b32.cont [3/9] (short) (narrow) %v430_v53, 64 }
 0x223   :  { %v438_v3 = vpop.permute.xlu0 %437  ;;  %v440_v41 = vpop.permute.xlu1 %439 }
 0x224   :  { %455 = vxpose.xlu1.b32.cont [4/9] (short) (narrow) %v432_v10, 64 }
 0x227   :  { %v442_v32 = vpop.permute.xlu0 %441 }
 0x228   :  { %456 = vxpose.xlu1.b32.cont [5/9] (short) (narrow) %v434_v59, 64 }
 0x22c   :  { %457 = vxpose.xlu1.b32.cont [6/9] (short) (narrow) %v436_v45, 64 }
 0x230   :  { %458 = vxpose.xlu1.b32.cont [7/9] (short) (narrow) %v438_v3, 64  ;;  %v621_v3 = vld [vmem:[%s6777_s6 + $0x38] sm:$0xff] }
 0x234   :  { %459 = vxpose.xlu1.b32.cont [8/9] (short) (narrow) %v440_v41, 64  ;;  %v620_v41 = vld [vmem:[%s6777_s6 + $0x30] sm:$0xff] }
 0x238   :  { %460 = vxpose.xlu1.b32.end [9/9] (short) (narrow) %v442_v32, 64 }
 0x242   :  { %v1794_v0 = vpop.permute.xlu0 %1793 }
 0x243   :  { %1820 = vxpose.xlu0.b32.start [1/9] (short) (narrow) %v1794_v0, 64 }
 0x246   :  { %v1796_v60 = vpop.permute.xlu0 %1795 }
 0x247   :  { %1821 = vxpose.xlu0.b32.cont [2/9] (short) (narrow) %v1796_v60, 64 }
 0x24a   :  { %v1798_v20 = vpop.permute.xlu0 %1797 }
 0x24b   :  { %1822 = vxpose.xlu0.b32.cont [3/9] (short) (narrow) %v1798_v20, 64 }
 0x24e   :  { %v1800_v24 = vpop.permute.xlu0 %1799 }
 0x24f   :  { %1823 = vxpose.xlu0.b32.cont [4/9] (short) (narrow) %v1800_v24, 64 }
 0x252   :  { %v1802_v44 = vpop.permute.xlu0 %1801 }
 0x253   :  { %1824 = vxpose.xlu0.b32.cont [5/9] (short) (narrow) %v1802_v44, 64  ;;  %v7242_v44 = vld [vmem:[#allocation67_spill] sm:$0xff] }
 0x256   :  { %v1804_v5 = vpop.permute.xlu0 %1803 }
 0x257   :  { %1825 = vxpose.xlu0.b32.cont [6/9] (short) (narrow) %v1804_v5, 64  ;;  %v7243_v5 = vld [vmem:[#allocation3_spill] sm:$0xff] }
 0x25a   :  { %v1806_v54 = vpop.permute.xlu0 %1805 }
 0x25b   :  { %1826 = vxpose.xlu0.b32.cont [7/9] (short) (narrow) %v1806_v54, 64  ;;  %v7244_v54 = vld [vmem:[#allocation86_spill] sm:$0xff] }
 0x25e   :  { %v1808_v26 = vpop.permute.xlu0 %1807 }
 0x25f   :  { %1827 = vxpose.xlu0.b32.cont [8/9] (short) (narrow) %v1808_v26, 64 }
 0x262   :  { %v1810_v43 = vpop.permute.xlu0 %1809 }
 0x263   :  { %1828 = vxpose.xlu0.b32.end [9/9] (short) (narrow) %v1810_v43, 64  ;;  %v7245_v43 = vld [vmem:[#allocation17_spill] sm:$0xff] }
 0x298   :  { %v468_v8 = vpop.trf.xlu1 }
 0x299   :  { %3536 = vmatprep.mubr.msk.f32.mxu1 %vm484_vm3, %v468_v8  ;;  %v7246_v8 = vld [vmem:[#allocation6_spill] sm:$0xff] }
 0x29c   :  { %v469_v37 = vpop.trf.xlu1 }
 0x29d   :  { %3537 = vmatmul.mubr.msk.f32.vlgmr.msra.gmra.mrb[0].mxu1 %vm484_vm3, %v469_v37 }
 0x2a0   :  { %v470_v52 = vpop.trf.xlu1 }
 0x2a1   :  { %3539 = vmatprep.mubr.msk.f32.mxu1 %vm484_vm3, %v470_v52  ;;  %v7247_v52 = vld [vmem:[#allocation19_spill] sm:$0xff] }
 0x2a4   :  { %v471_v48 = vpop.trf.xlu1 }
 0x2a5   :  { %3540 = vmatmul.mubr.msk.f32.gmra.mrb[2].mxu1 %vm484_vm3, %v471_v48 }
 0x2a8   :  { %v472_v47 = vpop.trf.xlu1 }
 0x2a9   :  { %3542 = vmatprep.mubr.msk.f32.mxu1 %vm484_vm3, %v472_v47  ;;  %v7249_v47 = vld [vmem:[#allocation40_spill] sm:$0xff] }
 0x2ac   :  { %v473_v57 = vpop.trf.xlu1 }
 0x2ad   :  { %3543 = vmatmul.mubr.msk.f32.gmra.mrb[4].mxu1 %vm484_vm3, %v473_v57  ;;  %v3017_v57 = vld [vmem:[%s6776_s2 + $0x30] sm:$0xff] }
 0x2b0   :  { %v474_v40 = vpop.trf.xlu1 }
 0x2b1   :  { %3545 = vmatprep.mubr.msk.f32.mxu1 %vm484_vm3, %v474_v40  ;;  %v3018_v40 = vld [vmem:[%s6776_s2 + $0x38] sm:$0xff] }
 0x2b4   :  { %v475_v19 = vpop.trf.xlu1 }
 0x2b5   :  { %3546 = vmatmul.mubr.msk.f32.gmra.mrb[6].mxu1 %vm484_vm3, %v475_v19  ;;  %v3791_v19 = vpack.c.bf16 %v3018_v40, %v3017_v57  ;;  %v7253_v57 = vld [vmem:[#allocation107_spill] sm:$0xff] }
 0x2b6   :  { %3564 = vmatprep.mubr.msk.f32.mxu1 %vm3851_vm4, %v7241_v4 }
 0x2b7   :  { %3792 = vmatprep.subr.bf16.mxu0 %v3791_v19 }
 0x2b8   :  { %3794 = vmatpush3.bf16.msra.mxu0 %v3791_v19  ;;  %v6007_v19 = vld [vmem:[%s6774_s4 + $0x70] sm:$0xff] }
 0x2c3   :  { %v1836_v26 = vpop.trf.xlu0 }
 0x2c7   :  { %v1837_v37 = vpop.trf.xlu0 }
 0x2cb   :  { %v1838_v48 = vpop.trf.xlu0 }
 0x370   :  { %v3538_v58 = vpop.f32.mrb[0].mxu1 }
 0x371   :  { %v623_v14 = vmul.f32 %v3538_v58, %v615_v25  ;;  %v575_v63 = vpop.f32.mrb[1].mxu1 }
 0x372   :  { %v622_v13 = vmul.f32 %v614_v29, %v575_v63 }
 0x374   :  { %v3740_v56 = vpack.c.bf16 %v623_v14, %v622_v13 }
 0x376   :  { %3741 = vmatpush3.bf16.msra.mxu1 %v3740_v56 }
 0x377   :  { %3742 = vmatprep.subr.bf16.mxu1 %v3850_v36 }
 0x378   :  { %v3541_v18 = vpop.f32.mrb[2].mxu1 }
 0x379   :  { %v625_v16 = vmul.f32 %v3541_v18, %v617_v27  ;;  %v585_v1 = vpop.f32.mrb[3].mxu1 }
 0x37a   :  { %v624_v17 = vmul.f32 %v616_v22, %v585_v1 }
 0x37c   :  { %v3743_v50 = vpack.c.bf16 %v625_v16, %v624_v17 }
 0x37e   :  { %3744 = vmatpush3.bf16.msra.mxu1 %v3743_v50 }
 0x37f   :  { %3745 = vmatprep.subr.bf16.mxu1 %v3850_v36 }
 0x380   :  { %v3544_v34 = vpop.f32.mrb[4].mxu1 }
 0x381   :  { %v627_v53 = vmul.f32 %v3544_v34, %v619_v42  ;;  %v595_v10 = vpop.f32.mrb[5].mxu1 }
 0x382   :  { %v626_v59 = vmul.f32 %v618_v31, %v595_v10 }
 0x384   :  { %v3746_v45 = vpack.c.bf16 %v627_v53, %v626_v59 }
 0x386   :  { %3747 = vmatpush3.bf16.msra.mxu1 %v3746_v45  ;;  %v1983_v45 = vld [vmem:[%s6777_s6 + $0x10] sm:$0xff] }
 0x387   :  { %3748 = vmatprep.subr.bf16.mxu1 %v3850_v36 }
 0x388   :  { %v3547_v32 = vpop.f32.mrb[6].mxu1 }
 0x389   :  { %v629_v0 = vmul.f32 %v3547_v32, %v621_v3  ;;  %v605_v60 = vpop.f32.mrb[7].mxu1 }
 0x38a   :  { %v628_v20 = vmul.f32 %v620_v41, %v605_v60 }
 0x38c   :  { %v3749_v24 = vpack.c.bf16 %v629_v0, %v628_v20  ;;  %v1986_v20 = vld [vmem:[%s6777_s6 + $0x28] sm:$0xff] }
 0x38e   :  { %3750 = vmatpush3.bf16.msra.mxu1 %v3749_v24  ;;  %v1985_v24 = vld [vmem:[%s6777_s6 + $0x20] sm:$0xff] }
 0x38f   :  { %3752 = vmatprep.subr.bf16.mxu1 %v7242_v44 }
 0x391   :  { %3565 = vmatmul.mubr.msk.f32.vlgmr.msra.gmra.mrb[8].mxu1 %vm60_vm0, %v7243_v5 }
 0x392   :  { %3754 = vmatpush3.bf16.msra.mxu1 %v7242_v44  ;;  %3567 = vmatprep.mubr.msk.f32.mxu1 %vm3851_vm4, %v7241_v4 }
 0x393   :  { %3756 = vmatprep.subr.bf16.mxu1 %v7244_v54 }
 0x395   :  { %3568 = vmatmul.mubr.msk.f32.gmra.mrb[10].mxu1 %vm60_vm0, %v7228_v7  ;;  %v7248_v7 = vld [vmem:[#allocation89_spill] sm:$0xff] }
 0x396   :  { %3758 = vmatpush3.bf16.msra.mxu1 %v7244_v54  ;;  %3570 = vmatprep.mubr.msk.f32.mxu1 %vm3851_vm4, %v7241_v4 }
 0x397   :  { %3760 = vmatprep.subr.bf16.mxu1 %v7245_v43 }
 0x399   :  { %3571 = vmatmul.mubr.msk.f32.gmra.mrb[12].mxu1 %vm60_vm0, %v7246_v8  ;;  %v1988_v8 = vld [vmem:[%s6777_s6 + $0x38] sm:$0xff] }
 0x39a   :  { %3762 = vmatpush3.bf16.msra.mxu1 %v7245_v43  ;;  %3573 = vmatprep.mubr.msk.f32.mxu1 %vm3851_vm4, %v7241_v4 }
 0x39b   :  { %3764 = vmatprep.subr.bf16.mxu1 %v7247_v52 }
 0x39d   :  { %3574 = vmatmul.mubr.msk.f32.gmra.mrb[14].mxu1 %vm60_vm0, %v7232_v46  ;;  %v1839_v46 = vpop.trf.xlu0 }
 0x39e   :  { %3766 = vmatpush3.bf16.msra.mxu1 %v7247_v52  ;;  %3576 = vmatprep.mubr.msk.f32.mxu1 %vm3851_vm4, %v7241_v4 }
 0x39f   :  { %3607 = vmatprep.subr.mxu1 %v7248_v7 }
 0x3a1   :  { %3577 = vmatmul.mubr.msk.f32.gmra.mrb[16].mxu1 %vm60_vm0, %v7237_v28  ;;  %v1840_v28 = vpop.trf.xlu0 }
 0x3a2   :  { %3608 = vmatpush3.msra.mxu1 %v7248_v7  ;;  %3579 = vmatprep.mubr.msk.f32.mxu1 %vm3851_vm4, %v7241_v4 }
 0x3a3   :  { %3767 = vmatprep.subr.bf16.mxu1 %v3850_v36 }
 0x3a5   :  { %3580 = vmatmul.mubr.msk.f32.gmra.mrb[18].mxu1 %vm60_vm0, %v7238_v51  ;;  %v1841_v51 = vpop.trf.xlu0 }
 0x3a6   :  { %3582 = vmatprep.mubr.msk.f32.mxu1 %vm3851_vm4, %v7241_v4 }
 0x3a9   :  { %3583 = vmatmul.mubr.msk.f32.gmra.mrb[20].mxu1 %vm60_vm0, %v7239_v39  ;;  %v1842_v39 = vpop.trf.xlu0 }
 0x3aa   :  { %3585 = vmatprep.mubr.msk.f32.mxu1 %vm3851_vm4, %v7241_v4 }
 0x3ad   :  { %3586 = vmatmul.mubr.msk.f32.gmra.mrb[22].mxu1 %vm60_vm0, %v7240_v61  ;;  %v1843_v61 = vpop.trf.xlu0 }
 0x3ae   :  { %3588 = vmatprep.mubr.msk.f32.mxu1 %vm3851_vm4, %v7241_v4 }
 0x3b1   :  { %3589 = vmatmul.mubr.msk.f32.gmra.mrb[24].mxu1 %vm60_vm0, %v7249_v47 }
 0x3b2   :  { %3609 = vmatprep.mubr.msk.f32.mxu1 %vm484_vm3, %v1836_v26 }
 0x3b5   :  { %3610 = vmatmul.mubr.msk.f32.vlgmr.msra.gmra.mrb[26].mxu1 %vm484_vm3, %v1837_v37  ;;  %v1987_v37 = vld [vmem:[%s6777_s6 + $0x30] sm:$0xff] }
 0x3b6   :  { %3612 = vmatprep.mubr.msk.f32.mxu1 %vm484_vm3, %v1838_v48 }
 0x3b9   :  { %3613 = vmatmul.mubr.msk.f32.gmra.mrb[28].mxu1 %vm484_vm3, %v1839_v46 }
 0x3ba   :  { %3615 = vmatprep.mubr.msk.f32.mxu1 %vm484_vm3, %v1840_v28 }
 0x3bd   :  { %3616 = vmatmul.mubr.msk.f32.gmra.mrb[30].mxu1 %vm484_vm3, %v1841_v51  ;;  %v7252_v51 = vld [vmem:[#allocation103_spill] sm:$0xff] }
 0x3be   :  { %3618 = vmatprep.mubr.msk.f32.mxu1 %vm484_vm3, %v1842_v39  ;;  %v5991_v39 = vld [vmem:[%s6774_s4] sm:$0xff] }
 0x3c1   :  { %3619 = vmatmul.mubr.msk.f32.gmra.mrb[32].mxu1 %vm484_vm3, %v1843_v61  ;;  %v5996_v61 = vld [vmem:[%s6774_s4 + $0x38] sm:$0xff] }
 0x3c2   :  { %3637 = vmatprep.mubr.msk.f32.mxu1 %vm3851_vm4, %v7241_v4  ;;  %v2164_v40 = vmul.f32 0.0, %v5996_v61 }
 0x464   :  { %v723_v15 = vpop.f32.mrb[8].mxu1 }
 0x465   :  { %v1684_v21 = vadd.f32 %v7250_v55, %v723_v15  ;;  %v3566_v2 = vpop.f32.mrb[9].mxu1  ;;  %v7254_v15 = vld [vmem:[#allocation113_spill] sm:$0xff] }
 0x466   :  { %v6017_v2 = vld [vmem:[%s6774_s4 + $0xa8] sm:$0xff] }
 0x467   :  { %3680 = vmatprep.mubr.msk.f32.mxu0 %vm60_vm0, %v1684_v21  ;;  %v2179_v21 = vmul.f32 0.0, %v6007_v19 }
 0x468   :  { %v728_v49 = vpop.f32.mrb[10].mxu1 }
 0x469   :  { %v1685_v9 = vadd.f32 %v5654_v11, %v728_v49  ;;  %v3569_v62 = vpop.f32.mrb[11].mxu1  ;;  %v2142_v49 = vld [vmem:[#allocation2 + $0x5] sm:$0xff] }
 0x46a   :  { %v2180_v62 = vmul.f32 %v6007_v19, %v2142_v49 }
 0x46b   :  { %3681 = vmatmul.mubr.msk.f32.vlgmr.msra.gmra.mrb[36].mxu0 %vm60_vm0, %v1685_v9  ;;  %v7255_v9 = vld [vmem:[#allocation122_spill] sm:$0xff] }
 0x46c   :  { %v733_v30 = vpop.f32.mrb[12].mxu1 }
 0x46d   :  { %v1686_v25 = vadd.f32 %v7251_v6, %v733_v30  ;;  %v3572_v29 = vpop.f32.mrb[13].mxu1  ;;  %v2196_v6 = vmul.f32 %v6017_v2, %v2142_v49 }
 0x46e   :  { %v2143_v29 = vld [vmem:[#allocation2 + $0x1d] sm:$0xff] }
 0x46f   :  { %3683 = vmatprep.mubr.msk.f32.mxu0 %vm60_vm0, %v1686_v25  ;;  %v6028_v25 = vld [vmem:[%s6774_s4 + $0xe0] sm:$0xff] }
 0x470   :  { %v738_v58 = vpop.f32.mrb[14].mxu1 }
 0x471   :  { %v1687_v14 = vadd.f32 %v5716_v38, %v738_v58  ;;  %v3575_v63 = vpop.f32.mrb[15].mxu1  ;;  %v2165_v58 = vmul.f32 %v5996_v61, %v2142_v49 }
 0x473   :  { %3684 = vmatmul.mubr.msk.f32.gmra.mrb[38].mxu0 %vm60_vm0, %v1687_v14  ;;  %v7256_v14 = vld [vmem:[#allocation33_spill] sm:$0xff] }
 0x474   :  { %v743_v13 = vpop.f32.mrb[16].mxu1 }
 0x475   :  { %v1688_v56 = vadd.f32 %v5777_v23, %v743_v13  ;;  %v3578_v27 = vpop.f32.mrb[17].mxu1  ;;  %v2197_v13 = vmul.f32 %v6017_v2, %v2143_v29 }
 0x476   :  { %v2213_v27 = vmul.f32 %v6028_v25, %v2143_v29 }
 0x477   :  { %3686 = vmatprep.mubr.msk.f32.mxu0 %vm60_vm0, %v1688_v56 }
 0x478   :  { %v748_v11 = vpop.f32.mrb[18].mxu1 }
 0x479   :  { %v1689_v22 = vadd.f32 %v5800_v33, %v748_v11  ;;  %v3581_v18 = vpop.f32.mrb[19].mxu1  ;;  %v1982_v33 = vld [vmem:[%s6777_s6 + $0x8] sm:$0xff]  ;;  %v6040_v11 = vld [vmem:[%s6774_s4 + $0x118] sm:$0xff] }
 0x47a   :  { %v2152_v18 = vmul.f32 %v5991_v39, %v2142_v49 }
 0x47b   :  { %3687 = vmatmul.mubr.msk.f32.gmra.mrb[40].mxu0 %vm60_vm0, %v1689_v22  ;;  %v2144_v22 = vld [vmem:[#allocation2 + $0x35] sm:$0xff] }
 0x47c   :  { %v753_v16 = vpop.f32.mrb[20].mxu1 }
 0x47d   :  { %v1690_v1 = vadd.f32 %v5817_v35, %v753_v16  ;;  %v3584_v17 = vpop.f32.mrb[21].mxu1  ;;  %v1981_v35 = vld [vmem:[%s6777_s6] sm:$0xff]  ;;  %v2166_v16 = vmul.f32 %v5996_v61, %v2143_v29 }
 0x47e   :  { %v2181_v17 = vmul.f32 %v6007_v19, %v2143_v29 }
 0x47f   :  { %3689 = vmatprep.mubr.msk.f32.mxu0 %vm60_vm0, %v1690_v1 }
 0x480   :  { %v758_v38 = vpop.f32.mrb[22].mxu1 }
 0x481   :  { %v1691_v50 = vadd.f32 %v5821_v12, %v758_v38  ;;  %v3587_v42 = vpop.f32.mrb[23].mxu1  ;;  %v1984_v12 = vld [vmem:[%s6777_s6 + $0x18] sm:$0xff] }
 0x482   :  { %v7257_v38 = vld [vmem:[#allocation14_spill] sm:$0xff]  ;;  %v2214_v42 = vmul.f32 %v6028_v25, %v2144_v22 }
 0x483   :  { %3690 = vmatmul.mubr.msk.f32.gmra.mrb[42].mxu0 %vm60_vm0, %v1691_v50 }
 0x484   :  { %v763_v23 = vpop.f32.mrb[24].mxu1 }
 0x485   :  { %v3590_v31 = vpop.f32.mrb[25].mxu1  ;;  %3692 = vmatprep.mubr.msk.f32.mxu0 %vm60_vm0, %v763_v23 }
 0x486   :  { %v2230_v31 = vmul.f32 %v6040_v11, %v2144_v22 }
 0x488   :  { %v3611_v34 = vpop.f32.mrb[26].mxu1 }
 0x489   :  { %v1990_v53 = vmul.f32 %v3611_v34, %v1982_v33  ;;  %v1942_v10 = vpop.f32.mrb[27].mxu1  ;;  %v2145_v33 = vld [vmem:[#allocation2 + $0x4d] sm:$0xff]  ;;  %v2182_v34 = vmul.f32 %v6007_v19, %v2144_v22 }
 0x48a   :  { %v1989_v59 = vmul.f32 %v1981_v35, %v1942_v10  ;;  %v2173_v35 = vadd.f32 %v2166_v16, %v2152_v18  ;;  %v2198_v10 = vmul.f32 %v6017_v2, %v2144_v22  ;;  %v6099_v18 = vld [vmem:[%s6774_s4 + $0x78] sm:$0xff] }
 0x48c   :  { %v3768_v3 = vpack.c.bf16 %v1990_v53, %v1989_v59  ;;  %v3614_v41 = vpop.f32.mrb[28].mxu1  ;;  %v7258_v59 = vld [vmem:[#allocation66_spill] sm:$0xff] }
 0x48d   :  { %v1992_v32 = vmul.f32 %v3614_v41, %v1984_v12  ;;  %v1952_v0 = vpop.f32.mrb[29].mxu1  ;;  %v2153_v12 = vmul.f32 %v5991_v39, %v2143_v29  ;;  %v6063_v41 = vld [vmem:[%s6774_s4 + $0x150] sm:$0xff] }
 0x48e   :  { %v1991_v60 = vmul.f32 %v1983_v45, %v1952_v0  ;;  %3769 = vmatpush3.bf16.msra.mxu1 %v3768_v3  ;;  %v2167_v45 = vmul.f32 %v5996_v61, %v2144_v22  ;;  %v2231_v3 = vmul.f32 %v6040_v11, %v2145_v33 }
 0x48f   :  { %3770 = vmatprep.subr.bf16.mxu1 %v3850_v36 }
 0x490   :  { %v3771_v44 = vpack.c.bf16 %v1992_v32, %v1991_v60  ;;  %v3617_v5 = vpop.f32.mrb[30].mxu1  ;;  %v2246_v32 = vmul.f32 %v6063_v41, %v2145_v33 }
 0x491   :  { %v1994_v54 = vmul.f32 %v3617_v5, %v1986_v20  ;;  %v1962_v26 = vpop.f32.mrb[31].mxu1  ;;  %v2199_v20 = vmul.f32 %v6017_v2, %v2145_v33  ;;  %v2146_v5 = vld [vmem:[#allocation2 + $0x65] sm:$0xff] }
 0x492   :  { %v1993_v43 = vmul.f32 %v1985_v24, %v1962_v26  ;;  %3772 = vmatpush3.bf16.msra.mxu1 %v3771_v44  ;;  %v2215_v24 = vmul.f32 %v6028_v25, %v2145_v33  ;;  %v6071_v44 = vld [vmem:[%s6774_s4 + $0x8] sm:$0xff] }
 0x493   :  { %3773 = vmatprep.subr.bf16.mxu1 %v3850_v36 }
 0x494   :  { %v3774_v52 = vpack.c.bf16 %v1994_v54, %v1993_v43  ;;  %v3620_v7 = vpop.f32.mrb[32].mxu1  ;;  %v2190_v54 = vadd.f32 %v2182_v34, %v2173_v35  ;;  %v7259_v43 = vld [vmem:[#allocation44_spill] sm:$0xff]  ;;  %v2156_v34 = vmul.f32 %v5991_v39, %v2146_v5 }
 0x495   :  { %v1996_v48 = vmul.f32 %v3620_v7, %v1988_v8  ;;  %v1972_v46 = vpop.f32.mrb[33].mxu1  ;;  %v2168_v8 = vmul.f32 %v5996_v61, %v2145_v33  ;;  %v2154_v7 = vmul.f32 %v5991_v39, %v2144_v22 }
 0x496   :  { %v1995_v28 = vmul.f32 %v1987_v37, %v1972_v46  ;;  %3775 = vmatpush3.bf16.msra.mxu1 %v3774_v52  ;;  %v2183_v37 = vmul.f32 %v6007_v19, %v2145_v33  ;;  %v2174_v52 = vadd.f32 %v2167_v45, %v2153_v12  ;;  %v2247_v46 = vmul.f32 %v6063_v41, %v2146_v5 }
 0x497   :  { %3776 = vmatprep.subr.bf16.mxu1 %v3850_v36  ;;  %v2151_v36 = vmul.f32 0.0, %v5991_v39  ;;  %v2175_v29 = vadd.f32 %v2168_v8, %v2154_v7 }
 0x498   :  { %v3777_v47 = vpack.c.bf16 %v1996_v48, %v1995_v28  ;;  %v2269_v48 = vmul.f32 0.0, %v6071_v44 }
 0x499   :  { %v2171_v55 = vadd.f32 %v2164_v40, %v2151_v36  ;;  %v2172_v1 = vadd.f32 %v2165_v58, %v2151_v36  ;;  %v6085_v36 = vld [vmem:[%s6774_s4 + $0x40] sm:$0xff]  ;;  %v2216_v40 = vmul.f32 %v6028_v25, %v2146_v5  ;;  %v2191_v58 = vadd.f32 %v2183_v37, %v2174_v52  ;;  %v2149_v52 = vld [vmem:[#allocation2 + $0xad] sm:$0xff] }
 0x49a   :  { %3778 = vmatpush3.bf16.msra.mxu1 %v3777_v47 }
 0x49b   :  { %v2187_v30 = vadd.f32 %v2179_v21, %v2171_v55  ;;  %v2188_v63 = vadd.f32 %v2180_v62, %v2171_v55  ;;  %v2189_v53 = vadd.f32 %v2181_v17, %v2172_v1  ;;  %v2232_v55 = vmul.f32 %v6040_v11, %v2146_v5  ;;  %v7260_v62 = vld [vmem:[#allocation53_spill] sm:$0xff] }
 0x49c   :  { %v2207_v21 = vadd.f32 %v2199_v20, %v2190_v54 }
 0x49d   :  { %3638 = vmatmul.mubr.msk.f32.vlgmr.msra.gmra.mrb[34].mxu1 %vm60_vm0, %v7252_v51  ;;  %v2204_v56 = vadd.f32 %v2196_v6, %v2187_v30  ;;  %v2205_v50 = vadd.f32 %v2197_v13, %v2188_v63  ;;  %v2206_v26 = vadd.f32 %v2198_v10, %v2189_v53  ;;  %v2200_v30 = vmul.f32 %v6017_v2, %v2146_v5  ;;  %v2147_v6 = vld [vmem:[#allocation2 + $0x7d] sm:$0xff] }
 0x49e   :  { %3640 = vmatprep.mubr.msk.f32.mxu1 %vm3851_vm4, %v7241_v4  ;;  %v2155_v63 = vmul.f32 %v5991_v39, %v2145_v33  ;;  %v2169_v13 = vmul.f32 %v5996_v61, %v2146_v5  ;;  %v2248_v1 = vmul.f32 %v6063_v41, %v2147_v6  ;;  %v2224_v17 = vadd.f32 %v2216_v40, %v2207_v21  ;;  %v6124_v21 = vld [vmem:[%s6774_s4 + $0xe8] sm:$0xff] }
 0x49f   :  { %v2221_v23 = vadd.f32 %v2213_v27, %v2204_v56  ;;  %v2222_v0 = vadd.f32 %v2214_v42, %v2205_v50  ;;  %v2223_v49 = vadd.f32 %v2215_v24, %v2206_v26  ;;  %v2284_v27 = vmul.f32 0.0, %v6085_v36  ;;  %v2148_v42 = vld [vmem:[#allocation2 + $0x95] sm:$0xff] }
 0x4a0   :  { %v2233_v50 = vmul.f32 %v6040_v11, %v2147_v6  ;;  %v2208_v33 = vadd.f32 %v2200_v30, %v2191_v58  ;;  %v2217_v35 = vmul.f32 %v6028_v25, %v2147_v6  ;;  %v2176_v53 = vadd.f32 %v2169_v13, %v2155_v63 }
 0x4a1   :  { %3641 = vmatmul.mubr.msk.f32.gmra.mrb[36].mxu1 %vm60_vm0, %v7253_v57  ;;  %v2237_v60 = vadd.f32 %v2230_v31, %v2221_v23  ;;  %v2238_v28 = vadd.f32 %v2231_v3, %v2222_v0  ;;  %v2239_v16 = vadd.f32 %v2232_v55, %v2223_v49  ;;  %v2201_v31 = vmul.f32 %v6017_v2, %v2147_v6  ;;  %v6112_v0 = vld [vmem:[%s6774_s4 + $0xb0] sm:$0xff]  ;;  %v2261_v49 = vld [vmem:[#allocation2 + $0x1e] sm:$0xff] }
 0x4a2   :  { %3643 = vmatprep.mubr.msk.f32.mxu1 %vm3851_vm4, %v7241_v4  ;;  %v2170_v10 = vmul.f32 %v5996_v61, %v2147_v6  ;;  %v2185_v12 = vmul.f32 %v6007_v19, %v2147_v6  ;;  %v2300_v3 = vmul.f32 0.0, %v6099_v18  ;;  %v2240_v24 = vadd.f32 %v2233_v50, %v2224_v17 }
 0x4a3   :  { %v2252_v47 = vadd.f32 %v2246_v32, %v2237_v60  ;;  %v2253_v22 = vadd.f32 %v2247_v46, %v2238_v28  ;;  %v2260_v60 = vld [vmem:[#allocation2 + $0x6] sm:$0xff]  ;;  %v2254_v20 = vadd.f32 %v2248_v1, %v2239_v16  ;;  %v2249_v54 = vmul.f32 %v6063_v41, %v2148_v42 }
 0x4a4   :  { %v2218_v39 = vmul.f32 %v6028_v25, %v2148_v42  ;;  %v2234_v61 = vmul.f32 %v6040_v11, %v2148_v42  ;;  %v2225_v26 = vadd.f32 %v2217_v35, %v2208_v33  ;;  %v2186_v8 = vmul.f32 %v6007_v19, %v2148_v42 }
 0x4a5   :  { %3644 = vmatmul.mubr.msk.f32.gmra.mrb[38].mxu1 %vm60_vm0, %v7254_v15  ;;  %v2275_v56 = vadd.f32 %v2269_v48, %v2252_v47  ;;  %v2276_v32 = vadd.f32 %v2269_v48, %v2253_v22  ;;  %v2202_v37 = vmul.f32 %v6017_v2, %v2148_v42  ;;  %v2177_v7 = vadd.f32 %v2170_v10, %v2156_v34  ;;  %v2262_v42 = vld [vmem:[#allocation2 + $0x36] sm:$0xff] }
 0x4a6   :  { %3646 = vmatprep.mubr.msk.f32.mxu1 %vm3851_vm4, %v7241_v4  ;;  %v2193_v46 = vadd.f32 %v2185_v12, %v2176_v53  ;;  %v2301_v28 = vmul.f32 %v6099_v18, %v2260_v60  ;;  %v2317_v47 = vmul.f32 %v6112_v0, %v2260_v60  ;;  %v2277_v30 = vadd.f32 %v2269_v48, %v2254_v20  ;;  %v6137_v48 = vld [vmem:[%s6774_s4 + $0x120] sm:$0xff] }
 0x4a7   :  { %v2291_v45 = vadd.f32 %v2284_v27, %v2275_v56  ;;  %v2292_v55 = vadd.f32 %v2284_v27, %v2276_v32  ;;  %v2241_v58 = vadd.f32 %v2234_v61, %v2225_v26  ;;  %v2250_v63 = vmul.f32 %v6063_v41, %v2149_v52 }
 0x4a8   :  { %v2194_v13 = vadd.f32 %v2186_v8, %v2177_v7  ;;  %v2203_v56 = vmul.f32 %v6017_v2, %v2149_v52  ;;  %v2210_v27 = vadd.f32 %v2202_v37, %v2193_v46  ;;  %v2219_v22 = vmul.f32 %v6028_v25, %v2149_v52 }
 0x4a9   :  { %3647 = vmatmul.mubr.msk.f32.gmra.mrb[40].mxu1 %vm60_vm0, %v7255_v9  ;;  %v2308_v40 = vadd.f32 %v2300_v3, %v2291_v45  ;;  %v2334_v1 = vmul.f32 %v6124_v21, %v2261_v49  ;;  %v2309_v17 = vadd.f32 %v2301_v28, %v2292_v55  ;;  %v2318_v50 = vmul.f32 %v6112_v0, %v2261_v49 }
 0x4aa   :  { %3649 = vmatprep.mubr.msk.f32.mxu1 %vm3851_vm4, %v7241_v4  ;;  %v2271_v35 = vmul.f32 %v6071_v44, %v2261_v49  ;;  %v2251_v53 = vmul.f32 0.0, %v6063_v41  ;;  %v2256_v10 = vadd.f32 %v2250_v63, %v2241_v58  ;;  %v2211_v12 = vadd.f32 %v2203_v56, %v2194_v13  ;;  %v2264_v58 = vld [vmem:[#allocation2 + $0x66] sm:$0xff] }
 0x4ab   :  { %v2325_v16 = vadd.f32 %v2317_v47, %v2308_v40  ;;  %v2220_v45 = vmul.f32 0.0, %v6028_v25  ;;  %v2227_v3 = vadd.f32 %v2219_v22, %v2210_v27  ;;  %v2236_v32 = vmul.f32 0.0, %v6040_v11  ;;  %v6156_v47 = vld [vmem:[%s6774_s4 + $0x158] sm:$0xff] }
 0x4ac   :  { %v2351_v20 = vmul.f32 %v6137_v48, %v2262_v42  ;;  %v2303_v41 = vmul.f32 %v6099_v18, %v2262_v42  ;;  %v2272_v8 = vmul.f32 %v6071_v44, %v2262_v42  ;;  %v2279_v25 = vadd.f32 %v2271_v35, %v2256_v10 }
 0x4ad   :  { %3650 = vmatmul.mubr.msk.f32.gmra.mrb[42].mxu1 %vm60_vm0, %v7256_v14  ;;  %v2243_v7 = vadd.f32 %v2236_v32, %v2227_v3  ;;  %v2321_v10 = vmul.f32 %v6112_v0, %v2264_v58  ;;  %v2274_v3 = vmul.f32 %v6071_v44, %v2264_v58 }
 0x4ae   :  { %3652 = vmatprep.mubr.msk.f32.mxu1 %vm3851_vm4, %v7241_v4 }
 0x4af   :  { %v2258_v22 = vadd.f32 %v2251_v53, %v2243_v7 }
 0x4b1   :  { %3653 = vmatmul.mubr.msk.f32.gmra.mrb[44].mxu1 %vm60_vm0, %v7257_v38 }
 0x4b2   :  { %3655 = vmatprep.mubr.msk.f32.mxu1 %vm3851_vm4, %v7241_v4 }
 0x4b5   :  { %3656 = vmatmul.mubr.msk.f32.gmra.mrb[46].mxu1 %vm60_vm0, %v7258_v59 }
 0x4b6   :  { %3658 = vmatprep.mubr.msk.f32.mxu1 %vm3851_vm4, %v7241_v4 }
 0x4b9   :  { %3659 = vmatmul.mubr.msk.f32.gmra.mrb[48].mxu1 %vm60_vm0, %v7259_v43 }
 0x4ba   :  { %3661 = vmatprep.mubr.msk.f32.mxu1 %vm3851_vm4, %v7241_v4  ;;  %v2184_v4 = vmul.f32 %v6007_v19, %v2146_v5  ;;  %v2285_v19 = vmul.f32 %v6085_v36, %v2260_v60 }
 0x4bc   :  { %v2192_v23 = vadd.f32 %v2184_v4, %v2175_v29  ;;  %v2255_v4 = vadd.f32 %v2249_v54, %v2240_v24  ;;  %v2235_v29 = vmul.f32 %v6040_v11, %v2149_v52  ;;  %v2293_v33 = vadd.f32 %v2285_v19, %v2277_v30 }
 0x4bd   :  { %3662 = vmatmul.mubr.msk.f32.gmra.mrb[50].mxu1 %vm60_vm0, %v7260_v62  ;;  %v2270_v62 = vmul.f32 %v6071_v44, %v2260_v60  ;;  %v2342_v60 = vadd.f32 %v2334_v1, %v2325_v16  ;;  %v2326_v24 = vadd.f32 %v2318_v50, %v2309_v17  ;;  %v2335_v54 = vmul.f32 %v6124_v21, %v2262_v42 }
 0x4be   :  { %v2209_v5 = vadd.f32 %v2201_v31, %v2192_v23  ;;  %v2286_v23 = vmul.f32 %v6085_v36, %v2261_v49  ;;  %v2302_v31 = vmul.f32 %v6099_v18, %v2261_v49  ;;  %v2287_v52 = vmul.f32 %v6085_v36, %v2262_v42 }
 0x4bf   :  { %v2278_v2 = vadd.f32 %v2270_v62, %v2255_v4  ;;  %v2228_v11 = vadd.f32 %v2220_v45, %v2211_v12  ;;  %v2358_v55 = vadd.f32 %v2351_v20, %v2342_v60  ;;  %v6163_v62 = vld [vmem:[%s6774_s4 + $0x10] sm:$0xff]  ;;  %v2343_v19 = vadd.f32 %v2335_v54, %v2326_v24 }
 0x4c0   :  { %v2226_v6 = vadd.f32 %v2218_v39, %v2209_v5  ;;  %v2263_v39 = vld [vmem:[#allocation2 + $0x4e] sm:$0xff]  ;;  %v2310_v61 = vadd.f32 %v2302_v31, %v2293_v33  ;;  %v2319_v5 = vmul.f32 %v6112_v0, %v2262_v42  ;;  %v2295_v13 = vadd.f32 %v2287_v52, %v2279_v25  ;;  %v2265_v31 = vld [vmem:[#allocation2 + $0x7e] sm:$0xff] }
 0x4c1   :  { %v2294_v26 = vadd.f32 %v2286_v23, %v2278_v2  ;;  %v2320_v46 = vmul.f32 %v6112_v0, %v2263_v39  ;;  %v2336_v28 = vmul.f32 %v6124_v21, %v2263_v39  ;;  %v2367_v40 = vmul.f32 %v6156_v47, %v2263_v39  ;;  %v6174_v42 = vld [vmem:[%s6774_s4 + $0x48] sm:$0xff] }
 0x4c2   :  { %v2242_v34 = vadd.f32 %v2235_v29, %v2226_v6  ;;  %v2352_v49 = vmul.f32 %v6137_v48, %v2263_v39  ;;  %v2327_v4 = vadd.f32 %v2319_v5, %v2310_v61  ;;  %v2288_v6 = vmul.f32 %v6085_v36, %v2263_v39  ;;  %v6186_v61 = vld [vmem:[%s6774_s4 + $0x80] sm:$0xff] }
 0x4c3   :  { %v2311_v30 = vadd.f32 %v2303_v41, %v2294_v26  ;;  %v2304_v29 = vmul.f32 %v6099_v18, %v2263_v39  ;;  %v2273_v56 = vmul.f32 %v6071_v44, %v2263_v39  ;;  %v2244_v27 = vadd.f32 %v2236_v32, %v2228_v11  ;;  %v2266_v44 = vld [vmem:[#allocation2 + $0x96] sm:$0xff] }
 0x4c4   :  { %v2257_v37 = vadd.f32 %v2251_v53, %v2242_v34  ;;  %v2337_v16 = vmul.f32 %v6124_v21, %v2264_v58  ;;  %v2353_v1 = vmul.f32 %v6137_v48, %v2264_v58  ;;  %v2373_v17 = vadd.f32 %v2367_v40, %v2358_v55 }
 0x4c5   :  { %v2390_v50 = vmul.f32 0.0, %v6163_v62  ;;  %v2368_v23 = vmul.f32 %v6156_v47, %v2264_v58  ;;  %v2359_v2 = vadd.f32 %v2352_v49, %v2343_v19  ;;  %v2344_v33 = vadd.f32 %v2336_v28, %v2327_v4  ;;  %v6197_v49 = vld [vmem:[%s6774_s4 + $0xb8] sm:$0xff]  ;;  %v2381_v19 = vld [vmem:[#allocation2 + $0x7] sm:$0xff] }
 0x4c6   :  { %v2280_v63 = vadd.f32 %v2272_v8, %v2257_v37  ;;  %v2328_v35 = vadd.f32 %v2320_v46, %v2311_v30  ;;  %v2305_v34 = vmul.f32 %v6099_v18, %v2264_v58  ;;  %v2312_v45 = vadd.f32 %v2304_v29, %v2295_v13 }
 0x4c7   :  { %v2289_v32 = vmul.f32 %v6085_v36, %v2264_v58  ;;  %v2259_v60 = vadd.f32 %v2251_v53, %v2244_v27  ;;  %v2281_v20 = vadd.f32 %v2273_v56, %v2258_v22  ;;  %v2396_v24 = vadd.f32 %v2390_v50, %v2373_v17  ;;  %v2267_v22 = vld [vmem:[#allocation2 + $0xae] sm:$0xff] }
 0x4c8   :  { %v2296_v12 = vadd.f32 %v2288_v6, %v2280_v63  ;;  %v2405_v54 = vmul.f32 0.0, %v6174_v42  ;;  %v2369_v39 = vmul.f32 %v6156_v47, %v2265_v31  ;;  %v2374_v5 = vadd.f32 %v2368_v23, %v2359_v2 }
 0x4c9   :  { %v2360_v26 = vadd.f32 %v2353_v1, %v2344_v33  ;;  %v2345_v41 = vadd.f32 %v2337_v16, %v2328_v35  ;;  %v2354_v8 = vmul.f32 %v6137_v48, %v2265_v31  ;;  %v2322_v53 = vmul.f32 %v6112_v0, %v2265_v31  ;;  %v2382_v33 = vld [vmem:[#allocation2 + $0x1f] sm:$0xff]  ;;  %v6210_v35 = vld [vmem:[%s6774_s4 + $0xf0] sm:$0xff] }
 0x4ca   :  { %v2313_v37 = vadd.f32 %v2305_v34, %v2296_v12  ;;  %v2329_v25 = vadd.f32 %v2321_v10, %v2312_v45  ;;  %v2338_v52 = vmul.f32 %v6124_v21, %v2265_v31  ;;  %v2282_v11 = vadd.f32 %v2274_v3, %v2259_v60 }
 0x4cb   :  { %v2290_v7 = vmul.f32 %v6085_v36, %v2265_v31  ;;  %v2297_v46 = vadd.f32 %v2289_v32, %v2281_v20  ;;  %v2306_v28 = vmul.f32 %v6099_v18, %v2265_v31  ;;  %v2412_v40 = vadd.f32 %v2405_v54, %v2396_v24 }
 0x4cc   :  { %v2421_v55 = vmul.f32 0.0, %v6186_v61  ;;  %v2397_v4 = vadd.f32 %v2390_v50, %v2374_v5  ;;  %v2375_v30 = vadd.f32 %v2369_v39, %v2360_v26  ;;  %v2361_v6 = vadd.f32 %v2354_v8, %v2345_v41  ;;  %v2383_v8 = vld [vmem:[#allocation2 + $0x37] sm:$0xff] }
 0x4cd   :  { %v2370_v29 = vmul.f32 %v6156_v47, %v2266_v44  ;;  %v2339_v58 = vmul.f32 %v6124_v21, %v2266_v44  ;;  %v2330_v36 = vadd.f32 %v2322_v53, %v2313_v37  ;;  %v2346_v63 = vadd.f32 %v2338_v52, %v2329_v25 }
 0x4ce   :  { %v2355_v13 = vmul.f32 %v6137_v48, %v2266_v44  ;;  %v2307_v56 = vmul.f32 %v6099_v18, %v2266_v44  ;;  %v2323_v27 = vmul.f32 %v6112_v0, %v2266_v44  ;;  %v2298_v16 = vadd.f32 %v2290_v7, %v2282_v11  ;;  %v6223_v44 = vld [vmem:[%s6774_s4 + $0x128] sm:$0xff] }
 0x4cf   :  { %v2314_v1 = vadd.f32 %v2306_v28, %v2297_v46  ;;  %v2429_v17 = vadd.f32 %v2421_v55, %v2412_v40  ;;  %v2438_v23 = vmul.f32 %v6197_v49, %v2381_v19  ;;  %v2422_v31 = vmul.f32 %v6186_v61, %v2381_v19 }
 0x4d0   :  { %v2406_v2 = vmul.f32 %v6174_v42, %v2381_v19  ;;  %v2413_v34 = vadd.f32 %v2405_v54, %v2397_v4  ;;  %v2398_v18 = vadd.f32 %v2390_v50, %v2375_v30  ;;  %v2376_v10 = vadd.f32 %v2370_v29, %v2361_v6 }
 0x4d1   :  { %v2391_v12 = vmul.f32 %v6163_v62, %v2381_v19  ;;  %v2347_v45 = vadd.f32 %v2339_v58, %v2330_v36  ;;  %v2356_v3 = vmul.f32 %v6137_v48, %v2267_v22  ;;  %v2371_v32 = vmul.f32 %v6156_v47, %v2267_v22  ;;  %v2384_v58 = vld [vmem:[#allocation2 + $0x4f] sm:$0xff]  ;;  %v6236_v36 = vld [vmem:[%s6774_s4 + $0x160] sm:$0xff] }
 0x4d2   :  { %v2362_v60 = vadd.f32 %v2355_v13, %v2346_v63  ;;  %v2315_v20 = vadd.f32 %v2307_v56, %v2298_v16  ;;  %v2324_v24 = vmul.f32 %v6112_v0, %v2267_v22  ;;  %v2331_v39 = vadd.f32 %v2323_v27, %v2314_v1 }
 0x4d3   :  { %v2340_v5 = vmul.f32 %v6124_v21, %v2267_v22  ;;  %v2446_v26 = vadd.f32 %v2438_v23, %v2429_v17  ;;  %v2455_v41 = vmul.f32 %v6210_v35, %v2382_v33  ;;  %v2439_v50 = vmul.f32 %v6197_v49, %v2382_v33 }
 0x4d4   :  { %v2423_v54 = vmul.f32 %v6186_v61, %v2382_v33  ;;  %v2430_v37 = vadd.f32 %v2422_v31, %v2413_v34  ;;  %v2414_v53 = vadd.f32 %v2406_v2, %v2398_v18  ;;  %v2399_v25 = vadd.f32 %v2391_v12, %v2376_v10  ;;  %v6247_v34 = vld [vmem:[%s6774_s4 + $0x18] sm:$0xff] }
 0x4d5   :  { %v2407_v0 = vmul.f32 %v6174_v42, %v2382_v33  ;;  %v2363_v52 = vadd.f32 %v2356_v3, %v2347_v45  ;;  %v2377_v11 = vadd.f32 %v2371_v32, %v2362_v60  ;;  %v2392_v7 = vmul.f32 %v6163_v62, %v2382_v33  ;;  %v2385_v33 = vld [vmem:[#allocation2 + $0x67] sm:$0xff] }
 0x4d6   :  { %v2372_v46 = vmul.f32 0.0, %v6156_v47  ;;  %v2332_v28 = vadd.f32 %v2324_v24, %v2315_v20  ;;  %v2341_v40 = vmul.f32 0.0, %v6124_v21  ;;  %v2348_v55 = vadd.f32 %v2340_v5, %v2331_v39 }
 0x4d7   :  { %v2357_v19 = vmul.f32 0.0, %v6137_v48  ;;  %v2463_v4 = vadd.f32 %v2455_v41, %v2446_v26  ;;  %v2472_v30 = vmul.f32 %v6223_v44, %v2383_v8  ;;  %v2456_v6 = vmul.f32 %v6210_v35, %v2383_v8 }
 0x4d8   :  { %v2440_v29 = vmul.f32 %v6197_v49, %v2383_v8  ;;  %v2447_v47 = vadd.f32 %v2439_v50, %v2430_v37  ;;  %v2431_v63 = vadd.f32 %v2423_v54, %v2414_v53  ;;  %v2415_v13 = vadd.f32 %v2407_v0, %v2399_v25  ;;  %v2386_v53 = vld [vmem:[#allocation2 + $0x7f] sm:$0xff] }
 0x4d9   :  { %v2424_v21 = vmul.f32 %v6186_v61, %v2383_v8  ;;  %v2400_v56 = vadd.f32 %v2392_v7, %v2377_v11  ;;  %v2408_v48 = vmul.f32 %v6174_v42, %v2383_v8  ;;  %v2378_v27 = vadd.f32 %v2372_v46, %v2363_v52 }
 0x4da   :  { %v2393_v22 = vmul.f32 %v6163_v62, %v2383_v8  ;;  %v2349_v16 = vadd.f32 %v2341_v40, %v2332_v28  ;;  %v2364_v1 = vadd.f32 %v2357_v19, %v2348_v55  ;;  %v2441_v17 = vmul.f32 %v6197_v49, %v2384_v58  ;;  %v6259_v8 = vld [vmem:[%s6774_s4 + $0x50] sm:$0xff] }
 0x4db   :  { %v2479_v23 = vadd.f32 %v2472_v30, %v2463_v4  ;;  %v2488_v31 = vmul.f32 %v6236_v36, %v2384_v58  ;;  %v2473_v2 = vmul.f32 %v6223_v44, %v2384_v58  ;;  %v2464_v18 = vadd.f32 %v2456_v6, %v2447_v47  ;;  %v6271_v47 = vld [vmem:[%s6774_s4 + $0x88] sm:$0xff] }
 0x4dc   :  { %v2448_v10 = vadd.f32 %v2440_v29, %v2431_v63  ;;  %v2457_v12 = vmul.f32 %v6210_v35, %v2384_v58  ;;  %v2432_v45 = vadd.f32 %v2424_v21, %v2415_v13  ;;  %v2409_v3 = vmul.f32 %v6174_v42, %v2384_v58 }
 0x4dd   :  { %v2425_v32 = vmul.f32 %v6186_v61, %v2384_v58  ;;  %v2416_v60 = vadd.f32 %v2408_v48, %v2400_v56  ;;  %v2401_v20 = vadd.f32 %v2393_v22, %v2378_v27  ;;  %v2394_v24 = vmul.f32 %v6163_v62, %v2384_v58 }
 0x4de   :  { %v2379_v39 = vadd.f32 %v2372_v46, %v2364_v1  ;;  %v2365_v5 = vadd.f32 %v2357_v19, %v2349_v16  ;;  %v2494_v26 = vadd.f32 %v2488_v31, %v2479_v23  ;;  %v2511_v41 = vmul.f32 0.0, %v6247_v34 }
 0x4df   :  { %v2489_v50 = vmul.f32 %v6236_v36, %v2385_v33  ;;  %v2474_v54 = vmul.f32 %v6223_v44, %v2385_v33  ;;  %v2480_v37 = vadd.f32 %v2473_v2, %v2464_v18  ;;  %v2465_v25 = vadd.f32 %v2457_v12, %v2448_v10  ;;  %v6282_v18 = vld [vmem:[%s6774_s4 + $0xc0] sm:$0xff] }
 0x4e0   :  { %v2449_v0 = vadd.f32 %v2441_v17, %v2432_v45  ;;  %v2458_v52 = vmul.f32 %v6210_v35, %v2385_v33  ;;  %v2426_v11 = vmul.f32 %v6186_v61, %v2385_v33  ;;  %v2442_v7 = vmul.f32 %v6197_v49, %v2385_v33 }
 0x4e1   :  { %v2433_v28 = vadd.f32 %v2425_v32, %v2416_v60  ;;  %v2417_v40 = vadd.f32 %v2409_v3, %v2401_v20  ;;  %v2395_v55 = vmul.f32 %v6163_v62, %v2385_v33  ;;  %v2410_v19 = vmul.f32 %v6174_v42, %v2385_v33  ;;  %v2387_v62 = vld [vmem:[#allocation2 + $0x97] sm:$0xff]  ;;  %v2502_v33 = vld [vmem:[#allocation2 + $0x8] sm:$0xff] }
 0x4e2   :  { %v2402_v4 = vadd.f32 %v2394_v24, %v2379_v39  ;;  %v2380_v30 = vadd.f32 %v2372_v46, %v2365_v5  ;;  %v2517_v6 = vadd.f32 %v2511_v41, %v2494_v26  ;;  %v2526_v29 = vmul.f32 0.0, %v6259_v8  ;;  %v2388_v24 = vld [vmem:[#allocation2 + $0xaf] sm:$0xff] }
 0x4e3   :  { %v2490_v58 = vmul.f32 %v6236_v36, %v2386_v53  ;;  %v2495_v63 = vadd.f32 %v2489_v50, %v2480_v37  ;;  %v2481_v13 = vadd.f32 %v2474_v54, %v2465_v25  ;;  %v2466_v21 = vadd.f32 %v2458_v52, %v2449_v0  ;;  %v2503_v0 = vld [vmem:[#allocation2 + $0x20] sm:$0xff]  ;;  %v6295_v52 = vld [vmem:[%s6774_s4 + $0xf8] sm:$0xff] }
 0x4e4   :  { %v2475_v56 = vmul.f32 %v6223_v44, %v2386_v53  ;;  %v2450_v48 = vadd.f32 %v2442_v7, %v2433_v28  ;;  %v2459_v27 = vmul.f32 %v6210_v35, %v2386_v53  ;;  %v2434_v46 = vadd.f32 %v2426_v11, %v2417_v40 }
 0x4e5   :  { %v2443_v22 = vmul.f32 %v6197_v49, %v2386_v53  ;;  %v2418_v16 = vadd.f32 %v2410_v19, %v2402_v4  ;;  %v2427_v1 = vmul.f32 %v6186_v61, %v2386_v53  ;;  %v2403_v17 = vadd.f32 %v2395_v55, %v2380_v30 }
 0x4e6   :  { %v2411_v23 = vmul.f32 %v6174_v42, %v2386_v53  ;;  %v2533_v31 = vadd.f32 %v2526_v29, %v2517_v6  ;;  %v2542_v2 = vmul.f32 0.0, %v6271_v47  ;;  %v2518_v10 = vadd.f32 %v2511_v41, %v2495_v63 }
 0x4e7   :  { %v2496_v12 = vadd.f32 %v2490_v58, %v2481_v13  ;;  %v2482_v45 = vadd.f32 %v2475_v56, %v2466_v21  ;;  %v2491_v3 = vmul.f32 %v6236_v36, %v2387_v62  ;;  %v2467_v32 = vadd.f32 %v2459_v27, %v2450_v48  ;;  %v2504_v56 = vld [vmem:[#allocation2 + $0x38] sm:$0xff] }
 0x4e8   :  { %v2476_v60 = vmul.f32 %v6223_v44, %v2387_v62  ;;  %v2451_v20 = vadd.f32 %v2443_v22, %v2434_v46  ;;  %v2460_v42 = vmul.f32 %v6210_v35, %v2387_v62  ;;  %v2435_v39 = vadd.f32 %v2427_v1, %v2418_v16 }
 0x4e9   :  { %v2444_v5 = vmul.f32 %v6197_v49, %v2387_v62  ;;  %v2419_v26 = vadd.f32 %v2411_v23, %v2403_v17  ;;  %v2428_v50 = vmul.f32 %v6186_v61, %v2387_v62  ;;  %v2550_v54 = vadd.f32 %v2542_v2, %v2533_v31  ;;  %v6308_v62 = vld [vmem:[%s6774_s4 + $0x130] sm:$0xff] }
 0x4ea   :  { %v2559_v37 = vmul.f32 %v6282_v18, %v2502_v33  ;;  %v2543_v53 = vmul.f32 %v6271_v47, %v2502_v33  ;;  %v2527_v25 = vmul.f32 %v6259_v8, %v2502_v33  ;;  %v2534_v11 = vadd.f32 %v2526_v29, %v2518_v10 }
 0x4eb   :  { %v2519_v7 = vadd.f32 %v2511_v41, %v2496_v12  ;;  %v2497_v28 = vadd.f32 %v2491_v3, %v2482_v45  ;;  %v2512_v40 = vmul.f32 %v6247_v34, %v2502_v33  ;;  %v2483_v55 = vadd.f32 %v2476_v60, %v2467_v32  ;;  %v2505_v32 = vld [vmem:[#allocation2 + $0x50] sm:$0xff]  ;;  %v6321_v60 = vld [vmem:[%s6774_s4 + $0x168] sm:$0xff] }
 0x4ec   :  { %v2492_v61 = vmul.f32 %v6236_v36, %v2388_v24  ;;  %v2468_v19 = vadd.f32 %v2460_v42, %v2451_v20  ;;  %v2477_v4 = vmul.f32 %v6223_v44, %v2388_v24  ;;  %v2452_v30 = vadd.f32 %v2444_v5, %v2435_v39 }
 0x4ed   :  { %v2461_v6 = vmul.f32 %v6210_v35, %v2388_v24  ;;  %v2436_v58 = vadd.f32 %v2428_v50, %v2419_v26  ;;  %v2445_v63 = vmul.f32 %v6197_v49, %v2388_v24  ;;  %v2567_v13 = vadd.f32 %v2559_v37, %v2550_v54 }
 0x4ee   :  { %v2576_v21 = vmul.f32 %v6295_v52, %v2503_v0  ;;  %v2560_v41 = vmul.f32 %v6282_v18, %v2503_v0  ;;  %v2544_v29 = vmul.f32 %v6271_v47, %v2503_v0  ;;  %v2551_v48 = vadd.f32 %v2543_v53, %v2534_v11  ;;  %v6332_v11 = vld [vmem:[%s6774_s4 + $0x20] sm:$0xff] }
 0x4ef   :  { %v2535_v27 = vadd.f32 %v2527_v25, %v2519_v7  ;;  %v2520_v46 = vadd.f32 %v2512_v40, %v2497_v28  ;;  %v2528_v22 = vmul.f32 %v6259_v8, %v2503_v0  ;;  %v2498_v16 = vadd.f32 %v2492_v61, %v2483_v55 }
 0x4f0   :  { %v2513_v49 = vmul.f32 %v6247_v34, %v2503_v0  ;;  %v2484_v1 = vadd.f32 %v2477_v4, %v2468_v19  ;;  %v2493_v17 = vmul.f32 0.0, %v6236_v36  ;;  %v2469_v23 = vadd.f32 %v2461_v6, %v2452_v30  ;;  %v2506_v0 = vld [vmem:[#allocation2 + $0x68] sm:$0xff] }
 0x4f1   :  { %v2478_v31 = vmul.f32 0.0, %v6223_v44  ;;  %v2453_v2 = vadd.f32 %v2445_v63, %v2436_v58  ;;  %v2462_v33 = vmul.f32 0.0, %v6210_v35  ;;  %v2584_v10 = vadd.f32 %v2576_v21, %v2567_v13 }
 0x4f2   :  { %v2593_v12 = vmul.f32 %v6308_v62, %v2504_v56  ;;  %v2577_v45 = vmul.f32 %v6295_v52, %v2504_v56  ;;  %v2561_v3 = vmul.f32 %v6282_v18, %v2504_v56  ;;  %v2568_v36 = vadd.f32 %v2560_v41, %v2551_v48 }
 0x4f3   :  { %v2552_v20 = vadd.f32 %v2544_v29, %v2535_v27  ;;  %v2536_v42 = vadd.f32 %v2528_v22, %v2520_v46  ;;  %v2545_v44 = vmul.f32 %v6271_v47, %v2504_v56  ;;  %v2521_v24 = vadd.f32 %v2513_v49, %v2498_v16  ;;  %v2507_v27 = vld [vmem:[#allocation2 + $0x80] sm:$0xff] }
 0x4f4   :  { %v2529_v35 = vmul.f32 %v6259_v8, %v2504_v56  ;;  %v2499_v39 = vadd.f32 %v2493_v17, %v2484_v1  ;;  %v2514_v5 = vmul.f32 %v6247_v34, %v2504_v56  ;;  %v2485_v26 = vadd.f32 %v2478_v31, %v2469_v23  ;;  %v6344_v56 = vld [vmem:[%s6774_s4 + $0x58] sm:$0xff] }
 0x4f5   :  { %v2470_v50 = vadd.f32 %v2462_v33, %v2453_v2  ;;  %v2600_v54 = vadd.f32 %v2593_v12, %v2584_v10  ;;  %v2609_v37 = vmul.f32 %v6321_v60, %v2505_v32  ;;  %v2594_v53 = vmul.f32 %v6308_v62, %v2505_v32 }
 0x4f6   :  { %v2578_v25 = vmul.f32 %v6295_v52, %v2505_v32  ;;  %v2585_v7 = vadd.f32 %v2577_v45, %v2568_v36  ;;  %v2569_v28 = vadd.f32 %v2561_v3, %v2552_v20  ;;  %v2553_v40 = vadd.f32 %v2545_v44, %v2536_v42  ;;  %v6356_v36 = vld [vmem:[%s6774_s4 + $0x90] sm:$0xff] }
 0x4f7   :  { %v2562_v55 = vmul.f32 %v6282_v18, %v2505_v32  ;;  %v2537_v61 = vadd.f32 %v2529_v35, %v2521_v24  ;;  %v2546_v19 = vmul.f32 %v6271_v47, %v2505_v32  ;;  %v2530_v4 = vmul.f32 %v6259_v8, %v2505_v32  ;;  %v2508_v35 = vld [vmem:[#allocation2 + $0x98] sm:$0xff] }
 0x4f8   :  { %v2522_v30 = vadd.f32 %v2514_v5, %v2499_v39  ;;  %v2500_v6 = vadd.f32 %v2493_v17, %v2485_v26  ;;  %v2515_v58 = vmul.f32 %v6247_v34, %v2505_v32  ;;  %v2486_v63 = vadd.f32 %v2478_v31, %v2470_v50 }
 0x4f9   :  { %v2615_v13 = vadd.f32 %v2609_v37, %v2600_v54  ;;  %v2632_v21 = vmul.f32 0.0, %v6332_v11  ;;  %v2610_v41 = vmul.f32 %v6321_v60, %v2506_v0  ;;  %v2595_v29 = vmul.f32 %v6308_v62, %v2506_v0 }
 0x4fa   :  { %v2601_v48 = vadd.f32 %v2594_v53, %v2585_v7  ;;  %v2586_v46 = vadd.f32 %v2578_v25, %v2569_v28  ;;  %v2570_v22 = vadd.f32 %v2562_v55, %v2553_v40  ;;  %v2579_v16 = vmul.f32 %v6295_v52, %v2506_v0  ;;  %v6367_v7 = vld [vmem:[%s6774_s4 + $0xc8] sm:$0xff] }
 0x4fb   :  { %v2554_v49 = vadd.f32 %v2546_v19, %v2537_v61  ;;  %v2563_v1 = vmul.f32 %v6282_v18, %v2506_v0  ;;  %v2547_v23 = vmul.f32 %v6271_v47, %v2506_v0  ;;  %v2531_v31 = vmul.f32 %v6259_v8, %v2506_v0 }
 0x4fc   :  { %v2538_v2 = vadd.f32 %v2530_v4, %v2522_v30  ;;  %v2523_v33 = vadd.f32 %v2515_v58, %v2500_v6  ;;  %v2501_v10 = vadd.f32 %v2493_v17, %v2486_v63  ;;  %v2516_v12 = vmul.f32 %v6247_v34, %v2506_v0  ;;  %v2623_v0 = vld [vmem:[#allocation2 + $0x9] sm:$0xff] }
 0x4fd   :  { %v2638_v45 = vadd.f32 %v2632_v21, %v2615_v13  ;;  %v2647_v3 = vmul.f32 0.0, %v6344_v56  ;;  %v2611_v32 = vmul.f32 %v6321_v60, %v2507_v27  ;;  %v2616_v20 = vadd.f32 %v2610_v41, %v2601_v48  ;;  %v2509_v6 = vld [vmem:[#allocation2 + $0xb0] sm:$0xff] }
 0x4fe   :  { %v2602_v42 = vadd.f32 %v2595_v29, %v2586_v46  ;;  %v2587_v44 = vadd.f32 %v2579_v16, %v2570_v22  ;;  %v2596_v24 = vmul.f32 %v6308_v62, %v2507_v27  ;;  %v2571_v39 = vadd.f32 %v2563_v1, %v2554_v49  ;;  %v2624_v22 = vld [vmem:[#allocation2 + $0x21] sm:$0xff] }
 0x4ff   :  { %v2580_v17 = vmul.f32 %v6295_v52, %v2507_v27  ;;  %v2564_v34 = vmul.f32 %v6282_v18, %v2507_v27  ;;  %v2548_v5 = vmul.f32 %v6271_v47, %v2507_v27  ;;  %v2555_v26 = vadd.f32 %v2547_v23, %v2538_v2  ;;  %v6380_v16 = vld [vmem:[%s6774_s4 + $0x100] sm:$0xff] }
 0x500   :  { %v2539_v50 = vadd.f32 %v2531_v31, %v2523_v33  ;;  %v2524_v54 = vadd.f32 %v2516_v12, %v2501_v10  ;;  %v2532_v37 = vmul.f32 %v6259_v8, %v2507_v27  ;;  %v2654_v53 = vadd.f32 %v2647_v3, %v2638_v45 }
 0x501   :  { %v2663_v25 = vmul.f32 0.0, %v6356_v36  ;;  %v2639_v28 = vadd.f32 %v2632_v21, %v2616_v20  ;;  %v2617_v40 = vadd.f32 %v2611_v32, %v2602_v42  ;;  %v2603_v55 = vadd.f32 %v2596_v24, %v2587_v44  ;;  %v2625_v24 = vld [vmem:[#allocation2 + $0x39] sm:$0xff] }
 0x502   :  { %v2612_v61 = vmul.f32 %v6321_v60, %v2508_v35  ;;  %v2588_v19 = vadd.f32 %v2580_v17, %v2571_v39  ;;  %v2597_v4 = vmul.f32 %v6308_v62, %v2508_v35  ;;  %v2581_v30 = vmul.f32 %v6295_v52, %v2508_v35 }
 0x503   :  { %v2565_v8 = vmul.f32 %v6282_v18, %v2508_v35  ;;  %v2572_v58 = vadd.f32 %v2564_v34, %v2555_v26  ;;  %v2556_v63 = vadd.f32 %v2548_v5, %v2539_v50  ;;  %v2540_v13 = vadd.f32 %v2532_v37, %v2524_v54 }
 0x504   :  { %v2549_v41 = vmul.f32 %v6271_v47, %v2508_v35  ;;  %v2671_v29 = vadd.f32 %v2663_v25, %v2654_v53  ;;  %v2680_v48 = vmul.f32 %v6367_v7, %v2623_v0  ;;  %v2664_v27 = vmul.f32 %v6356_v36, %v2623_v0  ;;  %v6393_v35 = vld [vmem:[%s6774_s4 + $0x138] sm:$0xff] }
 0x505   :  { %v2648_v46 = vmul.f32 %v6344_v56, %v2623_v0  ;;  %v2655_v49 = vadd.f32 %v2647_v3, %v2639_v28  ;;  %v2640_v1 = vadd.f32 %v2632_v21, %v2617_v40  ;;  %v2618_v23 = vadd.f32 %v2612_v61, %v2603_v55 }
 0x506   :  { %v2633_v31 = vmul.f32 %v6332_v11, %v2623_v0  ;;  %v2604_v2 = vadd.f32 %v2597_v4, %v2588_v19  ;;  %v2613_v47 = vmul.f32 %v6321_v60, %v2509_v6  ;;  %v2598_v33 = vmul.f32 %v6308_v62, %v2509_v6  ;;  %v2626_v19 = vld [vmem:[#allocation2 + $0x51] sm:$0xff] }
 0x507   :  { %v2582_v10 = vmul.f32 %v6295_v52, %v2509_v6  ;;  %v2589_v12 = vadd.f32 %v2581_v30, %v2572_v58  ;;  %v2573_v45 = vadd.f32 %v2565_v8, %v2556_v63  ;;  %v2557_v32 = vadd.f32 %v2549_v41, %v2540_v13  ;;  %v6406_v4 = vld [vmem:[%s6774_s4 + $0x170] sm:$0xff] }
 0x508   :  { %v2566_v20 = vmul.f32 %v6282_v18, %v2509_v6  ;;  %v2688_v42 = vadd.f32 %v2680_v48, %v2671_v29  ;;  %v2697_v44 = vmul.f32 %v6380_v16, %v2624_v22  ;;  %v2681_v21 = vmul.f32 %v6367_v7, %v2624_v22 }
 0x509   :  { %v2665_v3 = vmul.f32 %v6356_v36, %v2624_v22  ;;  %v2672_v39 = vadd.f32 %v2664_v27, %v2655_v49  ;;  %v2656_v17 = vadd.f32 %v2648_v46, %v2640_v1  ;;  %v2641_v34 = vadd.f32 %v2633_v31, %v2618_v23  ;;  %v2627_v49 = vld [vmem:[#allocation2 + $0x69] sm:$0xff] }
 0x50a   :  { %v2649_v5 = vmul.f32 %v6344_v56, %v2624_v22  ;;  %v2619_v26 = vadd.f32 %v2613_v47, %v2604_v2  ;;  %v2634_v18 = vmul.f32 %v6332_v11, %v2624_v22  ;;  %v2614_v50 = vmul.f32 0.0, %v6321_v60  ;;  %v6417_v22 = vld [vmem:[%s6774_s4 + $0x28] sm:$0xff] }
 0x50b   :  { %v2599_v54 = vmul.f32 0.0, %v6308_v62  ;;  %v2605_v37 = vadd.f32 %v2598_v33, %v2589_v12  ;;  %v2590_v53 = vadd.f32 %v2582_v10, %v2573_v45  ;;  %v2574_v25 = vadd.f32 %v2566_v20, %v2557_v32 }
 0x50c   :  { %v2583_v0 = vmul.f32 0.0, %v6295_v52  ;;  %v2705_v28 = vadd.f32 %v2697_v44, %v2688_v42  ;;  %v2714_v40 = vmul.f32 %v6393_v35, %v2625_v24  ;;  %v2698_v55 = vmul.f32 %v6380_v16, %v2625_v24 }
 0x50d   :  { %v2682_v61 = vmul.f32 %v6367_v7, %v2625_v24  ;;  %v2689_v60 = vadd.f32 %v2681_v21, %v2672_v39  ;;  %v2673_v62 = vadd.f32 %v2665_v3, %v2656_v17  ;;  %v2657_v30 = vadd.f32 %v2649_v5, %v2641_v34  ;;  %v2628_v17 = vld [vmem:[#allocation2 + $0x81] sm:$0xff] }
 0x50e   :  { %v2666_v8 = vmul.f32 %v6356_v36, %v2625_v24  ;;  %v2642_v6 = vadd.f32 %v2634_v18, %v2619_v26  ;;  %v2650_v52 = vmul.f32 %v6344_v56, %v2625_v24  ;;  %v2620_v58 = vadd.f32 %v2614_v50, %v2605_v37 }
 0x50f   :  { %v2635_v63 = vmul.f32 %v6332_v11, %v2625_v24  ;;  %v2606_v13 = vadd.f32 %v2599_v54, %v2590_v53  ;;  %v2591_v41 = vadd.f32 %v2583_v0, %v2574_v25  ;;  %v2721_v29 = vadd.f32 %v2714_v40, %v2705_v28  ;;  %v6431_v24 = vld [vmem:[%s6774_s4 + $0x60] sm:$0xff] }
 0x510   :  { %v2730_v48 = vmul.f32 %v6406_v4, %v2626_v19  ;;  %v2715_v27 = vmul.f32 %v6393_v35, %v2626_v19  ;;  %v2699_v46 = vmul.f32 %v6380_v16, %v2626_v19  ;;  %v2706_v1 = vadd.f32 %v2698_v55, %v2689_v60  ;;  %v2744_v55 = vld [vmem:[#allocation2 + $0xa] sm:$0xff]  ;;  %v6443_v60 = vld [vmem:[%s6774_s4 + $0x98] sm:$0xff] }
 0x511   :  { %v2690_v23 = vadd.f32 %v2682_v61, %v2673_v62  ;;  %v2674_v31 = vadd.f32 %v2666_v8, %v2657_v30  ;;  %v2683_v2 = vmul.f32 %v6367_v7, %v2626_v19  ;;  %v2658_v47 = vadd.f32 %v2650_v52, %v2642_v6  ;;  %v2745_v30 = vld [vmem:[#allocation2 + $0x22] sm:$0xff]  ;;  %v6449_v8 = vld [vmem:[%s6774_s4 + $0xd0] sm:$0xff] }
 0x512   :  { %v2667_v33 = vmul.f32 %v6356_v36, %v2626_v19  ;;  %v2651_v10 = vmul.f32 %v6344_v56, %v2626_v19  ;;  %v2643_v12 = vadd.f32 %v2635_v63, %v2620_v58  ;;  %v2621_v45 = vadd.f32 %v2614_v50, %v2606_v13  ;;  %v2629_v63 = vld [vmem:[#allocation2 + $0x99] sm:$0xff] }
 0x513   :  { %v2636_v32 = vmul.f32 %v6332_v11, %v2626_v19  ;;  %v2607_v20 = vadd.f32 %v2599_v54, %v2591_v41  ;;  %v2736_v42 = vadd.f32 %v2730_v48, %v2721_v29  ;;  %v6424_v44 = vmul.f32 0.0, %v6417_v22 }
 0x514   :  { %v2731_v21 = vmul.f32 %v6406_v4, %v2627_v49  ;;  %v2716_v3 = vmul.f32 %v6393_v35, %v2627_v49  ;;  %v2722_v39 = vadd.f32 %v2715_v27, %v2706_v1  ;;  %v2707_v34 = vadd.f32 %v2699_v46, %v2690_v23 }
 0x515   :  { %v2691_v5 = vadd.f32 %v2683_v2, %v2674_v31  ;;  %v2700_v26 = vmul.f32 %v6380_v16, %v2627_v49  ;;  %v2675_v18 = vadd.f32 %v2667_v33, %v2658_v47  ;;  %v2684_v54 = vmul.f32 %v6367_v7, %v2627_v49  ;;  %v6464_v33 = vld [vmem:[#allocation2 + $0x3a] sm:$0xff] }
 0x516   :  { %v2668_v37 = vmul.f32 %v6356_v36, %v2627_v49  ;;  %v2652_v53 = vmul.f32 %v6344_v56, %v2627_v49  ;;  %v2659_v25 = vadd.f32 %v2651_v10, %v2643_v12  ;;  %v2644_v0 = vadd.f32 %v2636_v32, %v2621_v45  ;;  %v6469_v10 = vld [vmem:[%s6774_s4 + $0x140] sm:$0xff] }
 0x517   :  { %v2622_v28 = vadd.f32 %v2614_v50, %v2607_v20  ;;  %v2637_v40 = vmul.f32 %v6332_v11, %v2627_v49  ;;  %v2759_v61 = vadd.f32 %v6424_v44, %v2736_v42  ;;  %v2768_v19 = vmul.f32 0.0, %v6431_v24  ;;  %v6454_v11 = vld [vmem:[%s6774_s4 + $0x108] sm:$0xff] }
 0x518   :  { %v2732_v62 = vmul.f32 %v6406_v4, %v2628_v17  ;;  %v2737_v50 = vadd.f32 %v2731_v21, %v2722_v39  ;;  %v2723_v6 = vadd.f32 %v2716_v3, %v2707_v34  ;;  %v2708_v52 = vadd.f32 %v2700_v26, %v2691_v5  ;;  %v2630_v39 = vld [vmem:[#allocation2 + $0xb1] sm:$0xff] }
 0x519   :  { %v2717_v58 = vmul.f32 %v6393_v35, %v2628_v17  ;;  %v2692_v13 = vadd.f32 %v2684_v54, %v2675_v18  ;;  %v2701_v41 = vmul.f32 %v6380_v16, %v2628_v17  ;;  %v2685_v29 = vmul.f32 %v6367_v7, %v2628_v17 }
 0x51a   :  { %v2669_v48 = vmul.f32 %v6356_v36, %v2628_v17  ;;  %v2676_v27 = vadd.f32 %v2668_v37, %v2659_v25  ;;  %v2660_v46 = vadd.f32 %v2652_v53, %v2644_v0  ;;  %v2645_v49 = vadd.f32 %v2637_v40, %v2622_v28 }
 0x51b   :  { %v2653_v1 = vmul.f32 %v6344_v56, %v2628_v17  ;;  %v2775_v23 = vadd.f32 %v2768_v19, %v2759_v61  ;;  %v2784_v31 = vmul.f32 0.0, %v6443_v60  ;;  %v2801_v2 = vmul.f32 %v6449_v8, %v2744_v55 }
 0x51c   :  { %v2818_v47 = vmul.f32 %v6454_v11, %v2745_v30  ;;  %v2760_v12 = vadd.f32 %v6424_v44, %v2737_v50  ;;  %v2738_v45 = vadd.f32 %v2732_v62, %v2723_v6  ;;  %v2724_v32 = vadd.f32 %v2717_v58, %v2708_v52 }
 0x51d   :  { %v2733_v56 = vmul.f32 %v6406_v4, %v2629_v63  ;;  %v2709_v20 = vadd.f32 %v2701_v41, %v2692_v13  ;;  %v2718_v42 = vmul.f32 %v6393_v35, %v2629_v63  ;;  %v2702_v21 = vmul.f32 %v6380_v16, %v2629_v63 }
 0x51e   :  { %v2686_v3 = vmul.f32 %v6367_v7, %v2629_v63  ;;  %v2693_v17 = vadd.f32 %v2685_v29, %v2676_v27  ;;  %v2677_v34 = vadd.f32 %v2669_v48, %v2660_v46  ;;  %v2661_v5 = vadd.f32 %v2653_v1, %v2645_v49 }
 0x51f   :  { %v2670_v26 = vmul.f32 %v6356_v36, %v2629_v63  ;;  %v2792_v18 = vadd.f32 %v2784_v31, %v2775_v23  ;;  %v2835_v54 = vmul.f32 %v6469_v10, %v6464_v33  ;;  %v2785_v37 = vmul.f32 %v6443_v60, %v2744_v55 }
 0x520   :  { %v2769_v53 = vmul.f32 %v6431_v24, %v2744_v55  ;;  %v2776_v25 = vadd.f32 %v2768_v19, %v2760_v12  ;;  %v2761_v0 = vadd.f32 %v6424_v44, %v2738_v45  ;;  %v2739_v28 = vadd.f32 %v2733_v56, %v2724_v32  ;;  %v6490_v19 = vld [vmem:[%s6778_s3] ss:$0 sm:$0xff]  ;;  %v2747_v45 = vld [vmem:[#allocation2 + $0x52] sm:$0xff] }
 0x521   :  { %v2754_v40 = vmul.f32 %v6417_v22, %v2744_v55  ;;  %v2725_v61 = vadd.f32 %v2718_v42, %v2709_v20  ;;  %v2734_v62 = vmul.f32 %v6406_v4, %v2630_v39  ;;  %v2719_v50 = vmul.f32 %v6393_v35, %v2630_v39  ;;  %v6505_v32 = vld [vmem:[%s6774_s4 + $0x178] sm:$0xff] }
 0x522   :  { %v2703_v36 = vmul.f32 %v6380_v16, %v2630_v39  ;;  %v2710_v6 = vadd.f32 %v2702_v21, %v2693_v17  ;;  %v2694_v52 = vadd.f32 %v2686_v3, %v2677_v34  ;;  %v2678_v58 = vadd.f32 %v2670_v26, %v2661_v5  ;;  %v6524_v3 = vld [vmem:[%s6774_s4 + $0x68] sm:$0xff] }
 0x523   :  { %v2687_v63 = vmul.f32 %v6367_v7, %v2630_v39  ;;  %v2809_v44 = vadd.f32 %v2801_v2, %v2792_v18  ;;  %v2802_v55 = vmul.f32 %v6449_v8, %v2745_v30  ;;  %v2786_v13 = vmul.f32 %v6443_v60, %v2745_v30 }
 0x524   :  { %v2770_v41 = vmul.f32 %v6431_v24, %v2745_v30  ;;  %v2793_v29 = vadd.f32 %v2785_v37, %v2776_v25  ;;  %v2777_v48 = vadd.f32 %v2769_v53, %v2761_v0  ;;  %v2762_v27 = vadd.f32 %v2754_v40, %v2739_v28 }
 0x525   :  { %v2755_v46 = vmul.f32 %v6417_v22, %v2745_v30  ;;  %v2740_v1 = vadd.f32 %v2734_v62, %v2725_v61  ;;  %v6497_v7 = vmul.f32 0.0, %v6406_v4  ;;  %v2720_v23 = vmul.f32 0.0, %v6393_v35  ;;  %v6510_v30 = vld [vmem:[%s6774_s4 + $0x30] sm:$0xff] }
 0x526   :  { %v2704_v31 = vmul.f32 0.0, %v6380_v16  ;;  %v2726_v4 = vadd.f32 %v2719_v50, %v2710_v6  ;;  %v2711_v56 = vadd.f32 %v2703_v36, %v2694_v52  ;;  %v2695_v20 = vadd.f32 %v2687_v63, %v2678_v58  ;;  %v2748_v36 = vld [vmem:[#allocation2 + $0x6a] sm:$0xff] }
 0x527   :  { %v2826_v16 = vadd.f32 %v2818_v47, %v2809_v44  ;;  %v2819_v42 = vmul.f32 %v6454_v11, %v6464_v33  ;;  %v2803_v21 = vmul.f32 %v6449_v8, %v6464_v33  ;;  %v2810_v39 = vadd.f32 %v2802_v55, %v2793_v29 }
 0x528   :  { %v2794_v17 = vadd.f32 %v2786_v13, %v2777_v48  ;;  %v2778_v34 = vadd.f32 %v2770_v41, %v2762_v27  ;;  %v2787_v47 = vmul.f32 %v6443_v60, %v6464_v33  ;;  %v2851_v5 = vmul.f32 %v6505_v32, %v2747_v45 }
 0x529   :  { %v6534_v26 = vmul.f32 0.0, %v6510_v30  ;;  %v2763_v18 = vadd.f32 %v2755_v46, %v2740_v1  ;;  %v2771_v37 = vmul.f32 %v6431_v24, %v6464_v33  ;;  %v2741_v53 = vadd.f32 %v6497_v7, %v2726_v4  ;;  %v2749_v4 = vld [vmem:[#allocation2 + $0x82] sm:$0xff] }
 0x52a   :  { %v2756_v25 = vmul.f32 %v6417_v22, %v6464_v33  ;;  %v2727_v0 = vadd.f32 %v2720_v23, %v2711_v56  ;;  %v2712_v28 = vadd.f32 %v2704_v31, %v2695_v20  ;;  %v2842_v40 = vadd.f32 %v2835_v54, %v2826_v16 }
 0x52b   :  { %v6542_v61 = vmul.f32 0.0, %v6524_v3  ;;  %v2836_v62 = vmul.f32 %v6469_v10, %v2747_v45  ;;  %v2820_v50 = vmul.f32 %v6454_v11, %v2747_v45  ;;  %v2827_v6 = vadd.f32 %v2819_v42, %v2810_v39 }
 0x52c   :  { %v2811_v52 = vadd.f32 %v2803_v21, %v2794_v17  ;;  %v2795_v58 = vadd.f32 %v2787_v47, %v2778_v34  ;;  %v2804_v63 = vmul.f32 %v6449_v8, %v2747_v45  ;;  %v2779_v55 = vadd.f32 %v2771_v37, %v2763_v18 }
 0x52d   :  { %v2788_v33 = vmul.f32 %v6443_v60, %v2747_v45  ;;  %v2772_v13 = vmul.f32 %v6431_v24, %v2747_v45  ;;  %v2757_v54 = vmul.f32 %v6417_v22, %v2747_v45  ;;  %v2764_v48 = vadd.f32 %v2756_v25, %v2741_v53 }
 0x52e   :  { %v2742_v27 = vadd.f32 %v6497_v7, %v2727_v0  ;;  %v2728_v46 = vadd.f32 %v2720_v23, %v2712_v28  ;;  %v2857_v1 = vadd.f32 %v2851_v5, %v2842_v40  ;;  %v2852_v31 = vmul.f32 %v6505_v32, %v2748_v36  ;;  %v2865_v5 = vld [vmem:[#allocation2 + $0xb] sm:$0xff]  ;;  %v6578_v0 = vld [vmem:[#allocation2 + $0x23] sm:$0xff]  ;;  %v6583_v28 = vld [vmem:[%s6774_s4 + $0xd8] sm:$0xff] }
 0x52f   :  { %v2843_v45 = vadd.f32 %v2836_v62, %v2827_v6  ;;  %v2828_v23 = vadd.f32 %v2820_v50, %v2811_v52  ;;  %v2812_v56 = vadd.f32 %v2804_v63, %v2795_v58  ;;  %v2821_v20 = vmul.f32 %v6454_v11, %v2748_v36  ;;  %v2750_v6 = vld [vmem:[#allocation2 + $0x9a] sm:$0xff] }
 0x530   :  { %v2805_v16 = vmul.f32 %v6449_v8, %v2748_v36  ;;  %v2789_v42 = vmul.f32 %v6443_v60, %v2748_v36  ;;  %v2773_v21 = vmul.f32 %v6431_v24, %v2748_v36  ;;  %v2780_v39 = vadd.f32 %v2772_v13, %v2764_v48 }
 0x531   :  { %v2765_v17 = vadd.f32 %v2757_v54, %v2742_v27  ;;  %v2743_v34 = vadd.f32 %v6497_v7, %v2728_v46  ;;  %v2758_v47 = vmul.f32 %v6417_v22, %v2748_v36  ;;  %v2880_v18 = vadd.f32 %v6534_v26, %v2857_v1  ;;  %v6588_v22 = vld [vmem:[%s6774_s4 + $0x110] sm:$0xff] }
 0x532   :  { %v2853_v53 = vmul.f32 %v6505_v32, %v2749_v4  ;;  %v2838_v25 = vmul.f32 %v6469_v10, %v2749_v4  ;;  %v2858_v7 = vadd.f32 %v2852_v31, %v2843_v45  ;;  %v2829_v62 = vadd.f32 %v2821_v20, %v2812_v56 }
 0x533   :  { %v2822_v50 = vmul.f32 %v6454_v11, %v2749_v4  ;;  %v2806_v58 = vmul.f32 %v6449_v8, %v2749_v4  ;;  %v2790_v63 = vmul.f32 %v6443_v60, %v2749_v4  ;;  %v2797_v13 = vadd.f32 %v2789_v42, %v2780_v39 }
 0x534   :  { %v2781_v54 = vadd.f32 %v2773_v21, %v2765_v17  ;;  %v2896_v48 = vadd.f32 %v6542_v61, %v2880_v18  ;;  %v2922_v27 = vmul.f32 %v6583_v28, %v2865_v5  ;;  %v2939_v46 = vmul.f32 %v6588_v22, %v6578_v0 }
 0x535   :  { %v2845_v1 = vadd.f32 %v2838_v25, %v2829_v62  ;;  %v2854_v31 = vmul.f32 %v6505_v32, %v2750_v6  ;;  %v2807_v56 = vmul.f32 %v6449_v8, %v2750_v6  ;;  %v2814_v20 = vadd.f32 %v2806_v58, %v2797_v13 }
 0x536   :  { %v2791_v42 = vmul.f32 %v6443_v60, %v2750_v6  ;;  %v2890_v17 = vmul.f32 %v6524_v3, %v2865_v5  ;;  %v2923_v58 = vmul.f32 %v6583_v28, %v6578_v0 }
 0x53e   :  { %v3682_v49 = vpop.f32.mrb[36].mxu0 }
 0x53f   :  { %v3152_v2 = vadd.f32 %v3682_v49, %v6490_v19  ;;  %v3146_v12 = vpop.f32.mrb[37].mxu0 }
 0x540   :  { %v3147_v35 = vadd.f32 %v6490_v19, %v3146_v12  ;;  %v6562_v12 = vld [vmem:[%s6774_s4 + $0xa0] sm:$0xff] }
 0x541   :  { %3236 = vst.msk [vmem:[%s6779_s7 + $0x8] sm:$0xff] %vm60_vm0, %v3152_v2  ;;  %v2837_v2 = vmul.f32 %v6469_v10, %v2748_v36  ;;  %v2905_v37 = vmul.f32 0.0, %v6562_v12  ;;  %v2906_v39 = vmul.f32 %v6562_v12, %v2865_v5 }
 0x542   :  { %3235 = vst.msk [vmem:[%s6779_s7] sm:$0xff] %vm60_vm0, %v3147_v35  ;;  %v2796_v35 = vadd.f32 %v2788_v33, %v2779_v55 }
 0x543   :  { %v2844_v40 = vadd.f32 %v2837_v2, %v2828_v23  ;;  %v2751_v2 = vld [vmem:[#allocation2 + $0xb2] sm:$0xff]  ;;  %v2823_v23 = vmul.f32 %v6454_v11, %v2750_v6  ;;  %v2913_v21 = vadd.f32 %v2905_v37, %v2896_v48  ;;  %v2841_v48 = vmul.f32 0.0, %v6469_v10 }
 0x544   :  { %v2813_v52 = vadd.f32 %v2805_v16, %v2796_v35  ;;  %v2798_v35 = vadd.f32 %v2790_v63, %v2781_v54  ;;  %v2855_v25 = vmul.f32 %v6505_v32, %v2751_v2  ;;  %v2840_v62 = vmul.f32 %v6469_v10, %v2751_v2 }
 0x545   :  { %v2824_v60 = vmul.f32 %v6454_v11, %v2751_v2  ;;  %v2808_v37 = vmul.f32 %v6449_v8, %v2751_v2  ;;  %v2907_v63 = vmul.f32 %v6562_v12, %v6578_v0  ;;  %v2867_v8 = vld [vmem:[#allocation2 + $0x3b] sm:$0xff]  ;;  %v2891_v54 = vmul.f32 %v6524_v3, %v6578_v0 }
 0x546   :  { %v3685_v44 = vpop.f32.mrb[38].mxu0  ;;  %v2830_v45 = vadd.f32 %v2822_v50, %v2813_v52 }
 0x547   :  { %v3162_v41 = vadd.f32 %v3685_v44, %v6490_v19  ;;  %v3156_v29 = vpop.f32.mrb[39].mxu0  ;;  %v2774_v44 = vmul.f32 %v6431_v24, %v2749_v4  ;;  %v2881_v24 = vadd.f32 %v6534_v26, %v2858_v7  ;;  %v2839_v4 = vmul.f32 %v6469_v10, %v2750_v6 }
 0x548   :  { %v3157_v49 = vadd.f32 %v6490_v19, %v3156_v29  ;;  %v2831_v6 = vadd.f32 %v2823_v23, %v2814_v20  ;;  %v2924_v23 = vmul.f32 %v6583_v28, %v2867_v8  ;;  %v2908_v20 = vmul.f32 %v6562_v12, %v2867_v8 }
 0x549   :  { %3238 = vst.msk [vmem:[%s6779_s7 + $0x18] sm:$0xff] %vm60_vm0, %v3162_v41  ;;  %v2766_v41 = vadd.f32 %v2758_v47, %v2743_v34  ;;  %v2875_v34 = vmul.f32 %v6510_v30, %v2865_v5  ;;  %v2897_v47 = vadd.f32 %v6542_v61, %v2881_v24  ;;  %v2815_v5 = vadd.f32 %v2807_v56, %v2798_v35  ;;  %v2868_v56 = vld [vmem:[#allocation2 + $0x53] sm:$0xff] }
 0x54a   :  { %3237 = vst.msk [vmem:[%s6779_s7 + $0x10] sm:$0xff] %vm60_vm0, %v3157_v49  ;;  %v2859_v49 = vadd.f32 %v2853_v53, %v2844_v40  ;;  %v2860_v53 = vadd.f32 %v2854_v31, %v2845_v1  ;;  %v2846_v40 = vadd.f32 %v2839_v4, %v2830_v45  ;;  %v2940_v4 = vmul.f32 %v6588_v22, %v2867_v8 }
 0x54b   :  { %v2782_v16 = vadd.f32 %v2774_v44, %v2766_v41  ;;  %v6636_v44 = vld [vmem:[%s6774_s4 + $0x148] sm:$0xff]  ;;  %v2876_v41 = vmul.f32 %v6510_v30, %v6578_v0  ;;  %v2832_v1 = vadd.f32 %v2824_v60, %v2815_v5  ;;  %v2892_v35 = vmul.f32 %v6524_v3, %v2867_v8 }
 0x54c   :  { %v2882_v18 = vadd.f32 %v6534_v26, %v2859_v49  ;;  %v2930_v26 = vadd.f32 %v2922_v27, %v2913_v21  ;;  %v2883_v13 = vadd.f32 %v2875_v34, %v2860_v53  ;;  %v2825_v27 = vmul.f32 0.0, %v6454_v11  ;;  %v2869_v53 = vld [vmem:[#allocation2 + $0x6b] sm:$0xff] }
 0x54d   :  { %v2799_v52 = vadd.f32 %v2791_v42, %v2782_v16  ;;  %v2861_v24 = vadd.f32 %v2855_v25, %v2846_v40  ;;  %v2847_v49 = vadd.f32 %v2840_v62, %v2831_v6  ;;  %v2956_v45 = vmul.f32 %v6636_v44, %v2867_v8 }
 0x54e   :  { %v3688_v36 = vpop.f32.mrb[40].mxu0  ;;  %v2947_v2 = vadd.f32 %v2939_v46, %v2930_v26  ;;  %v2899_v11 = vadd.f32 %v2891_v54, %v2883_v13  ;;  %v2877_v46 = vmul.f32 %v6510_v30, %v2867_v8  ;;  %v2848_v21 = vadd.f32 %v2841_v48, %v2832_v1 }
 0x54f   :  { %v3172_v55 = vadd.f32 %v3688_v36, %v6490_v19  ;;  %v3166_v33 = vpop.f32.mrb[41].mxu0  ;;  %v2816_v31 = vadd.f32 %v2808_v37, %v2799_v52  ;;  %v2884_v16 = vadd.f32 %v2876_v41, %v2861_v24  ;;  %v2925_v62 = vmul.f32 %v6583_v28, %v2868_v56 }
 0x550   :  { %v3167_v29 = vadd.f32 %v6490_v19, %v3166_v33  ;;  %v2898_v33 = vadd.f32 %v2890_v17, %v2882_v18  ;;  %v2963_v17 = vadd.f32 %v2956_v45, %v2947_v2  ;;  %v2941_v18 = vmul.f32 %v6588_v22, %v2868_v56 }
 0x551   :  { %3240 = vst.msk [vmem:[%s6779_s7 + $0x28] sm:$0xff] %vm60_vm0, %v3172_v55  ;;  %v2914_v55 = vadd.f32 %v2906_v39, %v2897_v47  ;;  %v2833_v39 = vadd.f32 %v2825_v27, %v2816_v31  ;;  %v2957_v47 = vmul.f32 %v6636_v44, %v2868_v56  ;;  %v2916_v40 = vadd.f32 %v2908_v20, %v2899_v11  ;;  %v2871_v11 = vld [vmem:[#allocation2 + $0x9b] sm:$0xff] }
 0x552   :  { %3239 = vst.msk [vmem:[%s6779_s7 + $0x20] sm:$0xff] %vm60_vm0, %v3167_v29  ;;  %v2856_v29 = vmul.f32 0.0, %v6505_v32  ;;  %v6655_v32 = vld [vmem:[%s6774_s4 + $0x180] sm:$0xff]  ;;  %v2915_v0 = vadd.f32 %v2907_v63, %v2898_v33  ;;  %v2909_v60 = vmul.f32 %v6562_v12, %v2868_v56  ;;  %v2893_v37 = vmul.f32 %v6524_v3, %v2868_v56 }
 0x553   :  { %v2931_v10 = vadd.f32 %v2923_v58, %v2914_v55  ;;  %v2972_v34 = vmul.f32 %v6655_v32, %v2868_v56  ;;  %v2849_v52 = vadd.f32 %v2841_v48, %v2833_v39  ;;  %v2973_v26 = vmul.f32 %v6655_v32, %v2869_v53  ;;  %v6672_v63 = vld [vmem:[%s6775_s5] sm:$0xff] }
 0x554   :  { %v2862_v42 = vadd.f32 %v2856_v29, %v2847_v49  ;;  %v2863_v5 = vadd.f32 %v2856_v29, %v2848_v21  ;;  %v2958_v58 = vmul.f32 %v6636_v44, %v2869_v53  ;;  %v2870_v55 = vld [vmem:[#allocation2 + $0x83] sm:$0xff]  ;;  %v2933_v13 = vadd.f32 %v2925_v62, %v2916_v40 }
 0x555   :  { %v2948_v25 = vadd.f32 %v2940_v4, %v2931_v10  ;;  %v2942_v54 = vmul.f32 %v6588_v22, %v2869_v53  ;;  %v2926_v41 = vmul.f32 %v6583_v28, %v2869_v53  ;;  %v2910_v48 = vmul.f32 %v6562_v12, %v2869_v53 }
 0x556   :  { %v3691_v7 = vpop.f32.mrb[42].mxu0  ;;  %v2885_v6 = vadd.f32 %v2877_v46, %v2862_v42  ;;  %v2894_v27 = vmul.f32 %v6524_v3, %v2869_v53  ;;  %v2879_v24 = vmul.f32 %v6510_v30, %v2869_v53  ;;  %v2864_v2 = vadd.f32 %v2856_v29, %v2849_v52 }
 0x557   :  { %v3182_v50 = vadd.f32 %v3691_v7, %v6490_v19  ;;  %v3176_v36 = vpop.f32.mrb[43].mxu0  ;;  %v2932_v7 = vadd.f32 %v2924_v23, %v2915_v0  ;;  %v2964_v8 = vadd.f32 %v2957_v47, %v2948_v25  ;;  %v2974_v4 = vmul.f32 %v6655_v32, %v2870_v55  ;;  %v2872_v25 = vld [vmem:[#allocation2 + $0xb3] sm:$0xff] }
 0x558   :  { %v3177_v61 = vadd.f32 %v6490_v19, %v3176_v36  ;;  %v2900_v36 = vadd.f32 %v2892_v35, %v2884_v16  ;;  %v2901_v1 = vadd.f32 %v2893_v37, %v2885_v6  ;;  %v2959_v10 = vmul.f32 %v6636_v44, %v2870_v55 }
 0x559   :  { %3242 = vst.msk [vmem:[%s6779_s7 + $0x38] sm:$0xff] %vm60_vm0, %v3182_v50  ;;  %v2878_v50 = vmul.f32 %v6510_v30, %v2868_v56  ;;  %v2949_v33 = vadd.f32 %v2941_v18, %v2932_v7  ;;  %v2979_v23 = vadd.f32 %v2973_v26, %v2964_v8  ;;  %v2943_v0 = vmul.f32 %v6588_v22, %v2870_v55 }
 0x55a   :  { %3241 = vst.msk [vmem:[%s6779_s7 + $0x30] sm:$0xff] %vm60_vm0, %v3177_v61  ;;  %v2978_v61 = vadd.f32 %v2972_v34, %v2963_v17  ;;  %v2917_v49 = vadd.f32 %v2909_v60, %v2900_v36  ;;  %v2950_v20 = vadd.f32 %v2942_v54, %v2933_v13  ;;  %v2927_v35 = vmul.f32 %v6583_v28, %v2870_v55 }
 0x55b   :  { %v2886_v31 = vadd.f32 %v2878_v50, %v2863_v5  ;;  %v2965_v56 = vadd.f32 %v2958_v58, %v2949_v33  ;;  %v2911_v30 = vmul.f32 %v6562_v12, %v2870_v55  ;;  %v2895_v46 = vmul.f32 %v6524_v3, %v2870_v55 }
 0x55c   :  { %v2987_v45 = vadd.f32 %v6672_v63, %v2978_v61  ;;  %v2934_v16 = vadd.f32 %v2926_v41, %v2917_v49  ;;  %v2918_v29 = vadd.f32 %v2910_v48, %v2901_v1  ;;  %v2887_v21 = vadd.f32 %v2879_v24, %v2864_v2 }
 0x55d   :  { %v2902_v42 = vadd.f32 %v2894_v27, %v2886_v31  ;;  %v2988_v17 = vadd.f32 %v6672_v63, %v2979_v23  ;;  %v2980_v34 = vadd.f32 %v2974_v4, %v2965_v56  ;;  %v2975_v47 = vmul.f32 %v6655_v32, %v2871_v11 }
 0x55e   :  { %v2995_v39 = vmul.f32 %v2987_v45, %v7252_v51  ;;  %v2960_v18 = vmul.f32 %v6636_v44, %v2871_v11  ;;  %v2966_v53 = vadd.f32 %v2959_v10, %v2950_v20  ;;  %v2944_v7 = vmul.f32 %v6588_v22, %v2871_v11 }
 0x55f   :  { %v2928_v40 = vmul.f32 %v6583_v28, %v2871_v11  ;;  %v2912_v3 = vmul.f32 %v6562_v12, %v2871_v11  ;;  %v2951_v62 = vadd.f32 %v2943_v0, %v2934_v16  ;;  %v2935_v60 = vadd.f32 %v2927_v35, %v2918_v29 }
 0x560   :  { %v2919_v37 = vadd.f32 %v2911_v30, %v2902_v42  ;;  %v2903_v50 = vadd.f32 %v2895_v46, %v2887_v21  ;;  %v2996_v5 = vmul.f32 %v2988_v17, %v7253_v57  ;;  %v2989_v52 = vadd.f32 %v6672_v63, %v2980_v34 }
 0x561   :  { %v2976_v61 = vmul.f32 %v6655_v32, %v2872_v25  ;;  %v2981_v26 = vadd.f32 %v2975_v47, %v2966_v53  ;;  %v2961_v58 = vmul.f32 %v6636_v44, %v2872_v25  ;;  %v2945_v8 = vmul.f32 %v6588_v22, %v2872_v25 }
 0x562   :  { %v2929_v12 = vmul.f32 %v6583_v28, %v2872_v25  ;;  %v2967_v55 = vadd.f32 %v2960_v18, %v2951_v62  ;;  %v2952_v33 = vadd.f32 %v2944_v7, %v2935_v60  ;;  %v2936_v13 = vadd.f32 %v2928_v40, %v2919_v37 }
 0x563   :  { %v2920_v54 = vadd.f32 %v2912_v3, %v2903_v50  ;;  %v2997_v27 = vmul.f32 %v2989_v52, %v7254_v15  ;;  %v2990_v24 = vadd.f32 %v6672_v63, %v2981_v26  ;;  %v2977_v49 = vmul.f32 0.0, %v6655_v32 }
 0x564   :  { %v2962_v1 = vmul.f32 0.0, %v6636_v44  ;;  %v2946_v31 = vmul.f32 0.0, %v6588_v22  ;;  %v2982_v28 = vadd.f32 %v2976_v61, %v2967_v55  ;;  %v2968_v2 = vadd.f32 %v2961_v58, %v2952_v33 }
 0x565   :  { %v2953_v45 = vadd.f32 %v2945_v8, %v2936_v13  ;;  %v2937_v4 = vadd.f32 %v2929_v12, %v2920_v54  ;;  %v2998_v0 = vmul.f32 %v2990_v24, %v7255_v9 }
 0x566   :  { %v2991_v15 = vadd.f32 %v6672_v63, %v2982_v28  ;;  %v2983_v32 = vadd.f32 %v2977_v49, %v2968_v2 }
 0x567   :  { %v2969_v11 = vadd.f32 %v2962_v1, %v2953_v45  ;;  %v2954_v44 = vadd.f32 %v2946_v31, %v2937_v4 }
 0x568   :  { %v2999_v30 = vmul.f32 %v2991_v15, %v7256_v14  ;;  %v2992_v46 = vadd.f32 %v6672_v63, %v2983_v32 }
 0x569   :  { %v2984_v16 = vadd.f32 %v2977_v49, %v2969_v11  ;;  %v2970_v29 = vadd.f32 %v2962_v1, %v2954_v44 }
 0x56b   :  { %v2993_v17 = vadd.f32 %v6672_v63, %v2984_v16  ;;  %v2985_v34 = vadd.f32 %v2977_v49, %v2970_v29 }
 0x56d   :  { %v3001_v14 = vmul.f32 %v2993_v17, %v7258_v59  ;;  %v2994_v25 = vadd.f32 %v6672_v63, %v2985_v34 }
 0x56f   :  { %v3002_v62 = vmul.f32 %v2994_v25, %v7259_v43 }
 0x570   :  { %v2090_v51 = vpop.f32.mrb[34].mxu1 }
 0x571   :  { %v3003_v36 = vadd.f32 %v2995_v39, %v2090_v51  ;;  %v3639_v6 = vpop.f32.mrb[35].mxu1  ;;  %v3000_v39 = vmul.f32 %v2992_v46, %v7257_v38 }
 0x573   :  { %3693 = vmatmul.mubr.msk.f32.gmra.mrb[44].mxu0 %vm60_vm0, %v3003_v36 }
 0x574   :  { %v2095_v41 = vpop.f32.mrb[36].mxu1 }
 0x575   :  { %v3004_v48 = vadd.f32 %v2996_v5, %v2095_v41  ;;  %v3642_v57 = vpop.f32.mrb[37].mxu1 }
 0x577   :  { %3695 = vmatprep.mubr.msk.f32.mxu0 %vm60_vm0, %v3004_v48 }
 0x578   :  { %v2100_v23 = vpop.f32.mrb[38].mxu1 }
 0x579   :  { %v3005_v56 = vadd.f32 %v2997_v27, %v2100_v23  ;;  %v3645_v10 = vpop.f32.mrb[39].mxu1 }
 0x57b   :  { %3696 = vmatmul.mubr.msk.f32.gmra.mrb[46].mxu0 %vm60_vm0, %v3005_v56 }
 0x57c   :  { %v2105_v20 = vpop.f32.mrb[40].mxu1 }
 0x57d   :  { %v3006_v22 = vadd.f32 %v2998_v0, %v2105_v20  ;;  %v3648_v35 = vpop.f32.mrb[41].mxu1 }
 0x57f   :  { %3698 = vmatprep.mubr.msk.f32.mxu0 %vm60_vm0, %v3006_v22 }
 0x580   :  { %v2110_v42 = vpop.f32.mrb[42].mxu1 }
 0x581   :  { %v3007_v9 = vadd.f32 %v2999_v30, %v2110_v42  ;;  %v3651_v21 = vpop.f32.mrb[43].mxu1 }
 0x583   :  { %3699 = vmatmul.mubr.msk.f32.gmra.mrb[48].mxu0 %vm60_vm0, %v3007_v9 }
 0x584   :  { %v2115_v47 = vpop.f32.mrb[44].mxu1 }
 0x585   :  { %v3008_v18 = vadd.f32 %v3000_v39, %v2115_v47  ;;  %v3654_v53 = vpop.f32.mrb[45].mxu1 }
 0x587   :  { %3701 = vmatprep.mubr.msk.f32.mxu0 %vm60_vm0, %v3008_v18 }
 0x588   :  { %v2120_v7 = vpop.f32.mrb[46].mxu1 }
 0x589   :  { %v3009_v40 = vadd.f32 %v3001_v14, %v2120_v7  ;;  %v3657_v3 = vpop.f32.mrb[47].mxu1 }
 0x58b   :  { %3702 = vmatmul.mubr.msk.f32.gmra.mrb[50].mxu0 %vm60_vm0, %v3009_v40 }
 0x58c   :  { %v2125_v38 = vpop.f32.mrb[48].mxu1 }
 0x58d   :  { %v3010_v60 = vadd.f32 %v3002_v62, %v2125_v38  ;;  %v3660_v37 = vpop.f32.mrb[49].mxu1 }
 0x58f   :  { %3704 = vmatprep.mubr.msk.f32.mxu0 %vm60_vm0, %v3010_v60 }
 0x590   :  { %v2130_v50 = vpop.f32.mrb[50].mxu1 }
 0x591   :  { %v3663_v51 = vpop.f32.mrb[51].mxu1  ;;  %3705 = vmatmul.mubr.msk.f32.gmra.mrb[52].mxu0 %vm60_vm0, %v2130_v50 }
 0x646   :  { %v3694_v36 = vpop.f32.mrb[44].mxu0 }
 0x647   :  { %v3192_v59 = vadd.f32 %v3694_v36, %v6490_v19  ;;  %v3186_v63 = vpop.f32.mrb[45].mxu0 }
 0x648   :  { %v3187_v6 = vadd.f32 %v6490_v19, %v3186_v63 }
 0x649   :  { %3244 = vst.msk [vmem:[%s6779_s7 + $0x48] sm:$0xff] %vm60_vm0, %v3192_v59 }
 0x64a   :  { %3243 = vst.msk [vmem:[%s6779_s7 + $0x40] sm:$0xff] %vm60_vm0, %v3187_v6 }
 0x64e   :  { %v3697_v43 = vpop.f32.mrb[46].mxu0 }
 0x64f   :  { %v3202_v5 = vadd.f32 %v3697_v43, %v6490_v19  ;;  %v3196_v52 = vpop.f32.mrb[47].mxu0 }
 0x650   :  { %v3197_v61 = vadd.f32 %v6490_v19, %v3196_v52 }
 0x651   :  { %3246 = vst.msk [vmem:[%s6779_s7 + $0x58] sm:$0xff] %vm60_vm0, %v3202_v5 }
 0x652   :  { %3245 = vst.msk [vmem:[%s6779_s7 + $0x50] sm:$0xff] %vm60_vm0, %v3197_v61 }
 0x656   :  { %v3700_v26 = vpop.f32.mrb[48].mxu0 }
 0x657   :  { %v3212_v58 = vadd.f32 %v3700_v26, %v6490_v19  ;;  %v3206_v8 = vpop.f32.mrb[49].mxu0 }
 0x658   :  { %v3207_v12 = vadd.f32 %v6490_v19, %v3206_v8 }
 0x659   :  { %3248 = vst.msk [vmem:[%s6779_s7 + $0x68] sm:$0xff] %vm60_vm0, %v3212_v58 }
 0x65a   :  { %3247 = vst.msk [vmem:[%s6779_s7 + $0x60] sm:$0xff] %vm60_vm0, %v3207_v12 }
 0x65e   :  { %v3703_v55 = vpop.f32.mrb[50].mxu0 }
 0x65f   :  { %v3222_v33 = vadd.f32 %v3703_v55, %v6490_v19  ;;  %v3216_v13 = vpop.f32.mrb[51].mxu0 }
 0x660   :  { %v3217_v54 = vadd.f32 %v6490_v19, %v3216_v13 }
 0x661   :  { %3250 = vst.msk [vmem:[%s6779_s7 + $0x78] sm:$0xff] %vm60_vm0, %v3222_v33 }
 0x662   :  { %3249 = vst.msk [vmem:[%s6779_s7 + $0x70] sm:$0xff] %vm60_vm0, %v3217_v54 }
 0x664   :  { %v3706_v41 = vpop.f32.mrb[52].mxu0 }
 0x665   :  { %v3232_v48 = vadd.f32 %v3706_v41, %v6490_v19  ;;  %v3226_v57 = vpop.f32.mrb[53].mxu0 }
 0x666   :  { %v3227_v27 = vadd.f32 %v6490_v19, %v3226_v57 }
 0x667   :  { %3252 = vst.msk [vmem:[%s6779_s7 + $0x88] sm:$0xff] %vm60_vm0, %v3232_v48 }
 0x668   :  { %3251 = vst.msk [vmem:[%s6779_s7 + $0x80] sm:$0xff] %vm60_vm0, %v3227_v27 }

</bundles_post_ra>
